<compile_context>
chip_gen: v7x
topology: tpu7x:2x2x1
jax: 0.10.0
libtpu: 0.0.40
codegen_flags: <defaults>
</compile_context>

<pallas_src>
import functools

import jax
import jax.numpy as jnp
from jax import lax
from jax.experimental import pallas as pl
from jax.experimental.pallas import tpu as pltpu


def _round_up(x, m):
    return ((x + m - 1) // m) * m


_VMEM = pl.BlockSpec(memory_space=pltpu.MemorySpace.VMEM)


# --------------------------- in-kernel GRU recurrence --------------------------
def _gru_recurrence(gx_ref, whh, bhn, h_ref, lens, out_ref, *, T, Bp, Hp):
    """Serial GRU recurrence over T steps on lane-dense 2-D slabs.

    gx_ref : (T*Bp, 3*Hp) ref  precomputed x @ W_ih^T + b_ih (+ b_hh folded for r,z)
    whh    : (Hp, 3*Hp)  value W_hh^T, gate blocks [r | z | n] on the lane axis
    bhn    : (1, Hp)     value n-gate b_hh (sits inside r * (.), PyTorch order)
    h_ref  : (Bp, Hp)    ref   carry; holds h0 on entry, final hidden on exit
    lens   : (Bp, 1) i32 value packed-sequence lengths, or None (no masking)
    out_ref: (T*Bp, Hp)  ref   per-step hidden (zeroed past len), or None
    """

    def step(t):
        row = t * Bp
        if not isinstance(row, int):
            row = pl.multiple_of(row, 8)
        h_prev = h_ref[...]
        gx = gx_ref[pl.ds(row, Bp), :]                                # (Bp, 3Hp)
        gh = jnp.dot(h_prev, whh, preferred_element_type=jnp.float32)
        r = jax.nn.sigmoid(gx[:, :Hp] + gh[:, :Hp])
        z = jax.nn.sigmoid(gx[:, Hp:2 * Hp] + gh[:, Hp:2 * Hp])
        n = jnp.tanh(gx[:, 2 * Hp:] + r * (gh[:, 2 * Hp:] + bhn))
        h_new = (1.0 - z) * n + z * h_prev
        if lens is None:
            h_ref[...] = h_new
            if out_ref is not None:
                out_ref[pl.ds(row, Bp), :] = h_new
        else:
            mask = t < lens                                           # (Bp, 1) bool
            h_ref[...] = jnp.where(mask, h_new, h_prev)               # masked carry
            if out_ref is not None:
                out_ref[pl.ds(row, Bp), :] = jnp.where(mask, h_new, 0.0)

    if T <= 32:                 # short recurrences: fully unroll for the scheduler
        for t in range(T):
            step(t)
    else:                       # long recurrences: in-kernel loop
        pl.loop(0, T)(step)


# --------------------------------- kernels -------------------------------------
def encoder_kernel(x_ref, len_ref,
                   wih0_ref, whh0_ref, b0_ref, bn0_ref,
                   wih1_ref, whh1_ref, b1_ref, bn1_ref,
                   wmv_ref, bmv_ref, w3_ref, b3_ref,
                   muvar_ref, hdec_ref,
                   gx_scr, seq_scr, h_scr):
    """Encoder 2-layer GRU (masked) + fused mu/logvar head + fc3, one invocation."""
    Bp, Hp = h_scr.shape
    T = seq_scr.shape[0] // Bp
    lens = len_ref[...]                                               # (Bp, 1) int32

    # ---- encoder layer 0: hoisted input projection + recurrence ----
    gx_scr[...] = (jnp.dot(x_ref[...], wih0_ref[...],
                           preferred_element_type=jnp.float32) + b0_ref[...])
    h_scr[...] = jnp.zeros_like(h_scr)
    _gru_recurrence(gx_scr, whh0_ref[...], bn0_ref[...], h_scr, lens, seq_scr,
                    T=T, Bp=Bp, Hp=Hp)

    # ---- encoder layer 1 (only its final hidden is used downstream) ----
    # TODO(synk): inter-layer dropout (training mode only) is the identity here.
    gx_scr[...] = (jnp.dot(seq_scr[...], wih1_ref[...],
                           preferred_element_type=jnp.float32) + b1_ref[...])
    h_scr[...] = jnp.zeros_like(h_scr)
    _gru_recurrence(gx_scr, whh1_ref[...], bn1_ref[...], h_scr, lens, None,
                    T=T, Bp=Bp, Hp=Hp)

    # ---- VAE bottleneck: fused [mu | logvar] head, then fc3 on mu (eval: z=mu) ----
    muvar = (jnp.dot(h_scr[...], wmv_ref[...],
                     preferred_element_type=jnp.float32) + bmv_ref[...])
    muvar_ref[...] = muvar
    Lp = wmv_ref.shape[1] // 2
    hdec_ref[...] = (jnp.dot(muvar[:, :Lp], w3_ref[...],
                             preferred_element_type=jnp.float32) + b3_ref[...])


def decoder_kernel(z_ref, h0_ref,
                   wih0_ref, whh0_ref, b0_ref, bn0_ref,
                   wih1_ref, whh1_ref, b1_ref, bn1_ref,
                   wfc_ref, bfc_ref,
                   pred_ref,
                   gx_scr, seq_scr, h_scr):
    """Decoder 2-layer GRU (no masking) + output Linear + exp, one invocation."""
    Bp, Hp = h_scr.shape
    T = seq_scr.shape[0] // Bp

    # ---- decoder layer 0 (initial hidden = h_dec) ----
    gx_scr[...] = (jnp.dot(z_ref[...], wih0_ref[...],
                           preferred_element_type=jnp.float32) + b0_ref[...])
    h_scr[...] = h0_ref[...]
    _gru_recurrence(gx_scr, whh0_ref[...], bn0_ref[...], h_scr, None, seq_scr,
                    T=T, Bp=Bp, Hp=Hp)

    # ---- decoder layer 1 (initial hidden = h_dec again; hidden repeated per layer) ----
    # gx for layer 1 is fully materialized from layer-0 outputs BEFORE seq_scr is reused.
    gx_scr[...] = (jnp.dot(seq_scr[...], wih1_ref[...],
                           preferred_element_type=jnp.float32) + b1_ref[...])
    h_scr[...] = h0_ref[...]
    _gru_recurrence(gx_scr, whh1_ref[...], bn1_ref[...], h_scr, None, seq_scr,
                    T=T, Bp=Bp, Hp=Hp)

    # ---- output head: Linear + exp, one batched MXU matmul over all steps ----
    pred_ref[...] = jnp.exp(jnp.dot(seq_scr[...], wfc_ref[...],
                                    preferred_element_type=jnp.float32) + bfc_ref[...])


# ------------------------------ pallas wrappers --------------------------------
def _encoder_call(x2d, len_p, e0, e1, wmv_p, bmv_p, w3_p, b3_p, *, T, Bp, Hp):
    Lp2 = wmv_p.shape[1]
    return pl.pallas_call(
        encoder_kernel,
        out_shape=(jax.ShapeDtypeStruct((Bp, Lp2), jnp.float32),
                   jax.ShapeDtypeStruct((Bp, Hp), jnp.float32)),
        in_specs=[_VMEM] * 14,
        out_specs=(_VMEM, _VMEM),
        scratch_shapes=[pltpu.VMEM((T * Bp, 3 * Hp), jnp.float32),
                        pltpu.VMEM((T * Bp, Hp), jnp.float32),
                        pltpu.VMEM((Bp, Hp), jnp.float32)],
    )(x2d, len_p, *e0, *e1, wmv_p, bmv_p, w3_p, b3_p)


def _decoder_call(z2d, h_dec, d0, d1, wfc_p, bfc_p, *, T, Bp, Hp, Op):
    return pl.pallas_call(
        decoder_kernel,
        out_shape=jax.ShapeDtypeStruct((T * Bp, Op), jnp.float32),
        in_specs=[_VMEM] * 12,
        out_specs=_VMEM,
        scratch_shapes=[pltpu.VMEM((T * Bp, 3 * Hp), jnp.float32),
                        pltpu.VMEM((T * Bp, Hp), jnp.float32),
                        pltpu.VMEM((Bp, Hp), jnp.float32)],
    )(z2d, h_dec, *d0, *d1, wfc_p, bfc_p)


# ------------------------------ parameter packing -------------------------------
def _pack_gru_layer(w_ih, w_hh, b_ih, b_hh, H, Hp):
    """Lane-aligned W_ih^T / W_hh^T with gate blocks widened H -> Hp, biases folded."""
    in_f = w_ih.shape[1]
    Ip = _round_up(max(in_f, 1), 128)
    f32 = jnp.float32
    wih_p = jnp.zeros((Ip, 3 * Hp), f32)
    whh_p = jnp.zeros((Hp, 3 * Hp), f32)
    bias_p = jnp.zeros((1, 3 * Hp), f32)   # b_ih (+ b_hh for r,z) -> folded into gx
    bhn_p = jnp.zeros((1, Hp), f32)        # n-gate b_hh stays inside the recurrence
    for g in range(3):                     # gates r, z, n (PyTorch order)
        wih_p = wih_p.at[:in_f, g * Hp:g * Hp + H].set(
            w_ih[g * H:(g + 1) * H, :].T.astype(f32))
        whh_p = whh_p.at[:H, g * Hp:g * Hp + H].set(
            w_hh[g * H:(g + 1) * H, :].T.astype(f32))
        bg = b_ih[g * H:(g + 1) * H].astype(f32)
        if g < 2:
            bg = bg + b_hh[g * H:(g + 1) * H].astype(f32)
        bias_p = bias_p.at[0, g * Hp:g * Hp + H].set(bg)
    bhn_p = bhn_p.at[0, :H].set(b_hh[2 * H:3 * H].astype(f32))
    return wih_p, whh_p, bias_p, bhn_p


def _pack_linear(w, b, in_pad, out_pad):
    out_f, in_f = w.shape
    w_p = jnp.zeros((in_pad, out_pad), jnp.float32).at[:in_f, :out_f].set(
        w.T.astype(jnp.float32))
    b_p = jnp.zeros((1, out_pad), jnp.float32).at[0, :out_f].set(b.astype(jnp.float32))
    return w_p, b_p


# -------------------------------- full forward ----------------------------------
@functools.partial(jax.jit, static_argnames=("hidden_size", "latent_size", "output_size"))
def rnn_vae_forward(x, lengths, params, *, hidden_size, latent_size, output_size):
    B, T, in_f = x.shape
    H, L, O = hidden_size, latent_size, output_size
    Hp = _round_up(H, 128)
    Lp = _round_up(L, 128)
    Op = _round_up(O, 128)
    Ip = _round_up(max(in_f, 1), 128)
    Bp = _round_up(max(B, 1), 8)           # fill the 8 sublanes of every vreg
    f32 = jnp.float32

    # ---- pack parameters (transposed, lane-aligned, biases pre-folded) -----------
    e0 = _pack_gru_layer(params["enc_w_ih_l0"], params["enc_w_hh_l0"],
                         params["enc_b_ih_l0"], params["enc_b_hh_l0"], H, Hp)
    e1 = _pack_gru_layer(params["enc_w_ih_l1"], params["enc_w_hh_l1"],
                         params["enc_b_ih_l1"], params["enc_b_hh_l1"], H, Hp)
    d0 = _pack_gru_layer(params["dec_w_ih_l0"], params["dec_w_hh_l0"],
                         params["dec_b_ih_l0"], params["dec_b_hh_l0"], H, Hp)
    d1 = _pack_gru_layer(params["dec_w_ih_l1"], params["dec_w_hh_l1"],
                         params["dec_b_ih_l1"], params["dec_b_hh_l1"], H, Hp)
    w21_p, b21_p = _pack_linear(params["fc21_w"], params["fc21_b"], Hp, Lp)
    w22_p, b22_p = _pack_linear(params["fc22_w"], params["fc22_b"], Hp, Lp)
    wmv_p = jnp.concatenate([w21_p, w22_p], axis=1)      # fused [mu | logvar] head
    bmv_p = jnp.concatenate([b21_p, b22_p], axis=1)
    w3_p, b3_p = _pack_linear(params["fc3_w"], params["fc3_b"], Lp, Hp)
    wfc_p, bfc_p = _pack_linear(params["fc_w"], params["fc_b"], Hp, Op)

    # ---- encoder inputs: time-major, padded, flattened to a lane-dense 2-D slab --
    x_tm = jnp.transpose(x.astype(f32), (1, 0, 2))                     # (T, B, I)
    x_tm = jnp.pad(x_tm, ((0, 0), (0, Bp - B), (0, Ip - in_f)))        # (T, Bp, Ip)
    x2d = x_tm.reshape(T * Bp, Ip)
    len_p = jnp.pad(lengths.astype(jnp.int32), (0, Bp - B)).reshape(Bp, 1)

    # ---- kernel 1: encoder (2 masked GRU layers) + mu/logvar + fc3 ---------------
    muvar, h_dec = _encoder_call(x2d, len_p, e0, e1, wmv_p, bmv_p, w3_p, b3_p,
                                 T=T, Bp=Bp, Hp=Hp)
    mu = muvar[:B, :L]
    logvar = muvar[:B, Lp:Lp + L]
    z = mu                                   # eval-mode reparameterize: z = mu

    # decoder input, faithful to `z.repeat(1, seq_len, 1).view(B, seq_len, L)`
    z_rep = jnp.tile(z, (T, 1)).reshape(B, T, L)
    z_tm = jnp.transpose(z_rep, (1, 0, 2)).astype(f32)                 # (T, B, L)
    z_tm = jnp.pad(z_tm, ((0, 0), (0, Bp - B), (0, Lp - L)))
    z2d = z_tm.reshape(T * Bp, Lp)

    # ---- kernel 2: decoder (2 GRU layers, both start from h_dec) + Linear + exp --
    pred2d = _decoder_call(z2d, h_dec, d0, d1, wfc_p, bfc_p,
                           T=T, Bp=Bp, Hp=Hp, Op=Op)
    pred = pred2d.reshape(T, Bp, Op)
    x_hat = jnp.transpose(pred[:, :B, :O], (1, 0, 2))                  # (B, T, O)
    return x_hat, mu, logvar


# ------------------------------- pure-JAX reference ------------------------------
def rnn_vae_reference(x, lengths, params, hidden_size, latent_size, output_size):
    B, T, _ = x.shape
    H, L = hidden_size, latent_size
    hi = lax.Precision.HIGHEST
    f32 = jnp.float32

    def gru_layer(x_tm, lens, w_ih, w_hh, b_ih, b_hh, h0):
        def step(h, inp):
            xt, t = inp
            gx = jnp.dot(xt, w_ih.T, precision=hi) + b_ih
            gh = jnp.dot(h, w_hh.T, precision=hi) + b_hh
            r = jax.nn.sigmoid(gx[:, :H] + gh[:, :H])
            zg = jax.nn.sigmoid(gx[:, H:2 * H] + gh[:, H:2 * H])
            n = jnp.tanh(gx[:, 2 * H:] + r * gh[:, 2 * H:])
            h_new = (1.0 - zg) * n + zg * h
            if lens is None:
                return h_new, h_new
            m = (t < lens)[:, None]
            return jnp.where(m, h_new, h), jnp.where(m, h_new, 0.0)
        hT, outs = lax.scan(step, h0, (x_tm, jnp.arange(T)))
        return outs, hT

    x_tm = jnp.transpose(x.astype(f32), (1, 0, 2))
    h0 = jnp.zeros((B, H), f32)
    o0, _ = gru_layer(x_tm, lengths, params["enc_w_ih_l0"], params["enc_w_hh_l0"],
                      params["enc_b_ih_l0"], params["enc_b_hh_l0"], h0)
    _, enc_h = gru_layer(o0, lengths, params["enc_w_ih_l1"], params["enc_w_hh_l1"],
                         params["enc_b_ih_l1"], params["enc_b_hh_l1"], h0)
    mu = jnp.dot(enc_h, params["fc21_w"].T, precision=hi) + params["fc21_b"]
    logvar = jnp.dot(enc_h, params["fc22_w"].T, precision=hi) + params["fc22_b"]
    z = mu
    h_dec = jnp.dot(z, params["fc3_w"].T, precision=hi) + params["fc3_b"]
    z_rep = jnp.tile(z, (T, 1)).reshape(B, T, L)
    z_tm = jnp.transpose(z_rep, (1, 0, 2))
    dd0, _ = gru_layer(z_tm, None, params["dec_w_ih_l0"], params["dec_w_hh_l0"],
                       params["dec_b_ih_l0"], params["dec_b_hh_l0"], h_dec)
    dd1, _ = gru_layer(dd0, None, params["dec_w_ih_l1"], params["dec_w_hh_l1"],
                       params["dec_b_ih_l1"], params["dec_b_hh_l1"], h_dec)
    pred = jnp.exp(jnp.dot(dd1, params["fc_w"].T, precision=hi) + params["fc_b"])
    return jnp.transpose(pred, (1, 0, 2)), mu, logvar


if __name__ == "__main__":
    # RNN_VAE defaults: input_size=3, hidden_size=64, latent_size=50, output_size=1,
    # num_layers=2 for both encoder and decoder.
    input_size, hidden_size, latent_size, output_size = 3, 64, 50, 1
    B, T = 2, 8

    key = jax.random.PRNGKey(0)
    keys = iter(jax.random.split(key, 32))

    def uni(shape, bound):
        return jax.random.uniform(next(keys), shape, jnp.float32, -bound, bound)

    gb = 1.0 / (hidden_size ** 0.5)
    lb_h = 1.0 / (hidden_size ** 0.5)
    lb_l = 1.0 / (latent_size ** 0.5)
    params = {}
    for layer, in_f in (("l0", input_size), ("l1", hidden_size)):     # encoder GRU
        params[f"enc_w_ih_{layer}"] = uni((3 * hidden_size, in_f), gb)
        params[f"enc_w_hh_{layer}"] = uni((3 * hidden_size, hidden_size), gb)
        params[f"enc_b_ih_{layer}"] = uni((3 * hidden_size,), gb)
        params[f"enc_b_hh_{layer}"] = uni((3 * hidden_size,), gb)
    for layer, in_f in (("l0", latent_size), ("l1", hidden_size)):    # decoder GRU
        params[f"dec_w_ih_{layer}"] = uni((3 * hidden_size, in_f), gb)
        params[f"dec_w_hh_{layer}"] = uni((3 * hidden_size, hidden_size), gb)
        params[f"dec_b_ih_{layer}"] = uni((3 * hidden_size,), gb)
        params[f"dec_b_hh_{layer}"] = uni((3 * hidden_size,), gb)
    params["fc21_w"] = uni((latent_size, hidden_size), lb_h)
    params["fc21_b"] = uni((latent_size,), lb_h)
    params["fc22_w"] = uni((latent_size, hidden_size), lb_h)
    params["fc22_b"] = uni((latent_size,), lb_h)
    params["fc3_w"] = uni((hidden_size, latent_size), lb_l)
    params["fc3_b"] = uni((hidden_size,), lb_l)
    params["fc_w"] = uni((output_size, hidden_size), lb_h)
    params["fc_b"] = uni((output_size,), lb_h)

    x = jax.random.normal(next(keys), (B, T, input_size), jnp.float32)
    lengths = jnp.array([8, 5], jnp.int32)    # variable lengths (enforce_sorted=False)

    x_hat, mu, logvar = rnn_vae_forward(
        x, lengths, params,
        hidden_size=hidden_size, latent_size=latent_size, output_size=output_size)
    x_hat = jax.block_until_ready(x_hat)
    mu = jax.block_until_ready(mu)
    logvar = jax.block_until_ready(logvar)

    ref_x_hat, ref_mu, ref_logvar = rnn_vae_reference(
        x, lengths, params, hidden_size, latent_size, output_size)

    assert x_hat.shape == (B, T, output_size)
    assert mu.shape == (B, latent_size)
    assert logvar.shape == (B, latent_size)
    assert jnp.allclose(mu, ref_mu, atol=5e-4, rtol=5e-4), \
        float(jnp.max(jnp.abs(mu - ref_mu)))
    assert jnp.allclose(logvar, ref_logvar, atol=5e-4, rtol=5e-4), \
        float(jnp.max(jnp.abs(logvar - ref_logvar)))
    assert jnp.allclose(x_hat, ref_x_hat, atol=5e-4, rtol=5e-4), \
        float(jnp.max(jnp.abs(x_hat - ref_x_hat)))

    print("KERNEL_OK")
</pallas_src>

<mosaic_0001>
module attributes {stable_mosaic.version = 11 : i64} {
  func.func @encoder_kernel(%arg0: memref<64x128xf32, #tpu.memory_space<vmem>>, %arg1: memref<8x1xi32, #tpu.memory_space<vmem>>, %arg2: memref<128x384xf32, #tpu.memory_space<vmem>>, %arg3: memref<128x384xf32, #tpu.memory_space<vmem>>, %arg4: memref<1x384xf32, #tpu.memory_space<vmem>>, %arg5: memref<1x128xf32, #tpu.memory_space<vmem>>, %arg6: memref<128x384xf32, #tpu.memory_space<vmem>>, %arg7: memref<128x384xf32, #tpu.memory_space<vmem>>, %arg8: memref<1x384xf32, #tpu.memory_space<vmem>>, %arg9: memref<1x128xf32, #tpu.memory_space<vmem>>, %arg10: memref<128x256xf32, #tpu.memory_space<vmem>>, %arg11: memref<1x256xf32, #tpu.memory_space<vmem>>, %arg12: memref<128x128xf32, #tpu.memory_space<vmem>>, %arg13: memref<1x128xf32, #tpu.memory_space<vmem>>, %arg14: memref<8x256xf32, #tpu.memory_space<vmem>>, %arg15: memref<8x128xf32, #tpu.memory_space<vmem>>, %arg16: memref<64x384xf32, #tpu.memory_space<vmem>>, %arg17: memref<64x128xf32, #tpu.memory_space<vmem>>, %arg18: memref<8x128xf32, #tpu.memory_space<vmem>>) attributes {dimension_semantics = [], scalar_prefetch = 0 : i64, scratch_operands = 3 : i64, tpu.core_type = #tpu.core_type<tc>} {
    %c0 = arith.constant 0 : index
    %c0_0 = arith.constant 0 : index
    %0 = vector.load %arg1[%c0, %c0_0] : memref<8x1xi32, #tpu.memory_space<vmem>>, vector<8x1xi32>
    %c0_1 = arith.constant 0 : index
    %c0_2 = arith.constant 0 : index
    %1 = vector.load %arg0[%c0_1, %c0_2] : memref<64x128xf32, #tpu.memory_space<vmem>>, vector<64x128xf32>
    %c0_3 = arith.constant 0 : index
    %c0_4 = arith.constant 0 : index
    %2 = vector.load %arg2[%c0_3, %c0_4] : memref<128x384xf32, #tpu.memory_space<vmem>>, vector<128x384xf32>
    %cst = arith.constant dense<0.000000e+00> : vector<64x384xf32>
    %3 = tpu.matmul %1, %2, %cst {dimension_numbers = #tpu.dot_dimension_numbers<[1], [0], [0], [1], [0, 0, 1, 1], [], []>} : vector<64x128xf32>, vector<128x384xf32>, vector<64x384xf32> -> vector<64x384xf32>
    %c0_5 = arith.constant 0 : index
    %c0_6 = arith.constant 0 : index
    %4 = vector.load %arg4[%c0_5, %c0_6] : memref<1x384xf32, #tpu.memory_space<vmem>>, vector<1x384xf32>
    %5 = vector.broadcast %4 : vector<1x384xf32> to vector<64x384xf32>
    %6 = arith.addf %3, %5 : vector<64x384xf32>
    %c0_7 = arith.constant 0 : index
    %c0_8 = arith.constant 0 : index
    %7 = vector.load %arg16[%c0_7, %c0_8] : memref<64x384xf32, #tpu.memory_space<vmem>>, vector<64x384xf32>
    tpu.vector_store %arg16[%c0_7, %c0_8], %6 {strides = array<i32>} : memref<64x384xf32, #tpu.memory_space<vmem>>, vector<64x384xf32>,
    %cst_9 = arith.constant 0.000000e+00 : f32
    %8 = vector.broadcast %cst_9 : f32 to vector<8x128xf32>
    %c0_10 = arith.constant 0 : index
    %c0_11 = arith.constant 0 : index
    %9 = vector.load %arg18[%c0_10, %c0_11] : memref<8x128xf32, #tpu.memory_space<vmem>>, vector<8x128xf32>
    tpu.vector_store %arg18[%c0_10, %c0_11], %8 {strides = array<i32>} : memref<8x128xf32, #tpu.memory_space<vmem>>, vector<8x128xf32>,
    %c0_12 = arith.constant 0 : index
    %c0_13 = arith.constant 0 : index
    %10 = vector.load %arg3[%c0_12, %c0_13] : memref<128x384xf32, #tpu.memory_space<vmem>>, vector<128x384xf32>
    %c0_14 = arith.constant 0 : index
    %c0_15 = arith.constant 0 : index
    %11 = vector.load %arg5[%c0_14, %c0_15] : memref<1x128xf32, #tpu.memory_space<vmem>>, vector<1x128xf32>
    %c0_16 = arith.constant 0 : index
    %c0_17 = arith.constant 0 : index
    %12 = vector.load %arg18[%c0_16, %c0_17] : memref<8x128xf32, #tpu.memory_space<vmem>>, vector<8x128xf32>
    %c0_18 = arith.constant 0 : index
    %c0_19 = arith.constant 0 : index
    %13 = vector.load %arg16[%c0_18, %c0_19] : memref<64x384xf32, #tpu.memory_space<vmem>>, vector<8x384xf32>
    %cst_20 = arith.constant dense<0.000000e+00> : vector<8x384xf32>
    %14 = tpu.matmul %12, %10, %cst_20 {dimension_numbers = #tpu.dot_dimension_numbers<[1], [0], [0], [1], [0, 0, 1, 1], [], []>} : vector<8x128xf32>, vector<128x384xf32>, vector<8x384xf32> -> vector<8x384xf32>
    %15 = vector.extract_strided_slice %13 {offsets = [0, 0], sizes = [8, 128], strides = [1, 1]} : vector<8x384xf32> to vector<8x128xf32>
    %16 = vector.extract_strided_slice %14 {offsets = [0, 0], sizes = [8, 128], strides = [1, 1]} : vector<8x384xf32> to vector<8x128xf32>
    %17 = arith.addf %15, %16 : vector<8x128xf32>
    %18 = arith.negf %17 : vector<8x128xf32>
    %19 = math.exp %18 : vector<8x128xf32>
    %cst_21 = arith.constant 1.000000e+00 : f32
    %20 = vector.broadcast %cst_21 : f32 to vector<8x128xf32>
    %21 = arith.addf %20, %19 : vector<8x128xf32>
    %22 = arith.divf %20, %21 : vector<8x128xf32>
    %23 = vector.extract_strided_slice %13 {offsets = [0, 128], sizes = [8, 128], strides = [1, 1]} : vector<8x384xf32> to vector<8x128xf32>
    %24 = vector.extract_strided_slice %14 {offsets = [0, 128], sizes = [8, 128], strides = [1, 1]} : vector<8x384xf32> to vector<8x128xf32>
    %25 = arith.addf %23, %24 : vector<8x128xf32>
    %26 = arith.negf %25 : vector<8x128xf32>
    %27 = math.exp %26 : vector<8x128xf32>
    %cst_22 = arith.constant 1.000000e+00 : f32
    %28 = vector.broadcast %cst_22 : f32 to vector<8x128xf32>
    %29 = arith.addf %28, %27 : vector<8x128xf32>
    %30 = arith.divf %28, %29 : vector<8x128xf32>
    %31 = vector.extract_strided_slice %13 {offsets = [0, 256], sizes = [8, 128], strides = [1, 1]} : vector<8x384xf32> to vector<8x128xf32>
    %32 = vector.extract_strided_slice %14 {offsets = [0, 256], sizes = [8, 128], strides = [1, 1]} : vector<8x384xf32> to vector<8x128xf32>
    %33 = vector.broadcast %11 : vector<1x128xf32> to vector<8x128xf32>
    %34 = arith.addf %32, %33 : vector<8x128xf32>
    %35 = arith.mulf %22, %34 : vector<8x128xf32>
    %36 = arith.addf %31, %35 : vector<8x128xf32>
    %37 = math.tanh %36 : vector<8x128xf32>
    %cst_23 = arith.constant 1.000000e+00 : f32
    %38 = vector.broadcast %cst_23 : f32 to vector<8x128xf32>
    %39 = arith.subf %38, %30 : vector<8x128xf32>
    %40 = arith.mulf %39, %37 : vector<8x128xf32>
    %41 = arith.mulf %30, %12 : vector<8x128xf32>
    %42 = arith.addf %40, %41 : vector<8x128xf32>
    %c0_i32 = arith.constant 0 : i32
    %43 = vector.broadcast %c0_i32 : i32 to vector<8x1xi32>
    %44 = arith.cmpi sgt, %0, %43 : vector<8x1xi32>
    %45 = vector.shape_cast %44 : vector<8x1xi1> to vector<8x1xi1>
    %46 = vector.broadcast %45 : vector<8x1xi1> to vector<8x128xi1>
    %47 = arith.select %46, %42, %12 : vector<8x128xi1>, vector<8x128xf32>
    %c0_24 = arith.constant 0 : index
    %c0_25 = arith.constant 0 : index
    %48 = vector.load %arg18[%c0_24, %c0_25] : memref<8x128xf32, #tpu.memory_space<vmem>>, vector<8x128xf32>
    tpu.vector_store %arg18[%c0_24, %c0_25], %47 {strides = array<i32>} : memref<8x128xf32, #tpu.memory_space<vmem>>, vector<8x128xf32>,
    %cst_26 = arith.constant 0.000000e+00 : f32
    %49 = vector.shape_cast %44 : vector<8x1xi1> to vector<8x1xi1>
    %50 = vector.broadcast %49 : vector<8x1xi1> to vector<8x128xi1>
    %51 = vector.broadcast %cst_26 : f32 to vector<8x128xf32>
    %52 = arith.select %50, %42, %51 : vector<8x128xi1>, vector<8x128xf32>
    %c0_27 = arith.constant 0 : index
    %c0_28 = arith.constant 0 : index
    %53 = vector.load %arg17[%c0_27, %c0_28] : memref<64x128xf32, #tpu.memory_space<vmem>>, vector<8x128xf32>
    tpu.vector_store %arg17[%c0_27, %c0_28], %52 {strides = array<i32>} : memref<64x128xf32, #tpu.memory_space<vmem>>, vector<8x128xf32>,
    %c0_29 = arith.constant 0 : index
    %c0_30 = arith.constant 0 : index
    %54 = vector.load %arg18[%c0_29, %c0_30] : memref<8x128xf32, #tpu.memory_space<vmem>>, vector<8x128xf32>
    %c8 = arith.constant 8 : index
    %c0_31 = arith.constant 0 : index
    %55 = vector.load %arg16[%c8, %c0_31] : memref<64x384xf32, #tpu.memory_space<vmem>>, vector<8x384xf32>
    %cst_32 = arith.constant dense<0.000000e+00> : vector<8x384xf32>
    %56 = tpu.matmul %54, %10, %cst_32 {dimension_numbers = #tpu.dot_dimension_numbers<[1], [0], [0], [1], [0, 0, 1, 1], [], []>} : vector<8x128xf32>, vector<128x384xf32>, vector<8x384xf32> -> vector<8x384xf32>
    %57 = vector.extract_strided_slice %55 {offsets = [0, 0], sizes = [8, 128], strides = [1, 1]} : vector<8x384xf32> to vector<8x128xf32>
    %58 = vector.extract_strided_slice %56 {offsets = [0, 0], sizes = [8, 128], strides = [1, 1]} : vector<8x384xf32> to vector<8x128xf32>
    %59 = arith.addf %57, %58 : vector<8x128xf32>
    %60 = arith.negf %59 : vector<8x128xf32>
    %61 = math.exp %60 : vector<8x128xf32>
    %cst_33 = arith.constant 1.000000e+00 : f32
    %62 = vector.broadcast %cst_33 : f32 to vector<8x128xf32>
    %63 = arith.addf %62, %61 : vector<8x128xf32>
    %64 = arith.divf %62, %63 : vector<8x128xf32>
    %65 = vector.extract_strided_slice %55 {offsets = [0, 128], sizes = [8, 128], strides = [1, 1]} : vector<8x384xf32> to vector<8x128xf32>
    %66 = vector.extract_strided_slice %56 {offsets = [0, 128], sizes = [8, 128], strides = [1, 1]} : vector<8x384xf32> to vector<8x128xf32>
    %67 = arith.addf %65, %66 : vector<8x128xf32>
    %68 = arith.negf %67 : vector<8x128xf32>
    %69 = math.exp %68 : vector<8x128xf32>
    %cst_34 = arith.constant 1.000000e+00 : f32
    %70 = vector.broadcast %cst_34 : f32 to vector<8x128xf32>
    %71 = arith.addf %70, %69 : vector<8x128xf32>
    %72 = arith.divf %70, %71 : vector<8x128xf32>
    %73 = vector.extract_strided_slice %55 {offsets = [0, 256], sizes = [8, 128], strides = [1, 1]} : vector<8x384xf32> to vector<8x128xf32>
    %74 = vector.extract_strided_slice %56 {offsets = [0, 256], sizes = [8, 128], strides = [1, 1]} : vector<8x384xf32> to vector<8x128xf32>
    %75 = vector.broadcast %11 : vector<1x128xf32> to vector<8x128xf32>
    %76 = arith.addf %74, %75 : vector<8x128xf32>
    %77 = arith.mulf %64, %76 : vector<8x128xf32>
    %78 = arith.addf %73, %77 : vector<8x128xf32>
    %79 = math.tanh %78 : vector<8x128xf32>
    %cst_35 = arith.constant 1.000000e+00 : f32
    %80 = vector.broadcast %cst_35 : f32 to vector<8x128xf32>
    %81 = arith.subf %80, %72 : vector<8x128xf32>
    %82 = arith.mulf %81, %79 : vector<8x128xf32>
    %83 = arith.mulf %72, %54 : vector<8x128xf32>
    %84 = arith.addf %82, %83 : vector<8x128xf32>
    %c1_i32 = arith.constant 1 : i32
    %85 = vector.broadcast %c1_i32 : i32 to vector<8x1xi32>
    %86 = arith.cmpi sgt, %0, %85 : vector<8x1xi32>
    %87 = vector.shape_cast %86 : vector<8x1xi1> to vector<8x1xi1>
    %88 = vector.broadcast %87 : vector<8x1xi1> to vector<8x128xi1>
    %89 = arith.select %88, %84, %54 : vector<8x128xi1>, vector<8x128xf32>
    %c0_36 = arith.constant 0 : index
    %c0_37 = arith.constant 0 : index
    %90 = vector.load %arg18[%c0_36, %c0_37] : memref<8x128xf32, #tpu.memory_space<vmem>>, vector<8x128xf32>
    tpu.vector_store %arg18[%c0_36, %c0_37], %89 {strides = array<i32>} : memref<8x128xf32, #tpu.memory_space<vmem>>, vector<8x128xf32>,
    %cst_38 = arith.constant 0.000000e+00 : f32
    %91 = vector.shape_cast %86 : vector<8x1xi1> to vector<8x1xi1>
    %92 = vector.broadcast %91 : vector<8x1xi1> to vector<8x128xi1>
    %93 = vector.broadcast %cst_38 : f32 to vector<8x128xf32>
    %94 = arith.select %92, %84, %93 : vector<8x128xi1>, vector<8x128xf32>
    %c8_39 = arith.constant 8 : index
    %c0_40 = arith.constant 0 : index
    %95 = vector.load %arg17[%c8_39, %c0_40] : memref<64x128xf32, #tpu.memory_space<vmem>>, vector<8x128xf32>
    tpu.vector_store %arg17[%c8_39, %c0_40], %94 {strides = array<i32>} : memref<64x128xf32, #tpu.memory_space<vmem>>, vector<8x128xf32>,
    %c0_41 = arith.constant 0 : index
    %c0_42 = arith.constant 0 : index
    %96 = vector.load %arg18[%c0_41, %c0_42] : memref<8x128xf32, #tpu.memory_space<vmem>>, vector<8x128xf32>
    %c16 = arith.constant 16 : index
    %c0_43 = arith.constant 0 : index
    %97 = vector.load %arg16[%c16, %c0_43] : memref<64x384xf32, #tpu.memory_space<vmem>>, vector<8x384xf32>
    %cst_44 = arith.constant dense<0.000000e+00> : vector<8x384xf32>
    %98 = tpu.matmul %96, %10, %cst_44 {dimension_numbers = #tpu.dot_dimension_numbers<[1], [0], [0], [1], [0, 0, 1, 1], [], []>} : vector<8x128xf32>, vector<128x384xf32>, vector<8x384xf32> -> vector<8x384xf32>
    %99 = vector.extract_strided_slice %97 {offsets = [0, 0], sizes = [8, 128], strides = [1, 1]} : vector<8x384xf32> to vector<8x128xf32>
    %100 = vector.extract_strided_slice %98 {offsets = [0, 0], sizes = [8, 128], strides = [1, 1]} : vector<8x384xf32> to vector<8x128xf32>
    %101 = arith.addf %99, %100 : vector<8x128xf32>
    %102 = arith.negf %101 : vector<8x128xf32>
    %103 = math.exp %102 : vector<8x128xf32>
    %cst_45 = arith.constant 1.000000e+00 : f32
    %104 = vector.broadcast %cst_45 : f32 to vector<8x128xf32>
    %105 = arith.addf %104, %103 : vector<8x128xf32>
    %106 = arith.divf %104, %105 : vector<8x128xf32>
    %107 = vector.extract_strided_slice %97 {offsets = [0, 128], sizes = [8, 128], strides = [1, 1]} : vector<8x384xf32> to vector<8x128xf32>
    %108 = vector.extract_strided_slice %98 {offsets = [0, 128], sizes = [8, 128], strides = [1, 1]} : vector<8x384xf32> to vector<8x128xf32>
    %109 = arith.addf %107, %108 : vector<8x128xf32>
    %110 = arith.negf %109 : vector<8x128xf32>
    %111 = math.exp %110 : vector<8x128xf32>
    %cst_46 = arith.constant 1.000000e+00 : f32
    %112 = vector.broadcast %cst_46 : f32 to vector<8x128xf32>
    %113 = arith.addf %112, %111 : vector<8x128xf32>
    %114 = arith.divf %112, %113 : vector<8x128xf32>
    %115 = vector.extract_strided_slice %97 {offsets = [0, 256], sizes = [8, 128], strides = [1, 1]} : vector<8x384xf32> to vector<8x128xf32>
    %116 = vector.extract_strided_slice %98 {offsets = [0, 256], sizes = [8, 128], strides = [1, 1]} : vector<8x384xf32> to vector<8x128xf32>
    %117 = vector.broadcast %11 : vector<1x128xf32> to vector<8x128xf32>
    %118 = arith.addf %116, %117 : vector<8x128xf32>
    %119 = arith.mulf %106, %118 : vector<8x128xf32>
    %120 = arith.addf %115, %119 : vector<8x128xf32>
    %121 = math.tanh %120 : vector<8x128xf32>
    %cst_47 = arith.constant 1.000000e+00 : f32
    %122 = vector.broadcast %cst_47 : f32 to vector<8x128xf32>
    %123 = arith.subf %122, %114 : vector<8x128xf32>
    %124 = arith.mulf %123, %121 : vector<8x128xf32>
    %125 = arith.mulf %114, %96 : vector<8x128xf32>
    %126 = arith.addf %124, %125 : vector<8x128xf32>
    %c2_i32 = arith.constant 2 : i32
    %127 = vector.broadcast %c2_i32 : i32 to vector<8x1xi32>
    %128 = arith.cmpi sgt, %0, %127 : vector<8x1xi32>
    %129 = vector.shape_cast %128 : vector<8x1xi1> to vector<8x1xi1>
    %130 = vector.broadcast %129 : vector<8x1xi1> to vector<8x128xi1>
    %131 = arith.select %130, %126, %96 : vector<8x128xi1>, vector<8x128xf32>
    %c0_48 = arith.constant 0 : index
    %c0_49 = arith.constant 0 : index
    %132 = vector.load %arg18[%c0_48, %c0_49] : memref<8x128xf32, #tpu.memory_space<vmem>>, vector<8x128xf32>
    tpu.vector_store %arg18[%c0_48, %c0_49], %131 {strides = array<i32>} : memref<8x128xf32, #tpu.memory_space<vmem>>, vector<8x128xf32>,
    %cst_50 = arith.constant 0.000000e+00 : f32
    %133 = vector.shape_cast %128 : vector<8x1xi1> to vector<8x1xi1>
    %134 = vector.broadcast %133 : vector<8x1xi1> to vector<8x128xi1>
    %135 = vector.broadcast %cst_50 : f32 to vector<8x128xf32>
    %136 = arith.select %134, %126, %135 : vector<8x128xi1>, vector<8x128xf32>
    %c16_51 = arith.constant 16 : index
    %c0_52 = arith.constant 0 : index
    %137 = vector.load %arg17[%c16_51, %c0_52] : memref<64x128xf32, #tpu.memory_space<vmem>>, vector<8x128xf32>
    tpu.vector_store %arg17[%c16_51, %c0_52], %136 {strides = array<i32>} : memref<64x128xf32, #tpu.memory_space<vmem>>, vector<8x128xf32>,
    %c0_53 = arith.constant 0 : index
    %c0_54 = arith.constant 0 : index
    %138 = vector.load %arg18[%c0_53, %c0_54] : memref<8x128xf32, #tpu.memory_space<vmem>>, vector<8x128xf32>
    %c24 = arith.constant 24 : index
    %c0_55 = arith.constant 0 : index
    %139 = vector.load %arg16[%c24, %c0_55] : memref<64x384xf32, #tpu.memory_space<vmem>>, vector<8x384xf32>
    %cst_56 = arith.constant dense<0.000000e+00> : vector<8x384xf32>
    %140 = tpu.matmul %138, %10, %cst_56 {dimension_numbers = #tpu.dot_dimension_numbers<[1], [0], [0], [1], [0, 0, 1, 1], [], []>} : vector<8x128xf32>, vector<128x384xf32>, vector<8x384xf32> -> vector<8x384xf32>
    %141 = vector.extract_strided_slice %139 {offsets = [0, 0], sizes = [8, 128], strides = [1, 1]} : vector<8x384xf32> to vector<8x128xf32>
    %142 = vector.extract_strided_slice %140 {offsets = [0, 0], sizes = [8, 128], strides = [1, 1]} : vector<8x384xf32> to vector<8x128xf32>
    %143 = arith.addf %141, %142 : vector<8x128xf32>
    %144 = arith.negf %143 : vector<8x128xf32>
    %145 = math.exp %144 : vector<8x128xf32>
    %cst_57 = arith.constant 1.000000e+00 : f32
    %146 = vector.broadcast %cst_57 : f32 to vector<8x128xf32>
    %147 = arith.addf %146, %145 : vector<8x128xf32>
    %148 = arith.divf %146, %147 : vector<8x128xf32>
    %149 = vector.extract_strided_slice %139 {offsets = [0, 128], sizes = [8, 128], strides = [1, 1]} : vector<8x384xf32> to vector<8x128xf32>
    %150 = vector.extract_strided_slice %140 {offsets = [0, 128], sizes = [8, 128], strides = [1, 1]} : vector<8x384xf32> to vector<8x128xf32>
    %151 = arith.addf %149, %150 : vector<8x128xf32>
    %152 = arith.negf %151 : vector<8x128xf32>
    %153 = math.exp %152 : vector<8x128xf32>
    %cst_58 = arith.constant 1.000000e+00 : f32
    %154 = vector.broadcast %cst_58 : f32 to vector<8x128xf32>
    %155 = arith.addf %154, %153 : vector<8x128xf32>
    %156 = arith.divf %154, %155 : vector<8x128xf32>
    %157 = vector.extract_strided_slice %139 {offsets = [0, 256], sizes = [8, 128], strides = [1, 1]} : vector<8x384xf32> to vector<8x128xf32>
    %158 = vector.extract_strided_slice %140 {offsets = [0, 256], sizes = [8, 128], strides = [1, 1]} : vector<8x384xf32> to vector<8x128xf32>
    %159 = vector.broadcast %11 : vector<1x128xf32> to vector<8x128xf32>
    %160 = arith.addf %158, %159 : vector<8x128xf32>
    %161 = arith.mulf %148, %160 : vector<8x128xf32>
    %162 = arith.addf %157, %161 : vector<8x128xf32>
    %163 = math.tanh %162 : vector<8x128xf32>
    %cst_59 = arith.constant 1.000000e+00 : f32
    %164 = vector.broadcast %cst_59 : f32 to vector<8x128xf32>
    %165 = arith.subf %164, %156 : vector<8x128xf32>
    %166 = arith.mulf %165, %163 : vector<8x128xf32>
    %167 = arith.mulf %156, %138 : vector<8x128xf32>
    %168 = arith.addf %166, %167 : vector<8x128xf32>
    %c3_i32 = arith.constant 3 : i32
    %169 = vector.broadcast %c3_i32 : i32 to vector<8x1xi32>
    %170 = arith.cmpi sgt, %0, %169 : vector<8x1xi32>
    %171 = vector.shape_cast %170 : vector<8x1xi1> to vector<8x1xi1>
    %172 = vector.broadcast %171 : vector<8x1xi1> to vector<8x128xi1>
    %173 = arith.select %172, %168, %138 : vector<8x128xi1>, vector<8x128xf32>
    %c0_60 = arith.constant 0 : index
    %c0_61 = arith.constant 0 : index
    %174 = vector.load %arg18[%c0_60, %c0_61] : memref<8x128xf32, #tpu.memory_space<vmem>>, vector<8x128xf32>
    tpu.vector_store %arg18[%c0_60, %c0_61], %173 {strides = array<i32>} : memref<8x128xf32, #tpu.memory_space<vmem>>, vector<8x128xf32>,
    %cst_62 = arith.constant 0.000000e+00 : f32
    %175 = vector.shape_cast %170 : vector<8x1xi1> to vector<8x1xi1>
    %176 = vector.broadcast %175 : vector<8x1xi1> to vector<8x128xi1>
    %177 = vector.broadcast %cst_62 : f32 to vector<8x128xf32>
    %178 = arith.select %176, %168, %177 : vector<8x128xi1>, vector<8x128xf32>
    %c24_63 = arith.constant 24 : index
    %c0_64 = arith.constant 0 : index
    %179 = vector.load %arg17[%c24_63, %c0_64] : memref<64x128xf32, #tpu.memory_space<vmem>>, vector<8x128xf32>
    tpu.vector_store %arg17[%c24_63, %c0_64], %178 {strides = array<i32>} : memref<64x128xf32, #tpu.memory_space<vmem>>, vector<8x128xf32>,
    %c0_65 = arith.constant 0 : index
    %c0_66 = arith.constant 0 : index
    %180 = vector.load %arg18[%c0_65, %c0_66] : memref<8x128xf32, #tpu.memory_space<vmem>>, vector<8x128xf32>
    %c32 = arith.constant 32 : index
    %c0_67 = arith.constant 0 : index
    %181 = vector.load %arg16[%c32, %c0_67] : memref<64x384xf32, #tpu.memory_space<vmem>>, vector<8x384xf32>
    %cst_68 = arith.constant dense<0.000000e+00> : vector<8x384xf32>
    %182 = tpu.matmul %180, %10, %cst_68 {dimension_numbers = #tpu.dot_dimension_numbers<[1], [0], [0], [1], [0, 0, 1, 1], [], []>} : vector<8x128xf32>, vector<128x384xf32>, vector<8x384xf32> -> vector<8x384xf32>
    %183 = vector.extract_strided_slice %181 {offsets = [0, 0], sizes = [8, 128], strides = [1, 1]} : vector<8x384xf32> to vector<8x128xf32>
    %184 = vector.extract_strided_slice %182 {offsets = [0, 0], sizes = [8, 128], strides = [1, 1]} : vector<8x384xf32> to vector<8x128xf32>
    %185 = arith.addf %183, %184 : vector<8x128xf32>
    %186 = arith.negf %185 : vector<8x128xf32>
    %187 = math.exp %186 : vector<8x128xf32>
    %cst_69 = arith.constant 1.000000e+00 : f32
    %188 = vector.broadcast %cst_69 : f32 to vector<8x128xf32>
    %189 = arith.addf %188, %187 : vector<8x128xf32>
    %190 = arith.divf %188, %189 : vector<8x128xf32>
    %191 = vector.extract_strided_slice %181 {offsets = [0, 128], sizes = [8, 128], strides = [1, 1]} : vector<8x384xf32> to vector<8x128xf32>
    %192 = vector.extract_strided_slice %182 {offsets = [0, 128], sizes = [8, 128], strides = [1, 1]} : vector<8x384xf32> to vector<8x128xf32>
    %193 = arith.addf %191, %192 : vector<8x128xf32>
    %194 = arith.negf %193 : vector<8x128xf32>
    %195 = math.exp %194 : vector<8x128xf32>
    %cst_70 = arith.constant 1.000000e+00 : f32
    %196 = vector.broadcast %cst_70 : f32 to vector<8x128xf32>
    %197 = arith.addf %196, %195 : vector<8x128xf32>
    %198 = arith.divf %196, %197 : vector<8x128xf32>
    %199 = vector.extract_strided_slice %181 {offsets = [0, 256], sizes = [8, 128], strides = [1, 1]} : vector<8x384xf32> to vector<8x128xf32>
    %200 = vector.extract_strided_slice %182 {offsets = [0, 256], sizes = [8, 128], strides = [1, 1]} : vector<8x384xf32> to vector<8x128xf32>
    %201 = vector.broadcast %11 : vector<1x128xf32> to vector<8x128xf32>
    %202 = arith.addf %200, %201 : vector<8x128xf32>
    %203 = arith.mulf %190, %202 : vector<8x128xf32>
    %204 = arith.addf %199, %203 : vector<8x128xf32>
    %205 = math.tanh %204 : vector<8x128xf32>
    %cst_71 = arith.constant 1.000000e+00 : f32
    %206 = vector.broadcast %cst_71 : f32 to vector<8x128xf32>
    %207 = arith.subf %206, %198 : vector<8x128xf32>
    %208 = arith.mulf %207, %205 : vector<8x128xf32>
    %209 = arith.mulf %198, %180 : vector<8x128xf32>
    %210 = arith.addf %208, %209 : vector<8x128xf32>
    %c4_i32 = arith.constant 4 : i32
    %211 = vector.broadcast %c4_i32 : i32 to vector<8x1xi32>
    %212 = arith.cmpi sgt, %0, %211 : vector<8x1xi32>
    %213 = vector.shape_cast %212 : vector<8x1xi1> to vector<8x1xi1>
    %214 = vector.broadcast %213 : vector<8x1xi1> to vector<8x128xi1>
    %215 = arith.select %214, %210, %180 : vector<8x128xi1>, vector<8x128xf32>
    %c0_72 = arith.constant 0 : index
    %c0_73 = arith.constant 0 : index
    %216 = vector.load %arg18[%c0_72, %c0_73] : memref<8x128xf32, #tpu.memory_space<vmem>>, vector<8x128xf32>
    tpu.vector_store %arg18[%c0_72, %c0_73], %215 {strides = array<i32>} : memref<8x128xf32, #tpu.memory_space<vmem>>, vector<8x128xf32>,
    %cst_74 = arith.constant 0.000000e+00 : f32
    %217 = vector.shape_cast %212 : vector<8x1xi1> to vector<8x1xi1>
    %218 = vector.broadcast %217 : vector<8x1xi1> to vector<8x128xi1>
    %219 = vector.broadcast %cst_74 : f32 to vector<8x128xf32>
    %220 = arith.select %218, %210, %219 : vector<8x128xi1>, vector<8x128xf32>
    %c32_75 = arith.constant 32 : index
    %c0_76 = arith.constant 0 : index
    %221 = vector.load %arg17[%c32_75, %c0_76] : memref<64x128xf32, #tpu.memory_space<vmem>>, vector<8x128xf32>
    tpu.vector_store %arg17[%c32_75, %c0_76], %220 {strides = array<i32>} : memref<64x128xf32, #tpu.memory_space<vmem>>, vector<8x128xf32>,
    %c0_77 = arith.constant 0 : index
    %c0_78 = arith.constant 0 : index
    %222 = vector.load %arg18[%c0_77, %c0_78] : memref<8x128xf32, #tpu.memory_space<vmem>>, vector<8x128xf32>
    %c40 = arith.constant 40 : index
    %c0_79 = arith.constant 0 : index
    %223 = vector.load %arg16[%c40, %c0_79] : memref<64x384xf32, #tpu.memory_space<vmem>>, vector<8x384xf32>
    %cst_80 = arith.constant dense<0.000000e+00> : vector<8x384xf32>
    %224 = tpu.matmul %222, %10, %cst_80 {dimension_numbers = #tpu.dot_dimension_numbers<[1], [0], [0], [1], [0, 0, 1, 1], [], []>} : vector<8x128xf32>, vector<128x384xf32>, vector<8x384xf32> -> vector<8x384xf32>
    %225 = vector.extract_strided_slice %223 {offsets = [0, 0], sizes = [8, 128], strides = [1, 1]} : vector<8x384xf32> to vector<8x128xf32>
    %226 = vector.extract_strided_slice %224 {offsets = [0, 0], sizes = [8, 128], strides = [1, 1]} : vector<8x384xf32> to vector<8x128xf32>
    %227 = arith.addf %225, %226 : vector<8x128xf32>
    %228 = arith.negf %227 : vector<8x128xf32>
    %229 = math.exp %228 : vector<8x128xf32>
    %cst_81 = arith.constant 1.000000e+00 : f32
    %230 = vector.broadcast %cst_81 : f32 to vector<8x128xf32>
    %231 = arith.addf %230, %229 : vector<8x128xf32>
    %232 = arith.divf %230, %231 : vector<8x128xf32>
    %233 = vector.extract_strided_slice %223 {offsets = [0, 128], sizes = [8, 128], strides = [1, 1]} : vector<8x384xf32> to vector<8x128xf32>
    %234 = vector.extract_strided_slice %224 {offsets = [0, 128], sizes = [8, 128], strides = [1, 1]} : vector<8x384xf32> to vector<8x128xf32>
    %235 = arith.addf %233, %234 : vector<8x128xf32>
    %236 = arith.negf %235 : vector<8x128xf32>
    %237 = math.exp %236 : vector<8x128xf32>
    %cst_82 = arith.constant 1.000000e+00 : f32
    %238 = vector.broadcast %cst_82 : f32 to vector<8x128xf32>
    %239 = arith.addf %238, %237 : vector<8x128xf32>
    %240 = arith.divf %238, %239 : vector<8x128xf32>
    %241 = vector.extract_strided_slice %223 {offsets = [0, 256], sizes = [8, 128], strides = [1, 1]} : vector<8x384xf32> to vector<8x128xf32>
    %242 = vector.extract_strided_slice %224 {offsets = [0, 256], sizes = [8, 128], strides = [1, 1]} : vector<8x384xf32> to vector<8x128xf32>
    %243 = vector.broadcast %11 : vector<1x128xf32> to vector<8x128xf32>
    %244 = arith.addf %242, %243 : vector<8x128xf32>
    %245 = arith.mulf %232, %244 : vector<8x128xf32>
    %246 = arith.addf %241, %245 : vector<8x128xf32>
    %247 = math.tanh %246 : vector<8x128xf32>
    %cst_83 = arith.constant 1.000000e+00 : f32
    %248 = vector.broadcast %cst_83 : f32 to vector<8x128xf32>
    %249 = arith.subf %248, %240 : vector<8x128xf32>
    %250 = arith.mulf %249, %247 : vector<8x128xf32>
    %251 = arith.mulf %240, %222 : vector<8x128xf32>
    %252 = arith.addf %250, %251 : vector<8x128xf32>
    %c5_i32 = arith.constant 5 : i32
    %253 = vector.broadcast %c5_i32 : i32 to vector<8x1xi32>
    %254 = arith.cmpi sgt, %0, %253 : vector<8x1xi32>
    %255 = vector.shape_cast %254 : vector<8x1xi1> to vector<8x1xi1>
    %256 = vector.broadcast %255 : vector<8x1xi1> to vector<8x128xi1>
    %257 = arith.select %256, %252, %222 : vector<8x128xi1>, vector<8x128xf32>
    %c0_84 = arith.constant 0 : index
    %c0_85 = arith.constant 0 : index
    %258 = vector.load %arg18[%c0_84, %c0_85] : memref<8x128xf32, #tpu.memory_space<vmem>>, vector<8x128xf32>
    tpu.vector_store %arg18[%c0_84, %c0_85], %257 {strides = array<i32>} : memref<8x128xf32, #tpu.memory_space<vmem>>, vector<8x128xf32>,
    %cst_86 = arith.constant 0.000000e+00 : f32
    %259 = vector.shape_cast %254 : vector<8x1xi1> to vector<8x1xi1>
    %260 = vector.broadcast %259 : vector<8x1xi1> to vector<8x128xi1>
    %261 = vector.broadcast %cst_86 : f32 to vector<8x128xf32>
    %262 = arith.select %260, %252, %261 : vector<8x128xi1>, vector<8x128xf32>
    %c40_87 = arith.constant 40 : index
    %c0_88 = arith.constant 0 : index
    %263 = vector.load %arg17[%c40_87, %c0_88] : memref<64x128xf32, #tpu.memory_space<vmem>>, vector<8x128xf32>
    tpu.vector_store %arg17[%c40_87, %c0_88], %262 {strides = array<i32>} : memref<64x128xf32, #tpu.memory_space<vmem>>, vector<8x128xf32>,
    %c0_89 = arith.constant 0 : index
    %c0_90 = arith.constant 0 : index
    %264 = vector.load %arg18[%c0_89, %c0_90] : memref<8x128xf32, #tpu.memory_space<vmem>>, vector<8x128xf32>
    %c48 = arith.constant 48 : index
    %c0_91 = arith.constant 0 : index
    %265 = vector.load %arg16[%c48, %c0_91] : memref<64x384xf32, #tpu.memory_space<vmem>>, vector<8x384xf32>
    %cst_92 = arith.constant dense<0.000000e+00> : vector<8x384xf32>
    %266 = tpu.matmul %264, %10, %cst_92 {dimension_numbers = #tpu.dot_dimension_numbers<[1], [0], [0], [1], [0, 0, 1, 1], [], []>} : vector<8x128xf32>, vector<128x384xf32>, vector<8x384xf32> -> vector<8x384xf32>
    %267 = vector.extract_strided_slice %265 {offsets = [0, 0], sizes = [8, 128], strides = [1, 1]} : vector<8x384xf32> to vector<8x128xf32>
    %268 = vector.extract_strided_slice %266 {offsets = [0, 0], sizes = [8, 128], strides = [1, 1]} : vector<8x384xf32> to vector<8x128xf32>
    %269 = arith.addf %267, %268 : vector<8x128xf32>
    %270 = arith.negf %269 : vector<8x128xf32>
    %271 = math.exp %270 : vector<8x128xf32>
    %cst_93 = arith.constant 1.000000e+00 : f32
    %272 = vector.broadcast %cst_93 : f32 to vector<8x128xf32>
    %273 = arith.addf %272, %271 : vector<8x128xf32>
    %274 = arith.divf %272, %273 : vector<8x128xf32>
    %275 = vector.extract_strided_slice %265 {offsets = [0, 128], sizes = [8, 128], strides = [1, 1]} : vector<8x384xf32> to vector<8x128xf32>
    %276 = vector.extract_strided_slice %266 {offsets = [0, 128], sizes = [8, 128], strides = [1, 1]} : vector<8x384xf32> to vector<8x128xf32>
    %277 = arith.addf %275, %276 : vector<8x128xf32>
    %278 = arith.negf %277 : vector<8x128xf32>
    %279 = math.exp %278 : vector<8x128xf32>
    %cst_94 = arith.constant 1.000000e+00 : f32
    %280 = vector.broadcast %cst_94 : f32 to vector<8x128xf32>
    %281 = arith.addf %280, %279 : vector<8x128xf32>
    %282 = arith.divf %280, %281 : vector<8x128xf32>
    %283 = vector.extract_strided_slice %265 {offsets = [0, 256], sizes = [8, 128], strides = [1, 1]} : vector<8x384xf32> to vector<8x128xf32>
    %284 = vector.extract_strided_slice %266 {offsets = [0, 256], sizes = [8, 128], strides = [1, 1]} : vector<8x384xf32> to vector<8x128xf32>
    %285 = vector.broadcast %11 : vector<1x128xf32> to vector<8x128xf32>
    %286 = arith.addf %284, %285 : vector<8x128xf32>
    %287 = arith.mulf %274, %286 : vector<8x128xf32>
    %288 = arith.addf %283, %287 : vector<8x128xf32>
    %289 = math.tanh %288 : vector<8x128xf32>
    %cst_95 = arith.constant 1.000000e+00 : f32
    %290 = vector.broadcast %cst_95 : f32 to vector<8x128xf32>
    %291 = arith.subf %290, %282 : vector<8x128xf32>
    %292 = arith.mulf %291, %289 : vector<8x128xf32>
    %293 = arith.mulf %282, %264 : vector<8x128xf32>
    %294 = arith.addf %292, %293 : vector<8x128xf32>
    %c6_i32 = arith.constant 6 : i32
    %295 = vector.broadcast %c6_i32 : i32 to vector<8x1xi32>
    %296 = arith.cmpi sgt, %0, %295 : vector<8x1xi32>
    %297 = vector.shape_cast %296 : vector<8x1xi1> to vector<8x1xi1>
    %298 = vector.broadcast %297 : vector<8x1xi1> to vector<8x128xi1>
    %299 = arith.select %298, %294, %264 : vector<8x128xi1>, vector<8x128xf32>
    %c0_96 = arith.constant 0 : index
    %c0_97 = arith.constant 0 : index
    %300 = vector.load %arg18[%c0_96, %c0_97] : memref<8x128xf32, #tpu.memory_space<vmem>>, vector<8x128xf32>
    tpu.vector_store %arg18[%c0_96, %c0_97], %299 {strides = array<i32>} : memref<8x128xf32, #tpu.memory_space<vmem>>, vector<8x128xf32>,
    %cst_98 = arith.constant 0.000000e+00 : f32
    %301 = vector.shape_cast %296 : vector<8x1xi1> to vector<8x1xi1>
    %302 = vector.broadcast %301 : vector<8x1xi1> to vector<8x128xi1>
    %303 = vector.broadcast %cst_98 : f32 to vector<8x128xf32>
    %304 = arith.select %302, %294, %303 : vector<8x128xi1>, vector<8x128xf32>
    %c48_99 = arith.constant 48 : index
    %c0_100 = arith.constant 0 : index
    %305 = vector.load %arg17[%c48_99, %c0_100] : memref<64x128xf32, #tpu.memory_space<vmem>>, vector<8x128xf32>
    tpu.vector_store %arg17[%c48_99, %c0_100], %304 {strides = array<i32>} : memref<64x128xf32, #tpu.memory_space<vmem>>, vector<8x128xf32>,
    %c0_101 = arith.constant 0 : index
    %c0_102 = arith.constant 0 : index
    %306 = vector.load %arg18[%c0_101, %c0_102] : memref<8x128xf32, #tpu.memory_space<vmem>>, vector<8x128xf32>
    %c56 = arith.constant 56 : index
    %c0_103 = arith.constant 0 : index
    %307 = vector.load %arg16[%c56, %c0_103] : memref<64x384xf32, #tpu.memory_space<vmem>>, vector<8x384xf32>
    %cst_104 = arith.constant dense<0.000000e+00> : vector<8x384xf32>
    %308 = tpu.matmul %306, %10, %cst_104 {dimension_numbers = #tpu.dot_dimension_numbers<[1], [0], [0], [1], [0, 0, 1, 1], [], []>} : vector<8x128xf32>, vector<128x384xf32>, vector<8x384xf32> -> vector<8x384xf32>
    %309 = vector.extract_strided_slice %307 {offsets = [0, 0], sizes = [8, 128], strides = [1, 1]} : vector<8x384xf32> to vector<8x128xf32>
    %310 = vector.extract_strided_slice %308 {offsets = [0, 0], sizes = [8, 128], strides = [1, 1]} : vector<8x384xf32> to vector<8x128xf32>
    %311 = arith.addf %309, %310 : vector<8x128xf32>
    %312 = arith.negf %311 : vector<8x128xf32>
    %313 = math.exp %312 : vector<8x128xf32>
    %cst_105 = arith.constant 1.000000e+00 : f32
    %314 = vector.broadcast %cst_105 : f32 to vector<8x128xf32>
    %315 = arith.addf %314, %313 : vector<8x128xf32>
    %316 = arith.divf %314, %315 : vector<8x128xf32>
    %317 = vector.extract_strided_slice %307 {offsets = [0, 128], sizes = [8, 128], strides = [1, 1]} : vector<8x384xf32> to vector<8x128xf32>
    %318 = vector.extract_strided_slice %308 {offsets = [0, 128], sizes = [8, 128], strides = [1, 1]} : vector<8x384xf32> to vector<8x128xf32>
    %319 = arith.addf %317, %318 : vector<8x128xf32>
    %320 = arith.negf %319 : vector<8x128xf32>
    %321 = math.exp %320 : vector<8x128xf32>
    %cst_106 = arith.constant 1.000000e+00 : f32
    %322 = vector.broadcast %cst_106 : f32 to vector<8x128xf32>
    %323 = arith.addf %322, %321 : vector<8x128xf32>
    %324 = arith.divf %322, %323 : vector<8x128xf32>
    %325 = vector.extract_strided_slice %307 {offsets = [0, 256], sizes = [8, 128], strides = [1, 1]} : vector<8x384xf32> to vector<8x128xf32>
    %326 = vector.extract_strided_slice %308 {offsets = [0, 256], sizes = [8, 128], strides = [1, 1]} : vector<8x384xf32> to vector<8x128xf32>
    %327 = vector.broadcast %11 : vector<1x128xf32> to vector<8x128xf32>
    %328 = arith.addf %326, %327 : vector<8x128xf32>
    %329 = arith.mulf %316, %328 : vector<8x128xf32>
    %330 = arith.addf %325, %329 : vector<8x128xf32>
    %331 = math.tanh %330 : vector<8x128xf32>
    %cst_107 = arith.constant 1.000000e+00 : f32
    %332 = vector.broadcast %cst_107 : f32 to vector<8x128xf32>
    %333 = arith.subf %332, %324 : vector<8x128xf32>
    %334 = arith.mulf %333, %331 : vector<8x128xf32>
    %335 = arith.mulf %324, %306 : vector<8x128xf32>
    %336 = arith.addf %334, %335 : vector<8x128xf32>
    %c7_i32 = arith.constant 7 : i32
    %337 = vector.broadcast %c7_i32 : i32 to vector<8x1xi32>
    %338 = arith.cmpi sgt, %0, %337 : vector<8x1xi32>
    %339 = vector.shape_cast %338 : vector<8x1xi1> to vector<8x1xi1>
    %340 = vector.broadcast %339 : vector<8x1xi1> to vector<8x128xi1>
    %341 = arith.select %340, %336, %306 : vector<8x128xi1>, vector<8x128xf32>
    %c0_108 = arith.constant 0 : index
    %c0_109 = arith.constant 0 : index
    %342 = vector.load %arg18[%c0_108, %c0_109] : memref<8x128xf32, #tpu.memory_space<vmem>>, vector<8x128xf32>
    tpu.vector_store %arg18[%c0_108, %c0_109], %341 {strides = array<i32>} : memref<8x128xf32, #tpu.memory_space<vmem>>, vector<8x128xf32>,
    %cst_110 = arith.constant 0.000000e+00 : f32
    %343 = vector.shape_cast %338 : vector<8x1xi1> to vector<8x1xi1>
    %344 = vector.broadcast %343 : vector<8x1xi1> to vector<8x128xi1>
    %345 = vector.broadcast %cst_110 : f32 to vector<8x128xf32>
    %346 = arith.select %344, %336, %345 : vector<8x128xi1>, vector<8x128xf32>
    %c56_111 = arith.constant 56 : index
    %c0_112 = arith.constant 0 : index
    %347 = vector.load %arg17[%c56_111, %c0_112] : memref<64x128xf32, #tpu.memory_space<vmem>>, vector<8x128xf32>
    tpu.vector_store %arg17[%c56_111, %c0_112], %346 {strides = array<i32>} : memref<64x128xf32, #tpu.memory_space<vmem>>, vector<8x128xf32>,
    %c0_113 = arith.constant 0 : index
    %c0_114 = arith.constant 0 : index
    %348 = vector.load %arg17[%c0_113, %c0_114] : memref<64x128xf32, #tpu.memory_space<vmem>>, vector<64x128xf32>
    %c0_115 = arith.constant 0 : index
    %c0_116 = arith.constant 0 : index
    %349 = vector.load %arg6[%c0_115, %c0_116] : memref<128x384xf32, #tpu.memory_space<vmem>>, vector<128x384xf32>
    %cst_117 = arith.constant dense<0.000000e+00> : vector<64x384xf32>
    %350 = tpu.matmul %348, %349, %cst_117 {dimension_numbers = #tpu.dot_dimension_numbers<[1], [0], [0], [1], [0, 0, 1, 1], [], []>} : vector<64x128xf32>, vector<128x384xf32>, vector<64x384xf32> -> vector<64x384xf32>
    %c0_118 = arith.constant 0 : index
    %c0_119 = arith.constant 0 : index
    %351 = vector.load %arg8[%c0_118, %c0_119] : memref<1x384xf32, #tpu.memory_space<vmem>>, vector<1x384xf32>
    %352 = vector.broadcast %351 : vector<1x384xf32> to vector<64x384xf32>
    %353 = arith.addf %350, %352 : vector<64x384xf32>
    %c0_120 = arith.constant 0 : index
    %c0_121 = arith.constant 0 : index
    %354 = vector.load %arg16[%c0_120, %c0_121] : memref<64x384xf32, #tpu.memory_space<vmem>>, vector<64x384xf32>
    tpu.vector_store %arg16[%c0_120, %c0_121], %353 {strides = array<i32>} : memref<64x384xf32, #tpu.memory_space<vmem>>, vector<64x384xf32>,
    %cst_122 = arith.constant 0.000000e+00 : f32
    %355 = vector.broadcast %cst_122 : f32 to vector<8x128xf32>
    %c0_123 = arith.constant 0 : index
    %c0_124 = arith.constant 0 : index
    %356 = vector.load %arg18[%c0_123, %c0_124] : memref<8x128xf32, #tpu.memory_space<vmem>>, vector<8x128xf32>
    tpu.vector_store %arg18[%c0_123, %c0_124], %355 {strides = array<i32>} : memref<8x128xf32, #tpu.memory_space<vmem>>, vector<8x128xf32>,
    %c0_125 = arith.constant 0 : index
    %c0_126 = arith.constant 0 : index
    %357 = vector.load %arg7[%c0_125, %c0_126] : memref<128x384xf32, #tpu.memory_space<vmem>>, vector<128x384xf32>
    %c0_127 = arith.constant 0 : index
    %c0_128 = arith.constant 0 : index
    %358 = vector.load %arg9[%c0_127, %c0_128] : memref<1x128xf32, #tpu.memory_space<vmem>>, vector<1x128xf32>
    %c0_129 = arith.constant 0 : index
    %c0_130 = arith.constant 0 : index
    %359 = vector.load %arg18[%c0_129, %c0_130] : memref<8x128xf32, #tpu.memory_space<vmem>>, vector<8x128xf32>
    %c0_131 = arith.constant 0 : index
    %c0_132 = arith.constant 0 : index
    %360 = vector.load %arg16[%c0_131, %c0_132] : memref<64x384xf32, #tpu.memory_space<vmem>>, vector<8x384xf32>
    %cst_133 = arith.constant dense<0.000000e+00> : vector<8x384xf32>
    %361 = tpu.matmul %359, %357, %cst_133 {dimension_numbers = #tpu.dot_dimension_numbers<[1], [0], [0], [1], [0, 0, 1, 1], [], []>} : vector<8x128xf32>, vector<128x384xf32>, vector<8x384xf32> -> vector<8x384xf32>
    %362 = vector.extract_strided_slice %360 {offsets = [0, 0], sizes = [8, 128], strides = [1, 1]} : vector<8x384xf32> to vector<8x128xf32>
    %363 = vector.extract_strided_slice %361 {offsets = [0, 0], sizes = [8, 128], strides = [1, 1]} : vector<8x384xf32> to vector<8x128xf32>
    %364 = arith.addf %362, %363 : vector<8x128xf32>
    %365 = arith.negf %364 : vector<8x128xf32>
    %366 = math.exp %365 : vector<8x128xf32>
    %cst_134 = arith.constant 1.000000e+00 : f32
    %367 = vector.broadcast %cst_134 : f32 to vector<8x128xf32>
    %368 = arith.addf %367, %366 : vector<8x128xf32>
    %369 = arith.divf %367, %368 : vector<8x128xf32>
    %370 = vector.extract_strided_slice %360 {offsets = [0, 128], sizes = [8, 128], strides = [1, 1]} : vector<8x384xf32> to vector<8x128xf32>
    %371 = vector.extract_strided_slice %361 {offsets = [0, 128], sizes = [8, 128], strides = [1, 1]} : vector<8x384xf32> to vector<8x128xf32>
    %372 = arith.addf %370, %371 : vector<8x128xf32>
    %373 = arith.negf %372 : vector<8x128xf32>
    %374 = math.exp %373 : vector<8x128xf32>
    %cst_135 = arith.constant 1.000000e+00 : f32
    %375 = vector.broadcast %cst_135 : f32 to vector<8x128xf32>
    %376 = arith.addf %375, %374 : vector<8x128xf32>
    %377 = arith.divf %375, %376 : vector<8x128xf32>
    %378 = vector.extract_strided_slice %360 {offsets = [0, 256], sizes = [8, 128], strides = [1, 1]} : vector<8x384xf32> to vector<8x128xf32>
    %379 = vector.extract_strided_slice %361 {offsets = [0, 256], sizes = [8, 128], strides = [1, 1]} : vector<8x384xf32> to vector<8x128xf32>
    %380 = vector.broadcast %358 : vector<1x128xf32> to vector<8x128xf32>
    %381 = arith.addf %379, %380 : vector<8x128xf32>
    %382 = arith.mulf %369, %381 : vector<8x128xf32>
    %383 = arith.addf %378, %382 : vector<8x128xf32>
    %384 = math.tanh %383 : vector<8x128xf32>
    %cst_136 = arith.constant 1.000000e+00 : f32
    %385 = vector.broadcast %cst_136 : f32 to vector<8x128xf32>
    %386 = arith.subf %385, %377 : vector<8x128xf32>
    %387 = arith.mulf %386, %384 : vector<8x128xf32>
    %388 = arith.mulf %377, %359 : vector<8x128xf32>
    %389 = arith.addf %387, %388 : vector<8x128xf32>
    %c0_i32_137 = arith.constant 0 : i32
    %390 = vector.broadcast %c0_i32_137 : i32 to vector<8x1xi32>
    %391 = arith.cmpi sgt, %0, %390 : vector<8x1xi32>
    %392 = vector.shape_cast %391 : vector<8x1xi1> to vector<8x1xi1>
    %393 = vector.broadcast %392 : vector<8x1xi1> to vector<8x128xi1>
    %394 = arith.select %393, %389, %359 : vector<8x128xi1>, vector<8x128xf32>
    %c0_138 = arith.constant 0 : index
    %c0_139 = arith.constant 0 : index
    %395 = vector.load %arg18[%c0_138, %c0_139] : memref<8x128xf32, #tpu.memory_space<vmem>>, vector<8x128xf32>
    tpu.vector_store %arg18[%c0_138, %c0_139], %394 {strides = array<i32>} : memref<8x128xf32, #tpu.memory_space<vmem>>, vector<8x128xf32>,
    %c0_140 = arith.constant 0 : index
    %c0_141 = arith.constant 0 : index
    %396 = vector.load %arg18[%c0_140, %c0_141] : memref<8x128xf32, #tpu.memory_space<vmem>>, vector<8x128xf32>
    %c8_142 = arith.constant 8 : index
    %c0_143 = arith.constant 0 : index
    %397 = vector.load %arg16[%c8_142, %c0_143] : memref<64x384xf32, #tpu.memory_space<vmem>>, vector<8x384xf32>
    %cst_144 = arith.constant dense<0.000000e+00> : vector<8x384xf32>
    %398 = tpu.matmul %396, %357, %cst_144 {dimension_numbers = #tpu.dot_dimension_numbers<[1], [0], [0], [1], [0, 0, 1, 1], [], []>} : vector<8x128xf32>, vector<128x384xf32>, vector<8x384xf32> -> vector<8x384xf32>
    %399 = vector.extract_strided_slice %397 {offsets = [0, 0], sizes = [8, 128], strides = [1, 1]} : vector<8x384xf32> to vector<8x128xf32>
    %400 = vector.extract_strided_slice %398 {offsets = [0, 0], sizes = [8, 128], strides = [1, 1]} : vector<8x384xf32> to vector<8x128xf32>
    %401 = arith.addf %399, %400 : vector<8x128xf32>
    %402 = arith.negf %401 : vector<8x128xf32>
    %403 = math.exp %402 : vector<8x128xf32>
    %cst_145 = arith.constant 1.000000e+00 : f32
    %404 = vector.broadcast %cst_145 : f32 to vector<8x128xf32>
    %405 = arith.addf %404, %403 : vector<8x128xf32>
    %406 = arith.divf %404, %405 : vector<8x128xf32>
    %407 = vector.extract_strided_slice %397 {offsets = [0, 128], sizes = [8, 128], strides = [1, 1]} : vector<8x384xf32> to vector<8x128xf32>
    %408 = vector.extract_strided_slice %398 {offsets = [0, 128], sizes = [8, 128], strides = [1, 1]} : vector<8x384xf32> to vector<8x128xf32>
    %409 = arith.addf %407, %408 : vector<8x128xf32>
    %410 = arith.negf %409 : vector<8x128xf32>
    %411 = math.exp %410 : vector<8x128xf32>
    %cst_146 = arith.constant 1.000000e+00 : f32
    %412 = vector.broadcast %cst_146 : f32 to vector<8x128xf32>
    %413 = arith.addf %412, %411 : vector<8x128xf32>
    %414 = arith.divf %412, %413 : vector<8x128xf32>
    %415 = vector.extract_strided_slice %397 {offsets = [0, 256], sizes = [8, 128], strides = [1, 1]} : vector<8x384xf32> to vector<8x128xf32>
    %416 = vector.extract_strided_slice %398 {offsets = [0, 256], sizes = [8, 128], strides = [1, 1]} : vector<8x384xf32> to vector<8x128xf32>
    %417 = vector.broadcast %358 : vector<1x128xf32> to vector<8x128xf32>
    %418 = arith.addf %416, %417 : vector<8x128xf32>
    %419 = arith.mulf %406, %418 : vector<8x128xf32>
    %420 = arith.addf %415, %419 : vector<8x128xf32>
    %421 = math.tanh %420 : vector<8x128xf32>
    %cst_147 = arith.constant 1.000000e+00 : f32
    %422 = vector.broadcast %cst_147 : f32 to vector<8x128xf32>
    %423 = arith.subf %422, %414 : vector<8x128xf32>
    %424 = arith.mulf %423, %421 : vector<8x128xf32>
    %425 = arith.mulf %414, %396 : vector<8x128xf32>
    %426 = arith.addf %424, %425 : vector<8x128xf32>
    %c1_i32_148 = arith.constant 1 : i32
    %427 = vector.broadcast %c1_i32_148 : i32 to vector<8x1xi32>
    %428 = arith.cmpi sgt, %0, %427 : vector<8x1xi32>
    %429 = vector.shape_cast %428 : vector<8x1xi1> to vector<8x1xi1>
    %430 = vector.broadcast %429 : vector<8x1xi1> to vector<8x128xi1>
    %431 = arith.select %430, %426, %396 : vector<8x128xi1>, vector<8x128xf32>
    %c0_149 = arith.constant 0 : index
    %c0_150 = arith.constant 0 : index
    %432 = vector.load %arg18[%c0_149, %c0_150] : memref<8x128xf32, #tpu.memory_space<vmem>>, vector<8x128xf32>
    tpu.vector_store %arg18[%c0_149, %c0_150], %431 {strides = array<i32>} : memref<8x128xf32, #tpu.memory_space<vmem>>, vector<8x128xf32>,
    %c0_151 = arith.constant 0 : index
    %c0_152 = arith.constant 0 : index
    %433 = vector.load %arg18[%c0_151, %c0_152] : memref<8x128xf32, #tpu.memory_space<vmem>>, vector<8x128xf32>
    %c16_153 = arith.constant 16 : index
    %c0_154 = arith.constant 0 : index
    %434 = vector.load %arg16[%c16_153, %c0_154] : memref<64x384xf32, #tpu.memory_space<vmem>>, vector<8x384xf32>
    %cst_155 = arith.constant dense<0.000000e+00> : vector<8x384xf32>
    %435 = tpu.matmul %433, %357, %cst_155 {dimension_numbers = #tpu.dot_dimension_numbers<[1], [0], [0], [1], [0, 0, 1, 1], [], []>} : vector<8x128xf32>, vector<128x384xf32>, vector<8x384xf32> -> vector<8x384xf32>
    %436 = vector.extract_strided_slice %434 {offsets = [0, 0], sizes = [8, 128], strides = [1, 1]} : vector<8x384xf32> to vector<8x128xf32>
    %437 = vector.extract_strided_slice %435 {offsets = [0, 0], sizes = [8, 128], strides = [1, 1]} : vector<8x384xf32> to vector<8x128xf32>
    %438 = arith.addf %436, %437 : vector<8x128xf32>
    %439 = arith.negf %438 : vector<8x128xf32>
    %440 = math.exp %439 : vector<8x128xf32>
    %cst_156 = arith.constant 1.000000e+00 : f32
    %441 = vector.broadcast %cst_156 : f32 to vector<8x128xf32>
    %442 = arith.addf %441, %440 : vector<8x128xf32>
    %443 = arith.divf %441, %442 : vector<8x128xf32>
    %444 = vector.extract_strided_slice %434 {offsets = [0, 128], sizes = [8, 128], strides = [1, 1]} : vector<8x384xf32> to vector<8x128xf32>
    %445 = vector.extract_strided_slice %435 {offsets = [0, 128], sizes = [8, 128], strides = [1, 1]} : vector<8x384xf32> to vector<8x128xf32>
    %446 = arith.addf %444, %445 : vector<8x128xf32>
    %447 = arith.negf %446 : vector<8x128xf32>
    %448 = math.exp %447 : vector<8x128xf32>
    %cst_157 = arith.constant 1.000000e+00 : f32
    %449 = vector.broadcast %cst_157 : f32 to vector<8x128xf32>
    %450 = arith.addf %449, %448 : vector<8x128xf32>
    %451 = arith.divf %449, %450 : vector<8x128xf32>
    %452 = vector.extract_strided_slice %434 {offsets = [0, 256], sizes = [8, 128], strides = [1, 1]} : vector<8x384xf32> to vector<8x128xf32>
    %453 = vector.extract_strided_slice %435 {offsets = [0, 256], sizes = [8, 128], strides = [1, 1]} : vector<8x384xf32> to vector<8x128xf32>
    %454 = vector.broadcast %358 : vector<1x128xf32> to vector<8x128xf32>
    %455 = arith.addf %453, %454 : vector<8x128xf32>
    %456 = arith.mulf %443, %455 : vector<8x128xf32>
    %457 = arith.addf %452, %456 : vector<8x128xf32>
    %458 = math.tanh %457 : vector<8x128xf32>
    %cst_158 = arith.constant 1.000000e+00 : f32
    %459 = vector.broadcast %cst_158 : f32 to vector<8x128xf32>
    %460 = arith.subf %459, %451 : vector<8x128xf32>
    %461 = arith.mulf %460, %458 : vector<8x128xf32>
    %462 = arith.mulf %451, %433 : vector<8x128xf32>
    %463 = arith.addf %461, %462 : vector<8x128xf32>
    %c2_i32_159 = arith.constant 2 : i32
    %464 = vector.broadcast %c2_i32_159 : i32 to vector<8x1xi32>
    %465 = arith.cmpi sgt, %0, %464 : vector<8x1xi32>
    %466 = vector.shape_cast %465 : vector<8x1xi1> to vector<8x1xi1>
    %467 = vector.broadcast %466 : vector<8x1xi1> to vector<8x128xi1>
    %468 = arith.select %467, %463, %433 : vector<8x128xi1>, vector<8x128xf32>
    %c0_160 = arith.constant 0 : index
    %c0_161 = arith.constant 0 : index
    %469 = vector.load %arg18[%c0_160, %c0_161] : memref<8x128xf32, #tpu.memory_space<vmem>>, vector<8x128xf32>
    tpu.vector_store %arg18[%c0_160, %c0_161], %468 {strides = array<i32>} : memref<8x128xf32, #tpu.memory_space<vmem>>, vector<8x128xf32>,
    %c0_162 = arith.constant 0 : index
    %c0_163 = arith.constant 0 : index
    %470 = vector.load %arg18[%c0_162, %c0_163] : memref<8x128xf32, #tpu.memory_space<vmem>>, vector<8x128xf32>
    %c24_164 = arith.constant 24 : index
    %c0_165 = arith.constant 0 : index
    %471 = vector.load %arg16[%c24_164, %c0_165] : memref<64x384xf32, #tpu.memory_space<vmem>>, vector<8x384xf32>
    %cst_166 = arith.constant dense<0.000000e+00> : vector<8x384xf32>
    %472 = tpu.matmul %470, %357, %cst_166 {dimension_numbers = #tpu.dot_dimension_numbers<[1], [0], [0], [1], [0, 0, 1, 1], [], []>} : vector<8x128xf32>, vector<128x384xf32>, vector<8x384xf32> -> vector<8x384xf32>
    %473 = vector.extract_strided_slice %471 {offsets = [0, 0], sizes = [8, 128], strides = [1, 1]} : vector<8x384xf32> to vector<8x128xf32>
    %474 = vector.extract_strided_slice %472 {offsets = [0, 0], sizes = [8, 128], strides = [1, 1]} : vector<8x384xf32> to vector<8x128xf32>
    %475 = arith.addf %473, %474 : vector<8x128xf32>
    %476 = arith.negf %475 : vector<8x128xf32>
    %477 = math.exp %476 : vector<8x128xf32>
    %cst_167 = arith.constant 1.000000e+00 : f32
    %478 = vector.broadcast %cst_167 : f32 to vector<8x128xf32>
    %479 = arith.addf %478, %477 : vector<8x128xf32>
    %480 = arith.divf %478, %479 : vector<8x128xf32>
    %481 = vector.extract_strided_slice %471 {offsets = [0, 128], sizes = [8, 128], strides = [1, 1]} : vector<8x384xf32> to vector<8x128xf32>
    %482 = vector.extract_strided_slice %472 {offsets = [0, 128], sizes = [8, 128], strides = [1, 1]} : vector<8x384xf32> to vector<8x128xf32>
    %483 = arith.addf %481, %482 : vector<8x128xf32>
    %484 = arith.negf %483 : vector<8x128xf32>
    %485 = math.exp %484 : vector<8x128xf32>
    %cst_168 = arith.constant 1.000000e+00 : f32
    %486 = vector.broadcast %cst_168 : f32 to vector<8x128xf32>
    %487 = arith.addf %486, %485 : vector<8x128xf32>
    %488 = arith.divf %486, %487 : vector<8x128xf32>
    %489 = vector.extract_strided_slice %471 {offsets = [0, 256], sizes = [8, 128], strides = [1, 1]} : vector<8x384xf32> to vector<8x128xf32>
    %490 = vector.extract_strided_slice %472 {offsets = [0, 256], sizes = [8, 128], strides = [1, 1]} : vector<8x384xf32> to vector<8x128xf32>
    %491 = vector.broadcast %358 : vector<1x128xf32> to vector<8x128xf32>
    %492 = arith.addf %490, %491 : vector<8x128xf32>
    %493 = arith.mulf %480, %492 : vector<8x128xf32>
    %494 = arith.addf %489, %493 : vector<8x128xf32>
    %495 = math.tanh %494 : vector<8x128xf32>
    %cst_169 = arith.constant 1.000000e+00 : f32
    %496 = vector.broadcast %cst_169 : f32 to vector<8x128xf32>
    %497 = arith.subf %496, %488 : vector<8x128xf32>
    %498 = arith.mulf %497, %495 : vector<8x128xf32>
    %499 = arith.mulf %488, %470 : vector<8x128xf32>
    %500 = arith.addf %498, %499 : vector<8x128xf32>
    %c3_i32_170 = arith.constant 3 : i32
    %501 = vector.broadcast %c3_i32_170 : i32 to vector<8x1xi32>
    %502 = arith.cmpi sgt, %0, %501 : vector<8x1xi32>
    %503 = vector.shape_cast %502 : vector<8x1xi1> to vector<8x1xi1>
    %504 = vector.broadcast %503 : vector<8x1xi1> to vector<8x128xi1>
    %505 = arith.select %504, %500, %470 : vector<8x128xi1>, vector<8x128xf32>
    %c0_171 = arith.constant 0 : index
    %c0_172 = arith.constant 0 : index
    %506 = vector.load %arg18[%c0_171, %c0_172] : memref<8x128xf32, #tpu.memory_space<vmem>>, vector<8x128xf32>
    tpu.vector_store %arg18[%c0_171, %c0_172], %505 {strides = array<i32>} : memref<8x128xf32, #tpu.memory_space<vmem>>, vector<8x128xf32>,
    %c0_173 = arith.constant 0 : index
    %c0_174 = arith.constant 0 : index
    %507 = vector.load %arg18[%c0_173, %c0_174] : memref<8x128xf32, #tpu.memory_space<vmem>>, vector<8x128xf32>
    %c32_175 = arith.constant 32 : index
    %c0_176 = arith.constant 0 : index
    %508 = vector.load %arg16[%c32_175, %c0_176] : memref<64x384xf32, #tpu.memory_space<vmem>>, vector<8x384xf32>
    %cst_177 = arith.constant dense<0.000000e+00> : vector<8x384xf32>
    %509 = tpu.matmul %507, %357, %cst_177 {dimension_numbers = #tpu.dot_dimension_numbers<[1], [0], [0], [1], [0, 0, 1, 1], [], []>} : vector<8x128xf32>, vector<128x384xf32>, vector<8x384xf32> -> vector<8x384xf32>
    %510 = vector.extract_strided_slice %508 {offsets = [0, 0], sizes = [8, 128], strides = [1, 1]} : vector<8x384xf32> to vector<8x128xf32>
    %511 = vector.extract_strided_slice %509 {offsets = [0, 0], sizes = [8, 128], strides = [1, 1]} : vector<8x384xf32> to vector<8x128xf32>
    %512 = arith.addf %510, %511 : vector<8x128xf32>
    %513 = arith.negf %512 : vector<8x128xf32>
    %514 = math.exp %513 : vector<8x128xf32>
    %cst_178 = arith.constant 1.000000e+00 : f32
    %515 = vector.broadcast %cst_178 : f32 to vector<8x128xf32>
    %516 = arith.addf %515, %514 : vector<8x128xf32>
    %517 = arith.divf %515, %516 : vector<8x128xf32>
    %518 = vector.extract_strided_slice %508 {offsets = [0, 128], sizes = [8, 128], strides = [1, 1]} : vector<8x384xf32> to vector<8x128xf32>
    %519 = vector.extract_strided_slice %509 {offsets = [0, 128], sizes = [8, 128], strides = [1, 1]} : vector<8x384xf32> to vector<8x128xf32>
    %520 = arith.addf %518, %519 : vector<8x128xf32>
    %521 = arith.negf %520 : vector<8x128xf32>
    %522 = math.exp %521 : vector<8x128xf32>
    %cst_179 = arith.constant 1.000000e+00 : f32
    %523 = vector.broadcast %cst_179 : f32 to vector<8x128xf32>
    %524 = arith.addf %523, %522 : vector<8x128xf32>
    %525 = arith.divf %523, %524 : vector<8x128xf32>
    %526 = vector.extract_strided_slice %508 {offsets = [0, 256], sizes = [8, 128], strides = [1, 1]} : vector<8x384xf32> to vector<8x128xf32>
    %527 = vector.extract_strided_slice %509 {offsets = [0, 256], sizes = [8, 128], strides = [1, 1]} : vector<8x384xf32> to vector<8x128xf32>
    %528 = vector.broadcast %358 : vector<1x128xf32> to vector<8x128xf32>
    %529 = arith.addf %527, %528 : vector<8x128xf32>
    %530 = arith.mulf %517, %529 : vector<8x128xf32>
    %531 = arith.addf %526, %530 : vector<8x128xf32>
    %532 = math.tanh %531 : vector<8x128xf32>
    %cst_180 = arith.constant 1.000000e+00 : f32
    %533 = vector.broadcast %cst_180 : f32 to vector<8x128xf32>
    %534 = arith.subf %533, %525 : vector<8x128xf32>
    %535 = arith.mulf %534, %532 : vector<8x128xf32>
    %536 = arith.mulf %525, %507 : vector<8x128xf32>
    %537 = arith.addf %535, %536 : vector<8x128xf32>
    %c4_i32_181 = arith.constant 4 : i32
    %538 = vector.broadcast %c4_i32_181 : i32 to vector<8x1xi32>
    %539 = arith.cmpi sgt, %0, %538 : vector<8x1xi32>
    %540 = vector.shape_cast %539 : vector<8x1xi1> to vector<8x1xi1>
    %541 = vector.broadcast %540 : vector<8x1xi1> to vector<8x128xi1>
    %542 = arith.select %541, %537, %507 : vector<8x128xi1>, vector<8x128xf32>
    %c0_182 = arith.constant 0 : index
    %c0_183 = arith.constant 0 : index
    %543 = vector.load %arg18[%c0_182, %c0_183] : memref<8x128xf32, #tpu.memory_space<vmem>>, vector<8x128xf32>
    tpu.vector_store %arg18[%c0_182, %c0_183], %542 {strides = array<i32>} : memref<8x128xf32, #tpu.memory_space<vmem>>, vector<8x128xf32>,
    %c0_184 = arith.constant 0 : index
    %c0_185 = arith.constant 0 : index
    %544 = vector.load %arg18[%c0_184, %c0_185] : memref<8x128xf32, #tpu.memory_space<vmem>>, vector<8x128xf32>
    %c40_186 = arith.constant 40 : index
    %c0_187 = arith.constant 0 : index
    %545 = vector.load %arg16[%c40_186, %c0_187] : memref<64x384xf32, #tpu.memory_space<vmem>>, vector<8x384xf32>
    %cst_188 = arith.constant dense<0.000000e+00> : vector<8x384xf32>
    %546 = tpu.matmul %544, %357, %cst_188 {dimension_numbers = #tpu.dot_dimension_numbers<[1], [0], [0], [1], [0, 0, 1, 1], [], []>} : vector<8x128xf32>, vector<128x384xf32>, vector<8x384xf32> -> vector<8x384xf32>
    %547 = vector.extract_strided_slice %545 {offsets = [0, 0], sizes = [8, 128], strides = [1, 1]} : vector<8x384xf32> to vector<8x128xf32>
    %548 = vector.extract_strided_slice %546 {offsets = [0, 0], sizes = [8, 128], strides = [1, 1]} : vector<8x384xf32> to vector<8x128xf32>
    %549 = arith.addf %547, %548 : vector<8x128xf32>
    %550 = arith.negf %549 : vector<8x128xf32>
    %551 = math.exp %550 : vector<8x128xf32>
    %cst_189 = arith.constant 1.000000e+00 : f32
    %552 = vector.broadcast %cst_189 : f32 to vector<8x128xf32>
    %553 = arith.addf %552, %551 : vector<8x128xf32>
    %554 = arith.divf %552, %553 : vector<8x128xf32>
    %555 = vector.extract_strided_slice %545 {offsets = [0, 128], sizes = [8, 128], strides = [1, 1]} : vector<8x384xf32> to vector<8x128xf32>
    %556 = vector.extract_strided_slice %546 {offsets = [0, 128], sizes = [8, 128], strides = [1, 1]} : vector<8x384xf32> to vector<8x128xf32>
    %557 = arith.addf %555, %556 : vector<8x128xf32>
    %558 = arith.negf %557 : vector<8x128xf32>
    %559 = math.exp %558 : vector<8x128xf32>
    %cst_190 = arith.constant 1.000000e+00 : f32
    %560 = vector.broadcast %cst_190 : f32 to vector<8x128xf32>
    %561 = arith.addf %560, %559 : vector<8x128xf32>
    %562 = arith.divf %560, %561 : vector<8x128xf32>
    %563 = vector.extract_strided_slice %545 {offsets = [0, 256], sizes = [8, 128], strides = [1, 1]} : vector<8x384xf32> to vector<8x128xf32>
    %564 = vector.extract_strided_slice %546 {offsets = [0, 256], sizes = [8, 128], strides = [1, 1]} : vector<8x384xf32> to vector<8x128xf32>
    %565 = vector.broadcast %358 : vector<1x128xf32> to vector<8x128xf32>
    %566 = arith.addf %564, %565 : vector<8x128xf32>
    %567 = arith.mulf %554, %566 : vector<8x128xf32>
    %568 = arith.addf %563, %567 : vector<8x128xf32>
    %569 = math.tanh %568 : vector<8x128xf32>
    %cst_191 = arith.constant 1.000000e+00 : f32
    %570 = vector.broadcast %cst_191 : f32 to vector<8x128xf32>
    %571 = arith.subf %570, %562 : vector<8x128xf32>
    %572 = arith.mulf %571, %569 : vector<8x128xf32>
    %573 = arith.mulf %562, %544 : vector<8x128xf32>
    %574 = arith.addf %572, %573 : vector<8x128xf32>
    %c5_i32_192 = arith.constant 5 : i32
    %575 = vector.broadcast %c5_i32_192 : i32 to vector<8x1xi32>
    %576 = arith.cmpi sgt, %0, %575 : vector<8x1xi32>
    %577 = vector.shape_cast %576 : vector<8x1xi1> to vector<8x1xi1>
    %578 = vector.broadcast %577 : vector<8x1xi1> to vector<8x128xi1>
    %579 = arith.select %578, %574, %544 : vector<8x128xi1>, vector<8x128xf32>
    %c0_193 = arith.constant 0 : index
    %c0_194 = arith.constant 0 : index
    %580 = vector.load %arg18[%c0_193, %c0_194] : memref<8x128xf32, #tpu.memory_space<vmem>>, vector<8x128xf32>
    tpu.vector_store %arg18[%c0_193, %c0_194], %579 {strides = array<i32>} : memref<8x128xf32, #tpu.memory_space<vmem>>, vector<8x128xf32>,
    %c0_195 = arith.constant 0 : index
    %c0_196 = arith.constant 0 : index
    %581 = vector.load %arg18[%c0_195, %c0_196] : memref<8x128xf32, #tpu.memory_space<vmem>>, vector<8x128xf32>
    %c48_197 = arith.constant 48 : index
    %c0_198 = arith.constant 0 : index
    %582 = vector.load %arg16[%c48_197, %c0_198] : memref<64x384xf32, #tpu.memory_space<vmem>>, vector<8x384xf32>
    %cst_199 = arith.constant dense<0.000000e+00> : vector<8x384xf32>
    %583 = tpu.matmul %581, %357, %cst_199 {dimension_numbers = #tpu.dot_dimension_numbers<[1], [0], [0], [1], [0, 0, 1, 1], [], []>} : vector<8x128xf32>, vector<128x384xf32>, vector<8x384xf32> -> vector<8x384xf32>
    %584 = vector.extract_strided_slice %582 {offsets = [0, 0], sizes = [8, 128], strides = [1, 1]} : vector<8x384xf32> to vector<8x128xf32>
    %585 = vector.extract_strided_slice %583 {offsets = [0, 0], sizes = [8, 128], strides = [1, 1]} : vector<8x384xf32> to vector<8x128xf32>
    %586 = arith.addf %584, %585 : vector<8x128xf32>
    %587 = arith.negf %586 : vector<8x128xf32>
    %588 = math.exp %587 : vector<8x128xf32>
    %cst_200 = arith.constant 1.000000e+00 : f32
    %589 = vector.broadcast %cst_200 : f32 to vector<8x128xf32>
    %590 = arith.addf %589, %588 : vector<8x128xf32>
    %591 = arith.divf %589, %590 : vector<8x128xf32>
    %592 = vector.extract_strided_slice %582 {offsets = [0, 128], sizes = [8, 128], strides = [1, 1]} : vector<8x384xf32> to vector<8x128xf32>
    %593 = vector.extract_strided_slice %583 {offsets = [0, 128], sizes = [8, 128], strides = [1, 1]} : vector<8x384xf32> to vector<8x128xf32>
    %594 = arith.addf %592, %593 : vector<8x128xf32>
    %595 = arith.negf %594 : vector<8x128xf32>
    %596 = math.exp %595 : vector<8x128xf32>
    %cst_201 = arith.constant 1.000000e+00 : f32
    %597 = vector.broadcast %cst_201 : f32 to vector<8x128xf32>
    %598 = arith.addf %597, %596 : vector<8x128xf32>
    %599 = arith.divf %597, %598 : vector<8x128xf32>
    %600 = vector.extract_strided_slice %582 {offsets = [0, 256], sizes = [8, 128], strides = [1, 1]} : vector<8x384xf32> to vector<8x128xf32>
    %601 = vector.extract_strided_slice %583 {offsets = [0, 256], sizes = [8, 128], strides = [1, 1]} : vector<8x384xf32> to vector<8x128xf32>
    %602 = vector.broadcast %358 : vector<1x128xf32> to vector<8x128xf32>
    %603 = arith.addf %601, %602 : vector<8x128xf32>
    %604 = arith.mulf %591, %603 : vector<8x128xf32>
    %605 = arith.addf %600, %604 : vector<8x128xf32>
    %606 = math.tanh %605 : vector<8x128xf32>
    %cst_202 = arith.constant 1.000000e+00 : f32
    %607 = vector.broadcast %cst_202 : f32 to vector<8x128xf32>
    %608 = arith.subf %607, %599 : vector<8x128xf32>
    %609 = arith.mulf %608, %606 : vector<8x128xf32>
    %610 = arith.mulf %599, %581 : vector<8x128xf32>
    %611 = arith.addf %609, %610 : vector<8x128xf32>
    %c6_i32_203 = arith.constant 6 : i32
    %612 = vector.broadcast %c6_i32_203 : i32 to vector<8x1xi32>
    %613 = arith.cmpi sgt, %0, %612 : vector<8x1xi32>
    %614 = vector.shape_cast %613 : vector<8x1xi1> to vector<8x1xi1>
    %615 = vector.broadcast %614 : vector<8x1xi1> to vector<8x128xi1>
    %616 = arith.select %615, %611, %581 : vector<8x128xi1>, vector<8x128xf32>
    %c0_204 = arith.constant 0 : index
    %c0_205 = arith.constant 0 : index
    %617 = vector.load %arg18[%c0_204, %c0_205] : memref<8x128xf32, #tpu.memory_space<vmem>>, vector<8x128xf32>
    tpu.vector_store %arg18[%c0_204, %c0_205], %616 {strides = array<i32>} : memref<8x128xf32, #tpu.memory_space<vmem>>, vector<8x128xf32>,
    %c0_206 = arith.constant 0 : index
    %c0_207 = arith.constant 0 : index
    %618 = vector.load %arg18[%c0_206, %c0_207] : memref<8x128xf32, #tpu.memory_space<vmem>>, vector<8x128xf32>
    %c56_208 = arith.constant 56 : index
    %c0_209 = arith.constant 0 : index
    %619 = vector.load %arg16[%c56_208, %c0_209] : memref<64x384xf32, #tpu.memory_space<vmem>>, vector<8x384xf32>
    %cst_210 = arith.constant dense<0.000000e+00> : vector<8x384xf32>
    %620 = tpu.matmul %618, %357, %cst_210 {dimension_numbers = #tpu.dot_dimension_numbers<[1], [0], [0], [1], [0, 0, 1, 1], [], []>} : vector<8x128xf32>, vector<128x384xf32>, vector<8x384xf32> -> vector<8x384xf32>
    %621 = vector.extract_strided_slice %619 {offsets = [0, 0], sizes = [8, 128], strides = [1, 1]} : vector<8x384xf32> to vector<8x128xf32>
    %622 = vector.extract_strided_slice %620 {offsets = [0, 0], sizes = [8, 128], strides = [1, 1]} : vector<8x384xf32> to vector<8x128xf32>
    %623 = arith.addf %621, %622 : vector<8x128xf32>
    %624 = arith.negf %623 : vector<8x128xf32>
    %625 = math.exp %624 : vector<8x128xf32>
    %cst_211 = arith.constant 1.000000e+00 : f32
    %626 = vector.broadcast %cst_211 : f32 to vector<8x128xf32>
    %627 = arith.addf %626, %625 : vector<8x128xf32>
    %628 = arith.divf %626, %627 : vector<8x128xf32>
    %629 = vector.extract_strided_slice %619 {offsets = [0, 128], sizes = [8, 128], strides = [1, 1]} : vector<8x384xf32> to vector<8x128xf32>
    %630 = vector.extract_strided_slice %620 {offsets = [0, 128], sizes = [8, 128], strides = [1, 1]} : vector<8x384xf32> to vector<8x128xf32>
    %631 = arith.addf %629, %630 : vector<8x128xf32>
    %632 = arith.negf %631 : vector<8x128xf32>
    %633 = math.exp %632 : vector<8x128xf32>
    %cst_212 = arith.constant 1.000000e+00 : f32
    %634 = vector.broadcast %cst_212 : f32 to vector<8x128xf32>
    %635 = arith.addf %634, %633 : vector<8x128xf32>
    %636 = arith.divf %634, %635 : vector<8x128xf32>
    %637 = vector.extract_strided_slice %619 {offsets = [0, 256], sizes = [8, 128], strides = [1, 1]} : vector<8x384xf32> to vector<8x128xf32>
    %638 = vector.extract_strided_slice %620 {offsets = [0, 256], sizes = [8, 128], strides = [1, 1]} : vector<8x384xf32> to vector<8x128xf32>
    %639 = vector.broadcast %358 : vector<1x128xf32> to vector<8x128xf32>
    %640 = arith.addf %638, %639 : vector<8x128xf32>
    %641 = arith.mulf %628, %640 : vector<8x128xf32>
    %642 = arith.addf %637, %641 : vector<8x128xf32>
    %643 = math.tanh %642 : vector<8x128xf32>
    %cst_213 = arith.constant 1.000000e+00 : f32
    %644 = vector.broadcast %cst_213 : f32 to vector<8x128xf32>
    %645 = arith.subf %644, %636 : vector<8x128xf32>
    %646 = arith.mulf %645, %643 : vector<8x128xf32>
    %647 = arith.mulf %636, %618 : vector<8x128xf32>
    %648 = arith.addf %646, %647 : vector<8x128xf32>
    %c7_i32_214 = arith.constant 7 : i32
    %649 = vector.broadcast %c7_i32_214 : i32 to vector<8x1xi32>
    %650 = arith.cmpi sgt, %0, %649 : vector<8x1xi32>
    %651 = vector.shape_cast %650 : vector<8x1xi1> to vector<8x1xi1>
    %652 = vector.broadcast %651 : vector<8x1xi1> to vector<8x128xi1>
    %653 = arith.select %652, %648, %618 : vector<8x128xi1>, vector<8x128xf32>
    %c0_215 = arith.constant 0 : index
    %c0_216 = arith.constant 0 : index
    %654 = vector.load %arg18[%c0_215, %c0_216] : memref<8x128xf32, #tpu.memory_space<vmem>>, vector<8x128xf32>
    tpu.vector_store %arg18[%c0_215, %c0_216], %653 {strides = array<i32>} : memref<8x128xf32, #tpu.memory_space<vmem>>, vector<8x128xf32>,
    %c0_217 = arith.constant 0 : index
    %c0_218 = arith.constant 0 : index
    %655 = vector.load %arg18[%c0_217, %c0_218] : memref<8x128xf32, #tpu.memory_space<vmem>>, vector<8x128xf32>
    %c0_219 = arith.constant 0 : index
    %c0_220 = arith.constant 0 : index
    %656 = vector.load %arg10[%c0_219, %c0_220] : memref<128x256xf32, #tpu.memory_space<vmem>>, vector<128x256xf32>
    %cst_221 = arith.constant dense<0.000000e+00> : vector<8x256xf32>
    %657 = tpu.matmul %655, %656, %cst_221 {dimension_numbers = #tpu.dot_dimension_numbers<[1], [0], [0], [1], [0, 0, 1, 1], [], []>} : vector<8x128xf32>, vector<128x256xf32>, vector<8x256xf32> -> vector<8x256xf32>
    %c0_222 = arith.constant 0 : index
    %c0_223 = arith.constant 0 : index
    %658 = vector.load %arg11[%c0_222, %c0_223] : memref<1x256xf32, #tpu.memory_space<vmem>>, vector<1x256xf32>
    %659 = vector.broadcast %658 : vector<1x256xf32> to vector<8x256xf32>
    %660 = arith.addf %657, %659 : vector<8x256xf32>
    %c0_224 = arith.constant 0 : index
    %c0_225 = arith.constant 0 : index
    %661 = vector.load %arg14[%c0_224, %c0_225] : memref<8x256xf32, #tpu.memory_space<vmem>>, vector<8x256xf32>
    tpu.vector_store %arg14[%c0_224, %c0_225], %660 {strides = array<i32>} : memref<8x256xf32, #tpu.memory_space<vmem>>, vector<8x256xf32>,
    %662 = vector.extract_strided_slice %660 {offsets = [0, 0], sizes = [8, 128], strides = [1, 1]} : vector<8x256xf32> to vector<8x128xf32>
    %c0_226 = arith.constant 0 : index
    %c0_227 = arith.constant 0 : index
    %663 = vector.load %arg12[%c0_226, %c0_227] : memref<128x128xf32, #tpu.memory_space<vmem>>, vector<128x128xf32>
    %cst_228 = arith.constant dense<0.000000e+00> : vector<8x128xf32>
    %664 = tpu.matmul %662, %663, %cst_228 {dimension_numbers = #tpu.dot_dimension_numbers<[1], [0], [0], [1], [0, 0, 1, 1], [], []>} : vector<8x128xf32>, vector<128x128xf32>, vector<8x128xf32> -> vector<8x128xf32>
    %c0_229 = arith.constant 0 : index
    %c0_230 = arith.constant 0 : index
    %665 = vector.load %arg13[%c0_229, %c0_230] : memref<1x128xf32, #tpu.memory_space<vmem>>, vector<1x128xf32>
    %666 = vector.broadcast %665 : vector<1x128xf32> to vector<8x128xf32>
    %667 = arith.addf %664, %666 : vector<8x128xf32>
    %c0_231 = arith.constant 0 : index
    %c0_232 = arith.constant 0 : index
    %668 = vector.load %arg15[%c0_231, %c0_232] : memref<8x128xf32, #tpu.memory_space<vmem>>, vector<8x128xf32>
    tpu.vector_store %arg15[%c0_231, %c0_232], %667 {strides = array<i32>} : memref<8x128xf32, #tpu.memory_space<vmem>>, vector<8x128xf32>,
    return
  }
}

module attributes {stable_mosaic.version = 11 : i64} {
  func.func @decoder_kernel(%arg0: memref<64x128xf32, #tpu.memory_space<vmem>>, %arg1: memref<8x128xf32, #tpu.memory_space<vmem>>, %arg2: memref<128x384xf32, #tpu.memory_space<vmem>>, %arg3: memref<128x384xf32, #tpu.memory_space<vmem>>, %arg4: memref<1x384xf32, #tpu.memory_space<vmem>>, %arg5: memref<1x128xf32, #tpu.memory_space<vmem>>, %arg6: memref<128x384xf32, #tpu.memory_space<vmem>>, %arg7: memref<128x384xf32, #tpu.memory_space<vmem>>, %arg8: memref<1x384xf32, #tpu.memory_space<vmem>>, %arg9: memref<1x128xf32, #tpu.memory_space<vmem>>, %arg10: memref<128x128xf32, #tpu.memory_space<vmem>>, %arg11: memref<1x128xf32, #tpu.memory_space<vmem>>, %arg12: memref<64x128xf32, #tpu.memory_space<vmem>>, %arg13: memref<64x384xf32, #tpu.memory_space<vmem>>, %arg14: memref<64x128xf32, #tpu.memory_space<vmem>>, %arg15: memref<8x128xf32, #tpu.memory_space<vmem>>) attributes {dimension_semantics = [], scalar_prefetch = 0 : i64, scratch_operands = 3 : i64, tpu.core_type = #tpu.core_type<tc>} {
    %c0 = arith.constant 0 : index
    %c0_0 = arith.constant 0 : index
    %0 = vector.load %arg0[%c0, %c0_0] : memref<64x128xf32, #tpu.memory_space<vmem>>, vector<64x128xf32>
    %c0_1 = arith.constant 0 : index
    %c0_2 = arith.constant 0 : index
    %1 = vector.load %arg2[%c0_1, %c0_2] : memref<128x384xf32, #tpu.memory_space<vmem>>, vector<128x384xf32>
    %cst = arith.constant dense<0.000000e+00> : vector<64x384xf32>
    %2 = tpu.matmul %0, %1, %cst {dimension_numbers = #tpu.dot_dimension_numbers<[1], [0], [0], [1], [0, 0, 1, 1], [], []>} : vector<64x128xf32>, vector<128x384xf32>, vector<64x384xf32> -> vector<64x384xf32>
    %c0_3 = arith.constant 0 : index
    %c0_4 = arith.constant 0 : index
    %3 = vector.load %arg4[%c0_3, %c0_4] : memref<1x384xf32, #tpu.memory_space<vmem>>, vector<1x384xf32>
    %4 = vector.broadcast %3 : vector<1x384xf32> to vector<64x384xf32>
    %5 = arith.addf %2, %4 : vector<64x384xf32>
    %c0_5 = arith.constant 0 : index
    %c0_6 = arith.constant 0 : index
    %6 = vector.load %arg13[%c0_5, %c0_6] : memref<64x384xf32, #tpu.memory_space<vmem>>, vector<64x384xf32>
    tpu.vector_store %arg13[%c0_5, %c0_6], %5 {strides = array<i32>} : memref<64x384xf32, #tpu.memory_space<vmem>>, vector<64x384xf32>,
    %c0_7 = arith.constant 0 : index
    %c0_8 = arith.constant 0 : index
    %7 = vector.load %arg1[%c0_7, %c0_8] : memref<8x128xf32, #tpu.memory_space<vmem>>, vector<8x128xf32>
    %c0_9 = arith.constant 0 : index
    %c0_10 = arith.constant 0 : index
    %8 = vector.load %arg15[%c0_9, %c0_10] : memref<8x128xf32, #tpu.memory_space<vmem>>, vector<8x128xf32>
    tpu.vector_store %arg15[%c0_9, %c0_10], %7 {strides = array<i32>} : memref<8x128xf32, #tpu.memory_space<vmem>>, vector<8x128xf32>,
    %c0_11 = arith.constant 0 : index
    %c0_12 = arith.constant 0 : index
    %9 = vector.load %arg3[%c0_11, %c0_12] : memref<128x384xf32, #tpu.memory_space<vmem>>, vector<128x384xf32>
    %c0_13 = arith.constant 0 : index
    %c0_14 = arith.constant 0 : index
    %10 = vector.load %arg5[%c0_13, %c0_14] : memref<1x128xf32, #tpu.memory_space<vmem>>, vector<1x128xf32>
    %c0_15 = arith.constant 0 : index
    %c0_16 = arith.constant 0 : index
    %11 = vector.load %arg15[%c0_15, %c0_16] : memref<8x128xf32, #tpu.memory_space<vmem>>, vector<8x128xf32>
    %c0_17 = arith.constant 0 : index
    %c0_18 = arith.constant 0 : index
    %12 = vector.load %arg13[%c0_17, %c0_18] : memref<64x384xf32, #tpu.memory_space<vmem>>, vector<8x384xf32>
    %cst_19 = arith.constant dense<0.000000e+00> : vector<8x384xf32>
    %13 = tpu.matmul %11, %9, %cst_19 {dimension_numbers = #tpu.dot_dimension_numbers<[1], [0], [0], [1], [0, 0, 1, 1], [], []>} : vector<8x128xf32>, vector<128x384xf32>, vector<8x384xf32> -> vector<8x384xf32>
    %14 = vector.extract_strided_slice %12 {offsets = [0, 0], sizes = [8, 128], strides = [1, 1]} : vector<8x384xf32> to vector<8x128xf32>
    %15 = vector.extract_strided_slice %13 {offsets = [0, 0], sizes = [8, 128], strides = [1, 1]} : vector<8x384xf32> to vector<8x128xf32>
    %16 = arith.addf %14, %15 : vector<8x128xf32>
    %17 = arith.negf %16 : vector<8x128xf32>
    %18 = math.exp %17 : vector<8x128xf32>
    %cst_20 = arith.constant 1.000000e+00 : f32
    %19 = vector.broadcast %cst_20 : f32 to vector<8x128xf32>
    %20 = arith.addf %19, %18 : vector<8x128xf32>
    %21 = arith.divf %19, %20 : vector<8x128xf32>
    %22 = vector.extract_strided_slice %12 {offsets = [0, 128], sizes = [8, 128], strides = [1, 1]} : vector<8x384xf32> to vector<8x128xf32>
    %23 = vector.extract_strided_slice %13 {offsets = [0, 128], sizes = [8, 128], strides = [1, 1]} : vector<8x384xf32> to vector<8x128xf32>
    %24 = arith.addf %22, %23 : vector<8x128xf32>
    %25 = arith.negf %24 : vector<8x128xf32>
    %26 = math.exp %25 : vector<8x128xf32>
    %cst_21 = arith.constant 1.000000e+00 : f32
    %27 = vector.broadcast %cst_21 : f32 to vector<8x128xf32>
    %28 = arith.addf %27, %26 : vector<8x128xf32>
    %29 = arith.divf %27, %28 : vector<8x128xf32>
    %30 = vector.extract_strided_slice %12 {offsets = [0, 256], sizes = [8, 128], strides = [1, 1]} : vector<8x384xf32> to vector<8x128xf32>
    %31 = vector.extract_strided_slice %13 {offsets = [0, 256], sizes = [8, 128], strides = [1, 1]} : vector<8x384xf32> to vector<8x128xf32>
    %32 = vector.broadcast %10 : vector<1x128xf32> to vector<8x128xf32>
    %33 = arith.addf %31, %32 : vector<8x128xf32>
    %34 = arith.mulf %21, %33 : vector<8x128xf32>
    %35 = arith.addf %30, %34 : vector<8x128xf32>
    %36 = math.tanh %35 : vector<8x128xf32>
    %cst_22 = arith.constant 1.000000e+00 : f32
    %37 = vector.broadcast %cst_22 : f32 to vector<8x128xf32>
    %38 = arith.subf %37, %29 : vector<8x128xf32>
    %39 = arith.mulf %38, %36 : vector<8x128xf32>
    %40 = arith.mulf %29, %11 : vector<8x128xf32>
    %41 = arith.addf %39, %40 : vector<8x128xf32>
    %c0_23 = arith.constant 0 : index
    %c0_24 = arith.constant 0 : index
    %42 = vector.load %arg15[%c0_23, %c0_24] : memref<8x128xf32, #tpu.memory_space<vmem>>, vector<8x128xf32>
    tpu.vector_store %arg15[%c0_23, %c0_24], %41 {strides = array<i32>} : memref<8x128xf32, #tpu.memory_space<vmem>>, vector<8x128xf32>,
    %c0_25 = arith.constant 0 : index
    %c0_26 = arith.constant 0 : index
    %43 = vector.load %arg14[%c0_25, %c0_26] : memref<64x128xf32, #tpu.memory_space<vmem>>, vector<8x128xf32>
    tpu.vector_store %arg14[%c0_25, %c0_26], %41 {strides = array<i32>} : memref<64x128xf32, #tpu.memory_space<vmem>>, vector<8x128xf32>,
    %c0_27 = arith.constant 0 : index
    %c0_28 = arith.constant 0 : index
    %44 = vector.load %arg15[%c0_27, %c0_28] : memref<8x128xf32, #tpu.memory_space<vmem>>, vector<8x128xf32>
    %c8 = arith.constant 8 : index
    %c0_29 = arith.constant 0 : index
    %45 = vector.load %arg13[%c8, %c0_29] : memref<64x384xf32, #tpu.memory_space<vmem>>, vector<8x384xf32>
    %cst_30 = arith.constant dense<0.000000e+00> : vector<8x384xf32>
    %46 = tpu.matmul %44, %9, %cst_30 {dimension_numbers = #tpu.dot_dimension_numbers<[1], [0], [0], [1], [0, 0, 1, 1], [], []>} : vector<8x128xf32>, vector<128x384xf32>, vector<8x384xf32> -> vector<8x384xf32>
    %47 = vector.extract_strided_slice %45 {offsets = [0, 0], sizes = [8, 128], strides = [1, 1]} : vector<8x384xf32> to vector<8x128xf32>
    %48 = vector.extract_strided_slice %46 {offsets = [0, 0], sizes = [8, 128], strides = [1, 1]} : vector<8x384xf32> to vector<8x128xf32>
    %49 = arith.addf %47, %48 : vector<8x128xf32>
    %50 = arith.negf %49 : vector<8x128xf32>
    %51 = math.exp %50 : vector<8x128xf32>
    %cst_31 = arith.constant 1.000000e+00 : f32
    %52 = vector.broadcast %cst_31 : f32 to vector<8x128xf32>
    %53 = arith.addf %52, %51 : vector<8x128xf32>
    %54 = arith.divf %52, %53 : vector<8x128xf32>
    %55 = vector.extract_strided_slice %45 {offsets = [0, 128], sizes = [8, 128], strides = [1, 1]} : vector<8x384xf32> to vector<8x128xf32>
    %56 = vector.extract_strided_slice %46 {offsets = [0, 128], sizes = [8, 128], strides = [1, 1]} : vector<8x384xf32> to vector<8x128xf32>
    %57 = arith.addf %55, %56 : vector<8x128xf32>
    %58 = arith.negf %57 : vector<8x128xf32>
    %59 = math.exp %58 : vector<8x128xf32>
    %cst_32 = arith.constant 1.000000e+00 : f32
    %60 = vector.broadcast %cst_32 : f32 to vector<8x128xf32>
    %61 = arith.addf %60, %59 : vector<8x128xf32>
    %62 = arith.divf %60, %61 : vector<8x128xf32>
    %63 = vector.extract_strided_slice %45 {offsets = [0, 256], sizes = [8, 128], strides = [1, 1]} : vector<8x384xf32> to vector<8x128xf32>
    %64 = vector.extract_strided_slice %46 {offsets = [0, 256], sizes = [8, 128], strides = [1, 1]} : vector<8x384xf32> to vector<8x128xf32>
    %65 = vector.broadcast %10 : vector<1x128xf32> to vector<8x128xf32>
    %66 = arith.addf %64, %65 : vector<8x128xf32>
    %67 = arith.mulf %54, %66 : vector<8x128xf32>
    %68 = arith.addf %63, %67 : vector<8x128xf32>
    %69 = math.tanh %68 : vector<8x128xf32>
    %cst_33 = arith.constant 1.000000e+00 : f32
    %70 = vector.broadcast %cst_33 : f32 to vector<8x128xf32>
    %71 = arith.subf %70, %62 : vector<8x128xf32>
    %72 = arith.mulf %71, %69 : vector<8x128xf32>
    %73 = arith.mulf %62, %44 : vector<8x128xf32>
    %74 = arith.addf %72, %73 : vector<8x128xf32>
    %c0_34 = arith.constant 0 : index
    %c0_35 = arith.constant 0 : index
    %75 = vector.load %arg15[%c0_34, %c0_35] : memref<8x128xf32, #tpu.memory_space<vmem>>, vector<8x128xf32>
    tpu.vector_store %arg15[%c0_34, %c0_35], %74 {strides = array<i32>} : memref<8x128xf32, #tpu.memory_space<vmem>>, vector<8x128xf32>,
    %c8_36 = arith.constant 8 : index
    %c0_37 = arith.constant 0 : index
    %76 = vector.load %arg14[%c8_36, %c0_37] : memref<64x128xf32, #tpu.memory_space<vmem>>, vector<8x128xf32>
    tpu.vector_store %arg14[%c8_36, %c0_37], %74 {strides = array<i32>} : memref<64x128xf32, #tpu.memory_space<vmem>>, vector<8x128xf32>,
    %c0_38 = arith.constant 0 : index
    %c0_39 = arith.constant 0 : index
    %77 = vector.load %arg15[%c0_38, %c0_39] : memref<8x128xf32, #tpu.memory_space<vmem>>, vector<8x128xf32>
    %c16 = arith.constant 16 : index
    %c0_40 = arith.constant 0 : index
    %78 = vector.load %arg13[%c16, %c0_40] : memref<64x384xf32, #tpu.memory_space<vmem>>, vector<8x384xf32>
    %cst_41 = arith.constant dense<0.000000e+00> : vector<8x384xf32>
    %79 = tpu.matmul %77, %9, %cst_41 {dimension_numbers = #tpu.dot_dimension_numbers<[1], [0], [0], [1], [0, 0, 1, 1], [], []>} : vector<8x128xf32>, vector<128x384xf32>, vector<8x384xf32> -> vector<8x384xf32>
    %80 = vector.extract_strided_slice %78 {offsets = [0, 0], sizes = [8, 128], strides = [1, 1]} : vector<8x384xf32> to vector<8x128xf32>
    %81 = vector.extract_strided_slice %79 {offsets = [0, 0], sizes = [8, 128], strides = [1, 1]} : vector<8x384xf32> to vector<8x128xf32>
    %82 = arith.addf %80, %81 : vector<8x128xf32>
    %83 = arith.negf %82 : vector<8x128xf32>
    %84 = math.exp %83 : vector<8x128xf32>
    %cst_42 = arith.constant 1.000000e+00 : f32
    %85 = vector.broadcast %cst_42 : f32 to vector<8x128xf32>
    %86 = arith.addf %85, %84 : vector<8x128xf32>
    %87 = arith.divf %85, %86 : vector<8x128xf32>
    %88 = vector.extract_strided_slice %78 {offsets = [0, 128], sizes = [8, 128], strides = [1, 1]} : vector<8x384xf32> to vector<8x128xf32>
    %89 = vector.extract_strided_slice %79 {offsets = [0, 128], sizes = [8, 128], strides = [1, 1]} : vector<8x384xf32> to vector<8x128xf32>
    %90 = arith.addf %88, %89 : vector<8x128xf32>
    %91 = arith.negf %90 : vector<8x128xf32>
    %92 = math.exp %91 : vector<8x128xf32>
    %cst_43 = arith.constant 1.000000e+00 : f32
    %93 = vector.broadcast %cst_43 : f32 to vector<8x128xf32>
    %94 = arith.addf %93, %92 : vector<8x128xf32>
    %95 = arith.divf %93, %94 : vector<8x128xf32>
    %96 = vector.extract_strided_slice %78 {offsets = [0, 256], sizes = [8, 128], strides = [1, 1]} : vector<8x384xf32> to vector<8x128xf32>
    %97 = vector.extract_strided_slice %79 {offsets = [0, 256], sizes = [8, 128], strides = [1, 1]} : vector<8x384xf32> to vector<8x128xf32>
    %98 = vector.broadcast %10 : vector<1x128xf32> to vector<8x128xf32>
    %99 = arith.addf %97, %98 : vector<8x128xf32>
    %100 = arith.mulf %87, %99 : vector<8x128xf32>
    %101 = arith.addf %96, %100 : vector<8x128xf32>
    %102 = math.tanh %101 : vector<8x128xf32>
    %cst_44 = arith.constant 1.000000e+00 : f32
    %103 = vector.broadcast %cst_44 : f32 to vector<8x128xf32>
    %104 = arith.subf %103, %95 : vector<8x128xf32>
    %105 = arith.mulf %104, %102 : vector<8x128xf32>
    %106 = arith.mulf %95, %77 : vector<8x128xf32>
    %107 = arith.addf %105, %106 : vector<8x128xf32>
    %c0_45 = arith.constant 0 : index
    %c0_46 = arith.constant 0 : index
    %108 = vector.load %arg15[%c0_45, %c0_46] : memref<8x128xf32, #tpu.memory_space<vmem>>, vector<8x128xf32>
    tpu.vector_store %arg15[%c0_45, %c0_46], %107 {strides = array<i32>} : memref<8x128xf32, #tpu.memory_space<vmem>>, vector<8x128xf32>,
    %c16_47 = arith.constant 16 : index
    %c0_48 = arith.constant 0 : index
    %109 = vector.load %arg14[%c16_47, %c0_48] : memref<64x128xf32, #tpu.memory_space<vmem>>, vector<8x128xf32>
    tpu.vector_store %arg14[%c16_47, %c0_48], %107 {strides = array<i32>} : memref<64x128xf32, #tpu.memory_space<vmem>>, vector<8x128xf32>,
    %c0_49 = arith.constant 0 : index
    %c0_50 = arith.constant 0 : index
    %110 = vector.load %arg15[%c0_49, %c0_50] : memref<8x128xf32, #tpu.memory_space<vmem>>, vector<8x128xf32>
    %c24 = arith.constant 24 : index
    %c0_51 = arith.constant 0 : index
    %111 = vector.load %arg13[%c24, %c0_51] : memref<64x384xf32, #tpu.memory_space<vmem>>, vector<8x384xf32>
    %cst_52 = arith.constant dense<0.000000e+00> : vector<8x384xf32>
    %112 = tpu.matmul %110, %9, %cst_52 {dimension_numbers = #tpu.dot_dimension_numbers<[1], [0], [0], [1], [0, 0, 1, 1], [], []>} : vector<8x128xf32>, vector<128x384xf32>, vector<8x384xf32> -> vector<8x384xf32>
    %113 = vector.extract_strided_slice %111 {offsets = [0, 0], sizes = [8, 128], strides = [1, 1]} : vector<8x384xf32> to vector<8x128xf32>
    %114 = vector.extract_strided_slice %112 {offsets = [0, 0], sizes = [8, 128], strides = [1, 1]} : vector<8x384xf32> to vector<8x128xf32>
    %115 = arith.addf %113, %114 : vector<8x128xf32>
    %116 = arith.negf %115 : vector<8x128xf32>
    %117 = math.exp %116 : vector<8x128xf32>
    %cst_53 = arith.constant 1.000000e+00 : f32
    %118 = vector.broadcast %cst_53 : f32 to vector<8x128xf32>
    %119 = arith.addf %118, %117 : vector<8x128xf32>
    %120 = arith.divf %118, %119 : vector<8x128xf32>
    %121 = vector.extract_strided_slice %111 {offsets = [0, 128], sizes = [8, 128], strides = [1, 1]} : vector<8x384xf32> to vector<8x128xf32>
    %122 = vector.extract_strided_slice %112 {offsets = [0, 128], sizes = [8, 128], strides = [1, 1]} : vector<8x384xf32> to vector<8x128xf32>
    %123 = arith.addf %121, %122 : vector<8x128xf32>
    %124 = arith.negf %123 : vector<8x128xf32>
    %125 = math.exp %124 : vector<8x128xf32>
    %cst_54 = arith.constant 1.000000e+00 : f32
    %126 = vector.broadcast %cst_54 : f32 to vector<8x128xf32>
    %127 = arith.addf %126, %125 : vector<8x128xf32>
    %128 = arith.divf %126, %127 : vector<8x128xf32>
    %129 = vector.extract_strided_slice %111 {offsets = [0, 256], sizes = [8, 128], strides = [1, 1]} : vector<8x384xf32> to vector<8x128xf32>
    %130 = vector.extract_strided_slice %112 {offsets = [0, 256], sizes = [8, 128], strides = [1, 1]} : vector<8x384xf32> to vector<8x128xf32>
    %131 = vector.broadcast %10 : vector<1x128xf32> to vector<8x128xf32>
    %132 = arith.addf %130, %131 : vector<8x128xf32>
    %133 = arith.mulf %120, %132 : vector<8x128xf32>
    %134 = arith.addf %129, %133 : vector<8x128xf32>
    %135 = math.tanh %134 : vector<8x128xf32>
    %cst_55 = arith.constant 1.000000e+00 : f32
    %136 = vector.broadcast %cst_55 : f32 to vector<8x128xf32>
    %137 = arith.subf %136, %128 : vector<8x128xf32>
    %138 = arith.mulf %137, %135 : vector<8x128xf32>
    %139 = arith.mulf %128, %110 : vector<8x128xf32>
    %140 = arith.addf %138, %139 : vector<8x128xf32>
    %c0_56 = arith.constant 0 : index
    %c0_57 = arith.constant 0 : index
    %141 = vector.load %arg15[%c0_56, %c0_57] : memref<8x128xf32, #tpu.memory_space<vmem>>, vector<8x128xf32>
    tpu.vector_store %arg15[%c0_56, %c0_57], %140 {strides = array<i32>} : memref<8x128xf32, #tpu.memory_space<vmem>>, vector<8x128xf32>,
    %c24_58 = arith.constant 24 : index
    %c0_59 = arith.constant 0 : index
    %142 = vector.load %arg14[%c24_58, %c0_59] : memref<64x128xf32, #tpu.memory_space<vmem>>, vector<8x128xf32>
    tpu.vector_store %arg14[%c24_58, %c0_59], %140 {strides = array<i32>} : memref<64x128xf32, #tpu.memory_space<vmem>>, vector<8x128xf32>,
    %c0_60 = arith.constant 0 : index
    %c0_61 = arith.constant 0 : index
    %143 = vector.load %arg15[%c0_60, %c0_61] : memref<8x128xf32, #tpu.memory_space<vmem>>, vector<8x128xf32>
    %c32 = arith.constant 32 : index
    %c0_62 = arith.constant 0 : index
    %144 = vector.load %arg13[%c32, %c0_62] : memref<64x384xf32, #tpu.memory_space<vmem>>, vector<8x384xf32>
    %cst_63 = arith.constant dense<0.000000e+00> : vector<8x384xf32>
    %145 = tpu.matmul %143, %9, %cst_63 {dimension_numbers = #tpu.dot_dimension_numbers<[1], [0], [0], [1], [0, 0, 1, 1], [], []>} : vector<8x128xf32>, vector<128x384xf32>, vector<8x384xf32> -> vector<8x384xf32>
    %146 = vector.extract_strided_slice %144 {offsets = [0, 0], sizes = [8, 128], strides = [1, 1]} : vector<8x384xf32> to vector<8x128xf32>
    %147 = vector.extract_strided_slice %145 {offsets = [0, 0], sizes = [8, 128], strides = [1, 1]} : vector<8x384xf32> to vector<8x128xf32>
    %148 = arith.addf %146, %147 : vector<8x128xf32>
    %149 = arith.negf %148 : vector<8x128xf32>
    %150 = math.exp %149 : vector<8x128xf32>
    %cst_64 = arith.constant 1.000000e+00 : f32
    %151 = vector.broadcast %cst_64 : f32 to vector<8x128xf32>
    %152 = arith.addf %151, %150 : vector<8x128xf32>
    %153 = arith.divf %151, %152 : vector<8x128xf32>
    %154 = vector.extract_strided_slice %144 {offsets = [0, 128], sizes = [8, 128], strides = [1, 1]} : vector<8x384xf32> to vector<8x128xf32>
    %155 = vector.extract_strided_slice %145 {offsets = [0, 128], sizes = [8, 128], strides = [1, 1]} : vector<8x384xf32> to vector<8x128xf32>
    %156 = arith.addf %154, %155 : vector<8x128xf32>
    %157 = arith.negf %156 : vector<8x128xf32>
    %158 = math.exp %157 : vector<8x128xf32>
    %cst_65 = arith.constant 1.000000e+00 : f32
    %159 = vector.broadcast %cst_65 : f32 to vector<8x128xf32>
    %160 = arith.addf %159, %158 : vector<8x128xf32>
    %161 = arith.divf %159, %160 : vector<8x128xf32>
    %162 = vector.extract_strided_slice %144 {offsets = [0, 256], sizes = [8, 128], strides = [1, 1]} : vector<8x384xf32> to vector<8x128xf32>
    %163 = vector.extract_strided_slice %145 {offsets = [0, 256], sizes = [8, 128], strides = [1, 1]} : vector<8x384xf32> to vector<8x128xf32>
    %164 = vector.broadcast %10 : vector<1x128xf32> to vector<8x128xf32>
    %165 = arith.addf %163, %164 : vector<8x128xf32>
    %166 = arith.mulf %153, %165 : vector<8x128xf32>
    %167 = arith.addf %162, %166 : vector<8x128xf32>
    %168 = math.tanh %167 : vector<8x128xf32>
    %cst_66 = arith.constant 1.000000e+00 : f32
    %169 = vector.broadcast %cst_66 : f32 to vector<8x128xf32>
    %170 = arith.subf %169, %161 : vector<8x128xf32>
    %171 = arith.mulf %170, %168 : vector<8x128xf32>
    %172 = arith.mulf %161, %143 : vector<8x128xf32>
    %173 = arith.addf %171, %172 : vector<8x128xf32>
    %c0_67 = arith.constant 0 : index
    %c0_68 = arith.constant 0 : index
    %174 = vector.load %arg15[%c0_67, %c0_68] : memref<8x128xf32, #tpu.memory_space<vmem>>, vector<8x128xf32>
    tpu.vector_store %arg15[%c0_67, %c0_68], %173 {strides = array<i32>} : memref<8x128xf32, #tpu.memory_space<vmem>>, vector<8x128xf32>,
    %c32_69 = arith.constant 32 : index
    %c0_70 = arith.constant 0 : index
    %175 = vector.load %arg14[%c32_69, %c0_70] : memref<64x128xf32, #tpu.memory_space<vmem>>, vector<8x128xf32>
    tpu.vector_store %arg14[%c32_69, %c0_70], %173 {strides = array<i32>} : memref<64x128xf32, #tpu.memory_space<vmem>>, vector<8x128xf32>,
    %c0_71 = arith.constant 0 : index
    %c0_72 = arith.constant 0 : index
    %176 = vector.load %arg15[%c0_71, %c0_72] : memref<8x128xf32, #tpu.memory_space<vmem>>, vector<8x128xf32>
    %c40 = arith.constant 40 : index
    %c0_73 = arith.constant 0 : index
    %177 = vector.load %arg13[%c40, %c0_73] : memref<64x384xf32, #tpu.memory_space<vmem>>, vector<8x384xf32>
    %cst_74 = arith.constant dense<0.000000e+00> : vector<8x384xf32>
    %178 = tpu.matmul %176, %9, %cst_74 {dimension_numbers = #tpu.dot_dimension_numbers<[1], [0], [0], [1], [0, 0, 1, 1], [], []>} : vector<8x128xf32>, vector<128x384xf32>, vector<8x384xf32> -> vector<8x384xf32>
    %179 = vector.extract_strided_slice %177 {offsets = [0, 0], sizes = [8, 128], strides = [1, 1]} : vector<8x384xf32> to vector<8x128xf32>
    %180 = vector.extract_strided_slice %178 {offsets = [0, 0], sizes = [8, 128], strides = [1, 1]} : vector<8x384xf32> to vector<8x128xf32>
    %181 = arith.addf %179, %180 : vector<8x128xf32>
    %182 = arith.negf %181 : vector<8x128xf32>
    %183 = math.exp %182 : vector<8x128xf32>
    %cst_75 = arith.constant 1.000000e+00 : f32
    %184 = vector.broadcast %cst_75 : f32 to vector<8x128xf32>
    %185 = arith.addf %184, %183 : vector<8x128xf32>
    %186 = arith.divf %184, %185 : vector<8x128xf32>
    %187 = vector.extract_strided_slice %177 {offsets = [0, 128], sizes = [8, 128], strides = [1, 1]} : vector<8x384xf32> to vector<8x128xf32>
    %188 = vector.extract_strided_slice %178 {offsets = [0, 128], sizes = [8, 128], strides = [1, 1]} : vector<8x384xf32> to vector<8x128xf32>
    %189 = arith.addf %187, %188 : vector<8x128xf32>
    %190 = arith.negf %189 : vector<8x128xf32>
    %191 = math.exp %190 : vector<8x128xf32>
    %cst_76 = arith.constant 1.000000e+00 : f32
    %192 = vector.broadcast %cst_76 : f32 to vector<8x128xf32>
    %193 = arith.addf %192, %191 : vector<8x128xf32>
    %194 = arith.divf %192, %193 : vector<8x128xf32>
    %195 = vector.extract_strided_slice %177 {offsets = [0, 256], sizes = [8, 128], strides = [1, 1]} : vector<8x384xf32> to vector<8x128xf32>
    %196 = vector.extract_strided_slice %178 {offsets = [0, 256], sizes = [8, 128], strides = [1, 1]} : vector<8x384xf32> to vector<8x128xf32>
    %197 = vector.broadcast %10 : vector<1x128xf32> to vector<8x128xf32>
    %198 = arith.addf %196, %197 : vector<8x128xf32>
    %199 = arith.mulf %186, %198 : vector<8x128xf32>
    %200 = arith.addf %195, %199 : vector<8x128xf32>
    %201 = math.tanh %200 : vector<8x128xf32>
    %cst_77 = arith.constant 1.000000e+00 : f32
    %202 = vector.broadcast %cst_77 : f32 to vector<8x128xf32>
    %203 = arith.subf %202, %194 : vector<8x128xf32>
    %204 = arith.mulf %203, %201 : vector<8x128xf32>
    %205 = arith.mulf %194, %176 : vector<8x128xf32>
    %206 = arith.addf %204, %205 : vector<8x128xf32>
    %c0_78 = arith.constant 0 : index
    %c0_79 = arith.constant 0 : index
    %207 = vector.load %arg15[%c0_78, %c0_79] : memref<8x128xf32, #tpu.memory_space<vmem>>, vector<8x128xf32>
    tpu.vector_store %arg15[%c0_78, %c0_79], %206 {strides = array<i32>} : memref<8x128xf32, #tpu.memory_space<vmem>>, vector<8x128xf32>,
    %c40_80 = arith.constant 40 : index
    %c0_81 = arith.constant 0 : index
    %208 = vector.load %arg14[%c40_80, %c0_81] : memref<64x128xf32, #tpu.memory_space<vmem>>, vector<8x128xf32>
    tpu.vector_store %arg14[%c40_80, %c0_81], %206 {strides = array<i32>} : memref<64x128xf32, #tpu.memory_space<vmem>>, vector<8x128xf32>,
    %c0_82 = arith.constant 0 : index
    %c0_83 = arith.constant 0 : index
    %209 = vector.load %arg15[%c0_82, %c0_83] : memref<8x128xf32, #tpu.memory_space<vmem>>, vector<8x128xf32>
    %c48 = arith.constant 48 : index
    %c0_84 = arith.constant 0 : index
    %210 = vector.load %arg13[%c48, %c0_84] : memref<64x384xf32, #tpu.memory_space<vmem>>, vector<8x384xf32>
    %cst_85 = arith.constant dense<0.000000e+00> : vector<8x384xf32>
    %211 = tpu.matmul %209, %9, %cst_85 {dimension_numbers = #tpu.dot_dimension_numbers<[1], [0], [0], [1], [0, 0, 1, 1], [], []>} : vector<8x128xf32>, vector<128x384xf32>, vector<8x384xf32> -> vector<8x384xf32>
    %212 = vector.extract_strided_slice %210 {offsets = [0, 0], sizes = [8, 128], strides = [1, 1]} : vector<8x384xf32> to vector<8x128xf32>
    %213 = vector.extract_strided_slice %211 {offsets = [0, 0], sizes = [8, 128], strides = [1, 1]} : vector<8x384xf32> to vector<8x128xf32>
    %214 = arith.addf %212, %213 : vector<8x128xf32>
    %215 = arith.negf %214 : vector<8x128xf32>
    %216 = math.exp %215 : vector<8x128xf32>
    %cst_86 = arith.constant 1.000000e+00 : f32
    %217 = vector.broadcast %cst_86 : f32 to vector<8x128xf32>
    %218 = arith.addf %217, %216 : vector<8x128xf32>
    %219 = arith.divf %217, %218 : vector<8x128xf32>
    %220 = vector.extract_strided_slice %210 {offsets = [0, 128], sizes = [8, 128], strides = [1, 1]} : vector<8x384xf32> to vector<8x128xf32>
    %221 = vector.extract_strided_slice %211 {offsets = [0, 128], sizes = [8, 128], strides = [1, 1]} : vector<8x384xf32> to vector<8x128xf32>
    %222 = arith.addf %220, %221 : vector<8x128xf32>
    %223 = arith.negf %222 : vector<8x128xf32>
    %224 = math.exp %223 : vector<8x128xf32>
    %cst_87 = arith.constant 1.000000e+00 : f32
    %225 = vector.broadcast %cst_87 : f32 to vector<8x128xf32>
    %226 = arith.addf %225, %224 : vector<8x128xf32>
    %227 = arith.divf %225, %226 : vector<8x128xf32>
    %228 = vector.extract_strided_slice %210 {offsets = [0, 256], sizes = [8, 128], strides = [1, 1]} : vector<8x384xf32> to vector<8x128xf32>
    %229 = vector.extract_strided_slice %211 {offsets = [0, 256], sizes = [8, 128], strides = [1, 1]} : vector<8x384xf32> to vector<8x128xf32>
    %230 = vector.broadcast %10 : vector<1x128xf32> to vector<8x128xf32>
    %231 = arith.addf %229, %230 : vector<8x128xf32>
    %232 = arith.mulf %219, %231 : vector<8x128xf32>
    %233 = arith.addf %228, %232 : vector<8x128xf32>
    %234 = math.tanh %233 : vector<8x128xf32>
    %cst_88 = arith.constant 1.000000e+00 : f32
    %235 = vector.broadcast %cst_88 : f32 to vector<8x128xf32>
    %236 = arith.subf %235, %227 : vector<8x128xf32>
    %237 = arith.mulf %236, %234 : vector<8x128xf32>
    %238 = arith.mulf %227, %209 : vector<8x128xf32>
    %239 = arith.addf %237, %238 : vector<8x128xf32>
    %c0_89 = arith.constant 0 : index
    %c0_90 = arith.constant 0 : index
    %240 = vector.load %arg15[%c0_89, %c0_90] : memref<8x128xf32, #tpu.memory_space<vmem>>, vector<8x128xf32>
    tpu.vector_store %arg15[%c0_89, %c0_90], %239 {strides = array<i32>} : memref<8x128xf32, #tpu.memory_space<vmem>>, vector<8x128xf32>,
    %c48_91 = arith.constant 48 : index
    %c0_92 = arith.constant 0 : index
    %241 = vector.load %arg14[%c48_91, %c0_92] : memref<64x128xf32, #tpu.memory_space<vmem>>, vector<8x128xf32>
    tpu.vector_store %arg14[%c48_91, %c0_92], %239 {strides = array<i32>} : memref<64x128xf32, #tpu.memory_space<vmem>>, vector<8x128xf32>,
    %c0_93 = arith.constant 0 : index
    %c0_94 = arith.constant 0 : index
    %242 = vector.load %arg15[%c0_93, %c0_94] : memref<8x128xf32, #tpu.memory_space<vmem>>, vector<8x128xf32>
    %c56 = arith.constant 56 : index
    %c0_95 = arith.constant 0 : index
    %243 = vector.load %arg13[%c56, %c0_95] : memref<64x384xf32, #tpu.memory_space<vmem>>, vector<8x384xf32>
    %cst_96 = arith.constant dense<0.000000e+00> : vector<8x384xf32>
    %244 = tpu.matmul %242, %9, %cst_96 {dimension_numbers = #tpu.dot_dimension_numbers<[1], [0], [0], [1], [0, 0, 1, 1], [], []>} : vector<8x128xf32>, vector<128x384xf32>, vector<8x384xf32> -> vector<8x384xf32>
    %245 = vector.extract_strided_slice %243 {offsets = [0, 0], sizes = [8, 128], strides = [1, 1]} : vector<8x384xf32> to vector<8x128xf32>
    %246 = vector.extract_strided_slice %244 {offsets = [0, 0], sizes = [8, 128], strides = [1, 1]} : vector<8x384xf32> to vector<8x128xf32>
    %247 = arith.addf %245, %246 : vector<8x128xf32>
    %248 = arith.negf %247 : vector<8x128xf32>
    %249 = math.exp %248 : vector<8x128xf32>
    %cst_97 = arith.constant 1.000000e+00 : f32
    %250 = vector.broadcast %cst_97 : f32 to vector<8x128xf32>
    %251 = arith.addf %250, %249 : vector<8x128xf32>
    %252 = arith.divf %250, %251 : vector<8x128xf32>
    %253 = vector.extract_strided_slice %243 {offsets = [0, 128], sizes = [8, 128], strides = [1, 1]} : vector<8x384xf32> to vector<8x128xf32>
    %254 = vector.extract_strided_slice %244 {offsets = [0, 128], sizes = [8, 128], strides = [1, 1]} : vector<8x384xf32> to vector<8x128xf32>
    %255 = arith.addf %253, %254 : vector<8x128xf32>
    %256 = arith.negf %255 : vector<8x128xf32>
    %257 = math.exp %256 : vector<8x128xf32>
    %cst_98 = arith.constant 1.000000e+00 : f32
    %258 = vector.broadcast %cst_98 : f32 to vector<8x128xf32>
    %259 = arith.addf %258, %257 : vector<8x128xf32>
    %260 = arith.divf %258, %259 : vector<8x128xf32>
    %261 = vector.extract_strided_slice %243 {offsets = [0, 256], sizes = [8, 128], strides = [1, 1]} : vector<8x384xf32> to vector<8x128xf32>
    %262 = vector.extract_strided_slice %244 {offsets = [0, 256], sizes = [8, 128], strides = [1, 1]} : vector<8x384xf32> to vector<8x128xf32>
    %263 = vector.broadcast %10 : vector<1x128xf32> to vector<8x128xf32>
    %264 = arith.addf %262, %263 : vector<8x128xf32>
    %265 = arith.mulf %252, %264 : vector<8x128xf32>
    %266 = arith.addf %261, %265 : vector<8x128xf32>
    %267 = math.tanh %266 : vector<8x128xf32>
    %cst_99 = arith.constant 1.000000e+00 : f32
    %268 = vector.broadcast %cst_99 : f32 to vector<8x128xf32>
    %269 = arith.subf %268, %260 : vector<8x128xf32>
    %270 = arith.mulf %269, %267 : vector<8x128xf32>
    %271 = arith.mulf %260, %242 : vector<8x128xf32>
    %272 = arith.addf %270, %271 : vector<8x128xf32>
    %c0_100 = arith.constant 0 : index
    %c0_101 = arith.constant 0 : index
    %273 = vector.load %arg15[%c0_100, %c0_101] : memref<8x128xf32, #tpu.memory_space<vmem>>, vector<8x128xf32>
    tpu.vector_store %arg15[%c0_100, %c0_101], %272 {strides = array<i32>} : memref<8x128xf32, #tpu.memory_space<vmem>>, vector<8x128xf32>,
    %c56_102 = arith.constant 56 : index
    %c0_103 = arith.constant 0 : index
    %274 = vector.load %arg14[%c56_102, %c0_103] : memref<64x128xf32, #tpu.memory_space<vmem>>, vector<8x128xf32>
    tpu.vector_store %arg14[%c56_102, %c0_103], %272 {strides = array<i32>} : memref<64x128xf32, #tpu.memory_space<vmem>>, vector<8x128xf32>,
    %c0_104 = arith.constant 0 : index
    %c0_105 = arith.constant 0 : index
    %275 = vector.load %arg14[%c0_104, %c0_105] : memref<64x128xf32, #tpu.memory_space<vmem>>, vector<64x128xf32>
    %c0_106 = arith.constant 0 : index
    %c0_107 = arith.constant 0 : index
    %276 = vector.load %arg6[%c0_106, %c0_107] : memref<128x384xf32, #tpu.memory_space<vmem>>, vector<128x384xf32>
    %cst_108 = arith.constant dense<0.000000e+00> : vector<64x384xf32>
    %277 = tpu.matmul %275, %276, %cst_108 {dimension_numbers = #tpu.dot_dimension_numbers<[1], [0], [0], [1], [0, 0, 1, 1], [], []>} : vector<64x128xf32>, vector<128x384xf32>, vector<64x384xf32> -> vector<64x384xf32>
    %c0_109 = arith.constant 0 : index
    %c0_110 = arith.constant 0 : index
    %278 = vector.load %arg8[%c0_109, %c0_110] : memref<1x384xf32, #tpu.memory_space<vmem>>, vector<1x384xf32>
    %279 = vector.broadcast %278 : vector<1x384xf32> to vector<64x384xf32>
    %280 = arith.addf %277, %279 : vector<64x384xf32>
    %c0_111 = arith.constant 0 : index
    %c0_112 = arith.constant 0 : index
    %281 = vector.load %arg13[%c0_111, %c0_112] : memref<64x384xf32, #tpu.memory_space<vmem>>, vector<64x384xf32>
    tpu.vector_store %arg13[%c0_111, %c0_112], %280 {strides = array<i32>} : memref<64x384xf32, #tpu.memory_space<vmem>>, vector<64x384xf32>,
    %c0_113 = arith.constant 0 : index
    %c0_114 = arith.constant 0 : index
    %282 = vector.load %arg1[%c0_113, %c0_114] : memref<8x128xf32, #tpu.memory_space<vmem>>, vector<8x128xf32>
    %c0_115 = arith.constant 0 : index
    %c0_116 = arith.constant 0 : index
    %283 = vector.load %arg15[%c0_115, %c0_116] : memref<8x128xf32, #tpu.memory_space<vmem>>, vector<8x128xf32>
    tpu.vector_store %arg15[%c0_115, %c0_116], %282 {strides = array<i32>} : memref<8x128xf32, #tpu.memory_space<vmem>>, vector<8x128xf32>,
    %c0_117 = arith.constant 0 : index
    %c0_118 = arith.constant 0 : index
    %284 = vector.load %arg7[%c0_117, %c0_118] : memref<128x384xf32, #tpu.memory_space<vmem>>, vector<128x384xf32>
    %c0_119 = arith.constant 0 : index
    %c0_120 = arith.constant 0 : index
    %285 = vector.load %arg9[%c0_119, %c0_120] : memref<1x128xf32, #tpu.memory_space<vmem>>, vector<1x128xf32>
    %c0_121 = arith.constant 0 : index
    %c0_122 = arith.constant 0 : index
    %286 = vector.load %arg15[%c0_121, %c0_122] : memref<8x128xf32, #tpu.memory_space<vmem>>, vector<8x128xf32>
    %c0_123 = arith.constant 0 : index
    %c0_124 = arith.constant 0 : index
    %287 = vector.load %arg13[%c0_123, %c0_124] : memref<64x384xf32, #tpu.memory_space<vmem>>, vector<8x384xf32>
    %cst_125 = arith.constant dense<0.000000e+00> : vector<8x384xf32>
    %288 = tpu.matmul %286, %284, %cst_125 {dimension_numbers = #tpu.dot_dimension_numbers<[1], [0], [0], [1], [0, 0, 1, 1], [], []>} : vector<8x128xf32>, vector<128x384xf32>, vector<8x384xf32> -> vector<8x384xf32>
    %289 = vector.extract_strided_slice %287 {offsets = [0, 0], sizes = [8, 128], strides = [1, 1]} : vector<8x384xf32> to vector<8x128xf32>
    %290 = vector.extract_strided_slice %288 {offsets = [0, 0], sizes = [8, 128], strides = [1, 1]} : vector<8x384xf32> to vector<8x128xf32>
    %291 = arith.addf %289, %290 : vector<8x128xf32>
    %292 = arith.negf %291 : vector<8x128xf32>
    %293 = math.exp %292 : vector<8x128xf32>
    %cst_126 = arith.constant 1.000000e+00 : f32
    %294 = vector.broadcast %cst_126 : f32 to vector<8x128xf32>
    %295 = arith.addf %294, %293 : vector<8x128xf32>
    %296 = arith.divf %294, %295 : vector<8x128xf32>
    %297 = vector.extract_strided_slice %287 {offsets = [0, 128], sizes = [8, 128], strides = [1, 1]} : vector<8x384xf32> to vector<8x128xf32>
    %298 = vector.extract_strided_slice %288 {offsets = [0, 128], sizes = [8, 128], strides = [1, 1]} : vector<8x384xf32> to vector<8x128xf32>
    %299 = arith.addf %297, %298 : vector<8x128xf32>
    %300 = arith.negf %299 : vector<8x128xf32>
    %301 = math.exp %300 : vector<8x128xf32>
    %cst_127 = arith.constant 1.000000e+00 : f32
    %302 = vector.broadcast %cst_127 : f32 to vector<8x128xf32>
    %303 = arith.addf %302, %301 : vector<8x128xf32>
    %304 = arith.divf %302, %303 : vector<8x128xf32>
    %305 = vector.extract_strided_slice %287 {offsets = [0, 256], sizes = [8, 128], strides = [1, 1]} : vector<8x384xf32> to vector<8x128xf32>
    %306 = vector.extract_strided_slice %288 {offsets = [0, 256], sizes = [8, 128], strides = [1, 1]} : vector<8x384xf32> to vector<8x128xf32>
    %307 = vector.broadcast %285 : vector<1x128xf32> to vector<8x128xf32>
    %308 = arith.addf %306, %307 : vector<8x128xf32>
    %309 = arith.mulf %296, %308 : vector<8x128xf32>
    %310 = arith.addf %305, %309 : vector<8x128xf32>
    %311 = math.tanh %310 : vector<8x128xf32>
    %cst_128 = arith.constant 1.000000e+00 : f32
    %312 = vector.broadcast %cst_128 : f32 to vector<8x128xf32>
    %313 = arith.subf %312, %304 : vector<8x128xf32>
    %314 = arith.mulf %313, %311 : vector<8x128xf32>
    %315 = arith.mulf %304, %286 : vector<8x128xf32>
    %316 = arith.addf %314, %315 : vector<8x128xf32>
    %c0_129 = arith.constant 0 : index
    %c0_130 = arith.constant 0 : index
    %317 = vector.load %arg15[%c0_129, %c0_130] : memref<8x128xf32, #tpu.memory_space<vmem>>, vector<8x128xf32>
    tpu.vector_store %arg15[%c0_129, %c0_130], %316 {strides = array<i32>} : memref<8x128xf32, #tpu.memory_space<vmem>>, vector<8x128xf32>,
    %c0_131 = arith.constant 0 : index
    %c0_132 = arith.constant 0 : index
    %318 = vector.load %arg14[%c0_131, %c0_132] : memref<64x128xf32, #tpu.memory_space<vmem>>, vector<8x128xf32>
    tpu.vector_store %arg14[%c0_131, %c0_132], %316 {strides = array<i32>} : memref<64x128xf32, #tpu.memory_space<vmem>>, vector<8x128xf32>,
    %c0_133 = arith.constant 0 : index
    %c0_134 = arith.constant 0 : index
    %319 = vector.load %arg15[%c0_133, %c0_134] : memref<8x128xf32, #tpu.memory_space<vmem>>, vector<8x128xf32>
    %c8_135 = arith.constant 8 : index
    %c0_136 = arith.constant 0 : index
    %320 = vector.load %arg13[%c8_135, %c0_136] : memref<64x384xf32, #tpu.memory_space<vmem>>, vector<8x384xf32>
    %cst_137 = arith.constant dense<0.000000e+00> : vector<8x384xf32>
    %321 = tpu.matmul %319, %284, %cst_137 {dimension_numbers = #tpu.dot_dimension_numbers<[1], [0], [0], [1], [0, 0, 1, 1], [], []>} : vector<8x128xf32>, vector<128x384xf32>, vector<8x384xf32> -> vector<8x384xf32>
    %322 = vector.extract_strided_slice %320 {offsets = [0, 0], sizes = [8, 128], strides = [1, 1]} : vector<8x384xf32> to vector<8x128xf32>
    %323 = vector.extract_strided_slice %321 {offsets = [0, 0], sizes = [8, 128], strides = [1, 1]} : vector<8x384xf32> to vector<8x128xf32>
    %324 = arith.addf %322, %323 : vector<8x128xf32>
    %325 = arith.negf %324 : vector<8x128xf32>
    %326 = math.exp %325 : vector<8x128xf32>
    %cst_138 = arith.constant 1.000000e+00 : f32
    %327 = vector.broadcast %cst_138 : f32 to vector<8x128xf32>
    %328 = arith.addf %327, %326 : vector<8x128xf32>
    %329 = arith.divf %327, %328 : vector<8x128xf32>
    %330 = vector.extract_strided_slice %320 {offsets = [0, 128], sizes = [8, 128], strides = [1, 1]} : vector<8x384xf32> to vector<8x128xf32>
    %331 = vector.extract_strided_slice %321 {offsets = [0, 128], sizes = [8, 128], strides = [1, 1]} : vector<8x384xf32> to vector<8x128xf32>
    %332 = arith.addf %330, %331 : vector<8x128xf32>
    %333 = arith.negf %332 : vector<8x128xf32>
    %334 = math.exp %333 : vector<8x128xf32>
    %cst_139 = arith.constant 1.000000e+00 : f32
    %335 = vector.broadcast %cst_139 : f32 to vector<8x128xf32>
    %336 = arith.addf %335, %334 : vector<8x128xf32>
    %337 = arith.divf %335, %336 : vector<8x128xf32>
    %338 = vector.extract_strided_slice %320 {offsets = [0, 256], sizes = [8, 128], strides = [1, 1]} : vector<8x384xf32> to vector<8x128xf32>
    %339 = vector.extract_strided_slice %321 {offsets = [0, 256], sizes = [8, 128], strides = [1, 1]} : vector<8x384xf32> to vector<8x128xf32>
    %340 = vector.broadcast %285 : vector<1x128xf32> to vector<8x128xf32>
    %341 = arith.addf %339, %340 : vector<8x128xf32>
    %342 = arith.mulf %329, %341 : vector<8x128xf32>
    %343 = arith.addf %338, %342 : vector<8x128xf32>
    %344 = math.tanh %343 : vector<8x128xf32>
    %cst_140 = arith.constant 1.000000e+00 : f32
    %345 = vector.broadcast %cst_140 : f32 to vector<8x128xf32>
    %346 = arith.subf %345, %337 : vector<8x128xf32>
    %347 = arith.mulf %346, %344 : vector<8x128xf32>
    %348 = arith.mulf %337, %319 : vector<8x128xf32>
    %349 = arith.addf %347, %348 : vector<8x128xf32>
    %c0_141 = arith.constant 0 : index
    %c0_142 = arith.constant 0 : index
    %350 = vector.load %arg15[%c0_141, %c0_142] : memref<8x128xf32, #tpu.memory_space<vmem>>, vector<8x128xf32>
    tpu.vector_store %arg15[%c0_141, %c0_142], %349 {strides = array<i32>} : memref<8x128xf32, #tpu.memory_space<vmem>>, vector<8x128xf32>,
    %c8_143 = arith.constant 8 : index
    %c0_144 = arith.constant 0 : index
    %351 = vector.load %arg14[%c8_143, %c0_144] : memref<64x128xf32, #tpu.memory_space<vmem>>, vector<8x128xf32>
    tpu.vector_store %arg14[%c8_143, %c0_144], %349 {strides = array<i32>} : memref<64x128xf32, #tpu.memory_space<vmem>>, vector<8x128xf32>,
    %c0_145 = arith.constant 0 : index
    %c0_146 = arith.constant 0 : index
    %352 = vector.load %arg15[%c0_145, %c0_146] : memref<8x128xf32, #tpu.memory_space<vmem>>, vector<8x128xf32>
    %c16_147 = arith.constant 16 : index
    %c0_148 = arith.constant 0 : index
    %353 = vector.load %arg13[%c16_147, %c0_148] : memref<64x384xf32, #tpu.memory_space<vmem>>, vector<8x384xf32>
    %cst_149 = arith.constant dense<0.000000e+00> : vector<8x384xf32>
    %354 = tpu.matmul %352, %284, %cst_149 {dimension_numbers = #tpu.dot_dimension_numbers<[1], [0], [0], [1], [0, 0, 1, 1], [], []>} : vector<8x128xf32>, vector<128x384xf32>, vector<8x384xf32> -> vector<8x384xf32>
    %355 = vector.extract_strided_slice %353 {offsets = [0, 0], sizes = [8, 128], strides = [1, 1]} : vector<8x384xf32> to vector<8x128xf32>
    %356 = vector.extract_strided_slice %354 {offsets = [0, 0], sizes = [8, 128], strides = [1, 1]} : vector<8x384xf32> to vector<8x128xf32>
    %357 = arith.addf %355, %356 : vector<8x128xf32>
    %358 = arith.negf %357 : vector<8x128xf32>
    %359 = math.exp %358 : vector<8x128xf32>
    %cst_150 = arith.constant 1.000000e+00 : f32
    %360 = vector.broadcast %cst_150 : f32 to vector<8x128xf32>
    %361 = arith.addf %360, %359 : vector<8x128xf32>
    %362 = arith.divf %360, %361 : vector<8x128xf32>
    %363 = vector.extract_strided_slice %353 {offsets = [0, 128], sizes = [8, 128], strides = [1, 1]} : vector<8x384xf32> to vector<8x128xf32>
    %364 = vector.extract_strided_slice %354 {offsets = [0, 128], sizes = [8, 128], strides = [1, 1]} : vector<8x384xf32> to vector<8x128xf32>
    %365 = arith.addf %363, %364 : vector<8x128xf32>
    %366 = arith.negf %365 : vector<8x128xf32>
    %367 = math.exp %366 : vector<8x128xf32>
    %cst_151 = arith.constant 1.000000e+00 : f32
    %368 = vector.broadcast %cst_151 : f32 to vector<8x128xf32>
    %369 = arith.addf %368, %367 : vector<8x128xf32>
    %370 = arith.divf %368, %369 : vector<8x128xf32>
    %371 = vector.extract_strided_slice %353 {offsets = [0, 256], sizes = [8, 128], strides = [1, 1]} : vector<8x384xf32> to vector<8x128xf32>
    %372 = vector.extract_strided_slice %354 {offsets = [0, 256], sizes = [8, 128], strides = [1, 1]} : vector<8x384xf32> to vector<8x128xf32>
    %373 = vector.broadcast %285 : vector<1x128xf32> to vector<8x128xf32>
    %374 = arith.addf %372, %373 : vector<8x128xf32>
    %375 = arith.mulf %362, %374 : vector<8x128xf32>
    %376 = arith.addf %371, %375 : vector<8x128xf32>
    %377 = math.tanh %376 : vector<8x128xf32>
    %cst_152 = arith.constant 1.000000e+00 : f32
    %378 = vector.broadcast %cst_152 : f32 to vector<8x128xf32>
    %379 = arith.subf %378, %370 : vector<8x128xf32>
    %380 = arith.mulf %379, %377 : vector<8x128xf32>
    %381 = arith.mulf %370, %352 : vector<8x128xf32>
    %382 = arith.addf %380, %381 : vector<8x128xf32>
    %c0_153 = arith.constant 0 : index
    %c0_154 = arith.constant 0 : index
    %383 = vector.load %arg15[%c0_153, %c0_154] : memref<8x128xf32, #tpu.memory_space<vmem>>, vector<8x128xf32>
    tpu.vector_store %arg15[%c0_153, %c0_154], %382 {strides = array<i32>} : memref<8x128xf32, #tpu.memory_space<vmem>>, vector<8x128xf32>,
    %c16_155 = arith.constant 16 : index
    %c0_156 = arith.constant 0 : index
    %384 = vector.load %arg14[%c16_155, %c0_156] : memref<64x128xf32, #tpu.memory_space<vmem>>, vector<8x128xf32>
    tpu.vector_store %arg14[%c16_155, %c0_156], %382 {strides = array<i32>} : memref<64x128xf32, #tpu.memory_space<vmem>>, vector<8x128xf32>,
    %c0_157 = arith.constant 0 : index
    %c0_158 = arith.constant 0 : index
    %385 = vector.load %arg15[%c0_157, %c0_158] : memref<8x128xf32, #tpu.memory_space<vmem>>, vector<8x128xf32>
    %c24_159 = arith.constant 24 : index
    %c0_160 = arith.constant 0 : index
    %386 = vector.load %arg13[%c24_159, %c0_160] : memref<64x384xf32, #tpu.memory_space<vmem>>, vector<8x384xf32>
    %cst_161 = arith.constant dense<0.000000e+00> : vector<8x384xf32>
    %387 = tpu.matmul %385, %284, %cst_161 {dimension_numbers = #tpu.dot_dimension_numbers<[1], [0], [0], [1], [0, 0, 1, 1], [], []>} : vector<8x128xf32>, vector<128x384xf32>, vector<8x384xf32> -> vector<8x384xf32>
    %388 = vector.extract_strided_slice %386 {offsets = [0, 0], sizes = [8, 128], strides = [1, 1]} : vector<8x384xf32> to vector<8x128xf32>
    %389 = vector.extract_strided_slice %387 {offsets = [0, 0], sizes = [8, 128], strides = [1, 1]} : vector<8x384xf32> to vector<8x128xf32>
    %390 = arith.addf %388, %389 : vector<8x128xf32>
    %391 = arith.negf %390 : vector<8x128xf32>
    %392 = math.exp %391 : vector<8x128xf32>
    %cst_162 = arith.constant 1.000000e+00 : f32
    %393 = vector.broadcast %cst_162 : f32 to vector<8x128xf32>
    %394 = arith.addf %393, %392 : vector<8x128xf32>
    %395 = arith.divf %393, %394 : vector<8x128xf32>
    %396 = vector.extract_strided_slice %386 {offsets = [0, 128], sizes = [8, 128], strides = [1, 1]} : vector<8x384xf32> to vector<8x128xf32>
    %397 = vector.extract_strided_slice %387 {offsets = [0, 128], sizes = [8, 128], strides = [1, 1]} : vector<8x384xf32> to vector<8x128xf32>
    %398 = arith.addf %396, %397 : vector<8x128xf32>
    %399 = arith.negf %398 : vector<8x128xf32>
    %400 = math.exp %399 : vector<8x128xf32>
    %cst_163 = arith.constant 1.000000e+00 : f32
    %401 = vector.broadcast %cst_163 : f32 to vector<8x128xf32>
    %402 = arith.addf %401, %400 : vector<8x128xf32>
    %403 = arith.divf %401, %402 : vector<8x128xf32>
    %404 = vector.extract_strided_slice %386 {offsets = [0, 256], sizes = [8, 128], strides = [1, 1]} : vector<8x384xf32> to vector<8x128xf32>
    %405 = vector.extract_strided_slice %387 {offsets = [0, 256], sizes = [8, 128], strides = [1, 1]} : vector<8x384xf32> to vector<8x128xf32>
    %406 = vector.broadcast %285 : vector<1x128xf32> to vector<8x128xf32>
    %407 = arith.addf %405, %406 : vector<8x128xf32>
    %408 = arith.mulf %395, %407 : vector<8x128xf32>
    %409 = arith.addf %404, %408 : vector<8x128xf32>
    %410 = math.tanh %409 : vector<8x128xf32>
    %cst_164 = arith.constant 1.000000e+00 : f32
    %411 = vector.broadcast %cst_164 : f32 to vector<8x128xf32>
    %412 = arith.subf %411, %403 : vector<8x128xf32>
    %413 = arith.mulf %412, %410 : vector<8x128xf32>
    %414 = arith.mulf %403, %385 : vector<8x128xf32>
    %415 = arith.addf %413, %414 : vector<8x128xf32>
    %c0_165 = arith.constant 0 : index
    %c0_166 = arith.constant 0 : index
    %416 = vector.load %arg15[%c0_165, %c0_166] : memref<8x128xf32, #tpu.memory_space<vmem>>, vector<8x128xf32>
    tpu.vector_store %arg15[%c0_165, %c0_166], %415 {strides = array<i32>} : memref<8x128xf32, #tpu.memory_space<vmem>>, vector<8x128xf32>,
    %c24_167 = arith.constant 24 : index
    %c0_168 = arith.constant 0 : index
    %417 = vector.load %arg14[%c24_167, %c0_168] : memref<64x128xf32, #tpu.memory_space<vmem>>, vector<8x128xf32>
    tpu.vector_store %arg14[%c24_167, %c0_168], %415 {strides = array<i32>} : memref<64x128xf32, #tpu.memory_space<vmem>>, vector<8x128xf32>,
    %c0_169 = arith.constant 0 : index
    %c0_170 = arith.constant 0 : index
    %418 = vector.load %arg15[%c0_169, %c0_170] : memref<8x128xf32, #tpu.memory_space<vmem>>, vector<8x128xf32>
    %c32_171 = arith.constant 32 : index
    %c0_172 = arith.constant 0 : index
    %419 = vector.load %arg13[%c32_171, %c0_172] : memref<64x384xf32, #tpu.memory_space<vmem>>, vector<8x384xf32>
    %cst_173 = arith.constant dense<0.000000e+00> : vector<8x384xf32>
    %420 = tpu.matmul %418, %284, %cst_173 {dimension_numbers = #tpu.dot_dimension_numbers<[1], [0], [0], [1], [0, 0, 1, 1], [], []>} : vector<8x128xf32>, vector<128x384xf32>, vector<8x384xf32> -> vector<8x384xf32>
    %421 = vector.extract_strided_slice %419 {offsets = [0, 0], sizes = [8, 128], strides = [1, 1]} : vector<8x384xf32> to vector<8x128xf32>
    %422 = vector.extract_strided_slice %420 {offsets = [0, 0], sizes = [8, 128], strides = [1, 1]} : vector<8x384xf32> to vector<8x128xf32>
    %423 = arith.addf %421, %422 : vector<8x128xf32>
    %424 = arith.negf %423 : vector<8x128xf32>
    %425 = math.exp %424 : vector<8x128xf32>
    %cst_174 = arith.constant 1.000000e+00 : f32
    %426 = vector.broadcast %cst_174 : f32 to vector<8x128xf32>
    %427 = arith.addf %426, %425 : vector<8x128xf32>
    %428 = arith.divf %426, %427 : vector<8x128xf32>
    %429 = vector.extract_strided_slice %419 {offsets = [0, 128], sizes = [8, 128], strides = [1, 1]} : vector<8x384xf32> to vector<8x128xf32>
    %430 = vector.extract_strided_slice %420 {offsets = [0, 128], sizes = [8, 128], strides = [1, 1]} : vector<8x384xf32> to vector<8x128xf32>
    %431 = arith.addf %429, %430 : vector<8x128xf32>
    %432 = arith.negf %431 : vector<8x128xf32>
    %433 = math.exp %432 : vector<8x128xf32>
    %cst_175 = arith.constant 1.000000e+00 : f32
    %434 = vector.broadcast %cst_175 : f32 to vector<8x128xf32>
    %435 = arith.addf %434, %433 : vector<8x128xf32>
    %436 = arith.divf %434, %435 : vector<8x128xf32>
    %437 = vector.extract_strided_slice %419 {offsets = [0, 256], sizes = [8, 128], strides = [1, 1]} : vector<8x384xf32> to vector<8x128xf32>
    %438 = vector.extract_strided_slice %420 {offsets = [0, 256], sizes = [8, 128], strides = [1, 1]} : vector<8x384xf32> to vector<8x128xf32>
    %439 = vector.broadcast %285 : vector<1x128xf32> to vector<8x128xf32>
    %440 = arith.addf %438, %439 : vector<8x128xf32>
    %441 = arith.mulf %428, %440 : vector<8x128xf32>
    %442 = arith.addf %437, %441 : vector<8x128xf32>
    %443 = math.tanh %442 : vector<8x128xf32>
    %cst_176 = arith.constant 1.000000e+00 : f32
    %444 = vector.broadcast %cst_176 : f32 to vector<8x128xf32>
    %445 = arith.subf %444, %436 : vector<8x128xf32>
    %446 = arith.mulf %445, %443 : vector<8x128xf32>
    %447 = arith.mulf %436, %418 : vector<8x128xf32>
    %448 = arith.addf %446, %447 : vector<8x128xf32>
    %c0_177 = arith.constant 0 : index
    %c0_178 = arith.constant 0 : index
    %449 = vector.load %arg15[%c0_177, %c0_178] : memref<8x128xf32, #tpu.memory_space<vmem>>, vector<8x128xf32>
    tpu.vector_store %arg15[%c0_177, %c0_178], %448 {strides = array<i32>} : memref<8x128xf32, #tpu.memory_space<vmem>>, vector<8x128xf32>,
    %c32_179 = arith.constant 32 : index
    %c0_180 = arith.constant 0 : index
    %450 = vector.load %arg14[%c32_179, %c0_180] : memref<64x128xf32, #tpu.memory_space<vmem>>, vector<8x128xf32>
    tpu.vector_store %arg14[%c32_179, %c0_180], %448 {strides = array<i32>} : memref<64x128xf32, #tpu.memory_space<vmem>>, vector<8x128xf32>,
    %c0_181 = arith.constant 0 : index
    %c0_182 = arith.constant 0 : index
    %451 = vector.load %arg15[%c0_181, %c0_182] : memref<8x128xf32, #tpu.memory_space<vmem>>, vector<8x128xf32>
    %c40_183 = arith.constant 40 : index
    %c0_184 = arith.constant 0 : index
    %452 = vector.load %arg13[%c40_183, %c0_184] : memref<64x384xf32, #tpu.memory_space<vmem>>, vector<8x384xf32>
    %cst_185 = arith.constant dense<0.000000e+00> : vector<8x384xf32>
    %453 = tpu.matmul %451, %284, %cst_185 {dimension_numbers = #tpu.dot_dimension_numbers<[1], [0], [0], [1], [0, 0, 1, 1], [], []>} : vector<8x128xf32>, vector<128x384xf32>, vector<8x384xf32> -> vector<8x384xf32>
    %454 = vector.extract_strided_slice %452 {offsets = [0, 0], sizes = [8, 128], strides = [1, 1]} : vector<8x384xf32> to vector<8x128xf32>
    %455 = vector.extract_strided_slice %453 {offsets = [0, 0], sizes = [8, 128], strides = [1, 1]} : vector<8x384xf32> to vector<8x128xf32>
    %456 = arith.addf %454, %455 : vector<8x128xf32>
    %457 = arith.negf %456 : vector<8x128xf32>
    %458 = math.exp %457 : vector<8x128xf32>
    %cst_186 = arith.constant 1.000000e+00 : f32
    %459 = vector.broadcast %cst_186 : f32 to vector<8x128xf32>
    %460 = arith.addf %459, %458 : vector<8x128xf32>
    %461 = arith.divf %459, %460 : vector<8x128xf32>
    %462 = vector.extract_strided_slice %452 {offsets = [0, 128], sizes = [8, 128], strides = [1, 1]} : vector<8x384xf32> to vector<8x128xf32>
    %463 = vector.extract_strided_slice %453 {offsets = [0, 128], sizes = [8, 128], strides = [1, 1]} : vector<8x384xf32> to vector<8x128xf32>
    %464 = arith.addf %462, %463 : vector<8x128xf32>
    %465 = arith.negf %464 : vector<8x128xf32>
    %466 = math.exp %465 : vector<8x128xf32>
    %cst_187 = arith.constant 1.000000e+00 : f32
    %467 = vector.broadcast %cst_187 : f32 to vector<8x128xf32>
    %468 = arith.addf %467, %466 : vector<8x128xf32>
    %469 = arith.divf %467, %468 : vector<8x128xf32>
    %470 = vector.extract_strided_slice %452 {offsets = [0, 256], sizes = [8, 128], strides = [1, 1]} : vector<8x384xf32> to vector<8x128xf32>
    %471 = vector.extract_strided_slice %453 {offsets = [0, 256], sizes = [8, 128], strides = [1, 1]} : vector<8x384xf32> to vector<8x128xf32>
    %472 = vector.broadcast %285 : vector<1x128xf32> to vector<8x128xf32>
    %473 = arith.addf %471, %472 : vector<8x128xf32>
    %474 = arith.mulf %461, %473 : vector<8x128xf32>
    %475 = arith.addf %470, %474 : vector<8x128xf32>
    %476 = math.tanh %475 : vector<8x128xf32>
    %cst_188 = arith.constant 1.000000e+00 : f32
    %477 = vector.broadcast %cst_188 : f32 to vector<8x128xf32>
    %478 = arith.subf %477, %469 : vector<8x128xf32>
    %479 = arith.mulf %478, %476 : vector<8x128xf32>
    %480 = arith.mulf %469, %451 : vector<8x128xf32>
    %481 = arith.addf %479, %480 : vector<8x128xf32>
    %c0_189 = arith.constant 0 : index
    %c0_190 = arith.constant 0 : index
    %482 = vector.load %arg15[%c0_189, %c0_190] : memref<8x128xf32, #tpu.memory_space<vmem>>, vector<8x128xf32>
    tpu.vector_store %arg15[%c0_189, %c0_190], %481 {strides = array<i32>} : memref<8x128xf32, #tpu.memory_space<vmem>>, vector<8x128xf32>,
    %c40_191 = arith.constant 40 : index
    %c0_192 = arith.constant 0 : index
    %483 = vector.load %arg14[%c40_191, %c0_192] : memref<64x128xf32, #tpu.memory_space<vmem>>, vector<8x128xf32>
    tpu.vector_store %arg14[%c40_191, %c0_192], %481 {strides = array<i32>} : memref<64x128xf32, #tpu.memory_space<vmem>>, vector<8x128xf32>,
    %c0_193 = arith.constant 0 : index
    %c0_194 = arith.constant 0 : index
    %484 = vector.load %arg15[%c0_193, %c0_194] : memref<8x128xf32, #tpu.memory_space<vmem>>, vector<8x128xf32>
    %c48_195 = arith.constant 48 : index
    %c0_196 = arith.constant 0 : index
    %485 = vector.load %arg13[%c48_195, %c0_196] : memref<64x384xf32, #tpu.memory_space<vmem>>, vector<8x384xf32>
    %cst_197 = arith.constant dense<0.000000e+00> : vector<8x384xf32>
    %486 = tpu.matmul %484, %284, %cst_197 {dimension_numbers = #tpu.dot_dimension_numbers<[1], [0], [0], [1], [0, 0, 1, 1], [], []>} : vector<8x128xf32>, vector<128x384xf32>, vector<8x384xf32> -> vector<8x384xf32>
    %487 = vector.extract_strided_slice %485 {offsets = [0, 0], sizes = [8, 128], strides = [1, 1]} : vector<8x384xf32> to vector<8x128xf32>
    %488 = vector.extract_strided_slice %486 {offsets = [0, 0], sizes = [8, 128], strides = [1, 1]} : vector<8x384xf32> to vector<8x128xf32>
    %489 = arith.addf %487, %488 : vector<8x128xf32>
    %490 = arith.negf %489 : vector<8x128xf32>
    %491 = math.exp %490 : vector<8x128xf32>
    %cst_198 = arith.constant 1.000000e+00 : f32
    %492 = vector.broadcast %cst_198 : f32 to vector<8x128xf32>
    %493 = arith.addf %492, %491 : vector<8x128xf32>
    %494 = arith.divf %492, %493 : vector<8x128xf32>
    %495 = vector.extract_strided_slice %485 {offsets = [0, 128], sizes = [8, 128], strides = [1, 1]} : vector<8x384xf32> to vector<8x128xf32>
    %496 = vector.extract_strided_slice %486 {offsets = [0, 128], sizes = [8, 128], strides = [1, 1]} : vector<8x384xf32> to vector<8x128xf32>
    %497 = arith.addf %495, %496 : vector<8x128xf32>
    %498 = arith.negf %497 : vector<8x128xf32>
    %499 = math.exp %498 : vector<8x128xf32>
    %cst_199 = arith.constant 1.000000e+00 : f32
    %500 = vector.broadcast %cst_199 : f32 to vector<8x128xf32>
    %501 = arith.addf %500, %499 : vector<8x128xf32>
    %502 = arith.divf %500, %501 : vector<8x128xf32>
    %503 = vector.extract_strided_slice %485 {offsets = [0, 256], sizes = [8, 128], strides = [1, 1]} : vector<8x384xf32> to vector<8x128xf32>
    %504 = vector.extract_strided_slice %486 {offsets = [0, 256], sizes = [8, 128], strides = [1, 1]} : vector<8x384xf32> to vector<8x128xf32>
    %505 = vector.broadcast %285 : vector<1x128xf32> to vector<8x128xf32>
    %506 = arith.addf %504, %505 : vector<8x128xf32>
    %507 = arith.mulf %494, %506 : vector<8x128xf32>
    %508 = arith.addf %503, %507 : vector<8x128xf32>
    %509 = math.tanh %508 : vector<8x128xf32>
    %cst_200 = arith.constant 1.000000e+00 : f32
    %510 = vector.broadcast %cst_200 : f32 to vector<8x128xf32>
    %511 = arith.subf %510, %502 : vector<8x128xf32>
    %512 = arith.mulf %511, %509 : vector<8x128xf32>
    %513 = arith.mulf %502, %484 : vector<8x128xf32>
    %514 = arith.addf %512, %513 : vector<8x128xf32>
    %c0_201 = arith.constant 0 : index
    %c0_202 = arith.constant 0 : index
    %515 = vector.load %arg15[%c0_201, %c0_202] : memref<8x128xf32, #tpu.memory_space<vmem>>, vector<8x128xf32>
    tpu.vector_store %arg15[%c0_201, %c0_202], %514 {strides = array<i32>} : memref<8x128xf32, #tpu.memory_space<vmem>>, vector<8x128xf32>,
    %c48_203 = arith.constant 48 : index
    %c0_204 = arith.constant 0 : index
    %516 = vector.load %arg14[%c48_203, %c0_204] : memref<64x128xf32, #tpu.memory_space<vmem>>, vector<8x128xf32>
    tpu.vector_store %arg14[%c48_203, %c0_204], %514 {strides = array<i32>} : memref<64x128xf32, #tpu.memory_space<vmem>>, vector<8x128xf32>,
    %c0_205 = arith.constant 0 : index
    %c0_206 = arith.constant 0 : index
    %517 = vector.load %arg15[%c0_205, %c0_206] : memref<8x128xf32, #tpu.memory_space<vmem>>, vector<8x128xf32>
    %c56_207 = arith.constant 56 : index
    %c0_208 = arith.constant 0 : index
    %518 = vector.load %arg13[%c56_207, %c0_208] : memref<64x384xf32, #tpu.memory_space<vmem>>, vector<8x384xf32>
    %cst_209 = arith.constant dense<0.000000e+00> : vector<8x384xf32>
    %519 = tpu.matmul %517, %284, %cst_209 {dimension_numbers = #tpu.dot_dimension_numbers<[1], [0], [0], [1], [0, 0, 1, 1], [], []>} : vector<8x128xf32>, vector<128x384xf32>, vector<8x384xf32> -> vector<8x384xf32>
    %520 = vector.extract_strided_slice %518 {offsets = [0, 0], sizes = [8, 128], strides = [1, 1]} : vector<8x384xf32> to vector<8x128xf32>
    %521 = vector.extract_strided_slice %519 {offsets = [0, 0], sizes = [8, 128], strides = [1, 1]} : vector<8x384xf32> to vector<8x128xf32>
    %522 = arith.addf %520, %521 : vector<8x128xf32>
    %523 = arith.negf %522 : vector<8x128xf32>
    %524 = math.exp %523 : vector<8x128xf32>
    %cst_210 = arith.constant 1.000000e+00 : f32
    %525 = vector.broadcast %cst_210 : f32 to vector<8x128xf32>
    %526 = arith.addf %525, %524 : vector<8x128xf32>
    %527 = arith.divf %525, %526 : vector<8x128xf32>
    %528 = vector.extract_strided_slice %518 {offsets = [0, 128], sizes = [8, 128], strides = [1, 1]} : vector<8x384xf32> to vector<8x128xf32>
    %529 = vector.extract_strided_slice %519 {offsets = [0, 128], sizes = [8, 128], strides = [1, 1]} : vector<8x384xf32> to vector<8x128xf32>
    %530 = arith.addf %528, %529 : vector<8x128xf32>
    %531 = arith.negf %530 : vector<8x128xf32>
    %532 = math.exp %531 : vector<8x128xf32>
    %cst_211 = arith.constant 1.000000e+00 : f32
    %533 = vector.broadcast %cst_211 : f32 to vector<8x128xf32>
    %534 = arith.addf %533, %532 : vector<8x128xf32>
    %535 = arith.divf %533, %534 : vector<8x128xf32>
    %536 = vector.extract_strided_slice %518 {offsets = [0, 256], sizes = [8, 128], strides = [1, 1]} : vector<8x384xf32> to vector<8x128xf32>
    %537 = vector.extract_strided_slice %519 {offsets = [0, 256], sizes = [8, 128], strides = [1, 1]} : vector<8x384xf32> to vector<8x128xf32>
    %538 = vector.broadcast %285 : vector<1x128xf32> to vector<8x128xf32>
    %539 = arith.addf %537, %538 : vector<8x128xf32>
    %540 = arith.mulf %527, %539 : vector<8x128xf32>
    %541 = arith.addf %536, %540 : vector<8x128xf32>
    %542 = math.tanh %541 : vector<8x128xf32>
    %cst_212 = arith.constant 1.000000e+00 : f32
    %543 = vector.broadcast %cst_212 : f32 to vector<8x128xf32>
    %544 = arith.subf %543, %535 : vector<8x128xf32>
    %545 = arith.mulf %544, %542 : vector<8x128xf32>
    %546 = arith.mulf %535, %517 : vector<8x128xf32>
    %547 = arith.addf %545, %546 : vector<8x128xf32>
    %c0_213 = arith.constant 0 : index
    %c0_214 = arith.constant 0 : index
    %548 = vector.load %arg15[%c0_213, %c0_214] : memref<8x128xf32, #tpu.memory_space<vmem>>, vector<8x128xf32>
    tpu.vector_store %arg15[%c0_213, %c0_214], %547 {strides = array<i32>} : memref<8x128xf32, #tpu.memory_space<vmem>>, vector<8x128xf32>,
    %c56_215 = arith.constant 56 : index
    %c0_216 = arith.constant 0 : index
    %549 = vector.load %arg14[%c56_215, %c0_216] : memref<64x128xf32, #tpu.memory_space<vmem>>, vector<8x128xf32>
    tpu.vector_store %arg14[%c56_215, %c0_216], %547 {strides = array<i32>} : memref<64x128xf32, #tpu.memory_space<vmem>>, vector<8x128xf32>,
    %c0_217 = arith.constant 0 : index
    %c0_218 = arith.constant 0 : index
    %550 = vector.load %arg14[%c0_217, %c0_218] : memref<64x128xf32, #tpu.memory_space<vmem>>, vector<64x128xf32>
    %c0_219 = arith.constant 0 : index
    %c0_220 = arith.constant 0 : index
    %551 = vector.load %arg10[%c0_219, %c0_220] : memref<128x128xf32, #tpu.memory_space<vmem>>, vector<128x128xf32>
    %cst_221 = arith.constant dense<0.000000e+00> : vector<64x128xf32>
    %552 = tpu.matmul %550, %551, %cst_221 {dimension_numbers = #tpu.dot_dimension_numbers<[1], [0], [0], [1], [0, 0, 1, 1], [], []>} : vector<64x128xf32>, vector<128x128xf32>, vector<64x128xf32> -> vector<64x128xf32>
    %c0_222 = arith.constant 0 : index
    %c0_223 = arith.constant 0 : index
    %553 = vector.load %arg11[%c0_222, %c0_223] : memref<1x128xf32, #tpu.memory_space<vmem>>, vector<1x128xf32>
    %554 = vector.broadcast %553 : vector<1x128xf32> to vector<64x128xf32>
    %555 = arith.addf %552, %554 : vector<64x128xf32>
    %556 = math.exp %555 : vector<64x128xf32>
    %c0_224 = arith.constant 0 : index
    %c0_225 = arith.constant 0 : index
    %557 = vector.load %arg12[%c0_224, %c0_225] : memref<64x128xf32, #tpu.memory_space<vmem>>, vector<64x128xf32>
    tpu.vector_store %arg12[%c0_224, %c0_225], %556 {strides = array<i32>} : memref<64x128xf32, #tpu.memory_space<vmem>>, vector<64x128xf32>,
    return
  }
}

</mosaic_0001>

<bundles_post_ra>
// kernel: rnn_vae_forward.3
= control target key start
LH: loop header
LB: loop body
LE: loop exit
PB: predicated region body
PF: predicated region fallthrough
CT: control target
= control target key end

     0   :  { %v7743_v3 = vmov 0.0   ;;  %vm6027_vm0 = vmmov 0   ;;  %s7727_s2 = inlined_call_operand.vmem [shape: f32[128,384], index: 2, kind: input, shape index: {}]   ;;  %s7728_s3 = inlined_call_operand.vmem [shape: f32[128,384], index: 3, kind: input, shape index: {}]   ;;  %s7729_s0 = inlined_call_operand.vmem [shape: f32[64,128], index: 0, kind: input, shape index: {}]   ;;  %s7730_s1 = inlined_call_operand.vmem [shape: f32[8,128], index: 1, kind: input, shape index: {}]   ;;  %s7731_s4 = inlined_call_operand.vmem [shape: f32[1,384], index: 4, kind: input, shape index: {}]   ;;  %s7732_s5 = inlined_call_operand.vmem [shape: f32[1,128], index: 5, kind: input, shape index: {}]   ;;  %s7733_s6 = inlined_call_operand.vmem [shape: f32[128,384], index: 6, kind: input, shape index: {}]   ;;  %s7734_s7 = inlined_call_operand.vmem [shape: f32[128,384], index: 7, kind: input, shape index: {}]   ;;  %s7735_s8 = inlined_call_operand.vmem [shape: f32[1,384], index: 8, kind: input, shape index: {}]   ;;  %s7736_s9 = inlined_call_operand.vmem [shape: f32[1,128], index: 9, kind: input, shape index: {}]   ;;  %s7737_s10 = inlined_call_operand.vmem [shape: f32[128,128], index: 10, kind: input, shape index: {}]   ;;  %s7738_s11 = inlined_call_operand.vmem [shape: f32[1,128], index: 11, kind: input, shape index: {}]   ;;  %s7739_s12 = inlined_call_operand.vmem [shape: f32[64,128], index: 12, kind: output, shape index: {}]  }
   0x1   :  { %v50_v0 = vld [vmem:[%s7727_s2 + $0x8] sm:$0xff]  ;;  %v53_v1 = vld [vmem:[%s7727_s2 + $0x20] sm:$0xff]  ;;  %178 = vmatprep.mubr.f32.mxu1 %v7743_v3  ;;  %475 = vmatprep.mubr.f32.mxu0 %v7743_v3  ;;  %v52_v5 = vld [vmem:[%s7727_s2 + $0x18] sm:$0xff] }
   0x2   :  { %v49_v2 = vld [vmem:[%s7727_s2] sm:$0xff]  ;;  %v4724_v4 = vpack.c.bf16 %v53_v1, %v50_v0  ;;  %v359_v6 = vld [vmem:[%s7728_s3 + $0x8] sm:$0xff]  ;;  %v361_v11 = vld [vmem:[%s7728_s3 + $0x18] sm:$0xff] }
   0x3   :  { %v362_v7 = vld [vmem:[%s7728_s3 + $0x20] sm:$0xff]  ;;  %v4726_v8 = vpack.c.bf16 %v52_v5, %v49_v2  ;;  %v56_v12 = vld [vmem:[%s7727_s2 + $0x38] sm:$0xff]  ;;  %v59_v14 = vld [vmem:[%s7727_s2 + $0x50] sm:$0xff] }
   0x4   :  { %v6113_v9 = vpack.c.bf16 %v362_v7, %v359_v6  ;;  %v358_v10 = vld [vmem:[%s7728_s3] sm:$0xff]  ;;  %4725 = vmatprep.subr.bf16.mxu1 %v4724_v4  ;;  %v55_v15 = vld [vmem:[%s7727_s2 + $0x30] sm:$0xff]  ;;  %v58_v16 = vld [vmem:[%s7727_s2 + $0x48] sm:$0xff]  ;;  %v4728_v17 = vpack.c.bf16 %v59_v14, %v56_v12 }
   0x5   :  { %v6124_v13 = vpack.c.bf16 %v361_v11, %v358_v10  ;;  %4727 = vmatpush1.bf16.msra.mxu1 %v4726_v8  ;;  %v4730_v18 = vpack.c.bf16 %v58_v16, %v55_v15  ;;  %v365_v19 = vld [vmem:[%s7728_s3 + $0x38] sm:$0xff]  ;;  %v368_v20 = vld [vmem:[%s7728_s3 + $0x50] sm:$0xff]  ;;  %v367_v23 = vld [vmem:[%s7728_s3 + $0x48] sm:$0xff] }
   0x6   :  { %4789 = vmatprep.subr.bf16.mxu0 %v6113_v9  ;;  %v364_v21 = vld [vmem:[%s7728_s3 + $0x30] sm:$0xff]  ;;  %v6146_v22 = vpack.c.bf16 %v368_v20, %v365_v19  ;;  %v62_v24 = vld [vmem:[%s7727_s2 + $0x68] sm:$0xff]  ;;  %v65_v25 = vld [vmem:[%s7727_s2 + $0x80] sm:$0xff]  ;;  %4729 = vmatprep.subr.bf16.mxu1 %v4728_v17 }
   0x7   :  { %4791 = vmatpush1.bf16.msra.mxu0 %v6124_v13  ;;  %v6157_v26 = vpack.c.bf16 %v367_v23, %v364_v21  ;;  %v4732_v27 = vpack.c.bf16 %v65_v25, %v62_v24  ;;  %v61_v28 = vld [vmem:[%s7727_s2 + $0x60] sm:$0xff]  ;;  %v64_v29 = vld [vmem:[%s7727_s2 + $0x78] sm:$0xff]  ;;  %v371_v30 = vld [vmem:[%s7728_s3 + $0x68] sm:$0xff] }
   0x8   :  { %4793 = vmatprep.subr.bf16.mxu0 %v6146_v22  ;;  %v374_v31 = vld [vmem:[%s7728_s3 + $0x80] sm:$0xff]  ;;  %v373_v33 = vld [vmem:[%s7728_s3 + $0x78] sm:$0xff]  ;;  %v4734_v34 = vpack.c.bf16 %v64_v29, %v61_v28  ;;  %v71_v37 = vld [vmem:[%s7727_s2 + $0xb0] sm:$0xff] }
   0x9   :  { %v370_v32 = vld [vmem:[%s7728_s3 + $0x60] sm:$0xff]  ;;  %4731 = vmatpush1.bf16.msra.mxu1 %v4730_v18  ;;  %v6178_v35 = vpack.c.bf16 %v374_v31, %v371_v30  ;;  %v68_v36 = vld [vmem:[%s7727_s2 + $0x98] sm:$0xff]  ;;  %v67_v38 = vld [vmem:[%s7727_s2 + $0x90] sm:$0xff] }
   0xa   :  { %4733 = vmatprep.subr.bf16.mxu1 %v4732_v27  ;;  %v6190_v39 = vpack.c.bf16 %v373_v33, %v370_v32  ;;  %v4736_v40 = vpack.c.bf16 %v71_v37, %v68_v36  ;;  %v70_v41 = vld [vmem:[%s7727_s2 + $0xa8] sm:$0xff]  ;;  %v377_v42 = vld [vmem:[%s7728_s3 + $0x98] sm:$0xff]  ;;  %v380_v43 = vld [vmem:[%s7728_s3 + $0xb0] sm:$0xff] }
   0xb   :  { %4795 = vmatpush1.bf16.msra.mxu0 %v6157_v26  ;;  %v6202_v44 = vpack.c.bf16 %v380_v43, %v377_v42  ;;  %v376_v45 = vld [vmem:[%s7728_s3 + $0x90] sm:$0xff]  ;;  %v379_v46 = vld [vmem:[%s7728_s3 + $0xa8] sm:$0xff]  ;;  %v77_v48 = vld [vmem:[%s7727_s2 + $0xe0] sm:$0xff]  ;;  %v4738_v49 = vpack.c.bf16 %v70_v41, %v67_v38 }
   0xc   :  { %4797 = vmatprep.subr.bf16.mxu0 %v6178_v35  ;;  %v74_v47 = vld [vmem:[%s7727_s2 + $0xc8] sm:$0xff]  ;;  %v386_v51 = vld [vmem:[%s7728_s3 + $0xe0] sm:$0xff]  ;;  %v6223_v52 = vpack.c.bf16 %v379_v46, %v376_v45  ;;  %v76_v55 = vld [vmem:[%s7727_s2 + $0xd8] sm:$0xff] }
   0xd   :  { %4735 = vmatpush1.bf16.msra.mxu1 %v4734_v34  ;;  %v383_v50 = vld [vmem:[%s7728_s3 + $0xc8] sm:$0xff]  ;;  %v4740_v53 = vpack.c.bf16 %v77_v48, %v74_v47  ;;  %v73_v54 = vld [vmem:[%s7727_s2 + $0xc0] sm:$0xff]  ;;  %v385_v58 = vld [vmem:[%s7728_s3 + $0xd8] sm:$0xff] }
   0xe   :  { %4737 = vmatprep.subr.bf16.mxu1 %v4736_v40  ;;  %v382_v56 = vld [vmem:[%s7728_s3 + $0xc0] sm:$0xff]  ;;  %v6235_v57 = vpack.c.bf16 %v386_v51, %v383_v50  ;;  %v80_v59 = vld [vmem:[%s7727_s2 + $0xf8] sm:$0xff]  ;;  %v83_v60 = vld [vmem:[%s7727_s2 + $0x110] sm:$0xff]  ;;  %v4742_v63 = vpack.c.bf16 %v76_v55, %v73_v54 }
   0xf   :  { %4799 = vmatpush1.bf16.msra.mxu0 %v6190_v39  ;;  %v389_v61 = vld [vmem:[%s7728_s3 + $0xf8] sm:$0xff]  ;;  %v392_v62 = vld [vmem:[%s7728_s3 + $0x110] sm:$0xff]  ;;  %v6253_v0 = vpack.c.bf16 %v385_v58, %v382_v56  ;;  %v4744_v1 = vpack.c.bf16 %v83_v60, %v80_v59  ;;  %v82_v4 = vld [vmem:[%s7727_s2 + $0x108] sm:$0xff] }
  0x10   :  { %4801 = vmatprep.subr.bf16.mxu0 %v6202_v44  ;;  %v79_v2 = vld [vmem:[%s7727_s2 + $0xf0] sm:$0xff]  ;;  %v6265_v6 = vpack.c.bf16 %v392_v62, %v389_v61  ;;  %v391_v7 = vld [vmem:[%s7728_s3 + $0x108] sm:$0xff]  ;;  %v89_v10 = vld [vmem:[%s7727_s2 + $0x140] sm:$0xff] }
  0x11   :  { %4739 = vmatpush1.bf16.msra.mxu1 %v4738_v49  ;;  %v388_v5 = vld [vmem:[%s7728_s3 + $0xf0] sm:$0xff]  ;;  %v86_v8 = vld [vmem:[%s7727_s2 + $0x128] sm:$0xff]  ;;  %v398_v12 = vld [vmem:[%s7728_s3 + $0x140] sm:$0xff]  ;;  %v4746_v14 = vpack.c.bf16 %v82_v4, %v79_v2 }
  0x12   :  { %4741 = vmatprep.subr.bf16.mxu1 %v4740_v53  ;;  %v395_v11 = vld [vmem:[%s7728_s3 + $0x128] sm:$0xff]  ;;  %v6283_v15 = vpack.c.bf16 %v391_v7, %v388_v5  ;;  %v4748_v16 = vpack.c.bf16 %v89_v10, %v86_v8  ;;  %v85_v17 = vld [vmem:[%s7727_s2 + $0x120] sm:$0xff]  ;;  %v88_v18 = vld [vmem:[%s7727_s2 + $0x138] sm:$0xff] }
  0x13   :  { %4803 = vmatpush1.bf16.msra.mxu0 %v6223_v52  ;;  %v394_v19 = vld [vmem:[%s7728_s3 + $0x120] sm:$0xff]  ;;  %v6295_v20 = vpack.c.bf16 %v398_v12, %v395_v11  ;;  %v397_v21 = vld [vmem:[%s7728_s3 + $0x138] sm:$0xff]  ;;  %v95_v24 = vld [vmem:[%s7727_s2 + $0x170] sm:$0xff]  ;;  %v4750_v28 = vpack.c.bf16 %v88_v18, %v85_v17 }
  0x14   :  { %4805 = vmatprep.subr.bf16.mxu0 %v6235_v57  ;;  %v92_v23 = vld [vmem:[%s7727_s2 + $0x158] sm:$0xff]  ;;  %v404_v27 = vld [vmem:[%s7728_s3 + $0x170] sm:$0xff]  ;;  %v6313_v29 = vpack.c.bf16 %v397_v21, %v394_v19  ;;  %v94_v32 = vld [vmem:[%s7727_s2 + $0x168] sm:$0xff] }
  0x15   :  { %4743 = vmatpush1.bf16.msra.mxu1 %v4742_v63  ;;  %v401_v25 = vld [vmem:[%s7728_s3 + $0x158] sm:$0xff]  ;;  %v4752_v30 = vpack.c.bf16 %v95_v24, %v92_v23  ;;  %v91_v31 = vld [vmem:[%s7727_s2 + $0x150] sm:$0xff]  ;;  %v403_v36 = vld [vmem:[%s7728_s3 + $0x168] sm:$0xff]  ;;  %v7745_v23 = vmov 0.0|0.0  }
  0x16   :  { %4745 = vmatprep.subr.bf16.mxu1 %v4744_v1  ;;  %v400_v33 = vld [vmem:[%s7728_s3 + $0x150] sm:$0xff]  ;;  %v6325_v34 = vpack.c.bf16 %v404_v27, %v401_v25  ;;  %v54_v38 = vld [vmem:[%s7727_s2 + $0x28] sm:$0xff]  ;;  %v4754_v40 = vpack.c.bf16 %v94_v32, %v91_v31  ;;  %v57_v43 = vld [vmem:[%s7727_s2 + $0x40] sm:$0xff] }
  0x17   :  { %4807 = vmatpush1.bf16.msra.mxu0 %v6253_v0  ;;  %v51_v37 = vld [vmem:[%s7727_s2 + $0x10] sm:$0xff]  ;;  %v6337_v41 = vpack.c.bf16 %v403_v36, %v400_v33  ;;  %v60_v45 = vld [vmem:[%s7727_s2 + $0x58] sm:$0xff]  ;;  %v6349_v46 = vld [vmem:[%s7729_s0] sm:$0xff] }
  0x18   :  { %4809 = vmatprep.subr.bf16.mxu0 %v6265_v6  ;;  %v4756_v42 = vpack.c.bf16 %v54_v38, %v51_v37  ;;  %v6355_v47 = vld [vmem:[%s7730_s1] sm:$0xff]  ;;  %v4760_v48 = vpack.c.bf16 %v60_v45, %v57_v43  ;;  %v63_v49 = vld [vmem:[%s7727_s2 + $0x70] sm:$0xff]  ;;  %v66_v50 = vld [vmem:[%s7727_s2 + $0x88] sm:$0xff] }
  0x19   :  { %4747 = vmatpush1.bf16.msra.mxu1 %v4746_v14  ;;  %v6369_v51 = vld [vmem:[%s7729_s0 + $0x8] sm:$0xff]  ;;  %v4764_v53 = vpack.c.bf16 %v66_v50, %v63_v49  ;;  %v69_v54 = vld [vmem:[%s7727_s2 + $0xa0] sm:$0xff]  ;;  %v72_v55 = vld [vmem:[%s7727_s2 + $0xb8] sm:$0xff] }
  0x1a   :  { %4749 = vmatprep.subr.bf16.mxu1 %v4748_v16  ;;  %v6386_v56 = vld [vmem:[%s7729_s0 + $0x10] sm:$0xff]  ;;  %v4768_v58 = vpack.c.bf16 %v72_v55, %v69_v54  ;;  %v78_v60 = vld [vmem:[%s7727_s2 + $0xe8] sm:$0xff]  ;;  %v44_v61 = vld [vmem:[%s7729_s0 + $0x18] sm:$0xff]  ;;  %v99_v54 = vlaneseq }
  0x1b   :  { %4811 = vmatpush1.bf16.msra.mxu0 %v6283_v15  ;;  %v75_v59 = vld [vmem:[%s7727_s2 + $0xd0] sm:$0xff]  ;;  %v81_v63 = vld [vmem:[%s7727_s2 + $0x100] sm:$0xff]  ;;  %v84_v1 = vld [vmem:[%s7727_s2 + $0x118] sm:$0xff] }
  0x1c   :  { %4813 = vmatprep.subr.bf16.mxu0 %v6295_v20  ;;  %v4772_v62 = vpack.c.bf16 %v78_v60, %v75_v59  ;;  %v45_v2 = vld [vmem:[%s7729_s0 + $0x20] sm:$0xff]  ;;  %v4776_v4 = vpack.c.bf16 %v84_v1, %v81_v63  ;;  %v87_v5 = vld [vmem:[%s7727_s2 + $0x130] sm:$0xff]  ;;  %v90_v7 = vld [vmem:[%s7727_s2 + $0x148] sm:$0xff]  ;;  %v6552_v55 = vshrl.u32 %v99_v54, 7 }
  0x1d   :  { %4751 = vmatpush1.bf16.msra.mxu1 %v4750_v28  ;;  %v46_v8 = vld [vmem:[%s7729_s0 + $0x28] sm:$0xff]  ;;  %v4780_v10 = vpack.c.bf16 %v90_v7, %v87_v5  ;;  %v93_v11 = vld [vmem:[%s7727_s2 + $0x160] sm:$0xff]  ;;  %v96_v12 = vld [vmem:[%s7727_s2 + $0x178] sm:$0xff] }
  0x1e   :  { %4753 = vmatprep.subr.bf16.mxu1 %v4752_v30  ;;  %v47_v14 = vld [vmem:[%s7729_s0 + $0x30] sm:$0xff]  ;;  %v4784_v16 = vpack.c.bf16 %v96_v12, %v93_v11  ;;  %v48_v17 = vld [vmem:[%s7729_s0 + $0x38] sm:$0xff]  ;;  %v363_v19 = vld [vmem:[%s7728_s3 + $0x28] sm:$0xff]  ;;  %7749 = vst [vmem:[#allocation5_spill] sm:$0xff] %v6552_v55  ;;  %v7741_v59 = vsub.s32 1, %v6552_v55 }
  0x1f   :  { %4815 = vmatpush1.bf16.msra.mxu0 %v6313_v29  ;;  %v360_v18 = vld [vmem:[%s7728_s3 + $0x10] sm:$0xff]  ;;  %v366_v24 = vld [vmem:[%s7728_s3 + $0x40] sm:$0xff]  ;;  %v369_v25 = vld [vmem:[%s7728_s3 + $0x58] sm:$0xff] }
  0x20   :  { %4817 = vmatprep.subr.bf16.mxu0 %v6325_v34  ;;  %v6452_v21 = vpack.c.bf16 %v363_v19, %v360_v18  ;;  %v6465_v27 = vpack.c.bf16 %v369_v25, %v366_v24  ;;  %v372_v28 = vld [vmem:[%s7728_s3 + $0x70] sm:$0xff]  ;;  %v375_v30 = vld [vmem:[%s7728_s3 + $0x88] sm:$0xff]  ;;  %v378_v32 = vld [vmem:[%s7728_s3 + $0xa0] sm:$0xff] }
  0x21   :  { %4755 = vmatpush1.bf16.msra.mxu1 %v4754_v40  ;;  %v6476_v31 = vpack.c.bf16 %v375_v30, %v372_v28  ;;  %v381_v33 = vld [vmem:[%s7728_s3 + $0xb8] sm:$0xff]  ;;  %v384_v37 = vld [vmem:[%s7728_s3 + $0xd0] sm:$0xff]  ;;  %v387_v38 = vld [vmem:[%s7728_s3 + $0xe8] sm:$0xff] }
  0x22   :  { %4757 = vmatprep.subr.bf16.mxu1 %v4756_v42  ;;  %v6486_v36 = vpack.c.bf16 %v381_v33, %v378_v32  ;;  %v6496_v40 = vpack.c.bf16 %v387_v38, %v384_v37  ;;  %v393_v43 = vld [vmem:[%s7728_s3 + $0x118] sm:$0xff]  ;;  %v402_v50 = vld [vmem:[%s7728_s3 + $0x160] sm:$0xff] }
  0x23   :  { %4819 = vmatpush1.bf16.msra.mxu0 %v6337_v41 }
  0x24   :  { %4845 = vmatprep.subr.bf16.mxu0 %v6113_v9  ;;  %179 = vmatmul.mubr.f32.vlgmr.msra.gmra.mrb[0].mxu1 %v6349_v46 }
  0x25   :  { %4759 = vmatpush3.bf16.msra.mxu1 %v4756_v42  ;;  %184 = vmatprep.mubr.f32.mxu1 %v7743_v3  ;;  %v390_v42 = vld [vmem:[%s7728_s3 + $0x100] sm:$0xff] }
  0x26   :  { %476 = vmatmul.mubr.f32.vlgmr.msra.gmra.mrb[0].mxu0 %v6355_v47  ;;  %4761 = vmatprep.subr.bf16.mxu1 %v4760_v48  ;;  %v6508_v45 = vpack.c.bf16 %v393_v43, %v390_v42 }
  0x27   :  { %4847 = vmatpush1.bf16.msra.mxu0 %v6124_v13  ;;  %650 = vmatprep.mubr.f32.mxu0 %v7743_v3 }
  0x28   :  { %185 = vmatmul.mubr.f32.gmra.mrb[2].mxu1 %v6369_v51  ;;  %4849 = vmatprep.subr.bf16.mxu0 %v6146_v22 }
  0x29   :  { %4763 = vmatpush3.bf16.msra.mxu1 %v4760_v48  ;;  %190 = vmatprep.mubr.f32.mxu1 %v7743_v3  ;;  %v399_v48 = vld [vmem:[%s7728_s3 + $0x148] sm:$0xff] }
  0x2a   :  { %4765 = vmatprep.subr.bf16.mxu1 %v4764_v53 }
  0x2b   :  { %4851 = vmatpush1.bf16.msra.mxu0 %v6157_v26 }
  0x2c   :  { %191 = vmatmul.mubr.f32.gmra.mrb[4].mxu1 %v6386_v56  ;;  %4853 = vmatprep.subr.bf16.mxu0 %v6178_v35 }
  0x2d   :  { %4767 = vmatpush3.bf16.msra.mxu1 %v4764_v53  ;;  %196 = vmatprep.mubr.f32.mxu1 %v7743_v3 }
  0x2e   :  { %4769 = vmatprep.subr.bf16.mxu1 %v4768_v58 }
  0x2f   :  { %4855 = vmatpush1.bf16.msra.mxu0 %v6190_v39 }
  0x30   :  { %197 = vmatmul.mubr.f32.gmra.mrb[6].mxu1 %v44_v61  ;;  %4857 = vmatprep.subr.bf16.mxu0 %v6202_v44 }
  0x31   :  { %4771 = vmatpush3.bf16.msra.mxu1 %v4768_v58  ;;  %202 = vmatprep.mubr.f32.mxu1 %v7743_v3  ;;  %v97_v58 = vld [vmem:[%s7731_s4] sm:$0x7] }
  0x32   :  { %4773 = vmatprep.subr.bf16.mxu1 %v4772_v62 }
  0x33   :  { %4859 = vmatpush1.bf16.msra.mxu0 %v6223_v52 }
  0x34   :  { %203 = vmatmul.mubr.f32.gmra.mrb[8].mxu1 %v45_v2  ;;  %4861 = vmatprep.subr.bf16.mxu0 %v6235_v57 }
  0x35   :  { %4775 = vmatpush3.bf16.msra.mxu1 %v4772_v62  ;;  %208 = vmatprep.mubr.f32.mxu1 %v7743_v3 }
  0x36   :  { %4777 = vmatprep.subr.bf16.mxu1 %v4776_v4 }
  0x37   :  { %4863 = vmatpush1.bf16.msra.mxu0 %v6253_v0 }
  0x38   :  { %209 = vmatmul.mubr.f32.gmra.mrb[10].mxu1 %v46_v8  ;;  %4865 = vmatprep.subr.bf16.mxu0 %v6265_v6 }
  0x39   :  { %4779 = vmatpush3.bf16.msra.mxu1 %v4776_v4  ;;  %214 = vmatprep.mubr.f32.mxu1 %v7743_v3 }
  0x3a   :  { %4781 = vmatprep.subr.bf16.mxu1 %v4780_v10 }
  0x3b   :  { %4867 = vmatpush1.bf16.msra.mxu0 %v6283_v15 }
  0x3c   :  { %215 = vmatmul.mubr.f32.gmra.mrb[12].mxu1 %v47_v14  ;;  %4869 = vmatprep.subr.bf16.mxu0 %v6295_v20 }
  0x3d   :  { %4783 = vmatpush3.bf16.msra.mxu1 %v4780_v10  ;;  %220 = vmatprep.mubr.f32.mxu1 %v7743_v3 }
  0x3e   :  { %4785 = vmatprep.subr.bf16.mxu1 %v4784_v16 }
  0x3f   :  { %4871 = vmatpush1.bf16.msra.mxu0 %v6313_v29 }
  0x40   :  { %221 = vmatmul.mubr.f32.gmra.mrb[14].mxu1 %v48_v17  ;;  %4873 = vmatprep.subr.bf16.mxu0 %v6325_v34 }
  0x41   :  { %4787 = vmatpush3.bf16.msra.mxu1 %v4784_v16  ;;  %4064 = vmatprep.mubr.f32.mxu1 %v6349_v46  ;;  %v396_v46 = vld [vmem:[%s7728_s3 + $0x130] sm:$0xff] }
  0x42   :  { %4820 = vmatprep.subr.bf16.mxu1 %v7745_v23  ;;  %v6518_v49 = vpack.c.bf16 %v399_v48, %v396_v46 }
  0x43   :  { %4875 = vmatpush1.bf16.msra.mxu0 %v6337_v41 }
  0x44   :  { %4065 = vmatmul.mubr.f32.vlgmr.msra.gmra.mrb[16].mxu1 %v6369_v51  ;;  %4901 = vmatprep.subr.bf16.mxu0 %v6113_v9  ;;  %v405_v51 = vld [vmem:[%s7728_s3 + $0x178] sm:$0xff] }
  0x45   :  { %4822 = vmatpush3.bf16.msra.mxu1 %v6452_v21  ;;  %4067 = vmatprep.mubr.f32.mxu1 %v6386_v56  ;;  %v6528_v53 = vpack.c.bf16 %v405_v51, %v402_v50  ;;  %v7742_v56 = vsub.s32 0, %v6552_v55 }
  0x46   :  { %4823 = vmatprep.subr.bf16.mxu1 %v7745_v23 }
  0x47   :  { %v102_v60 = vrot.slane %v97_v58, %v7742_v56 }
  0x48   :  { %4068 = vmatmul.mubr.f32.gmra.mrb[18].mxu1 %v44_v61  ;;  %v106_v61 = vrot.slane %v97_v58, %v7741_v59 }
  0x49   :  { %4825 = vmatpush3.bf16.msra.mxu1 %v6465_v27  ;;  %4070 = vmatprep.mubr.f32.mxu1 %v45_v2 }
  0x4a   :  { %4826 = vmatprep.subr.bf16.mxu1 %v7745_v23 }
  0x4c   :  { %4071 = vmatmul.mubr.f32.gmra.mrb[20].mxu1 %v46_v8 }
  0x4d   :  { %4828 = vmatpush3.bf16.msra.mxu1 %v6476_v31  ;;  %4073 = vmatprep.mubr.f32.mxu1 %v47_v14 }
  0x4e   :  { %4829 = vmatprep.subr.bf16.mxu1 %v7745_v23 }
  0x50   :  { %4074 = vmatmul.mubr.f32.gmra.mrb[22].mxu1 %v48_v17 }
  0x51   :  { %4831 = vmatpush3.bf16.msra.mxu1 %v6486_v36  ;;  %4108 = vmatprep.mubr.msk.f32.mxu1 %vm6027_vm0, %v7743_v3 }
  0x52   :  { %4832 = vmatprep.subr.bf16.mxu1 %v7745_v23 }
  0x55   :  { %4834 = vmatpush3.bf16.msra.mxu1 %v6496_v40 }
  0x56   :  { %4835 = vmatprep.subr.bf16.mxu1 %v7745_v23 }
  0x59   :  { %4837 = vmatpush3.bf16.msra.mxu1 %v6508_v45 }
  0x5a   :  { %4838 = vmatprep.subr.bf16.mxu1 %v7745_v23 }
  0x5d   :  { %4840 = vmatpush3.bf16.msra.mxu1 %v6518_v49 }
  0x5e   :  { %4841 = vmatprep.subr.bf16.mxu1 %v7745_v23 }
  0x61   :  { %4843 = vmatpush3.bf16.msra.mxu1 %v6528_v53 }
  0x62   :  { %4876 = vmatprep.subr.bf16.mxu1 %v7745_v23 }
  0x64   :  { %4109 = vmatmul.mubr.f32.vlgmr.msra.gmra.mrb[24].mxu1 %v6355_v47 }
  0x65   :  { %4878 = vmatpush3.bf16.msra.mxu1 %v6452_v21  ;;  %4143 = vmatprep.mubr.msk.f32.mxu1 %vm6027_vm0, %v7743_v3 }
  0x66   :  { %4879 = vmatprep.subr.bf16.mxu1 %v7745_v23 }
  0x69   :  { %4881 = vmatpush3.bf16.msra.mxu1 %v6465_v27 }
  0x6a   :  { %4882 = vmatprep.subr.bf16.mxu1 %v7745_v23 }
  0x6d   :  { %4884 = vmatpush3.bf16.msra.mxu1 %v6476_v31 }
  0x6e   :  { %4885 = vmatprep.subr.bf16.mxu1 %v7745_v23 }
  0x71   :  { %4887 = vmatpush3.bf16.msra.mxu1 %v6486_v36 }
  0x72   :  { %4888 = vmatprep.subr.bf16.mxu1 %v7745_v23 }
  0x75   :  { %4890 = vmatpush3.bf16.msra.mxu1 %v6496_v40 }
  0x76   :  { %4891 = vmatprep.subr.bf16.mxu1 %v7745_v23 }
  0x79   :  { %4893 = vmatpush3.bf16.msra.mxu1 %v6508_v45 }
  0x7a   :  { %4894 = vmatprep.subr.bf16.mxu1 %v7745_v23 }
  0x7d   :  { %4896 = vmatpush3.bf16.msra.mxu1 %v6518_v49 }
  0x7e   :  { %4897 = vmatprep.subr.bf16.mxu1 %v7745_v23 }
  0x81   :  { %4899 = vmatpush3.bf16.msra.mxu1 %v6528_v53 }
  0x82   :  { %4932 = vmatprep.subr.bf16.mxu1 %v7745_v23 }
  0xf7   :  { %v180_v62 = vpop.f32.mrb[0].mxu1 }
  0xf8   :  { %v181_v63 = vadd.f32 %v180_v62, %v102_v60  ;;  %v182_v1 = vpop.f32.mrb[1].mxu1  ;;  %v7740_v62 = vsub.s32 2, %v6552_v55 }
  0xf9   :  { %v477_v2 = vpop.f32.mrb[0].mxu0  ;;  %v183_v4 = vadd.f32 %v182_v1, %v106_v61 }
  0xfa   :  { %v479_v5 = vpop.f32.mrb[1].mxu0  ;;  %v552_v7 = vadd.f32 %v477_v2, %v181_v63 }
  0xfb   :  { %v559_v8 = vadd.f32 %v479_v5, %v183_v4  ;;  %v186_v10 = vpop.f32.mrb[2].mxu1  ;;  %v110_v5 = vrot.slane %v97_v58, %v7740_v62 }
  0xfc   :  { %v6563_v11 = vadd.f32 %v186_v10, %v102_v60  ;;  %v188_v12 = vpop.f32.mrb[3].mxu1 }
  0xfd   :  { %v6565_v14 = vadd.f32 %v188_v12, %v106_v61 }
  0xff   :  { %v192_v16 = vpop.f32.mrb[4].mxu1 }
 0x100   :  { %v6567_v17 = vadd.f32 %v192_v16, %v102_v60  ;;  %v194_v18 = vpop.f32.mrb[5].mxu1 }
 0x101   :  { %v6569_v19 = vadd.f32 %v194_v18, %v106_v61 }
 0x103   :  { %v198_v24 = vpop.f32.mrb[6].mxu1 }
 0x104   :  { %v6571_v25 = vadd.f32 %v198_v24, %v102_v60  ;;  %v200_v28 = vpop.f32.mrb[7].mxu1  ;;  %v3653_v24 = vmul.f32 -1.442695, %v552_v7 }
 0x105   :  { %v6573_v30 = vadd.f32 %v200_v28, %v106_v61 }
 0x106   :  { %5847 = vpow2.f32 %v3653_v24  ;;  %v6611_v24 = vld [vmem:[%s7732_s5] ss:$0 sm:$0xff] }
 0x107   :  { %v204_v32 = vpop.f32.mrb[8].mxu1 }
 0x108   :  { %v6575_v33 = vadd.f32 %v204_v32, %v102_v60  ;;  %v206_v37 = vpop.f32.mrb[9].mxu1 }
 0x109   :  { %v6577_v38 = vadd.f32 %v206_v37, %v106_v61 }
 0x10b   :  { %v210_v42 = vpop.f32.mrb[10].mxu1 }
 0x10c   :  { %v6579_v43 = vadd.f32 %v210_v42, %v102_v60  ;;  %v212_v46 = vpop.f32.mrb[11].mxu1 }
 0x10d   :  { %v6581_v48 = vadd.f32 %v212_v46, %v106_v61 }
 0x10f   :  { %v216_v50 = vpop.f32.mrb[12].mxu1 }
 0x110   :  { %v6583_v51 = vadd.f32 %v216_v50, %v102_v60  ;;  %v218_v54 = vpop.f32.mrb[13].mxu1  ;;  %v5848_v7 = vpop.eup %5847 }
 0x111   :  { %v6586_v63 = vadd.f32 %v218_v54, %v106_v61 }
 0x113   :  { %v222_v1 = vpop.f32.mrb[14].mxu1 }
 0x114   :  { %v6588_v2 = vadd.f32 %v222_v1, %v102_v60  ;;  %v224_v4 = vpop.f32.mrb[15].mxu1 }
 0x115   :  { %v6592_v10 = vadd.f32 %v224_v4, %v106_v61  ;;  %v3654_v4 = vmul.f32 -1.442695, %v559_v8 }
 0x117   :  { %v4066_v12 = vpop.f32.mrb[16].mxu1  ;;  %5849 = vpow2.f32 %v3654_v4 }
 0x118   :  { %v6594_v16 = vadd.f32 %v4066_v12, %v110_v5  ;;  %v293_v18 = vpop.f32.mrb[17].mxu1 }
 0x119   :  { %v294_v8 = vadd.f32 %v293_v18, %v110_v5 }
 0x11b   :  { %v4069_v28 = vpop.f32.mrb[18].mxu1 }
 0x11c   :  { %v6596_v32 = vadd.f32 %v4069_v28, %v110_v5  ;;  %v303_v37 = vpop.f32.mrb[19].mxu1  ;;  %v556_v28 = vadd.f32 1.0, %v5848_v7 }
 0x11d   :  { %v6598_v42 = vadd.f32 %v303_v37, %v110_v5 }
 0x11e   :  { %5851 = vrcp.f32 %v556_v28 }
 0x11f   :  { %v4072_v60 = vpop.f32.mrb[20].mxu1 }
 0x120   :  { %v6600_v46 = vadd.f32 %v4072_v60, %v110_v5  ;;  %v313_v50 = vpop.f32.mrb[21].mxu1 }
 0x121   :  { %v6602_v54 = vadd.f32 %v313_v50, %v110_v5  ;;  %v5850_v37 = vpop.eup %5849 }
 0x122   :  { %v563_v60 = vadd.f32 1.0, %v5850_v37 }
 0x123   :  { %v4075_v58 = vpop.f32.mrb[22].mxu1 }
 0x124   :  { %v6604_v61 = vadd.f32 %v4075_v58, %v110_v5  ;;  %v323_v1 = vpop.f32.mrb[23].mxu1  ;;  %5853 = vrcp.f32 %v563_v60 }
 0x125   :  { %v6606_v12 = vadd.f32 %v323_v1, %v110_v5 }
 0x128   :  { %v5852_v59 = vpop.eup %5851 }
 0x12e   :  { %v5854_v4 = vpop.eup %5853 }
 0x12f   :  { %v576_v7 = vsub.f32 1.0, %v5854_v4  ;;  %v578_v23 = vmul.f32 %v5854_v4, %v6355_v47 }
 0x137   :  { %v548_v50 = vpop.f32.mrb[24].mxu1 }
 0x138   :  { %v572_v62 = vadd.f32 %v6611_v24, %v548_v50  ;;  %v4110_v58 = vpop.f32.mrb[25].mxu1 }
 0x13a   :  { %v573_v1 = vmul.f32 %v5852_v59, %v572_v62  ;;  %v7750_v59 = vmov 0.0|0.0  }
 0x13c   :  { %v574_v56 = vadd.f32 %v573_v1, %v294_v8 }
 0x13e   :  { %5855 = vtanh.f32 %v574_v56  ;;  %v7751_v56 = vmov 0.0  }
 0x148   :  { %v5856_v28 = vpop.eup %5855 }
 0x149   :  { %v577_v3 = vmul.f32 %v5856_v28, %v576_v7 }
 0x14b   :  { %v6615_v55 = vadd.f32 %v578_v23, %v577_v3 }
 0x14d   :  { %651 = vmatmul.mubr.f32.vlgmr.msra.gmra.mrb[2].mxu0 %v6615_v55  ;;  %4144 = vmatmul.mubr.f32.vlgmr.msra.gmra.mrb[26].mxu1 %v6615_v55 }
 0x14e   :  { %4903 = vmatpush1.bf16.msra.mxu0 %v6124_v13  ;;  %4934 = vmatpush3.bf16.msra.mxu1 %v6452_v21 }
 0x14f   :  { %4905 = vmatprep.subr.bf16.mxu0 %v6146_v22  ;;  %4935 = vmatprep.subr.bf16.mxu1 %v7750_v59 }
 0x150   :  { %819 = vmatprep.mubr.f32.mxu0 %v7751_v56  ;;  %4178 = vmatprep.mubr.msk.f32.mxu1 %vm6027_vm0, %v7751_v56 }
 0x152   :  { %4907 = vmatpush1.bf16.msra.mxu0 %v6157_v26  ;;  %4937 = vmatpush3.bf16.msra.mxu1 %v6465_v27 }
 0x153   :  { %4909 = vmatprep.subr.bf16.mxu0 %v6178_v35  ;;  %4938 = vmatprep.subr.bf16.mxu1 %v7750_v59 }
 0x156   :  { %4911 = vmatpush1.bf16.msra.mxu0 %v6190_v39  ;;  %4940 = vmatpush3.bf16.msra.mxu1 %v6476_v31 }
 0x157   :  { %4913 = vmatprep.subr.bf16.mxu0 %v6202_v44  ;;  %4941 = vmatprep.subr.bf16.mxu1 %v7750_v59 }
 0x15a   :  { %4915 = vmatpush1.bf16.msra.mxu0 %v6223_v52  ;;  %4943 = vmatpush3.bf16.msra.mxu1 %v6486_v36 }
 0x15b   :  { %4917 = vmatprep.subr.bf16.mxu0 %v6235_v57  ;;  %4944 = vmatprep.subr.bf16.mxu1 %v7750_v59 }
 0x15e   :  { %4919 = vmatpush1.bf16.msra.mxu0 %v6253_v0  ;;  %4946 = vmatpush3.bf16.msra.mxu1 %v6496_v40 }
 0x15f   :  { %4921 = vmatprep.subr.bf16.mxu0 %v6265_v6  ;;  %4947 = vmatprep.subr.bf16.mxu1 %v7750_v59 }
 0x162   :  { %4923 = vmatpush1.bf16.msra.mxu0 %v6283_v15  ;;  %4949 = vmatpush3.bf16.msra.mxu1 %v6508_v45 }
 0x163   :  { %4925 = vmatprep.subr.bf16.mxu0 %v6295_v20  ;;  %4950 = vmatprep.subr.bf16.mxu1 %v7750_v59 }
 0x166   :  { %4927 = vmatpush1.bf16.msra.mxu0 %v6313_v29  ;;  %4952 = vmatpush3.bf16.msra.mxu1 %v6518_v49 }
 0x167   :  { %4929 = vmatprep.subr.bf16.mxu0 %v6325_v34  ;;  %4953 = vmatprep.subr.bf16.mxu1 %v7750_v59 }
 0x16a   :  { %4931 = vmatpush1.bf16.msra.mxu0 %v6337_v41  ;;  %4955 = vmatpush3.bf16.msra.mxu1 %v6528_v53 }
 0x16b   :  { %4957 = vmatprep.subr.bf16.mxu0 %v6113_v9  ;;  %4988 = vmatprep.subr.bf16.mxu1 %v7750_v59 }
 0x220   :  { %v652_v3 = vpop.f32.mrb[2].mxu0  ;;  %v723_v47 = vpop.f32.mrb[26].mxu1 }
 0x221   :  { %v727_v23 = vadd.f32 %v652_v3, %v6563_v11  ;;  %v654_v62 = vpop.f32.mrb[3].mxu0  ;;  %v4145_v5 = vpop.f32.mrb[27].mxu1  ;;  %v741_v4 = vadd.f32 %v6611_v24, %v723_v47 }
 0x222   :  { %v734_v18 = vadd.f32 %v654_v62, %v6565_v14 }
 0x223   :  { %v3656_v37 = vmul.f32 -1.442695, %v727_v23 }
 0x224   :  { %v3657_v60 = vmul.f32 -1.442695, %v734_v18 }
 0x225   :  { %5857 = vpow2.f32 %v3656_v37 }
 0x226   :  { %5859 = vpow2.f32 %v3657_v60 }
 0x22f   :  { %v5858_v50 = vpop.eup %5857 }
 0x230   :  { %v731_v58 = vadd.f32 1.0, %v5858_v50  ;;  %v5860_v8 = vpop.eup %5859 }
 0x231   :  { %v738_v1 = vadd.f32 1.0, %v5860_v8 }
 0x232   :  { %5861 = vrcp.f32 %v731_v58 }
 0x233   :  { %5863 = vrcp.f32 %v738_v1 }
 0x23c   :  { %v5862_v7 = vpop.eup %5861 }
 0x23d   :  { %v742_v28 = vmul.f32 %v5862_v7, %v741_v4  ;;  %v5864_v3 = vpop.eup %5863 }
 0x23e   :  { %v745_v5 = vsub.f32 1.0, %v5864_v3  ;;  %v747_v62 = vmul.f32 %v5864_v3, %v6615_v55 }
 0x23f   :  { %v743_v11 = vadd.f32 %v742_v28, %v6594_v16 }
 0x241   :  { %5865 = vtanh.f32 %v743_v11 }
 0x24b   :  { %v5866_v14 = vpop.eup %5865 }
 0x24c   :  { %v746_v23 = vmul.f32 %v5866_v14, %v745_v5 }
 0x24e   :  { %v6659_v18 = vadd.f32 %v747_v62, %v746_v23 }
 0x250   :  { %820 = vmatmul.mubr.f32.vlgmr.msra.gmra.mrb[4].mxu0 %v6659_v18  ;;  %4179 = vmatmul.mubr.f32.vlgmr.msra.gmra.mrb[28].mxu1 %v6659_v18 }
 0x251   :  { %4959 = vmatpush1.bf16.msra.mxu0 %v6124_v13  ;;  %4990 = vmatpush3.bf16.msra.mxu1 %v6452_v21 }
 0x252   :  { %4961 = vmatprep.subr.bf16.mxu0 %v6146_v22  ;;  %4991 = vmatprep.subr.bf16.mxu1 %v7750_v59 }
 0x253   :  { %988 = vmatprep.mubr.f32.mxu0 %v7751_v56  ;;  %4213 = vmatprep.mubr.msk.f32.mxu1 %vm6027_vm0, %v7751_v56 }
 0x255   :  { %4963 = vmatpush1.bf16.msra.mxu0 %v6157_v26  ;;  %4993 = vmatpush3.bf16.msra.mxu1 %v6465_v27 }
 0x256   :  { %4965 = vmatprep.subr.bf16.mxu0 %v6178_v35  ;;  %4994 = vmatprep.subr.bf16.mxu1 %v7750_v59 }
 0x259   :  { %4967 = vmatpush1.bf16.msra.mxu0 %v6190_v39  ;;  %4996 = vmatpush3.bf16.msra.mxu1 %v6476_v31 }
 0x25a   :  { %4969 = vmatprep.subr.bf16.mxu0 %v6202_v44  ;;  %4997 = vmatprep.subr.bf16.mxu1 %v7750_v59 }
 0x25d   :  { %4971 = vmatpush1.bf16.msra.mxu0 %v6223_v52  ;;  %4999 = vmatpush3.bf16.msra.mxu1 %v6486_v36 }
 0x25e   :  { %4973 = vmatprep.subr.bf16.mxu0 %v6235_v57  ;;  %5000 = vmatprep.subr.bf16.mxu1 %v7750_v59 }
 0x261   :  { %4975 = vmatpush1.bf16.msra.mxu0 %v6253_v0  ;;  %5002 = vmatpush3.bf16.msra.mxu1 %v6496_v40 }
 0x262   :  { %4977 = vmatprep.subr.bf16.mxu0 %v6265_v6  ;;  %5003 = vmatprep.subr.bf16.mxu1 %v7750_v59 }
 0x265   :  { %4979 = vmatpush1.bf16.msra.mxu0 %v6283_v15  ;;  %5005 = vmatpush3.bf16.msra.mxu1 %v6508_v45 }
 0x266   :  { %4981 = vmatprep.subr.bf16.mxu0 %v6295_v20  ;;  %5006 = vmatprep.subr.bf16.mxu1 %v7750_v59 }
 0x269   :  { %4983 = vmatpush1.bf16.msra.mxu0 %v6313_v29  ;;  %5008 = vmatpush3.bf16.msra.mxu1 %v6518_v49 }
 0x26a   :  { %4985 = vmatprep.subr.bf16.mxu0 %v6325_v34  ;;  %5009 = vmatprep.subr.bf16.mxu1 %v7750_v59 }
 0x26d   :  { %4987 = vmatpush1.bf16.msra.mxu0 %v6337_v41  ;;  %5011 = vmatpush3.bf16.msra.mxu1 %v6528_v53 }
 0x26e   :  { %5013 = vmatprep.subr.bf16.mxu0 %v6113_v9  ;;  %5044 = vmatprep.subr.bf16.mxu1 %v7750_v59 }
 0x323   :  { %v821_v16 = vpop.f32.mrb[4].mxu0  ;;  %v892_v47 = vpop.f32.mrb[28].mxu1 }
 0x324   :  { %v896_v37 = vadd.f32 %v821_v16, %v6567_v17  ;;  %v823_v60 = vpop.f32.mrb[5].mxu0  ;;  %v4180_v50 = vpop.f32.mrb[29].mxu1  ;;  %v910_v3 = vadd.f32 %v6611_v24, %v892_v47 }
 0x325   :  { %v903_v58 = vadd.f32 %v823_v60, %v6569_v19 }
 0x326   :  { %v3658_v8 = vmul.f32 -1.442695, %v896_v37 }
 0x327   :  { %v3659_v1 = vmul.f32 -1.442695, %v903_v58 }
 0x328   :  { %5867 = vpow2.f32 %v3658_v8 }
 0x329   :  { %5869 = vpow2.f32 %v3659_v1 }
 0x332   :  { %v5868_v4 = vpop.eup %5867 }
 0x333   :  { %v900_v7 = vadd.f32 1.0, %v5868_v4  ;;  %v5870_v28 = vpop.eup %5869 }
 0x334   :  { %v907_v11 = vadd.f32 1.0, %v5870_v28 }
 0x335   :  { %5871 = vrcp.f32 %v900_v7 }
 0x336   :  { %5873 = vrcp.f32 %v907_v11 }
 0x33f   :  { %v5872_v5 = vpop.eup %5871 }
 0x340   :  { %v911_v14 = vmul.f32 %v5872_v5, %v910_v3  ;;  %v5874_v23 = vpop.eup %5873 }
 0x341   :  { %v914_v62 = vsub.f32 1.0, %v5874_v23  ;;  %v916_v37 = vmul.f32 %v5874_v23, %v6659_v18 }
 0x342   :  { %v912_v17 = vadd.f32 %v911_v14, %v6598_v42 }
 0x344   :  { %5875 = vtanh.f32 %v912_v17 }
 0x34e   :  { %v5876_v19 = vpop.eup %5875 }
 0x34f   :  { %v915_v16 = vmul.f32 %v5876_v19, %v914_v62 }
 0x351   :  { %v6703_v60 = vadd.f32 %v916_v37, %v915_v16 }
 0x353   :  { %989 = vmatmul.mubr.f32.vlgmr.msra.gmra.mrb[6].mxu0 %v6703_v60  ;;  %4214 = vmatmul.mubr.f32.vlgmr.msra.gmra.mrb[30].mxu1 %v6703_v60 }
 0x354   :  { %5015 = vmatpush1.bf16.msra.mxu0 %v6124_v13  ;;  %5046 = vmatpush3.bf16.msra.mxu1 %v6452_v21 }
 0x355   :  { %5017 = vmatprep.subr.bf16.mxu0 %v6146_v22  ;;  %5047 = vmatprep.subr.bf16.mxu1 %v7750_v59 }
 0x356   :  { %1157 = vmatprep.mubr.f32.mxu0 %v7751_v56  ;;  %4248 = vmatprep.mubr.msk.f32.mxu1 %vm6027_vm0, %v7751_v56 }
 0x358   :  { %5019 = vmatpush1.bf16.msra.mxu0 %v6157_v26  ;;  %5049 = vmatpush3.bf16.msra.mxu1 %v6465_v27 }
 0x359   :  { %5021 = vmatprep.subr.bf16.mxu0 %v6178_v35  ;;  %5050 = vmatprep.subr.bf16.mxu1 %v7750_v59 }
 0x35c   :  { %5023 = vmatpush1.bf16.msra.mxu0 %v6190_v39  ;;  %5052 = vmatpush3.bf16.msra.mxu1 %v6476_v31 }
 0x35d   :  { %5025 = vmatprep.subr.bf16.mxu0 %v6202_v44  ;;  %5053 = vmatprep.subr.bf16.mxu1 %v7750_v59 }
 0x360   :  { %5027 = vmatpush1.bf16.msra.mxu0 %v6223_v52  ;;  %5055 = vmatpush3.bf16.msra.mxu1 %v6486_v36 }
 0x361   :  { %5029 = vmatprep.subr.bf16.mxu0 %v6235_v57  ;;  %5056 = vmatprep.subr.bf16.mxu1 %v7750_v59 }
 0x364   :  { %5031 = vmatpush1.bf16.msra.mxu0 %v6253_v0  ;;  %5058 = vmatpush3.bf16.msra.mxu1 %v6496_v40 }
 0x365   :  { %5033 = vmatprep.subr.bf16.mxu0 %v6265_v6  ;;  %5059 = vmatprep.subr.bf16.mxu1 %v7750_v59 }
 0x368   :  { %5035 = vmatpush1.bf16.msra.mxu0 %v6283_v15  ;;  %5061 = vmatpush3.bf16.msra.mxu1 %v6508_v45 }
 0x369   :  { %5037 = vmatprep.subr.bf16.mxu0 %v6295_v20  ;;  %5062 = vmatprep.subr.bf16.mxu1 %v7750_v59 }
 0x36c   :  { %5039 = vmatpush1.bf16.msra.mxu0 %v6313_v29  ;;  %5064 = vmatpush3.bf16.msra.mxu1 %v6518_v49 }
 0x36d   :  { %5041 = vmatprep.subr.bf16.mxu0 %v6325_v34  ;;  %5065 = vmatprep.subr.bf16.mxu1 %v7750_v59 }
 0x370   :  { %5043 = vmatpush1.bf16.msra.mxu0 %v6337_v41  ;;  %5067 = vmatpush3.bf16.msra.mxu1 %v6528_v53 }
 0x371   :  { %5069 = vmatprep.subr.bf16.mxu0 %v6113_v9  ;;  %5100 = vmatprep.subr.bf16.mxu1 %v7750_v59 }
 0x426   :  { %v990_v42 = vpop.f32.mrb[6].mxu0  ;;  %v1061_v47 = vpop.f32.mrb[30].mxu1 }
 0x427   :  { %v1065_v50 = vadd.f32 %v990_v42, %v6571_v25  ;;  %v992_v58 = vpop.f32.mrb[7].mxu0  ;;  %v4215_v8 = vpop.f32.mrb[31].mxu1  ;;  %v1079_v14 = vadd.f32 %v6611_v24, %v1061_v47 }
 0x428   :  { %v1072_v1 = vadd.f32 %v992_v58, %v6573_v30 }
 0x429   :  { %v3660_v4 = vmul.f32 -1.442695, %v1065_v50 }
 0x42a   :  { %v3661_v7 = vmul.f32 -1.442695, %v1072_v1 }
 0x42b   :  { %5877 = vpow2.f32 %v3660_v4 }
 0x42c   :  { %5879 = vpow2.f32 %v3661_v7 }
 0x435   :  { %v5878_v28 = vpop.eup %5877 }
 0x436   :  { %v1069_v11 = vadd.f32 1.0, %v5878_v28  ;;  %v5880_v3 = vpop.eup %5879 }
 0x437   :  { %v1076_v5 = vadd.f32 1.0, %v5880_v3 }
 0x438   :  { %5881 = vrcp.f32 %v1069_v11 }
 0x439   :  { %5883 = vrcp.f32 %v1076_v5 }
 0x442   :  { %v5882_v17 = vpop.eup %5881 }
 0x443   :  { %v1080_v23 = vmul.f32 %v5882_v17, %v1079_v14  ;;  %v5884_v62 = vpop.eup %5883 }
 0x444   :  { %v1083_v19 = vsub.f32 1.0, %v5884_v62  ;;  %v1085_v37 = vmul.f32 %v5884_v62, %v6703_v60 }
 0x445   :  { %v1081_v25 = vadd.f32 %v1080_v23, %v6596_v32 }
 0x447   :  { %5885 = vtanh.f32 %v1081_v25 }
 0x451   :  { %v5886_v30 = vpop.eup %5885 }
 0x452   :  { %v1084_v16 = vmul.f32 %v5886_v30, %v1083_v19 }
 0x454   :  { %v6747_v42 = vadd.f32 %v1085_v37, %v1084_v16 }
 0x456   :  { %1158 = vmatmul.mubr.f32.vlgmr.msra.gmra.mrb[8].mxu0 %v6747_v42  ;;  %4249 = vmatmul.mubr.f32.vlgmr.msra.gmra.mrb[32].mxu1 %v6747_v42 }
 0x457   :  { %5071 = vmatpush1.bf16.msra.mxu0 %v6124_v13  ;;  %5102 = vmatpush3.bf16.msra.mxu1 %v6452_v21 }
 0x458   :  { %5073 = vmatprep.subr.bf16.mxu0 %v6146_v22  ;;  %5103 = vmatprep.subr.bf16.mxu1 %v7750_v59 }
 0x459   :  { %1326 = vmatprep.mubr.f32.mxu0 %v7751_v56  ;;  %4283 = vmatprep.mubr.msk.f32.mxu1 %vm6027_vm0, %v7751_v56 }
 0x45b   :  { %5075 = vmatpush1.bf16.msra.mxu0 %v6157_v26  ;;  %5105 = vmatpush3.bf16.msra.mxu1 %v6465_v27 }
 0x45c   :  { %5077 = vmatprep.subr.bf16.mxu0 %v6178_v35  ;;  %5106 = vmatprep.subr.bf16.mxu1 %v7750_v59 }
 0x45f   :  { %5079 = vmatpush1.bf16.msra.mxu0 %v6190_v39  ;;  %5108 = vmatpush3.bf16.msra.mxu1 %v6476_v31 }
 0x460   :  { %5081 = vmatprep.subr.bf16.mxu0 %v6202_v44  ;;  %5109 = vmatprep.subr.bf16.mxu1 %v7750_v59 }
 0x463   :  { %5083 = vmatpush1.bf16.msra.mxu0 %v6223_v52  ;;  %5111 = vmatpush3.bf16.msra.mxu1 %v6486_v36 }
 0x464   :  { %5085 = vmatprep.subr.bf16.mxu0 %v6235_v57  ;;  %5112 = vmatprep.subr.bf16.mxu1 %v7750_v59 }
 0x467   :  { %5087 = vmatpush1.bf16.msra.mxu0 %v6253_v0  ;;  %5114 = vmatpush3.bf16.msra.mxu1 %v6496_v40 }
 0x468   :  { %5089 = vmatprep.subr.bf16.mxu0 %v6265_v6  ;;  %5115 = vmatprep.subr.bf16.mxu1 %v7750_v59 }
 0x46b   :  { %5091 = vmatpush1.bf16.msra.mxu0 %v6283_v15  ;;  %5117 = vmatpush3.bf16.msra.mxu1 %v6508_v45 }
 0x46c   :  { %5093 = vmatprep.subr.bf16.mxu0 %v6295_v20  ;;  %5118 = vmatprep.subr.bf16.mxu1 %v7750_v59 }
 0x46f   :  { %5095 = vmatpush1.bf16.msra.mxu0 %v6313_v29  ;;  %5120 = vmatpush3.bf16.msra.mxu1 %v6518_v49 }
 0x470   :  { %5097 = vmatprep.subr.bf16.mxu0 %v6325_v34  ;;  %5121 = vmatprep.subr.bf16.mxu1 %v7750_v59 }
 0x473   :  { %5099 = vmatpush1.bf16.msra.mxu0 %v6337_v41  ;;  %5123 = vmatpush3.bf16.msra.mxu1 %v6528_v53 }
 0x474   :  { %5125 = vmatprep.subr.bf16.mxu0 %v6113_v9  ;;  %5156 = vmatprep.subr.bf16.mxu1 %v7750_v59 }
 0x529   :  { %v1159_v32 = vpop.f32.mrb[8].mxu0  ;;  %v1230_v47 = vpop.f32.mrb[32].mxu1 }
 0x52a   :  { %v1234_v50 = vadd.f32 %v1159_v32, %v6575_v33  ;;  %v1161_v58 = vpop.f32.mrb[9].mxu0  ;;  %v4250_v8 = vpop.f32.mrb[33].mxu1  ;;  %v1248_v14 = vadd.f32 %v6611_v24, %v1230_v47 }
 0x52b   :  { %v1241_v1 = vadd.f32 %v1161_v58, %v6577_v38 }
 0x52c   :  { %v3662_v4 = vmul.f32 -1.442695, %v1234_v50 }
 0x52d   :  { %v3663_v7 = vmul.f32 -1.442695, %v1241_v1 }
 0x52e   :  { %5887 = vpow2.f32 %v3662_v4 }
 0x52f   :  { %5889 = vpow2.f32 %v3663_v7 }
 0x538   :  { %v5888_v28 = vpop.eup %5887 }
 0x539   :  { %v1238_v11 = vadd.f32 1.0, %v5888_v28  ;;  %v5890_v3 = vpop.eup %5889 }
 0x53a   :  { %v1245_v5 = vadd.f32 1.0, %v5890_v3 }
 0x53b   :  { %5891 = vrcp.f32 %v1238_v11 }
 0x53c   :  { %5893 = vrcp.f32 %v1245_v5 }
 0x545   :  { %v5892_v17 = vpop.eup %5891 }
 0x546   :  { %v1249_v23 = vmul.f32 %v5892_v17, %v1248_v14  ;;  %v5894_v25 = vpop.eup %5893 }
 0x547   :  { %v1252_v62 = vsub.f32 1.0, %v5894_v25  ;;  %v1254_v30 = vmul.f32 %v5894_v25, %v6747_v42 }
 0x548   :  { %v1250_v33 = vadd.f32 %v1249_v23, %v6602_v54 }
 0x54a   :  { %5895 = vtanh.f32 %v1250_v33 }
 0x554   :  { %v5896_v38 = vpop.eup %5895 }
 0x555   :  { %v1253_v19 = vmul.f32 %v5896_v38, %v1252_v62 }
 0x557   :  { %v6791_v16 = vadd.f32 %v1254_v30, %v1253_v19  ;;  %v1781_v30 = vld [vmem:[%s7733_s6 + $0x40] sm:$0xff] }
 0x559   :  { %1327 = vmatmul.mubr.f32.vlgmr.msra.gmra.mrb[10].mxu0 %v6791_v16  ;;  %4284 = vmatmul.mubr.f32.vlgmr.msra.gmra.mrb[34].mxu1 %v6791_v16 }
 0x55a   :  { %5127 = vmatpush1.bf16.msra.mxu0 %v6124_v13  ;;  %5158 = vmatpush3.bf16.msra.mxu1 %v6452_v21 }
 0x55b   :  { %5129 = vmatprep.subr.bf16.mxu0 %v6146_v22  ;;  %5159 = vmatprep.subr.bf16.mxu1 %v7750_v59 }
 0x55c   :  { %1495 = vmatprep.mubr.f32.mxu0 %v7751_v56  ;;  %4318 = vmatprep.mubr.msk.f32.mxu1 %vm6027_vm0, %v7751_v56 }
 0x55e   :  { %5131 = vmatpush1.bf16.msra.mxu0 %v6157_v26  ;;  %5161 = vmatpush3.bf16.msra.mxu1 %v6465_v27 }
 0x55f   :  { %5133 = vmatprep.subr.bf16.mxu0 %v6178_v35  ;;  %5162 = vmatprep.subr.bf16.mxu1 %v7750_v59 }
 0x562   :  { %5135 = vmatpush1.bf16.msra.mxu0 %v6190_v39  ;;  %5164 = vmatpush3.bf16.msra.mxu1 %v6476_v31 }
 0x563   :  { %5137 = vmatprep.subr.bf16.mxu0 %v6202_v44  ;;  %5165 = vmatprep.subr.bf16.mxu1 %v7750_v59 }
 0x566   :  { %5139 = vmatpush1.bf16.msra.mxu0 %v6223_v52  ;;  %5167 = vmatpush3.bf16.msra.mxu1 %v6486_v36 }
 0x567   :  { %5141 = vmatprep.subr.bf16.mxu0 %v6235_v57  ;;  %5168 = vmatprep.subr.bf16.mxu1 %v7750_v59 }
 0x56a   :  { %5143 = vmatpush1.bf16.msra.mxu0 %v6253_v0  ;;  %5170 = vmatpush3.bf16.msra.mxu1 %v6496_v40 }
 0x56b   :  { %5145 = vmatprep.subr.bf16.mxu0 %v6265_v6  ;;  %5171 = vmatprep.subr.bf16.mxu1 %v7750_v59 }
 0x56e   :  { %5147 = vmatpush1.bf16.msra.mxu0 %v6283_v15  ;;  %5173 = vmatpush3.bf16.msra.mxu1 %v6508_v45 }
 0x56f   :  { %5149 = vmatprep.subr.bf16.mxu0 %v6295_v20  ;;  %5174 = vmatprep.subr.bf16.mxu1 %v7750_v59 }
 0x572   :  { %5151 = vmatpush1.bf16.msra.mxu0 %v6313_v29  ;;  %5176 = vmatpush3.bf16.msra.mxu1 %v6518_v49 }
 0x573   :  { %5153 = vmatprep.subr.bf16.mxu0 %v6325_v34  ;;  %5177 = vmatprep.subr.bf16.mxu1 %v7750_v59 }
 0x576   :  { %5155 = vmatpush1.bf16.msra.mxu0 %v6337_v41  ;;  %5179 = vmatpush3.bf16.msra.mxu1 %v6528_v53 }
 0x577   :  { %5181 = vmatprep.subr.bf16.mxu0 %v6113_v9  ;;  %5212 = vmatprep.subr.bf16.mxu1 %v7750_v59 }
 0x62c   :  { %v1328_v54 = vpop.f32.mrb[10].mxu0  ;;  %v1399_v37 = vpop.f32.mrb[34].mxu1 }
 0x62d   :  { %v1403_v32 = vadd.f32 %v1328_v54, %v6579_v43  ;;  %v1330_v47 = vpop.f32.mrb[11].mxu0  ;;  %v4285_v50 = vpop.f32.mrb[35].mxu1  ;;  %v1417_v9 = vadd.f32 %v6611_v24, %v1399_v37  ;;  %v1784_v54 = vld [vmem:[%s7733_s6 + $0x58] sm:$0xff] }
 0x62e   :  { %v1410_v58 = vadd.f32 %v1330_v47, %v6581_v48  ;;  %v1779_v50 = vld [vmem:[%s7733_s6 + $0x30] sm:$0xff] }
 0x62f   :  { %v3664_v8 = vmul.f32 -1.442695, %v1403_v32 }
 0x630   :  { %v3665_v1 = vmul.f32 -1.442695, %v1410_v58  ;;  %v1782_v58 = vld [vmem:[%s7733_s6 + $0x48] sm:$0xff] }
 0x631   :  { %5897 = vpow2.f32 %v3664_v8  ;;  %v1786_v8 = vld [vmem:[%s7733_s6 + $0x68] sm:$0xff] }
 0x632   :  { %5899 = vpow2.f32 %v3665_v1  ;;  %v5272_v1 = vpack.c.bf16 %v1784_v54, %v1781_v30  ;;  %v1816_v30 = vld [vmem:[%s7733_s6 + $0x158] sm:$0xff]  ;;  %v1819_v54 = vld [vmem:[%s7733_s6 + $0x170] sm:$0xff] }
 0x63b   :  { %v5898_v4 = vpop.eup %5897 }
 0x63c   :  { %v1407_v7 = vadd.f32 1.0, %v5898_v4  ;;  %v5900_v28 = vpop.eup %5899  ;;  %v1789_v4 = vld [vmem:[%s7733_s6 + $0x80] sm:$0xff] }
 0x63d   :  { %v1414_v11 = vadd.f32 1.0, %v5900_v28  ;;  %v1790_v28 = vld [vmem:[%s7733_s6 + $0x88] sm:$0xff] }
 0x63e   :  { %5901 = vrcp.f32 %v1407_v7  ;;  %v1787_v7 = vld [vmem:[%s7733_s6 + $0x70] sm:$0xff] }
 0x63f   :  { %5903 = vrcp.f32 %v1414_v11  ;;  %v5242_v11 = vpack.c.bf16 %v1782_v58, %v1779_v50  ;;  %v5264_v58 = vpack.c.bf16 %v1819_v54, %v1816_v30  ;;  %v2124_v30 = vld [vmem:[%s7734_s7 + $0x150] sm:$0xff]  ;;  %v2127_v54 = vld [vmem:[%s7734_s7 + $0x168] sm:$0xff] }
 0x648   :  { %v5902_v3 = vpop.eup %5901 }
 0x649   :  { %v1418_v5 = vmul.f32 %v5902_v3, %v1417_v9  ;;  %v5904_v14 = vpop.eup %5903  ;;  %v5244_v9 = vpack.c.bf16 %v1789_v4, %v1786_v8  ;;  %v5276_v3 = vpack.c.bf16 %v1790_v28, %v1787_v7  ;;  %v1818_v4 = vld [vmem:[%s7733_s6 + $0x168] sm:$0xff]  ;;  %v2089_v28 = vld [vmem:[%s7734_s7 + $0x38] sm:$0xff] }
 0x64a   :  { %v1421_v17 = vsub.f32 1.0, %v5904_v14  ;;  %v1423_v33 = vmul.f32 %v5904_v14, %v6791_v16  ;;  %v1792_v14 = vld [vmem:[%s7733_s6 + $0x98] sm:$0xff] }
 0x64b   :  { %v1419_v43 = vadd.f32 %v1418_v5, %v6600_v46  ;;  %v1776_v46 = vld [vmem:[%s7733_s6 + $0x18] sm:$0xff]  ;;  %v1785_v5 = vld [vmem:[%s7733_s6 + $0x60] sm:$0xff] }
 0x64d   :  { %5905 = vtanh.f32 %v1419_v43  ;;  %v1788_v43 = vld [vmem:[%s7733_s6 + $0x78] sm:$0xff] }
 0x657   :  { %v5906_v48 = vpop.eup %5905 }
 0x658   :  { %v1422_v23 = vmul.f32 %v5906_v48, %v1421_v17  ;;  %v1795_v17 = vld [vmem:[%s7733_s6 + $0xb0] sm:$0xff]  ;;  %v1793_v48 = vld [vmem:[%s7733_s6 + $0xa0] sm:$0xff] }
 0x65a   :  { %v6835_v25 = vadd.f32 %v1423_v33, %v1422_v23  ;;  %v1796_v23 = vld [vmem:[%s7733_s6 + $0xb8] sm:$0xff]  ;;  %v5246_v33 = vpack.c.bf16 %v1788_v43, %v1785_v5  ;;  %v2091_v5 = vld [vmem:[%s7734_s7 + $0x48] sm:$0xff] }
 0x65c   :  { %1496 = vmatmul.mubr.f32.vlgmr.msra.gmra.mrb[12].mxu0 %v6835_v25  ;;  %4319 = vmatmul.mubr.f32.vlgmr.msra.gmra.mrb[36].mxu1 %v6835_v25 }
 0x65d   :  { %5183 = vmatpush1.bf16.msra.mxu0 %v6124_v13  ;;  %5214 = vmatpush3.bf16.msra.mxu1 %v6452_v21  ;;  %v1774_v13 = vld [vmem:[%s7733_s6 + $0x8] sm:$0xff] }
 0x65e   :  { %5185 = vmatprep.subr.bf16.mxu0 %v6146_v22  ;;  %5215 = vmatprep.subr.bf16.mxu1 %v7750_v59  ;;  %v1777_v22 = vld [vmem:[%s7733_s6 + $0x20] sm:$0xff] }
 0x65f   :  { %1664 = vmatprep.mubr.f32.mxu0 %v7751_v56  ;;  %4353 = vmatprep.mubr.msk.f32.mxu1 %vm6027_vm0, %v7751_v56 }
 0x661   :  { %5187 = vmatpush1.bf16.msra.mxu0 %v6157_v26  ;;  %5217 = vmatpush3.bf16.msra.mxu1 %v6465_v27  ;;  %v1775_v26 = vld [vmem:[%s7733_s6 + $0x10] sm:$0xff] }
 0x662   :  { %5189 = vmatprep.subr.bf16.mxu0 %v6178_v35  ;;  %5218 = vmatprep.subr.bf16.mxu1 %v7750_v59  ;;  %v5236_v35 = vpack.c.bf16 %v1777_v22, %v1774_v13  ;;  %v5248_v13 = vpack.c.bf16 %v1795_v17, %v1792_v14  ;;  %v5280_v22 = vpack.c.bf16 %v1796_v23, %v1793_v48  ;;  %v2095_v14 = vld [vmem:[%s7734_s7 + $0x68] sm:$0xff]  ;;  %v2098_v17 = vld [vmem:[%s7734_s7 + $0x80] sm:$0xff] }
 0x663   :  { %v7090_v48 = vpack.c.bf16 %v2098_v17, %v2095_v14  ;;  %v2094_v23 = vld [vmem:[%s7734_s7 + $0x60] sm:$0xff]  ;;  %v2120_v14 = vld [vmem:[%s7734_s7 + $0x130] sm:$0xff]  ;;  %v2123_v17 = vld [vmem:[%s7734_s7 + $0x148] sm:$0xff] }
 0x665   :  { %5191 = vmatpush1.bf16.msra.mxu0 %v6190_v39  ;;  %5220 = vmatpush3.bf16.msra.mxu1 %v6476_v31  ;;  %v1778_v39 = vld [vmem:[%s7733_s6 + $0x28] sm:$0xff] }
 0x666   :  { %5193 = vmatprep.subr.bf16.mxu0 %v6202_v44  ;;  %5221 = vmatprep.subr.bf16.mxu1 %v7750_v59  ;;  %v5268_v44 = vpack.c.bf16 %v1778_v39, %v1775_v26  ;;  %v1791_v26 = vld [vmem:[%s7733_s6 + $0x90] sm:$0xff]  ;;  %v1798_v39 = vld [vmem:[%s7733_s6 + $0xc8] sm:$0xff] }
 0x669   :  { %5195 = vmatpush1.bf16.msra.mxu0 %v6223_v52  ;;  %5223 = vmatpush3.bf16.msra.mxu1 %v6486_v36 }
 0x66a   :  { %5197 = vmatprep.subr.bf16.mxu0 %v6235_v57  ;;  %5224 = vmatprep.subr.bf16.mxu1 %v7750_v59 }
 0x66d   :  { %5199 = vmatpush1.bf16.msra.mxu0 %v6253_v0  ;;  %5226 = vmatpush3.bf16.msra.mxu1 %v6496_v40 }
 0x66e   :  { %5201 = vmatprep.subr.bf16.mxu0 %v6265_v6  ;;  %5227 = vmatprep.subr.bf16.mxu1 %v7750_v59 }
 0x671   :  { %5203 = vmatpush1.bf16.msra.mxu0 %v6283_v15  ;;  %5229 = vmatpush3.bf16.msra.mxu1 %v6508_v45 }
 0x672   :  { %5205 = vmatprep.subr.bf16.mxu0 %v6295_v20  ;;  %5230 = vmatprep.subr.bf16.mxu1 %v7750_v59 }
 0x675   :  { %5207 = vmatpush1.bf16.msra.mxu0 %v6313_v29  ;;  %5232 = vmatpush3.bf16.msra.mxu1 %v6518_v49 }
 0x676   :  { %5209 = vmatprep.subr.bf16.mxu0 %v6325_v34  ;;  %5233 = vmatprep.subr.bf16.mxu1 %v7750_v59 }
 0x679   :  { %5211 = vmatpush1.bf16.msra.mxu0 %v6337_v41  ;;  %5235 = vmatpush3.bf16.msra.mxu1 %v6528_v53 }
 0x67a   :  { %5237 = vmatprep.subr.bf16.mxu0 %v5236_v35  ;;  %5269 = vmatprep.subr.bf16.mxu1 %v5268_v44  ;;  %v1794_v35 = vld [vmem:[%s7733_s6 + $0xa8] sm:$0xff] }
 0x72f   :  { %v1497_v52 = vpop.f32.mrb[12].mxu0  ;;  %v1568_v57 = vpop.f32.mrb[36].mxu1 }
 0x730   :  { %v1572_v0 = vadd.f32 %v1497_v52, %v6583_v51  ;;  %v1499_v6 = vpop.f32.mrb[13].mxu0  ;;  %v4320_v15 = vpop.f32.mrb[37].mxu1  ;;  %v1586_v36 = vadd.f32 %v6611_v24, %v1568_v57  ;;  %v1780_v24 = vld [vmem:[%s7733_s6 + $0x38] sm:$0xff]  ;;  %v1799_v52 = vld [vmem:[%s7733_s6 + $0xd0] sm:$0xff]  ;;  %v1802_v57 = vld [vmem:[%s7733_s6 + $0xe8] sm:$0xff] }
 0x731   :  { %v1579_v20 = vadd.f32 %v1499_v6, %v6586_v63  ;;  %v1773_v63 = vld [vmem:[%s7733_s6] sm:$0xff]  ;;  %v5284_v15 = vpack.c.bf16 %v1802_v57, %v1799_v52  ;;  %v2107_v57 = vld [vmem:[%s7734_s7 + $0xc8] sm:$0xff] }
 0x732   :  { %v3666_v29 = vmul.f32 -1.442695, %v1572_v0  ;;  %v5238_v37 = vpack.c.bf16 %v1776_v46, %v1773_v63  ;;  %v5250_v0 = vpack.c.bf16 %v1794_v35, %v1791_v26  ;;  %v1811_v63 = vld [vmem:[%s7733_s6 + $0x130] sm:$0xff]  ;;  %v1814_v46 = vld [vmem:[%s7733_s6 + $0x148] sm:$0xff] }
 0x733   :  { %v3667_v34 = vmul.f32 -1.442695, %v1579_v20  ;;  %v1797_v20 = vld [vmem:[%s7733_s6 + $0xc0] sm:$0xff]  ;;  %v2104_v26 = vld [vmem:[%s7734_s7 + $0xb0] sm:$0xff] }
 0x734   :  { %5907 = vpow2.f32 %v3666_v29  ;;  %v1800_v29 = vld [vmem:[%s7733_s6 + $0xd8] sm:$0xff] }
 0x735   :  { %5909 = vpow2.f32 %v3667_v34  ;;  %v1804_v34 = vld [vmem:[%s7733_s6 + $0xf8] sm:$0xff] }
 0x73e   :  { %v5908_v41 = vpop.eup %5907 }
 0x73f   :  { %v1576_v21 = vadd.f32 1.0, %v5908_v41  ;;  %v5910_v27 = vpop.eup %5909  ;;  %v1807_v41 = vld [vmem:[%s7733_s6 + $0x110] sm:$0xff] }
 0x740   :  { %v1583_v31 = vadd.f32 1.0, %v5910_v27  ;;  %v1808_v27 = vld [vmem:[%s7733_s6 + $0x118] sm:$0xff] }
 0x741   :  { %5911 = vrcp.f32 %v1576_v21  ;;  %v1805_v21 = vld [vmem:[%s7733_s6 + $0x100] sm:$0xff] }
 0x742   :  { %5913 = vrcp.f32 %v1583_v31  ;;  %v5254_v31 = vpack.c.bf16 %v1800_v29, %v1797_v20  ;;  %v2109_v20 = vld [vmem:[%s7734_s7 + $0xd8] sm:$0xff] }
 0x74b   :  { %v5912_v40 = vpop.eup %5911 }
 0x74c   :  { %v1587_v45 = vmul.f32 %v5912_v40, %v1586_v36  ;;  %v5914_v53 = vpop.eup %5913  ;;  %v5256_v36 = vpack.c.bf16 %v1807_v41, %v1804_v34  ;;  %v5288_v40 = vpack.c.bf16 %v1808_v27, %v1805_v21  ;;  %v2113_v34 = vld [vmem:[%s7734_s7 + $0xf8] sm:$0xff]  ;;  %v2116_v41 = vld [vmem:[%s7734_s7 + $0x110] sm:$0xff] }
 0x74d   :  { %v1590_v51 = vsub.f32 1.0, %v5914_v53  ;;  %v1592_v19 = vmul.f32 %v5914_v53, %v6835_v25  ;;  %v1810_v53 = vld [vmem:[%s7733_s6 + $0x128] sm:$0xff]  ;;  %v7144_v21 = vpack.c.bf16 %v2116_v41, %v2113_v34  ;;  %v2112_v27 = vld [vmem:[%s7734_s7 + $0xf0] sm:$0xff] }
 0x74e   :  { %v1588_v49 = vadd.f32 %v1587_v45, %v6606_v12  ;;  %v1783_v12 = vld [vmem:[%s7733_s6 + $0x50] sm:$0xff] }
 0x74f   :  { %v5240_v47 = vpack.c.bf16 %v1783_v12, %v1780_v24  ;;  %v1803_v45 = vld [vmem:[%s7733_s6 + $0xf0] sm:$0xff]  ;;  %v5292_v12 = vpack.c.bf16 %v1814_v46, %v1811_v63  ;;  %v2087_v46 = vld [vmem:[%s7734_s7 + $0x28] sm:$0xff] }
 0x750   :  { %5915 = vtanh.f32 %v1588_v49  ;;  %v1806_v49 = vld [vmem:[%s7733_s6 + $0x108] sm:$0xff]  ;;  %v2084_v63 = vld [vmem:[%s7734_s7 + $0x10] sm:$0xff] }
 0x75a   :  { %v5916_v62 = vpop.eup %5915 }
 0x75b   :  { %v1591_v38 = vmul.f32 %v5916_v62, %v1590_v51  ;;  %v1813_v51 = vld [vmem:[%s7733_s6 + $0x140] sm:$0xff]  ;;  %v5258_v62 = vpack.c.bf16 %v1806_v49, %v1803_v45 }
 0x75c   :  { %v5260_v24 = vpack.c.bf16 %v1813_v51, %v1810_v53  ;;  %v2122_v45 = vld [vmem:[%s7734_s7 + $0x140] sm:$0xff]  ;;  %v2121_v51 = vld [vmem:[%s7734_s7 + $0x138] sm:$0xff] }
 0x75d   :  { %v6907_v32 = vadd.f32 %v1592_v19, %v1591_v38  ;;  %v1809_v38 = vld [vmem:[%s7733_s6 + $0x120] sm:$0xff]  ;;  %v1812_v19 = vld [vmem:[%s7733_s6 + $0x138] sm:$0xff] }
 0x75e   :  { %v5262_v50 = vpack.c.bf16 %v1812_v19, %v1809_v38  ;;  %v2118_v49 = vld [vmem:[%s7734_s7 + $0x120] sm:$0xff]  ;;  %v2128_v38 = vld [vmem:[%s7734_s7 + $0x170] sm:$0xff] }
 0x75f   :  { %1665 = vmatmul.mubr.f32.vlgmr.msra.gmra.mrb[14].mxu0 %v6907_v32  ;;  %4354 = vmatmul.mubr.f32.vlgmr.msra.gmra.mrb[38].mxu1 %v6907_v32 }
 0x760   :  { %5239 = vmatpush1.bf16.msra.mxu0 %v5238_v37  ;;  %5271 = vmatpush3.bf16.msra.mxu1 %v5268_v44  ;;  %v1801_v44 = vld [vmem:[%s7733_s6 + $0xe0] sm:$0xff] }
 0x761   :  { %4388 = vmatprep.mubr.f32.mxu1 %v6615_v55  ;;  %5241 = vmatprep.subr.bf16.mxu0 %v5240_v47  ;;  %v5252_v6 = vpack.c.bf16 %v1801_v44, %v1798_v39  ;;  %v1817_v37 = vld [vmem:[%s7733_s6 + $0x160] sm:$0xff]  ;;  %v1820_v47 = vld [vmem:[%s7733_s6 + $0x178] sm:$0xff]  ;;  %v2100_v39 = vld [vmem:[%s7734_s7 + $0x90] sm:$0xff] }
 0x762   :  { %5273 = vmatprep.subr.bf16.mxu1 %v5272_v1  ;;  %1902 = vmatprep.mubr.f32.mxu0 %v7751_v56  ;;  %v5296_v8 = vpack.c.bf16 %v1820_v47, %v1817_v37  ;;  %v2103_v44 = vld [vmem:[%s7734_s7 + $0xa8] sm:$0xff]  ;;  %v7199_v37 = vpack.c.bf16 %v2127_v54, %v2124_v30  ;;  %v2090_v47 = vld [vmem:[%s7734_s7 + $0x40] sm:$0xff] }
 0x763   :  { %v7116_v52 = vpack.c.bf16 %v2103_v44, %v2100_v39 }
 0x764   :  { %5243 = vmatpush1.bf16.msra.mxu0 %v5242_v11  ;;  %5275 = vmatpush3.bf16.msra.mxu1 %v5272_v1  ;;  %v1815_v1 = vld [vmem:[%s7733_s6 + $0x150] sm:$0xff] }
 0x765   :  { %5245 = vmatprep.subr.bf16.mxu0 %v5244_v9  ;;  %5277 = vmatprep.subr.bf16.mxu1 %v5276_v3  ;;  %v5266_v7 = vpack.c.bf16 %v1818_v4, %v1815_v1  ;;  %v2092_v11 = vld [vmem:[%s7734_s7 + $0x50] sm:$0xff]  ;;  %v2099_v1 = vld [vmem:[%s7734_s7 + $0x88] sm:$0xff]  ;;  %v2102_v4 = vld [vmem:[%s7734_s7 + $0xa0] sm:$0xff] }
 0x766   :  { %v7072_v9 = vpack.c.bf16 %v2092_v11, %v2089_v28  ;;  %v2114_v11 = vld [vmem:[%s7734_s7 + $0x100] sm:$0xff] }
 0x768   :  { %5247 = vmatpush1.bf16.msra.mxu0 %v5246_v33  ;;  %5279 = vmatpush3.bf16.msra.mxu1 %v5276_v3  ;;  %v2088_v3 = vld [vmem:[%s7734_s7 + $0x30] sm:$0xff]  ;;  %v2097_v33 = vld [vmem:[%s7734_s7 + $0x78] sm:$0xff] }
 0x769   :  { %5249 = vmatprep.subr.bf16.mxu0 %v5248_v13  ;;  %5281 = vmatprep.subr.bf16.mxu1 %v5280_v22  ;;  %v7080_v43 = vpack.c.bf16 %v2091_v5, %v2088_v3  ;;  %v7098_v13 = vpack.c.bf16 %v2097_v33, %v2094_v23  ;;  %v2117_v3 = vld [vmem:[%s7734_s7 + $0x118] sm:$0xff]  ;;  %v7258_v23 = vpack.c.bf16 %v2123_v17, %v2120_v14  ;;  %v2126_v33 = vld [vmem:[%s7734_s7 + $0x160] sm:$0xff] }
 0x76a   :  { %v7248_v5 = vpack.c.bf16 %v2117_v3, %v2114_v11  ;;  %v7752_v3 = vld [vmem:[#allocation5_spill] sm:$0xff] }
 0x76b   :  { %v7753_v14 = vsub.s32 0, %v7752_v3 }
 0x76c   :  { %5251 = vmatpush1.bf16.msra.mxu0 %v5250_v0  ;;  %5283 = vmatpush3.bf16.msra.mxu1 %v5280_v22  ;;  %v2101_v22 = vld [vmem:[%s7734_s7 + $0x98] sm:$0xff]  ;;  %v2110_v0 = vld [vmem:[%s7734_s7 + $0xe0] sm:$0xff] }
 0x76d   :  { %5253 = vmatprep.subr.bf16.mxu0 %v5252_v6  ;;  %5285 = vmatprep.subr.bf16.mxu1 %v5284_v15  ;;  %v7108_v35 = vpack.c.bf16 %v2104_v26, %v2101_v22  ;;  %v7126_v6 = vpack.c.bf16 %v2110_v0, %v2107_v57  ;;  %v2129_v22 = vld [vmem:[%s7734_s7 + $0x178] sm:$0xff] }
 0x76e   :  { %v7268_v26 = vpack.c.bf16 %v2129_v22, %v2126_v33  ;;  %v7754_v22 = vsub.s32 1, %v7752_v3 }
 0x770   :  { %5255 = vmatpush1.bf16.msra.mxu0 %v5254_v31  ;;  %5287 = vmatpush3.bf16.msra.mxu1 %v5284_v15  ;;  %v2106_v15 = vld [vmem:[%s7734_s7 + $0xc0] sm:$0xff]  ;;  %v2115_v31 = vld [vmem:[%s7734_s7 + $0x108] sm:$0xff] }
 0x771   :  { %5257 = vmatprep.subr.bf16.mxu0 %v5256_v36  ;;  %5289 = vmatprep.subr.bf16.mxu1 %v5288_v40  ;;  %v7134_v29 = vpack.c.bf16 %v2109_v20, %v2106_v15  ;;  %v7152_v36 = vpack.c.bf16 %v2115_v31, %v2112_v27 }
 0x774   :  { %5259 = vmatpush1.bf16.msra.mxu0 %v5258_v62  ;;  %5291 = vmatpush3.bf16.msra.mxu1 %v5288_v40  ;;  %v2119_v40 = vld [vmem:[%s7734_s7 + $0x128] sm:$0xff]  ;;  %v7176_v62 = vpack.c.bf16 %v2121_v51, %v2118_v49  ;;  %v6023_v49 = vld [vmem:[%s7732_s5] ss:$0 sm:$0xff] }
 0x775   :  { %5261 = vmatprep.subr.bf16.mxu0 %v5260_v24  ;;  %5293 = vmatprep.subr.bf16.mxu1 %v5292_v12  ;;  %v7165_v53 = vpack.c.bf16 %v2122_v45, %v2119_v40  ;;  %v7178_v24 = vpack.c.bf16 %v2087_v46, %v2084_v63 }
 0x778   :  { %5263 = vmatpush1.bf16.msra.mxu0 %v5262_v50  ;;  %5295 = vmatpush3.bf16.msra.mxu1 %v5292_v12  ;;  %v2125_v12 = vld [vmem:[%s7734_s7 + $0x158] sm:$0xff] }
 0x779   :  { %5265 = vmatprep.subr.bf16.mxu0 %v5264_v58  ;;  %5297 = vmatprep.subr.bf16.mxu1 %v5296_v8  ;;  %v7187_v19 = vpack.c.bf16 %v2128_v38, %v2125_v12  ;;  %v2093_v50 = vld [vmem:[%s7734_s7 + $0x58] sm:$0xff] }
 0x77a   :  { %v7207_v58 = vpack.c.bf16 %v2093_v50, %v2090_v47 }
 0x77c   :  { %5267 = vmatpush1.bf16.msra.mxu0 %v5266_v7  ;;  %5299 = vmatpush3.bf16.msra.mxu1 %v5296_v8  ;;  %v2096_v8 = vld [vmem:[%s7734_s7 + $0x70] sm:$0xff] }
 0x77d   :  { %5332 = vmatprep.subr.bf16.mxu1 %v7750_v59  ;;  %v7222_v7 = vpack.c.bf16 %v2099_v1, %v2096_v8 }
 0x77f   :  { %1903 = vmatmul.mubr.f32.vlgmr.msra.gmra.mrb[16].mxu0 %v6615_v55  ;;  %4389 = vmatmul.mubr.f32.vlgmr.msra.gmra.mrb[40].mxu1 %v6659_v18  ;;  %v2083_v55 = vld [vmem:[%s7734_s7 + $0x8] sm:$0xff] }
 0x780   :  { %4391 = vmatprep.mubr.f32.mxu1 %v6703_v60  ;;  %1908 = vmatprep.mubr.f32.mxu0 %v7751_v56 }
 0x781   :  { %5334 = vmatpush3.bf16.msra.mxu1 %v7178_v24 }
 0x782   :  { %5335 = vmatprep.subr.bf16.mxu1 %v7750_v59 }
 0x783   :  { %1909 = vmatmul.mubr.f32.gmra.mrb[18].mxu0 %v6659_v18  ;;  %4392 = vmatmul.mubr.f32.gmra.mrb[42].mxu1 %v6747_v42  ;;  %v2086_v18 = vld [vmem:[%s7734_s7 + $0x20] sm:$0xff] }
 0x784   :  { %4394 = vmatprep.mubr.f32.mxu1 %v6791_v16  ;;  %1914 = vmatprep.mubr.f32.mxu0 %v7751_v56 }
 0x785   :  { %5337 = vmatpush3.bf16.msra.mxu1 %v7207_v58 }
 0x786   :  { %5338 = vmatprep.subr.bf16.mxu1 %v7750_v59 }
 0x787   :  { %1915 = vmatmul.mubr.f32.gmra.mrb[20].mxu0 %v6703_v60  ;;  %4395 = vmatmul.mubr.f32.gmra.mrb[44].mxu1 %v6835_v25  ;;  %v7054_v60 = vpack.c.bf16 %v2086_v18, %v2083_v55  ;;  %v2105_v55 = vld [vmem:[%s7734_s7 + $0xb8] sm:$0xff] }
 0x788   :  { %4397 = vmatprep.mubr.f32.mxu1 %v6907_v32  ;;  %1920 = vmatprep.mubr.f32.mxu0 %v7751_v56  ;;  %v7228_v18 = vpack.c.bf16 %v2105_v55, %v2102_v4 }
 0x789   :  { %5301 = vmatprep.subr.bf16.mxu0 %v7054_v60  ;;  %5340 = vmatpush3.bf16.msra.mxu1 %v7222_v7 }
 0x78a   :  { %5341 = vmatprep.subr.bf16.mxu1 %v7750_v59 }
 0x78b   :  { %1921 = vmatmul.mubr.f32.gmra.mrb[22].mxu0 %v6747_v42  ;;  %v2082_v42 = vld [vmem:[%s7734_s7] sm:$0xff] }
 0x78c   :  { %1926 = vmatprep.mubr.f32.mxu0 %v7751_v56 }
 0x78d   :  { %5343 = vmatpush3.bf16.msra.mxu1 %v7228_v18 }
 0x78e   :  { %5344 = vmatprep.subr.bf16.mxu1 %v7750_v59 }
 0x78f   :  { %1927 = vmatmul.mubr.f32.gmra.mrb[24].mxu0 %v6791_v16  ;;  %v2085_v16 = vld [vmem:[%s7734_s7 + $0x18] sm:$0xff] }
 0x790   :  { %1932 = vmatprep.mubr.f32.mxu0 %v7751_v56 }
 0x793   :  { %1933 = vmatmul.mubr.f32.gmra.mrb[26].mxu0 %v6835_v25  ;;  %v7062_v25 = vpack.c.bf16 %v2085_v16, %v2082_v42  ;;  %v2108_v42 = vld [vmem:[%s7734_s7 + $0xd0] sm:$0xff]  ;;  %v2111_v16 = vld [vmem:[%s7734_s7 + $0xe8] sm:$0xff] }
 0x794   :  { %1938 = vmatprep.mubr.f32.mxu0 %v7751_v56  ;;  %v7238_v28 = vpack.c.bf16 %v2111_v16, %v2108_v42  ;;  %v7298_v42 = vld [vmem:[%s7730_s1] sm:$0xff] }
 0x795   :  { %5303 = vmatpush1.bf16.msra.mxu0 %v7062_v25 }
 0x796   :  { %5305 = vmatprep.subr.bf16.mxu0 %v7072_v9  ;;  %5346 = vmatpush3.bf16.msra.mxu1 %v7238_v28 }
 0x797   :  { %1939 = vmatmul.mubr.f32.gmra.mrb[28].mxu0 %v6907_v32  ;;  %5347 = vmatprep.subr.bf16.mxu1 %v7750_v59 }
 0x798   :  { %1944 = vmatprep.mubr.f32.mxu0 %v7751_v56 }
 0x799   :  { %5307 = vmatpush1.bf16.msra.mxu0 %v7080_v43 }
 0x79a   :  { %5309 = vmatprep.subr.bf16.mxu0 %v7090_v48  ;;  %5349 = vmatpush3.bf16.msra.mxu1 %v7248_v5 }
 0x79b   :  { %5350 = vmatprep.subr.bf16.mxu1 %v7750_v59 }
 0x79d   :  { %5311 = vmatpush1.bf16.msra.mxu0 %v7098_v13 }
 0x79e   :  { %5313 = vmatprep.subr.bf16.mxu0 %v7108_v35  ;;  %5352 = vmatpush3.bf16.msra.mxu1 %v7258_v23 }
 0x79f   :  { %5353 = vmatprep.subr.bf16.mxu1 %v7750_v59 }
 0x7a1   :  { %5315 = vmatpush1.bf16.msra.mxu0 %v7116_v52 }
 0x7a2   :  { %5317 = vmatprep.subr.bf16.mxu0 %v7126_v6  ;;  %5355 = vmatpush3.bf16.msra.mxu1 %v7268_v26 }
 0x7a3   :  { %5388 = vmatprep.subr.bf16.mxu1 %v7750_v59 }
 0x7a5   :  { %5319 = vmatpush1.bf16.msra.mxu0 %v7134_v29 }
 0x7a6   :  { %5321 = vmatprep.subr.bf16.mxu0 %v7144_v21 }
 0x7a9   :  { %5323 = vmatpush1.bf16.msra.mxu0 %v7152_v36 }
 0x7aa   :  { %5325 = vmatprep.subr.bf16.mxu0 %v7165_v53 }
 0x7ad   :  { %5327 = vmatpush1.bf16.msra.mxu0 %v7176_v62 }
 0x7ae   :  { %5329 = vmatprep.subr.bf16.mxu0 %v7187_v19 }
 0x7b1   :  { %5331 = vmatpush1.bf16.msra.mxu0 %v7199_v37 }
 0x7b2   :  { %5357 = vmatprep.subr.bf16.mxu0 %v7054_v60 }
 0x832   :  { %v1666_v39 = vpop.f32.mrb[14].mxu0  ;;  %v1737_v44 = vpop.f32.mrb[38].mxu1 }
 0x833   :  { %v1741_v57 = vadd.f32 %v1666_v39, %v6588_v2  ;;  %v1668_v0 = vpop.f32.mrb[15].mxu0  ;;  %v4355_v15 = vpop.f32.mrb[39].mxu1  ;;  %v1755_v51 = vadd.f32 %v6023_v49, %v1737_v44  ;;  %v7755_v49 = vsub.s32 2, %v7752_v3 }
 0x834   :  { %v1748_v20 = vadd.f32 %v1668_v0, %v6592_v10 }
 0x835   :  { %v3668_v34 = vmul.f32 -1.442695, %v1741_v57 }
 0x836   :  { %v3669_v41 = vmul.f32 -1.442695, %v1748_v20 }
 0x837   :  { %5917 = vpow2.f32 %v3668_v34 }
 0x838   :  { %5919 = vpow2.f32 %v3669_v41 }
 0x841   :  { %v5918_v27 = vpop.eup %5917 }
 0x842   :  { %v1745_v31 = vadd.f32 1.0, %v5918_v27  ;;  %v5920_v40 = vpop.eup %5919 }
 0x843   :  { %v1752_v45 = vadd.f32 1.0, %v5920_v40 }
 0x844   :  { %5921 = vrcp.f32 %v1745_v31 }
 0x845   :  { %5923 = vrcp.f32 %v1752_v45  ;;  %v7357_v45 = vld [vmem:[%s7736_s9] ss:$0 sm:$0xff] }
 0x84e   :  { %v5922_v63 = vpop.eup %5921 }
 0x84f   :  { %v1756_v2 = vmul.f32 %v5922_v63, %v1755_v51  ;;  %v5924_v54 = vpop.eup %5923 }
 0x850   :  { %v1759_v8 = vsub.f32 1.0, %v5924_v54  ;;  %v1761_v55 = vmul.f32 %v5924_v54, %v6907_v32  ;;  %v1821_v32 = vld [vmem:[%s7735_s8] sm:$0x7] }
 0x851   :  { %v1757_v46 = vadd.f32 %v1756_v2, %v6604_v61  ;;  %v7346_v17 = vrot.slane %v1821_v32, %v7753_v14  ;;  %v7350_v39 = vrot.slane %v1821_v32, %v7754_v22  ;;  %v7361_v51 = vrot.slane %v1821_v32, %v7755_v49 }
 0x852   :  { %v7279_v10 = vpop.f32.mrb[40].mxu1 }
 0x853   :  { %5925 = vtanh.f32 %v1757_v46  ;;  %v7281_v12 = vpop.f32.mrb[41].mxu1  ;;  %v2023_v49 = vadd.f32 %v7279_v10, %v7361_v51 }
 0x854   :  { %v2018_v54 = vadd.f32 %v7281_v12, %v7361_v51 }
 0x856   :  { %v7283_v38 = vpop.f32.mrb[42].mxu1 }
 0x857   :  { %v7285_v30 = vpop.f32.mrb[43].mxu1 }
 0x85a   :  { %v7287_v47 = vpop.f32.mrb[44].mxu1 }
 0x85b   :  { %v7289_v50 = vpop.f32.mrb[45].mxu1 }
 0x85d   :  { %v5926_v1 = vpop.eup %5925 }
 0x85e   :  { %v1760_v4 = vmul.f32 %v5926_v1, %v1759_v8 }
 0x860   :  { %v1762_v61 = vadd.f32 %v1761_v55, %v1760_v4 }
 0x862   :  { %1945 = vmatmul.mubr.f32.gmra.mrb[30].mxu0 %v1762_v61  ;;  %4398 = vmatmul.mubr.f32.gmra.mrb[46].mxu1 %v1762_v61 }
 0x863   :  { %2199 = vmatprep.mubr.f32.mxu0 %v7751_v56  ;;  %4432 = vmatprep.mubr.msk.f32.mxu1 %vm6027_vm0, %v7751_v56 }
 0x866   :  { %2200 = vmatmul.mubr.f32.vlgmr.msra.gmra.mrb[16].mxu0 %v7298_v42  ;;  %4433 = vmatmul.mubr.f32.vlgmr.msra.gmra.mrb[48].mxu1 %v7298_v42 }
 0x867   :  { %5359 = vmatpush1.bf16.msra.mxu0 %v7062_v25  ;;  %5390 = vmatpush3.bf16.msra.mxu1 %v7178_v24 }
 0x868   :  { %5361 = vmatprep.subr.bf16.mxu0 %v7072_v9  ;;  %5391 = vmatprep.subr.bf16.mxu1 %v7750_v59 }
 0x869   :  { %2374 = vmatprep.mubr.f32.mxu0 %v7751_v56  ;;  %4467 = vmatprep.mubr.msk.f32.mxu1 %vm6027_vm0, %v7751_v56 }
 0x86b   :  { %5363 = vmatpush1.bf16.msra.mxu0 %v7080_v43  ;;  %5393 = vmatpush3.bf16.msra.mxu1 %v7207_v58 }
 0x86c   :  { %5365 = vmatprep.subr.bf16.mxu0 %v7090_v48  ;;  %5394 = vmatprep.subr.bf16.mxu1 %v7750_v59 }
 0x86f   :  { %5367 = vmatpush1.bf16.msra.mxu0 %v7098_v13  ;;  %5396 = vmatpush3.bf16.msra.mxu1 %v7222_v7 }
 0x870   :  { %5369 = vmatprep.subr.bf16.mxu0 %v7108_v35  ;;  %5397 = vmatprep.subr.bf16.mxu1 %v7750_v59 }
 0x873   :  { %5371 = vmatpush1.bf16.msra.mxu0 %v7116_v52  ;;  %5399 = vmatpush3.bf16.msra.mxu1 %v7228_v18 }
 0x874   :  { %5373 = vmatprep.subr.bf16.mxu0 %v7126_v6  ;;  %5400 = vmatprep.subr.bf16.mxu1 %v7750_v59 }
 0x877   :  { %5375 = vmatpush1.bf16.msra.mxu0 %v7134_v29  ;;  %5402 = vmatpush3.bf16.msra.mxu1 %v7238_v28 }
 0x878   :  { %5377 = vmatprep.subr.bf16.mxu0 %v7144_v21  ;;  %5403 = vmatprep.subr.bf16.mxu1 %v7750_v59 }
 0x87b   :  { %5379 = vmatpush1.bf16.msra.mxu0 %v7152_v36  ;;  %5405 = vmatpush3.bf16.msra.mxu1 %v7248_v5 }
 0x87c   :  { %5381 = vmatprep.subr.bf16.mxu0 %v7165_v53  ;;  %5406 = vmatprep.subr.bf16.mxu1 %v7750_v59 }
 0x87f   :  { %5383 = vmatpush1.bf16.msra.mxu0 %v7176_v62  ;;  %5408 = vmatpush3.bf16.msra.mxu1 %v7258_v23 }
 0x880   :  { %5385 = vmatprep.subr.bf16.mxu0 %v7187_v19  ;;  %5409 = vmatprep.subr.bf16.mxu1 %v7750_v59 }
 0x883   :  { %5387 = vmatpush1.bf16.msra.mxu0 %v7199_v37  ;;  %5411 = vmatpush3.bf16.msra.mxu1 %v7268_v26 }
 0x884   :  { %5413 = vmatprep.subr.bf16.mxu0 %v7054_v60  ;;  %5444 = vmatprep.subr.bf16.mxu1 %v7750_v59 }
 0x935   :  { %v7340_v16 = vpop.f32.mrb[46].mxu1 }
 0x936   :  { %v7342_v11 = vpop.f32.mrb[47].mxu1 }
 0x939   :  { %v2201_v33 = vpop.f32.mrb[16].mxu0  ;;  %v2272_v44 = vpop.f32.mrb[48].mxu1 }
 0x93a   :  { %v5812_v57 = vadd.f32 %v2201_v33, %v7346_v17  ;;  %v2203_v0 = vpop.f32.mrb[17].mxu0  ;;  %v4434_v15 = vpop.f32.mrb[49].mxu1  ;;  %v2296_v2 = vadd.f32 %v7357_v45, %v2272_v44 }
 0x93b   :  { %v5813_v34 = vadd.f32 %v2203_v0, %v7350_v39 }
 0x93c   :  { %v3670_v20 = vmul.f32 -1.442695, %v5812_v57 }
 0x93d   :  { %v3671_v41 = vmul.f32 -1.442695, %v5813_v34 }
 0x93e   :  { %5927 = vpow2.f32 %v3670_v20 }
 0x93f   :  { %5929 = vpow2.f32 %v3671_v41 }
 0x948   :  { %v5928_v27 = vpop.eup %5927 }
 0x949   :  { %v2280_v31 = vadd.f32 1.0, %v5928_v27  ;;  %v5930_v40 = vpop.eup %5929 }
 0x94a   :  { %v2287_v63 = vadd.f32 1.0, %v5930_v40 }
 0x94b   :  { %5931 = vrcp.f32 %v2280_v31 }
 0x94c   :  { %5933 = vrcp.f32 %v2287_v63 }
 0x955   :  { %v5932_v46 = vpop.eup %5931 }
 0x956   :  { %v2297_v8 = vmul.f32 %v5932_v46, %v2296_v2  ;;  %v5934_v4 = vpop.eup %5933 }
 0x957   :  { %v2300_v55 = vsub.f32 1.0, %v5934_v4  ;;  %v2302_v33 = vmul.f32 %v7298_v42, %v5934_v4 }
 0x958   :  { %v2298_v1 = vadd.f32 %v2297_v8, %v2018_v54 }
 0x95a   :  { %5935 = vtanh.f32 %v2298_v1 }
 0x964   :  { %v5936_v61 = vpop.eup %5935 }
 0x965   :  { %v2301_v14 = vmul.f32 %v5936_v61, %v2300_v55 }
 0x967   :  { %v7367_v3 = vadd.f32 %v2302_v33, %v2301_v14 }
 0x969   :  { %2375 = vmatmul.mubr.f32.vlgmr.msra.gmra.mrb[18].mxu0 %v7367_v3  ;;  %4468 = vmatmul.mubr.f32.vlgmr.msra.gmra.mrb[50].mxu1 %v7367_v3 }
 0x96a   :  { %5415 = vmatpush1.bf16.msra.mxu0 %v7062_v25  ;;  %5446 = vmatpush3.bf16.msra.mxu1 %v7178_v24 }
 0x96b   :  { %5417 = vmatprep.subr.bf16.mxu0 %v7072_v9  ;;  %5447 = vmatprep.subr.bf16.mxu1 %v7750_v59 }
 0x96c   :  { %2543 = vmatprep.mubr.f32.mxu0 %v7751_v56  ;;  %4502 = vmatprep.mubr.msk.f32.mxu1 %vm6027_vm0, %v7751_v56 }
 0x96e   :  { %5419 = vmatpush1.bf16.msra.mxu0 %v7080_v43  ;;  %5449 = vmatpush3.bf16.msra.mxu1 %v7207_v58 }
 0x96f   :  { %5421 = vmatprep.subr.bf16.mxu0 %v7090_v48  ;;  %5450 = vmatprep.subr.bf16.mxu1 %v7750_v59 }
 0x972   :  { %5423 = vmatpush1.bf16.msra.mxu0 %v7098_v13  ;;  %5452 = vmatpush3.bf16.msra.mxu1 %v7222_v7 }
 0x973   :  { %5425 = vmatprep.subr.bf16.mxu0 %v7108_v35  ;;  %5453 = vmatprep.subr.bf16.mxu1 %v7750_v59 }
 0x976   :  { %5427 = vmatpush1.bf16.msra.mxu0 %v7116_v52  ;;  %5455 = vmatpush3.bf16.msra.mxu1 %v7228_v18 }
 0x977   :  { %5429 = vmatprep.subr.bf16.mxu0 %v7126_v6  ;;  %5456 = vmatprep.subr.bf16.mxu1 %v7750_v59 }
 0x97a   :  { %5431 = vmatpush1.bf16.msra.mxu0 %v7134_v29  ;;  %5458 = vmatpush3.bf16.msra.mxu1 %v7238_v28 }
 0x97b   :  { %5433 = vmatprep.subr.bf16.mxu0 %v7144_v21  ;;  %5459 = vmatprep.subr.bf16.mxu1 %v7750_v59 }
 0x97e   :  { %5435 = vmatpush1.bf16.msra.mxu0 %v7152_v36  ;;  %5461 = vmatpush3.bf16.msra.mxu1 %v7248_v5 }
 0x97f   :  { %5437 = vmatprep.subr.bf16.mxu0 %v7165_v53  ;;  %5462 = vmatprep.subr.bf16.mxu1 %v7750_v59 }
 0x982   :  { %5439 = vmatpush1.bf16.msra.mxu0 %v7176_v62  ;;  %5464 = vmatpush3.bf16.msra.mxu1 %v7258_v23 }
 0x983   :  { %5441 = vmatprep.subr.bf16.mxu0 %v7187_v19  ;;  %5465 = vmatprep.subr.bf16.mxu1 %v7750_v59 }
 0x986   :  { %5443 = vmatpush1.bf16.msra.mxu0 %v7199_v37  ;;  %5467 = vmatpush3.bf16.msra.mxu1 %v7268_v26 }
 0x987   :  { %5469 = vmatprep.subr.bf16.mxu0 %v7054_v60  ;;  %5500 = vmatprep.subr.bf16.mxu1 %v7750_v59 }
 0xa3c   :  { %v2376_v12 = vpop.f32.mrb[18].mxu0  ;;  %v2447_v42 = vpop.f32.mrb[50].mxu1 }
 0xa3d   :  { %v5814_v32 = vadd.f32 %v2376_v12, %v7346_v17  ;;  %v2378_v22 = vpop.f32.mrb[19].mxu0  ;;  %v4469_v44 = vpop.f32.mrb[51].mxu1  ;;  %v2465_v31 = vadd.f32 %v7357_v45, %v2447_v42 }
 0xa3e   :  { %v5815_v0 = vadd.f32 %v2378_v22, %v7350_v39 }
 0xa3f   :  { %v3673_v57 = vmul.f32 -1.442695, %v5814_v32 }
 0xa40   :  { %v3674_v15 = vmul.f32 -1.442695, %v5815_v0 }
 0xa41   :  { %5937 = vpow2.f32 %v3673_v57 }
 0xa42   :  { %5939 = vpow2.f32 %v3674_v15 }
 0xa4b   :  { %v5938_v20 = vpop.eup %5937 }
 0xa4c   :  { %v2455_v34 = vadd.f32 1.0, %v5938_v20  ;;  %v5940_v41 = vpop.eup %5939 }
 0xa4d   :  { %v2462_v27 = vadd.f32 1.0, %v5940_v41  ;;  %v2028_v41 = vadd.f32 %v7285_v30, %v7361_v51 }
 0xa4e   :  { %5941 = vrcp.f32 %v2455_v34 }
 0xa4f   :  { %5943 = vrcp.f32 %v2462_v27 }
 0xa58   :  { %v5942_v40 = vpop.eup %5941 }
 0xa59   :  { %v2466_v63 = vmul.f32 %v5942_v40, %v2465_v31  ;;  %v5944_v46 = vpop.eup %5943 }
 0xa5a   :  { %v2469_v54 = vsub.f32 1.0, %v5944_v46  ;;  %v2471_v4 = vmul.f32 %v5944_v46, %v7367_v3 }
 0xa5b   :  { %v2467_v2 = vadd.f32 %v2466_v63, %v2023_v49 }
 0xa5d   :  { %5945 = vtanh.f32 %v2467_v2 }
 0xa67   :  { %v5946_v8 = vpop.eup %5945 }
 0xa68   :  { %v2470_v1 = vmul.f32 %v5946_v8, %v2469_v54 }
 0xa6a   :  { %v7412_v55 = vadd.f32 %v2471_v4, %v2470_v1 }
 0xa6c   :  { %2544 = vmatmul.mubr.f32.vlgmr.msra.gmra.mrb[20].mxu0 %v7412_v55  ;;  %4503 = vmatmul.mubr.f32.vlgmr.msra.gmra.mrb[52].mxu1 %v7412_v55 }
 0xa6d   :  { %5471 = vmatpush1.bf16.msra.mxu0 %v7062_v25  ;;  %5502 = vmatpush3.bf16.msra.mxu1 %v7178_v24 }
 0xa6e   :  { %5473 = vmatprep.subr.bf16.mxu0 %v7072_v9  ;;  %5503 = vmatprep.subr.bf16.mxu1 %v7750_v59 }
 0xa6f   :  { %2712 = vmatprep.mubr.f32.mxu0 %v7751_v56  ;;  %4537 = vmatprep.mubr.msk.f32.mxu1 %vm6027_vm0, %v7751_v56 }
 0xa71   :  { %5475 = vmatpush1.bf16.msra.mxu0 %v7080_v43  ;;  %5505 = vmatpush3.bf16.msra.mxu1 %v7207_v58 }
 0xa72   :  { %5477 = vmatprep.subr.bf16.mxu0 %v7090_v48  ;;  %5506 = vmatprep.subr.bf16.mxu1 %v7750_v59 }
 0xa75   :  { %5479 = vmatpush1.bf16.msra.mxu0 %v7098_v13  ;;  %5508 = vmatpush3.bf16.msra.mxu1 %v7222_v7 }
 0xa76   :  { %5481 = vmatprep.subr.bf16.mxu0 %v7108_v35  ;;  %5509 = vmatprep.subr.bf16.mxu1 %v7750_v59 }
 0xa79   :  { %5483 = vmatpush1.bf16.msra.mxu0 %v7116_v52  ;;  %5511 = vmatpush3.bf16.msra.mxu1 %v7228_v18 }
 0xa7a   :  { %5485 = vmatprep.subr.bf16.mxu0 %v7126_v6  ;;  %5512 = vmatprep.subr.bf16.mxu1 %v7750_v59 }
 0xa7d   :  { %5487 = vmatpush1.bf16.msra.mxu0 %v7134_v29  ;;  %5514 = vmatpush3.bf16.msra.mxu1 %v7238_v28 }
 0xa7e   :  { %5489 = vmatprep.subr.bf16.mxu0 %v7144_v21  ;;  %5515 = vmatprep.subr.bf16.mxu1 %v7750_v59 }
 0xa81   :  { %5491 = vmatpush1.bf16.msra.mxu0 %v7152_v36  ;;  %5517 = vmatpush3.bf16.msra.mxu1 %v7248_v5 }
 0xa82   :  { %5493 = vmatprep.subr.bf16.mxu0 %v7165_v53  ;;  %5518 = vmatprep.subr.bf16.mxu1 %v7750_v59 }
 0xa85   :  { %5495 = vmatpush1.bf16.msra.mxu0 %v7176_v62  ;;  %5520 = vmatpush3.bf16.msra.mxu1 %v7258_v23 }
 0xa86   :  { %5497 = vmatprep.subr.bf16.mxu0 %v7187_v19  ;;  %5521 = vmatprep.subr.bf16.mxu1 %v7750_v59 }
 0xa89   :  { %5499 = vmatpush1.bf16.msra.mxu0 %v7199_v37  ;;  %5523 = vmatpush3.bf16.msra.mxu1 %v7268_v26 }
 0xa8a   :  { %5525 = vmatprep.subr.bf16.mxu0 %v7054_v60  ;;  %5556 = vmatprep.subr.bf16.mxu1 %v7750_v59 }
 0xb3f   :  { %v2545_v10 = vpop.f32.mrb[20].mxu0  ;;  %v2616_v61 = vpop.f32.mrb[52].mxu1 }
 0xb40   :  { %v5816_v14 = vadd.f32 %v2545_v10, %v7346_v17  ;;  %v2547_v33 = vpop.f32.mrb[21].mxu0  ;;  %v4504_v12 = vpop.f32.mrb[53].mxu1  ;;  %v2634_v20 = vadd.f32 %v7357_v45, %v2616_v61 }
 0xb41   :  { %v5817_v32 = vadd.f32 %v2547_v33, %v7350_v39 }
 0xb42   :  { %v3675_v42 = vmul.f32 -1.442695, %v5816_v14 }
 0xb43   :  { %v3676_v22 = vmul.f32 -1.442695, %v5817_v32 }
 0xb44   :  { %5947 = vpow2.f32 %v3675_v42 }
 0xb45   :  { %5949 = vpow2.f32 %v3676_v22 }
 0xb4e   :  { %v5948_v44 = vpop.eup %5947 }
 0xb4f   :  { %v2624_v57 = vadd.f32 1.0, %v5948_v44  ;;  %v5950_v0 = vpop.eup %5949 }
 0xb50   :  { %v2631_v15 = vadd.f32 1.0, %v5950_v0  ;;  %v2033_v0 = vadd.f32 %v7283_v38, %v7361_v51 }
 0xb51   :  { %5951 = vrcp.f32 %v2624_v57 }
 0xb52   :  { %5953 = vrcp.f32 %v2631_v15 }
 0xb5b   :  { %v5952_v34 = vpop.eup %5951 }
 0xb5c   :  { %v2635_v27 = vmul.f32 %v5952_v34, %v2634_v20  ;;  %v5954_v40 = vpop.eup %5953 }
 0xb5d   :  { %v2638_v49 = vsub.f32 1.0, %v5954_v40  ;;  %v2640_v46 = vmul.f32 %v5954_v40, %v7412_v55 }
 0xb5e   :  { %v2636_v31 = vadd.f32 %v2635_v27, %v2028_v41 }
 0xb60   :  { %5955 = vtanh.f32 %v2636_v31 }
 0xb6a   :  { %v5956_v63 = vpop.eup %5955 }
 0xb6b   :  { %v2639_v2 = vmul.f32 %v5956_v63, %v2638_v49 }
 0xb6d   :  { %v7457_v54 = vadd.f32 %v2640_v46, %v2639_v2 }
 0xb6f   :  { %2713 = vmatmul.mubr.f32.vlgmr.msra.gmra.mrb[22].mxu0 %v7457_v54  ;;  %4538 = vmatmul.mubr.f32.vlgmr.msra.gmra.mrb[54].mxu1 %v7457_v54 }
 0xb70   :  { %5527 = vmatpush1.bf16.msra.mxu0 %v7062_v25  ;;  %5558 = vmatpush3.bf16.msra.mxu1 %v7178_v24 }
 0xb71   :  { %5529 = vmatprep.subr.bf16.mxu0 %v7072_v9  ;;  %5559 = vmatprep.subr.bf16.mxu1 %v7750_v59 }
 0xb72   :  { %2881 = vmatprep.mubr.f32.mxu0 %v7751_v56  ;;  %4572 = vmatprep.mubr.msk.f32.mxu1 %vm6027_vm0, %v7751_v56 }
 0xb74   :  { %5531 = vmatpush1.bf16.msra.mxu0 %v7080_v43  ;;  %5561 = vmatpush3.bf16.msra.mxu1 %v7207_v58 }
 0xb75   :  { %5533 = vmatprep.subr.bf16.mxu0 %v7090_v48  ;;  %5562 = vmatprep.subr.bf16.mxu1 %v7750_v59 }
 0xb78   :  { %5535 = vmatpush1.bf16.msra.mxu0 %v7098_v13  ;;  %5564 = vmatpush3.bf16.msra.mxu1 %v7222_v7 }
 0xb79   :  { %5537 = vmatprep.subr.bf16.mxu0 %v7108_v35  ;;  %5565 = vmatprep.subr.bf16.mxu1 %v7750_v59 }
 0xb7c   :  { %5539 = vmatpush1.bf16.msra.mxu0 %v7116_v52  ;;  %5567 = vmatpush3.bf16.msra.mxu1 %v7228_v18 }
 0xb7d   :  { %5541 = vmatprep.subr.bf16.mxu0 %v7126_v6  ;;  %5568 = vmatprep.subr.bf16.mxu1 %v7750_v59 }
 0xb80   :  { %5543 = vmatpush1.bf16.msra.mxu0 %v7134_v29  ;;  %5570 = vmatpush3.bf16.msra.mxu1 %v7238_v28 }
 0xb81   :  { %5545 = vmatprep.subr.bf16.mxu0 %v7144_v21  ;;  %5571 = vmatprep.subr.bf16.mxu1 %v7750_v59 }
 0xb84   :  { %5547 = vmatpush1.bf16.msra.mxu0 %v7152_v36  ;;  %5573 = vmatpush3.bf16.msra.mxu1 %v7248_v5 }
 0xb85   :  { %5549 = vmatprep.subr.bf16.mxu0 %v7165_v53  ;;  %5574 = vmatprep.subr.bf16.mxu1 %v7750_v59 }
 0xb88   :  { %5551 = vmatpush1.bf16.msra.mxu0 %v7176_v62  ;;  %5576 = vmatpush3.bf16.msra.mxu1 %v7258_v23 }
 0xb89   :  { %5553 = vmatprep.subr.bf16.mxu0 %v7187_v19  ;;  %5577 = vmatprep.subr.bf16.mxu1 %v7750_v59 }
 0xb8c   :  { %5555 = vmatpush1.bf16.msra.mxu0 %v7199_v37  ;;  %5579 = vmatpush3.bf16.msra.mxu1 %v7268_v26 }
 0xb8d   :  { %5581 = vmatprep.subr.bf16.mxu0 %v7054_v60  ;;  %5612 = vmatprep.subr.bf16.mxu1 %v7750_v59 }
 0xc42   :  { %v2714_v30 = vpop.f32.mrb[22].mxu0  ;;  %v2785_v8 = vpop.f32.mrb[54].mxu1 }
 0xc43   :  { %v5818_v1 = vadd.f32 %v2714_v30, %v7346_v17  ;;  %v2716_v4 = vpop.f32.mrb[23].mxu0  ;;  %v4539_v10 = vpop.f32.mrb[55].mxu1  ;;  %v2803_v44 = vadd.f32 %v7357_v45, %v2785_v8 }
 0xc44   :  { %v5819_v14 = vadd.f32 %v2716_v4, %v7350_v39 }
 0xc45   :  { %v3677_v61 = vmul.f32 -1.442695, %v5818_v1 }
 0xc46   :  { %v3678_v33 = vmul.f32 -1.442695, %v5819_v14 }
 0xc47   :  { %5957 = vpow2.f32 %v3677_v61 }
 0xc48   :  { %5959 = vpow2.f32 %v3678_v33 }
 0xc51   :  { %v5958_v12 = vpop.eup %5957 }
 0xc52   :  { %v2793_v42 = vadd.f32 1.0, %v5958_v12  ;;  %v5960_v32 = vpop.eup %5959 }
 0xc53   :  { %v2800_v22 = vadd.f32 1.0, %v5960_v32  ;;  %v2038_v32 = vadd.f32 %v7289_v50, %v7361_v51 }
 0xc54   :  { %5961 = vrcp.f32 %v2793_v42 }
 0xc55   :  { %5963 = vrcp.f32 %v2800_v22 }
 0xc5e   :  { %v5962_v57 = vpop.eup %5961 }
 0xc5f   :  { %v2804_v15 = vmul.f32 %v5962_v57, %v2803_v44  ;;  %v5964_v34 = vpop.eup %5963 }
 0xc60   :  { %v2807_v41 = vsub.f32 1.0, %v5964_v34  ;;  %v2809_v40 = vmul.f32 %v5964_v34, %v7457_v54 }
 0xc61   :  { %v2805_v20 = vadd.f32 %v2804_v15, %v2033_v0 }
 0xc63   :  { %5965 = vtanh.f32 %v2805_v20 }
 0xc6d   :  { %v5966_v27 = vpop.eup %5965 }
 0xc6e   :  { %v2808_v31 = vmul.f32 %v5966_v27, %v2807_v41 }
 0xc70   :  { %v7502_v49 = vadd.f32 %v2809_v40, %v2808_v31 }
 0xc72   :  { %2882 = vmatmul.mubr.f32.vlgmr.msra.gmra.mrb[24].mxu0 %v7502_v49  ;;  %4573 = vmatmul.mubr.f32.vlgmr.msra.gmra.mrb[56].mxu1 %v7502_v49 }
 0xc73   :  { %5583 = vmatpush1.bf16.msra.mxu0 %v7062_v25  ;;  %5614 = vmatpush3.bf16.msra.mxu1 %v7178_v24 }
 0xc74   :  { %5585 = vmatprep.subr.bf16.mxu0 %v7072_v9  ;;  %5615 = vmatprep.subr.bf16.mxu1 %v7750_v59 }
 0xc75   :  { %3050 = vmatprep.mubr.f32.mxu0 %v7751_v56  ;;  %4607 = vmatprep.mubr.msk.f32.mxu1 %vm6027_vm0, %v7751_v56 }
 0xc77   :  { %5587 = vmatpush1.bf16.msra.mxu0 %v7080_v43  ;;  %5617 = vmatpush3.bf16.msra.mxu1 %v7207_v58 }
 0xc78   :  { %5589 = vmatprep.subr.bf16.mxu0 %v7090_v48  ;;  %5618 = vmatprep.subr.bf16.mxu1 %v7750_v59 }
 0xc7b   :  { %5591 = vmatpush1.bf16.msra.mxu0 %v7098_v13  ;;  %5620 = vmatpush3.bf16.msra.mxu1 %v7222_v7 }
 0xc7c   :  { %5593 = vmatprep.subr.bf16.mxu0 %v7108_v35  ;;  %5621 = vmatprep.subr.bf16.mxu1 %v7750_v59 }
 0xc7f   :  { %5595 = vmatpush1.bf16.msra.mxu0 %v7116_v52  ;;  %5623 = vmatpush3.bf16.msra.mxu1 %v7228_v18 }
 0xc80   :  { %5597 = vmatprep.subr.bf16.mxu0 %v7126_v6  ;;  %5624 = vmatprep.subr.bf16.mxu1 %v7750_v59 }
 0xc83   :  { %5599 = vmatpush1.bf16.msra.mxu0 %v7134_v29  ;;  %5626 = vmatpush3.bf16.msra.mxu1 %v7238_v28 }
 0xc84   :  { %5601 = vmatprep.subr.bf16.mxu0 %v7144_v21  ;;  %5627 = vmatprep.subr.bf16.mxu1 %v7750_v59 }
 0xc87   :  { %5603 = vmatpush1.bf16.msra.mxu0 %v7152_v36  ;;  %5629 = vmatpush3.bf16.msra.mxu1 %v7248_v5 }
 0xc88   :  { %5605 = vmatprep.subr.bf16.mxu0 %v7165_v53  ;;  %5630 = vmatprep.subr.bf16.mxu1 %v7750_v59 }
 0xc8b   :  { %5607 = vmatpush1.bf16.msra.mxu0 %v7176_v62  ;;  %5632 = vmatpush3.bf16.msra.mxu1 %v7258_v23 }
 0xc8c   :  { %5609 = vmatprep.subr.bf16.mxu0 %v7187_v19  ;;  %5633 = vmatprep.subr.bf16.mxu1 %v7750_v59 }
 0xc8f   :  { %5611 = vmatpush1.bf16.msra.mxu0 %v7199_v37  ;;  %5635 = vmatpush3.bf16.msra.mxu1 %v7268_v26 }
 0xc90   :  { %5637 = vmatprep.subr.bf16.mxu0 %v7054_v60  ;;  %5668 = vmatprep.subr.bf16.mxu1 %v7750_v59 }
 0xd45   :  { %v2883_v38 = vpop.f32.mrb[24].mxu0  ;;  %v2954_v63 = vpop.f32.mrb[56].mxu1 }
 0xd46   :  { %v5820_v2 = vadd.f32 %v2883_v38, %v7346_v17  ;;  %v2885_v46 = vpop.f32.mrb[25].mxu0  ;;  %v4574_v30 = vpop.f32.mrb[57].mxu1  ;;  %v2972_v12 = vadd.f32 %v7357_v45, %v2954_v63 }
 0xd47   :  { %v5821_v1 = vadd.f32 %v2885_v46, %v7350_v39 }
 0xd48   :  { %v3679_v8 = vmul.f32 -1.442695, %v5820_v2 }
 0xd49   :  { %v3680_v4 = vmul.f32 -1.442695, %v5821_v1 }
 0xd4a   :  { %5967 = vpow2.f32 %v3679_v8 }
 0xd4b   :  { %5969 = vpow2.f32 %v3680_v4 }
 0xd54   :  { %v5968_v10 = vpop.eup %5967 }
 0xd55   :  { %v2962_v61 = vadd.f32 1.0, %v5968_v10  ;;  %v5970_v14 = vpop.eup %5969 }
 0xd56   :  { %v2969_v33 = vadd.f32 1.0, %v5970_v14 }
 0xd57   :  { %5971 = vrcp.f32 %v2962_v61  ;;  %v2043_v61 = vadd.f32 %v7287_v47, %v7361_v51 }
 0xd58   :  { %5973 = vrcp.f32 %v2969_v33 }
 0xd61   :  { %v5972_v42 = vpop.eup %5971 }
 0xd62   :  { %v2973_v22 = vmul.f32 %v5972_v42, %v2972_v12  ;;  %v5974_v57 = vpop.eup %5973 }
 0xd63   :  { %v2976_v0 = vsub.f32 1.0, %v5974_v57  ;;  %v2978_v34 = vmul.f32 %v5974_v57, %v7502_v49 }
 0xd64   :  { %v2974_v44 = vadd.f32 %v2973_v22, %v2038_v32 }
 0xd66   :  { %5975 = vtanh.f32 %v2974_v44 }
 0xd70   :  { %v5976_v15 = vpop.eup %5975 }
 0xd71   :  { %v2977_v20 = vmul.f32 %v5976_v15, %v2976_v0 }
 0xd73   :  { %v7547_v41 = vadd.f32 %v2978_v34, %v2977_v20  ;;  %v3501_v20 = vld [vmem:[%s7737_s10 + $0x20] sm:$0xff]  ;;  %v3502_v34 = vld [vmem:[%s7737_s10 + $0x28] sm:$0xff] }
 0xd75   :  { %3051 = vmatmul.mubr.f32.vlgmr.msra.gmra.mrb[26].mxu0 %v7547_v41  ;;  %4608 = vmatmul.mubr.f32.vlgmr.msra.gmra.mrb[58].mxu1 %v7547_v41 }
 0xd76   :  { %5639 = vmatpush1.bf16.msra.mxu0 %v7062_v25  ;;  %5670 = vmatpush3.bf16.msra.mxu1 %v7178_v24 }
 0xd77   :  { %5641 = vmatprep.subr.bf16.mxu0 %v7072_v9  ;;  %5671 = vmatprep.subr.bf16.mxu1 %v7750_v59 }
 0xd78   :  { %3219 = vmatprep.mubr.f32.mxu0 %v7751_v56  ;;  %4642 = vmatprep.mubr.msk.f32.mxu1 %vm6027_vm0, %v7751_v56 }
 0xd7a   :  { %5643 = vmatpush1.bf16.msra.mxu0 %v7080_v43  ;;  %5673 = vmatpush3.bf16.msra.mxu1 %v7207_v58 }
 0xd7b   :  { %5645 = vmatprep.subr.bf16.mxu0 %v7090_v48  ;;  %5674 = vmatprep.subr.bf16.mxu1 %v7750_v59 }
 0xd7e   :  { %5647 = vmatpush1.bf16.msra.mxu0 %v7098_v13  ;;  %5676 = vmatpush3.bf16.msra.mxu1 %v7222_v7 }
 0xd7f   :  { %5649 = vmatprep.subr.bf16.mxu0 %v7108_v35  ;;  %5677 = vmatprep.subr.bf16.mxu1 %v7750_v59 }
 0xd82   :  { %5651 = vmatpush1.bf16.msra.mxu0 %v7116_v52  ;;  %5679 = vmatpush3.bf16.msra.mxu1 %v7228_v18 }
 0xd83   :  { %5653 = vmatprep.subr.bf16.mxu0 %v7126_v6  ;;  %5680 = vmatprep.subr.bf16.mxu1 %v7750_v59 }
 0xd86   :  { %5655 = vmatpush1.bf16.msra.mxu0 %v7134_v29  ;;  %5682 = vmatpush3.bf16.msra.mxu1 %v7238_v28 }
 0xd87   :  { %5657 = vmatprep.subr.bf16.mxu0 %v7144_v21  ;;  %5683 = vmatprep.subr.bf16.mxu1 %v7750_v59 }
 0xd8a   :  { %5659 = vmatpush1.bf16.msra.mxu0 %v7152_v36  ;;  %5685 = vmatpush3.bf16.msra.mxu1 %v7248_v5 }
 0xd8b   :  { %5661 = vmatprep.subr.bf16.mxu0 %v7165_v53  ;;  %5686 = vmatprep.subr.bf16.mxu1 %v7750_v59 }
 0xd8e   :  { %5663 = vmatpush1.bf16.msra.mxu0 %v7176_v62  ;;  %5688 = vmatpush3.bf16.msra.mxu1 %v7258_v23 }
 0xd8f   :  { %5665 = vmatprep.subr.bf16.mxu0 %v7187_v19  ;;  %5689 = vmatprep.subr.bf16.mxu1 %v7750_v59 }
 0xd92   :  { %5667 = vmatpush1.bf16.msra.mxu0 %v7199_v37  ;;  %5691 = vmatpush3.bf16.msra.mxu1 %v7268_v26 }
 0xd93   :  { %5693 = vmatprep.subr.bf16.mxu0 %v7054_v60  ;;  %5724 = vmatprep.subr.bf16.mxu1 %v7750_v59 }
 0xe48   :  { %v3052_v50 = vpop.f32.mrb[26].mxu0  ;;  %v3123_v27 = vpop.f32.mrb[58].mxu1 }
 0xe49   :  { %v5822_v31 = vadd.f32 %v3052_v50, %v7346_v17  ;;  %v3054_v40 = vpop.f32.mrb[27].mxu0  ;;  %v4609_v38 = vpop.f32.mrb[59].mxu1  ;;  %v3141_v60 = vadd.f32 %v7357_v45, %v3123_v27  ;;  %v5756_v50 = vpack.c.bf16 %v3502_v34, %v3501_v20  ;;  %v3503_v27 = vld [vmem:[%s7737_s10 + $0x30] sm:$0xff] }
 0xe4a   :  { %v5823_v2 = vadd.f32 %v3054_v40, %v7350_v39  ;;  %v3505_v38 = vld [vmem:[%s7737_s10 + $0x40] sm:$0xff] }
 0xe4b   :  { %v3681_v63 = vmul.f32 -1.442695, %v5822_v31  ;;  %v3504_v31 = vld [vmem:[%s7737_s10 + $0x38] sm:$0xff] }
 0xe4c   :  { %v3682_v46 = vmul.f32 -1.442695, %v5823_v2  ;;  %v5760_v40 = vpack.c.bf16 %v3504_v31, %v3503_v27  ;;  %v3507_v2 = vld [vmem:[%s7737_s10 + $0x50] sm:$0xff] }
 0xe4d   :  { %5977 = vpow2.f32 %v3681_v63 }
 0xe4e   :  { %5979 = vpow2.f32 %v3682_v46  ;;  %v3508_v46 = vld [vmem:[%s7737_s10 + $0x58] sm:$0xff] }
 0xe57   :  { %v5978_v30 = vpop.eup %5977 }
 0xe58   :  { %v3131_v8 = vadd.f32 1.0, %v5978_v30  ;;  %v5980_v1 = vpop.eup %5979  ;;  %v5768_v30 = vpack.c.bf16 %v3508_v46, %v3507_v2 }
 0xe59   :  { %v3138_v4 = vadd.f32 1.0, %v5980_v1  ;;  %v3510_v1 = vld [vmem:[%s7737_s10 + $0x68] sm:$0xff] }
 0xe5a   :  { %5981 = vrcp.f32 %v3131_v8  ;;  %v3509_v8 = vld [vmem:[%s7737_s10 + $0x60] sm:$0xff] }
 0xe5b   :  { %5983 = vrcp.f32 %v3138_v4  ;;  %v5772_v4 = vpack.c.bf16 %v3510_v1, %v3509_v8 }
 0xe64   :  { %v5982_v10 = vpop.eup %5981 }
 0xe65   :  { %v3142_v14 = vmul.f32 %v5982_v10, %v3141_v60  ;;  %v5984_v12 = vpop.eup %5983  ;;  %v3511_v60 = vld [vmem:[%s7737_s10 + $0x70] sm:$0xff]  ;;  %v3512_v10 = vld [vmem:[%s7737_s10 + $0x78] sm:$0xff] }
 0xe66   :  { %v3145_v42 = vsub.f32 1.0, %v5984_v12  ;;  %v3147_v44 = vmul.f32 %v5984_v12, %v7547_v41 }
 0xe67   :  { %v3143_v33 = vadd.f32 %v3142_v14, %v2043_v61  ;;  %v5776_v61 = vpack.c.bf16 %v3512_v10, %v3511_v60 }
 0xe69   :  { %5985 = vtanh.f32 %v3143_v33 }
 0xe73   :  { %v5986_v32 = vpop.eup %5985 }
 0xe74   :  { %v3146_v22 = vmul.f32 %v5986_v32, %v3145_v42 }
 0xe76   :  { %v7592_v57 = vadd.f32 %v3147_v44, %v3146_v22 }
 0xe78   :  { %3220 = vmatmul.mubr.f32.vlgmr.msra.gmra.mrb[28].mxu0 %v7592_v57  ;;  %4643 = vmatmul.mubr.f32.vlgmr.msra.gmra.mrb[60].mxu1 %v7592_v57 }
 0xe79   :  { %5695 = vmatpush1.bf16.msra.mxu0 %v7062_v25  ;;  %5726 = vmatpush3.bf16.msra.mxu1 %v7178_v24  ;;  %v3498_v25 = vld [vmem:[%s7737_s10 + $0x8] sm:$0xff] }
 0xe7a   :  { %5697 = vmatprep.subr.bf16.mxu0 %v7072_v9  ;;  %5727 = vmatprep.subr.bf16.mxu1 %v7750_v59 }
 0xe7b   :  { %3388 = vmatprep.mubr.f32.mxu0 %v7751_v56  ;;  %4677 = vmatprep.mubr.msk.f32.mxu1 %vm6027_vm0, %v7751_v56  ;;  %v3497_v56 = vld [vmem:[%s7737_s10] sm:$0xff] }
 0xe7c   :  { %v5748_v9 = vpack.c.bf16 %v3498_v25, %v3497_v56 }
 0xe7d   :  { %5699 = vmatpush1.bf16.msra.mxu0 %v7080_v43  ;;  %5729 = vmatpush3.bf16.msra.mxu1 %v7207_v58 }
 0xe7e   :  { %5701 = vmatprep.subr.bf16.mxu0 %v7090_v48  ;;  %5730 = vmatprep.subr.bf16.mxu1 %v7750_v59 }
 0xe81   :  { %5703 = vmatpush1.bf16.msra.mxu0 %v7098_v13  ;;  %5732 = vmatpush3.bf16.msra.mxu1 %v7222_v7 }
 0xe82   :  { %5705 = vmatprep.subr.bf16.mxu0 %v7108_v35  ;;  %5733 = vmatprep.subr.bf16.mxu1 %v7750_v59 }
 0xe85   :  { %5707 = vmatpush1.bf16.msra.mxu0 %v7116_v52  ;;  %5735 = vmatpush3.bf16.msra.mxu1 %v7228_v18 }
 0xe86   :  { %5709 = vmatprep.subr.bf16.mxu0 %v7126_v6  ;;  %5736 = vmatprep.subr.bf16.mxu1 %v7750_v59 }
 0xe89   :  { %5711 = vmatpush1.bf16.msra.mxu0 %v7134_v29  ;;  %5738 = vmatpush3.bf16.msra.mxu1 %v7238_v28 }
 0xe8a   :  { %5713 = vmatprep.subr.bf16.mxu0 %v7144_v21  ;;  %5739 = vmatprep.subr.bf16.mxu1 %v7750_v59 }
 0xe8d   :  { %5715 = vmatpush1.bf16.msra.mxu0 %v7152_v36  ;;  %5741 = vmatpush3.bf16.msra.mxu1 %v7248_v5 }
 0xe8e   :  { %5717 = vmatprep.subr.bf16.mxu0 %v7165_v53  ;;  %5742 = vmatprep.subr.bf16.mxu1 %v7750_v59 }
 0xe91   :  { %5719 = vmatpush1.bf16.msra.mxu0 %v7176_v62  ;;  %5744 = vmatpush3.bf16.msra.mxu1 %v7258_v23  ;;  %v3499_v23 = vld [vmem:[%s7737_s10 + $0x10] sm:$0xff] }
 0xe92   :  { %5721 = vmatprep.subr.bf16.mxu0 %v7187_v19  ;;  %5745 = vmatprep.subr.bf16.mxu1 %v7750_v59 }
 0xe95   :  { %5723 = vmatpush1.bf16.msra.mxu0 %v7199_v37  ;;  %5747 = vmatpush3.bf16.msra.mxu1 %v7268_v26  ;;  %v2048_v37 = vadd.f32 %v7342_v11, %v7361_v51  ;;  %v3500_v26 = vld [vmem:[%s7737_s10 + $0x18] sm:$0xff] }
 0xe96   :  { %5749 = vmatprep.subr.bf16.mxu0 %v5748_v9  ;;  %v5752_v11 = vpack.c.bf16 %v3500_v26, %v3499_v23 }
 0xf4b   :  { %v3221_v43 = vpop.f32.mrb[28].mxu0  ;;  %v3292_v48 = vpop.f32.mrb[60].mxu1 }
 0xf4c   :  { %v5824_v13 = vadd.f32 %v3221_v43, %v7346_v17  ;;  %v3223_v35 = vpop.f32.mrb[29].mxu0  ;;  %v4644_v59 = vpop.f32.mrb[61].mxu1  ;;  %v3310_v24 = vadd.f32 %v7357_v45, %v3292_v48 }
 0xf4d   :  { %v5825_v6 = vadd.f32 %v3223_v35, %v7350_v39 }
 0xf4e   :  { %v3683_v52 = vmul.f32 -1.442695, %v5824_v13 }
 0xf4f   :  { %v3684_v29 = vmul.f32 -1.442695, %v5825_v6 }
 0xf50   :  { %5987 = vpow2.f32 %v3683_v52 }
 0xf51   :  { %5989 = vpow2.f32 %v3684_v29 }
 0xf5a   :  { %v5988_v21 = vpop.eup %5987 }
 0xf5b   :  { %v3300_v36 = vadd.f32 1.0, %v5988_v21  ;;  %v5990_v53 = vpop.eup %5989 }
 0xf5c   :  { %v3307_v62 = vadd.f32 1.0, %v5990_v53 }
 0xf5d   :  { %5991 = vrcp.f32 %v3300_v36 }
 0xf5e   :  { %5993 = vrcp.f32 %v3307_v62 }
 0xf67   :  { %v5992_v19 = vpop.eup %5991 }
 0xf68   :  { %v3311_v58 = vmul.f32 %v5992_v19, %v3310_v24  ;;  %v5994_v18 = vpop.eup %5993 }
 0xf69   :  { %v3314_v28 = vsub.f32 1.0, %v5994_v18  ;;  %v3316_v0 = vmul.f32 %v5994_v18, %v7592_v57 }
 0xf6a   :  { %v3312_v7 = vadd.f32 %v3311_v58, %v2048_v37 }
 0xf6c   :  { %5995 = vtanh.f32 %v3312_v7 }
 0xf76   :  { %v5996_v5 = vpop.eup %5995 }
 0xf77   :  { %v3315_v47 = vmul.f32 %v5996_v5, %v3314_v28 }
 0xf79   :  { %v7647_v15 = vadd.f32 %v3316_v0, %v3315_v47 }
 0xf7b   :  { %3389 = vmatmul.mubr.f32.vlgmr.msra.gmra.mrb[30].mxu0 %v7647_v15  ;;  %4678 = vmatmul.mubr.f32.vlgmr.msra.gmra.mrb[62].mxu1 %v7647_v15 }
 0xf7c   :  { %5751 = vmatpush3.bf16.msra.mxu0 %v5748_v9  ;;  %4712 = vmatprep.mubr.f32.mxu0 %v7367_v3  ;;  %v3506_v3 = vld [vmem:[%s7737_s10 + $0x48] sm:$0xff]  ;;  %v2053_v9 = vadd.f32 %v7340_v16, %v7361_v51 }
 0xf7d   :  { %5753 = vmatprep.subr.bf16.mxu0 %v5752_v11  ;;  %v5764_v63 = vpack.c.bf16 %v3506_v3, %v3505_v38 }
 0xf80   :  { %5755 = vmatpush3.bf16.msra.mxu0 %v5752_v11 }
 0xf81   :  { %5757 = vmatprep.subr.bf16.mxu0 %v5756_v50 }
 0xf84   :  { %5759 = vmatpush3.bf16.msra.mxu0 %v5756_v50 }
 0xf85   :  { %5761 = vmatprep.subr.bf16.mxu0 %v5760_v40 }
 0xf88   :  { %5763 = vmatpush3.bf16.msra.mxu0 %v5760_v40 }
 0xf89   :  { %5765 = vmatprep.subr.bf16.mxu0 %v5764_v63 }
 0xf8c   :  { %5767 = vmatpush3.bf16.msra.mxu0 %v5764_v63 }
 0xf8d   :  { %5769 = vmatprep.subr.bf16.mxu0 %v5768_v30 }
 0xf90   :  { %5771 = vmatpush3.bf16.msra.mxu0 %v5768_v30 }
 0xf91   :  { %5773 = vmatprep.subr.bf16.mxu0 %v5772_v4 }
 0xf94   :  { %5775 = vmatpush3.bf16.msra.mxu0 %v5772_v4 }
 0xf95   :  { %5777 = vmatprep.subr.bf16.mxu0 %v5776_v61 }
 0xf98   :  { %5779 = vmatpush3.bf16.msra.mxu0 %v5776_v61 }
 0xf9b   :  { %4713 = vmatmul.mubr.f32.vlgmr.msra.gmra.mrb[32].mxu0 %v7412_v55 }
 0xf9c   :  { %4715 = vmatprep.mubr.f32.mxu0 %v7457_v54 }
 0xf9f   :  { %4716 = vmatmul.mubr.f32.gmra.mrb[34].mxu0 %v7502_v49 }
 0xfa0   :  { %4718 = vmatprep.mubr.f32.mxu0 %v7547_v41 }
 0xfa3   :  { %4719 = vmatmul.mubr.f32.gmra.mrb[36].mxu0 %v7592_v57 }
 0xfa4   :  { %4721 = vmatprep.mubr.f32.mxu0 %v7647_v15 }
0x104e   :  { %v3390_v14 = vpop.f32.mrb[30].mxu0  ;;  %v3461_v33 = vpop.f32.mrb[62].mxu1 }
0x104f   :  { %v5826_v12 = vadd.f32 %v3390_v14, %v7346_v17  ;;  %v3392_v42 = vpop.f32.mrb[31].mxu0  ;;  %v4679_v32 = vpop.f32.mrb[63].mxu1  ;;  %v3479_v57 = vadd.f32 %v7357_v45, %v3461_v33 }
0x1050   :  { %v5827_v44 = vadd.f32 %v3392_v42, %v7350_v39  ;;  %v3687_v39 = vld [vmem:[%s7738_s11] ss:$0 sm:$0xff] }
0x1051   :  { %v3685_v22 = vmul.f32 -1.442695, %v5826_v12 }
0x1052   :  { %v3686_v55 = vmul.f32 -1.442695, %v5827_v44 }
0x1053   :  { %5997 = vpow2.f32 %v3685_v22 }
0x1054   :  { %5999 = vpow2.f32 %v3686_v55 }
0x105d   :  { %v5998_v54 = vpop.eup %5997 }
0x105e   :  { %v3469_v49 = vadd.f32 1.0, %v5998_v54  ;;  %v6000_v41 = vpop.eup %5999 }
0x105f   :  { %v3476_v56 = vadd.f32 1.0, %v6000_v41 }
0x1060   :  { %6001 = vrcp.f32 %v3469_v49 }
0x1061   :  { %6003 = vrcp.f32 %v3476_v56 }
0x106a   :  { %v6002_v25 = vpop.eup %6001 }
0x106b   :  { %v3480_v17 = vmul.f32 %v6002_v25, %v3479_v57  ;;  %v6004_v51 = vpop.eup %6003 }
0x106c   :  { %v3483_v58 = vsub.f32 1.0, %v6004_v51  ;;  %v3485_v23 = vmul.f32 %v6004_v51, %v7647_v15 }
0x106d   :  { %v3481_v43 = vadd.f32 %v3480_v17, %v2053_v9 }
0x106e   :  { %v4714_v48 = vpop.f32.mrb[32].mxu0 }
0x106f   :  { %6005 = vtanh.f32 %v3481_v43  ;;  %v3592_v13 = vadd.f32 %v4714_v48, %v3687_v39  ;;  %v3586_v35 = vpop.f32.mrb[33].mxu0 }
0x1070   :  { %v3587_v59 = vadd.f32 %v3687_v39, %v3586_v35 }
0x1071   :  { %v3627_v52 = vmul.f32 1.442695, %v3592_v13 }
0x1072   :  { %v3625_v6 = vmul.f32 1.442695, %v3587_v59  ;;  %v4717_v29 = vpop.f32.mrb[34].mxu0 }
0x1073   :  { %6007 = vpow2.f32 %v3627_v52  ;;  %v3602_v45 = vadd.f32 %v4717_v29, %v3687_v39  ;;  %v3596_v21 = vpop.f32.mrb[35].mxu0 }
0x1074   :  { %6009 = vpow2.f32 %v3625_v6  ;;  %v3597_v16 = vadd.f32 %v3687_v39, %v3596_v21 }
0x1075   :  { %v3631_v36 = vmul.f32 1.442695, %v3602_v45 }
0x1076   :  { %v3629_v53 = vmul.f32 1.442695, %v3597_v16  ;;  %v4720_v62 = vpop.f32.mrb[36].mxu0 }
0x1077   :  { %6011 = vpow2.f32 %v3631_v36  ;;  %v3612_v24 = vadd.f32 %v4720_v62, %v3687_v39  ;;  %v3606_v19 = vpop.f32.mrb[37].mxu0 }
0x1078   :  { %6013 = vpow2.f32 %v3629_v53  ;;  %v3607_v37 = vadd.f32 %v3687_v39, %v3606_v19 }
0x1079   :  { %v6006_v7 = vpop.eup %6005  ;;  %v3635_v18 = vmul.f32 1.442695, %v3612_v24 }
0x107a   :  { %v3633_v28 = vmul.f32 1.442695, %v3607_v37  ;;  %v3484_v5 = vmul.f32 %v6006_v7, %v3483_v58 }
0x107b   :  { %6015 = vpow2.f32 %v3635_v18 }
0x107c   :  { %6017 = vpow2.f32 %v3633_v28  ;;  %v3486_v26 = vadd.f32 %v3485_v23, %v3484_v5 }
0x107d   :  { %v6008_v47 = vpop.eup %6007 }
0x107e   :  { %v6010_v0 = vpop.eup %6009  ;;  %3642 = vst [vmem:[%s7739_s12 + $0x8] sm:$0xff] %v6008_v47  ;;  %4722 = vmatmul.mubr.f32.gmra.mrb[38].mxu0 %v3486_v26 }
0x107f   :  { %3641 = vst [vmem:[%s7739_s12] sm:$0xff] %v6010_v0 }
0x1081   :  { %v6012_v11 = vpop.eup %6011 }
0x1082   :  { %v6014_v20 = vpop.eup %6013  ;;  %3644 = vst [vmem:[%s7739_s12 + $0x18] sm:$0xff] %v6012_v11 }
0x1083   :  { %3643 = vst [vmem:[%s7739_s12 + $0x10] sm:$0xff] %v6014_v20 }
0x1085   :  { %v6016_v15 = vpop.eup %6015 }
0x1086   :  { %v6018_v34 = vpop.eup %6017  ;;  %3646 = vst [vmem:[%s7739_s12 + $0x28] sm:$0xff] %v6016_v15 }
0x1087   :  { %3645 = vst [vmem:[%s7739_s12 + $0x20] sm:$0xff] %v6018_v34 }
0x1151   :  { %v4723_v50 = vpop.f32.mrb[38].mxu0 }
0x1152   :  { %v3622_v27 = vadd.f32 %v4723_v50, %v3687_v39  ;;  %v3616_v31 = vpop.f32.mrb[39].mxu0 }
0x1153   :  { %v3617_v40 = vadd.f32 %v3687_v39, %v3616_v31 }
0x1154   :  { %v3639_v38 = vmul.f32 1.442695, %v3622_v27 }
0x1155   :  { %v3637_v3 = vmul.f32 1.442695, %v3617_v40 }
0x1156   :  { %6019 = vpow2.f32 %v3639_v38 }
0x1157   :  { %6021 = vpow2.f32 %v3637_v3 }
0x1160   :  { %v6020_v63 = vpop.eup %6019 }
0x1161   :  { %v6022_v2 = vpop.eup %6021  ;;  %3648 = vst [vmem:[%s7739_s12 + $0x38] sm:$0xff] %v6020_v63 }
0x1162   :  { %3647 = vst [vmem:[%s7739_s12 + $0x30] sm:$0xff] %v6022_v2 }

// kernel: rnn_vae_forward.2
= control target key start
LH: loop header
LB: loop body
LE: loop exit
PB: predicated region body
PF: predicated region fallthrough
CT: control target
= control target key end

     0   :  { %v8092_v3 = vmov 0.0   ;;  %v6168_v4 = vmov 0   ;;  %vm6170_vm3 = vmmov 0   ;;  %s8076_s2 = inlined_call_operand.vmem [shape: f32[128,384], index: 2, kind: input, shape index: {}]   ;;  %s8077_s0 = inlined_call_operand.vmem [shape: f32[64,128], index: 0, kind: input, shape index: {}]   ;;  %s8078_s3 = inlined_call_operand.vmem [shape: f32[128,384], index: 3, kind: input, shape index: {}]   ;;  %s8079_s1 = inlined_call_operand.vmem [shape: s32[8,1], index: 1, kind: input, shape index: {}]   ;;  %s8080_s4 = inlined_call_operand.vmem [shape: f32[1,384], index: 4, kind: input, shape index: {}]   ;;  %s8081_s5 = inlined_call_operand.vmem [shape: f32[1,128], index: 5, kind: input, shape index: {}]   ;;  %s8082_s6 = inlined_call_operand.vmem [shape: f32[128,384], index: 6, kind: input, shape index: {}]   ;;  %s8083_s7 = inlined_call_operand.vmem [shape: f32[128,384], index: 7, kind: input, shape index: {}]   ;;  %s8084_s8 = inlined_call_operand.vmem [shape: f32[1,384], index: 8, kind: input, shape index: {}]   ;;  %s8085_s9 = inlined_call_operand.vmem [shape: f32[1,128], index: 9, kind: input, shape index: {}]   ;;  %s8086_s10 = inlined_call_operand.vmem [shape: f32[128,256], index: 10, kind: input, shape index: {}]   ;;  %s8087_s12 = inlined_call_operand.vmem [shape: f32[128,128], index: 12, kind: input, shape index: {}]   ;;  %s8088_s11 = inlined_call_operand.vmem [shape: f32[1,256], index: 11, kind: input, shape index: {}]   ;;  %s8089_s14 = inlined_call_operand.vmem [shape: f32[8,256], index: 14, kind: output, shape index: {0}]   ;;  %s8090_s13 = inlined_call_operand.vmem [shape: f32[1,128], index: 13, kind: input, shape index: {}]   ;;  %s8091_s15 = inlined_call_operand.vmem [shape: f32[8,128], index: 15, kind: output, shape index: {1}]  }
   0x1   :  { %v59_v0 = vld [vmem:[%s8076_s2 + $0x8] sm:$0xff]  ;;  %v62_v1 = vld [vmem:[%s8076_s2 + $0x20] sm:$0xff]  ;;  %187 = vmatprep.mubr.f32.mxu0 %v8092_v3  ;;  %6003 = vset.pattern.permute.xlu0 %v6168_v4  ;;  %v61_v6 = vld [vmem:[%s8076_s2 + $0x18] sm:$0xff] }
   0x2   :  { %v58_v2 = vld [vmem:[%s8076_s2] sm:$0xff]  ;;  %v4855_v5 = vpack.c.bf16 %v62_v1, %v59_v0  ;;  %v65_v7 = vld [vmem:[%s8076_s2 + $0x38] sm:$0xff]  ;;  %v68_v8 = vld [vmem:[%s8076_s2 + $0x50] sm:$0xff]  ;;  %6004 = vset.pattern.permute.xlu1 %v6168_v4 }
   0x3   :  { %v4857_v9 = vpack.c.bf16 %v61_v6, %v58_v2  ;;  %v4859_v10 = vpack.c.bf16 %v68_v8, %v65_v7  ;;  %v64_v11 = vld [vmem:[%s8076_s2 + $0x30] sm:$0xff]  ;;  %v67_v12 = vld [vmem:[%s8076_s2 + $0x48] sm:$0xff]  ;;  %v74_v14 = vld [vmem:[%s8076_s2 + $0x80] sm:$0xff] }
   0x4   :  { %v71_v13 = vld [vmem:[%s8076_s2 + $0x68] sm:$0xff]  ;;  %4856 = vmatprep.subr.bf16.mxu0 %v4855_v5  ;;  %v4861_v15 = vpack.c.bf16 %v67_v12, %v64_v11  ;;  %v70_v17 = vld [vmem:[%s8076_s2 + $0x60] sm:$0xff]  ;;  %v73_v18 = vld [vmem:[%s8076_s2 + $0x78] sm:$0xff] }
   0x5   :  { %4858 = vmatpush1.bf16.msra.mxu0 %v4857_v9  ;;  %v4863_v16 = vpack.c.bf16 %v74_v14, %v71_v13  ;;  %v77_v19 = vld [vmem:[%s8076_s2 + $0x98] sm:$0xff]  ;;  %v80_v20 = vld [vmem:[%s8076_s2 + $0xb0] sm:$0xff]  ;;  %v4865_v21 = vpack.c.bf16 %v73_v18, %v70_v17  ;;  %v79_v24 = vld [vmem:[%s8076_s2 + $0xa8] sm:$0xff] }
   0x6   :  { %4860 = vmatprep.subr.bf16.mxu0 %v4859_v10  ;;  %v76_v22 = vld [vmem:[%s8076_s2 + $0x90] sm:$0xff]  ;;  %v4867_v23 = vpack.c.bf16 %v80_v20, %v77_v19  ;;  %v63_v26 = vld [vmem:[%s8076_s2 + $0x28] sm:$0xff]  ;;  %v86_v28 = vld [vmem:[%s8076_s2 + $0xe0] sm:$0xff] }
   0x7   :  { %v60_v25 = vld [vmem:[%s8076_s2 + $0x10] sm:$0xff]  ;;  %v83_v27 = vld [vmem:[%s8076_s2 + $0xc8] sm:$0xff]  ;;  %v66_v30 = vld [vmem:[%s8076_s2 + $0x40] sm:$0xff]  ;;  %v4869_v32 = vpack.c.bf16 %v79_v24, %v76_v22 }
   0x8   :  { %v4887_v29 = vpack.c.bf16 %v63_v26, %v60_v25  ;;  %v69_v31 = vld [vmem:[%s8076_s2 + $0x58] sm:$0xff]  ;;  %v82_v33 = vld [vmem:[%s8076_s2 + $0xc0] sm:$0xff]  ;;  %v4871_v35 = vpack.c.bf16 %v86_v28, %v83_v27  ;;  %v72_v38 = vld [vmem:[%s8076_s2 + $0x70] sm:$0xff] }
   0x9   :  { %4862 = vmatpush1.bf16.msra.mxu0 %v4861_v15  ;;  %v4891_v34 = vpack.c.bf16 %v69_v31, %v66_v30  ;;  %v85_v36 = vld [vmem:[%s8076_s2 + $0xd8] sm:$0xff]  ;;  %v6329_v37 = vld [vmem:[%s8077_s0] sm:$0xff]  ;;  %v92_v40 = vld [vmem:[%s8076_s2 + $0x110] sm:$0xff] }
   0xa   :  { %4864 = vmatprep.subr.bf16.mxu0 %v4863_v16  ;;  %4888 = vmatprep.subr.bf16.mxu1 %v4887_v29  ;;  %v89_v39 = vld [vmem:[%s8076_s2 + $0xf8] sm:$0xff]  ;;  %v75_v41 = vld [vmem:[%s8076_s2 + $0x88] sm:$0xff]  ;;  %v4873_v43 = vpack.c.bf16 %v85_v36, %v82_v33  ;;  %v78_v44 = vld [vmem:[%s8076_s2 + $0xa0] sm:$0xff] }
   0xb   :  { %4890 = vmatpush3.bf16.msra.mxu1 %v4887_v29  ;;  %4204 = vmatprep.mubr.f32.mxu1 %v6329_v37  ;;  %v4895_v42 = vpack.c.bf16 %v75_v41, %v72_v38  ;;  %v81_v45 = vld [vmem:[%s8076_s2 + $0xb8] sm:$0xff]  ;;  %v4875_v46 = vpack.c.bf16 %v92_v40, %v89_v39  ;;  %v88_v47 = vld [vmem:[%s8076_s2 + $0xf0] sm:$0xff]  ;;  %v91_v48 = vld [vmem:[%s8076_s2 + $0x108] sm:$0xff] }
   0xc   :  { %4892 = vmatprep.subr.bf16.mxu1 %v4891_v34  ;;  %v95_v49 = vld [vmem:[%s8076_s2 + $0x128] sm:$0xff]  ;;  %v98_v50 = vld [vmem:[%s8076_s2 + $0x140] sm:$0xff]  ;;  %v4899_v51 = vpack.c.bf16 %v81_v45, %v78_v44  ;;  %v84_v52 = vld [vmem:[%s8076_s2 + $0xd0] sm:$0xff]  ;;  %v4877_v54 = vpack.c.bf16 %v91_v48, %v88_v47  ;;  %v6169_v45 = vmov 0.0|0.0  }
   0xd   :  { %4866 = vmatpush1.bf16.msra.mxu0 %v4865_v21  ;;  %v87_v53 = vld [vmem:[%s8076_s2 + $0xe8] sm:$0xff]  ;;  %v4879_v55 = vpack.c.bf16 %v98_v50, %v95_v49  ;;  %v94_v56 = vld [vmem:[%s8076_s2 + $0x120] sm:$0xff]  ;;  %v97_v57 = vld [vmem:[%s8076_s2 + $0x138] sm:$0xff] }
   0xe   :  { %4868 = vmatprep.subr.bf16.mxu0 %v4867_v23  ;;  %v101_v58 = vld [vmem:[%s8076_s2 + $0x158] sm:$0xff]  ;;  %v104_v59 = vld [vmem:[%s8076_s2 + $0x170] sm:$0xff]  ;;  %v4903_v60 = vpack.c.bf16 %v87_v53, %v84_v52  ;;  %v90_v61 = vld [vmem:[%s8076_s2 + $0x100] sm:$0xff]  ;;  %v4881_v63 = vpack.c.bf16 %v97_v57, %v94_v56 }
   0xf   :  { %4894 = vmatpush3.bf16.msra.mxu1 %v4891_v34  ;;  %v93_v62 = vld [vmem:[%s8076_s2 + $0x118] sm:$0xff]  ;;  %v4883_v0 = vpack.c.bf16 %v104_v59, %v101_v58  ;;  %v100_v1 = vld [vmem:[%s8076_s2 + $0x150] sm:$0xff]  ;;  %v103_v2 = vld [vmem:[%s8076_s2 + $0x168] sm:$0xff] }
  0x10   :  { %4896 = vmatprep.subr.bf16.mxu1 %v4895_v42  ;;  %v367_v5 = vld [vmem:[%s8078_s3 + $0x8] sm:$0xff]  ;;  %v370_v6 = vld [vmem:[%s8078_s3 + $0x20] sm:$0xff]  ;;  %v4907_v7 = vpack.c.bf16 %v93_v62, %v90_v61  ;;  %v96_v8 = vld [vmem:[%s8076_s2 + $0x130] sm:$0xff]  ;;  %v4885_v10 = vpack.c.bf16 %v103_v2, %v100_v1 }
  0x11   :  { %4870 = vmatpush1.bf16.msra.mxu0 %v4869_v32  ;;  %v99_v9 = vld [vmem:[%s8076_s2 + $0x148] sm:$0xff]  ;;  %v6404_v11 = vpack.c.bf16 %v370_v6, %v367_v5  ;;  %v366_v12 = vld [vmem:[%s8078_s3] sm:$0xff]  ;;  %v369_v13 = vld [vmem:[%s8078_s3 + $0x18] sm:$0xff] }
  0x12   :  { %4872 = vmatprep.subr.bf16.mxu0 %v4871_v35  ;;  %v373_v14 = vld [vmem:[%s8078_s3 + $0x38] sm:$0xff]  ;;  %v376_v15 = vld [vmem:[%s8078_s3 + $0x50] sm:$0xff]  ;;  %v4911_v16 = vpack.c.bf16 %v99_v9, %v96_v8  ;;  %v102_v17 = vld [vmem:[%s8076_s2 + $0x160] sm:$0xff]  ;;  %v6424_v19 = vpack.c.bf16 %v369_v13, %v366_v12 }
  0x13   :  { %4898 = vmatpush3.bf16.msra.mxu1 %v4895_v42  ;;  %v105_v18 = vld [vmem:[%s8076_s2 + $0x178] sm:$0xff]  ;;  %v6427_v20 = vpack.c.bf16 %v376_v15, %v373_v14  ;;  %v372_v21 = vld [vmem:[%s8078_s3 + $0x30] sm:$0xff]  ;;  %v375_v22 = vld [vmem:[%s8078_s3 + $0x48] sm:$0xff] }
  0x14   :  { %4900 = vmatprep.subr.bf16.mxu1 %v4899_v51  ;;  %v379_v23 = vld [vmem:[%s8078_s3 + $0x68] sm:$0xff]  ;;  %v382_v24 = vld [vmem:[%s8078_s3 + $0x80] sm:$0xff]  ;;  %v4915_v25 = vpack.c.bf16 %v105_v18, %v102_v17  ;;  %v6453_v28 = vpack.c.bf16 %v375_v22, %v372_v21  ;;  %v381_v32 = vld [vmem:[%s8078_s3 + $0x78] sm:$0xff] }
  0x15   :  { %4874 = vmatpush1.bf16.msra.mxu0 %v4873_v43  ;;  %v6444_v26 = vld [vmem:[%s8079_s1] sm:$0xff]  ;;  %v51_v27 = vld [vmem:[%s8077_s0 + $0x8] sm:$0xff]  ;;  %v6458_v30 = vpack.c.bf16 %v382_v24, %v379_v23  ;;  %v385_v33 = vld [vmem:[%s8078_s3 + $0x98] sm:$0xff] }
  0x16   :  { %4876 = vmatprep.subr.bf16.mxu0 %v4875_v46  ;;  %vm588_vm0 = vcmp.gt.s32.totalorder %v6444_v26, 0  ;;  %vm765_vm1 = vcmp.gt.s32.totalorder %v6444_v26, 1  ;;  %v378_v31 = vld [vmem:[%s8078_s3 + $0x60] sm:$0xff]  ;;  %v388_v34 = vld [vmem:[%s8078_s3 + $0xb0] sm:$0xff]  ;;  %v371_v36 = vld [vmem:[%s8078_s3 + $0x28] sm:$0xff]  ;;  %vm1296_vm2 = vcmp.gt.s32.totalorder %v6444_v26, 4 }
  0x17   :  { %4902 = vmatpush3.bf16.msra.mxu1 %v4899_v51  ;;  %v589_v29 = vsel %vm588_vm0, 1, %v6168_v4  ;;  %v368_v35 = vld [vmem:[%s8078_s3 + $0x10] sm:$0xff]  ;;  %v6484_v39 = vpack.c.bf16 %v381_v32, %v378_v31  ;;  %v6487_v40 = vpack.c.bf16 %v388_v34, %v385_v33  ;;  %v387_v42 = vld [vmem:[%s8078_s3 + $0xa8] sm:$0xff]  ;;  %v394_v44 = vld [vmem:[%s8078_s3 + $0xe0] sm:$0xff]  ;;  %vm1650_vm4 = vcmp.gt.s32.totalorder %v6444_v26, 6 }
  0x18   :  { %4904 = vmatprep.subr.bf16.mxu1 %v4903_v60  ;;  %591 = vperm.xlu0 %6003, %v589_v29   ;;  %v52_v38 = vld [vmem:[%s8077_s0 + $0x10] sm:$0xff]  ;;  %v391_v43 = vld [vmem:[%s8078_s3 + $0xc8] sm:$0xff]  ;;  %v6502_v46 = vpack.c.bf16 %v371_v36, %v368_v35  ;;  %v374_v47 = vld [vmem:[%s8078_s3 + $0x40] sm:$0xff]  ;;  %v1297_v29 = vsel %vm1296_vm2, 1, %v6168_v4  ;;  %v1651_v35 = vsel %vm1650_vm4, 1, %v6168_v4  ;;  %vm942_vm6 = vcmp.gt.s32.totalorder %v6444_v26, 2 }
  0x19   :  { %4878 = vmatpush1.bf16.msra.mxu0 %v4877_v54  ;;  %v384_v41 = vld [vmem:[%s8078_s3 + $0x90] sm:$0xff]  ;;  %v377_v48 = vld [vmem:[%s8078_s3 + $0x58] sm:$0xff]  ;;  %v6518_v51 = vpack.c.bf16 %v394_v44, %v391_v43  ;;  %v390_v52 = vld [vmem:[%s8078_s3 + $0xc0] sm:$0xff]  ;;  %v108_v44 = vlaneseq  ;;  %vm1119_vm7 = vcmp.gt.s32.totalorder %v6444_v26, 3  ;;  %vm1473_vm8 = vcmp.gt.s32.totalorder %v6444_v26, 5 }
  0x1a   :  { %4880 = vmatprep.subr.bf16.mxu0 %v4879_v55  ;;  %v53_v49 = vld [vmem:[%s8077_s0 + $0x18] sm:$0xff]  ;;  %v6515_v50 = vpack.c.bf16 %v387_v42, %v384_v41  ;;  %v400_v55 = vld [vmem:[%s8078_s3 + $0x110] sm:$0xff]  ;;  %v6533_v56 = vpack.c.bf16 %v377_v48, %v374_v47  ;;  %v383_v58 = vld [vmem:[%s8078_s3 + $0x88] sm:$0xff]  ;;  %vm1827_vm9 = vcmp.gt.s32.totalorder %v6444_v26, 7 }
  0x1b   :  { %4906 = vmatpush3.bf16.msra.mxu1 %v4903_v60  ;;  %v393_v53 = vld [vmem:[%s8078_s3 + $0xd8] sm:$0xff]  ;;  %v380_v57 = vld [vmem:[%s8078_s3 + $0x70] sm:$0xff]  ;;  %v54_v59 = vld [vmem:[%s8077_s0 + $0x20] sm:$0xff]  ;;  %v6712_v47 = vshrl.u32 %v108_v44, 7 }
  0x1c   :  { %4908 = vmatprep.subr.bf16.mxu1 %v4907_v7  ;;  %v397_v54 = vld [vmem:[%s8078_s3 + $0xf8] sm:$0xff]  ;;  %v6547_v60 = vpack.c.bf16 %v393_v53, %v390_v52  ;;  %v396_v62 = vld [vmem:[%s8078_s3 + $0xf0] sm:$0xff]  ;;  %v406_v1 = vld [vmem:[%s8078_s3 + $0x140] sm:$0xff]  ;;  %v6565_v2 = vpack.c.bf16 %v383_v58, %v380_v57 }
  0x1d   :  { %4882 = vmatpush1.bf16.msra.mxu0 %v4881_v63  ;;  %v6550_v61 = vpack.c.bf16 %v400_v55, %v397_v54  ;;  %v399_v63 = vld [vmem:[%s8078_s3 + $0x108] sm:$0xff]  ;;  %v386_v5 = vld [vmem:[%s8078_s3 + $0xa0] sm:$0xff]  ;;  %v389_v6 = vld [vmem:[%s8078_s3 + $0xb8] sm:$0xff]  ;;  %v118_v48 = vsub.s32 2, %v6712_v47 }
  0x1e   :  { %4884 = vmatprep.subr.bf16.mxu0 %v4883_v0  ;;  %v403_v0 = vld [vmem:[%s8078_s3 + $0x128] sm:$0xff]  ;;  %v6579_v8 = vpack.c.bf16 %v399_v63, %v396_v62  ;;  %v56_v9 = vld [vmem:[%s8077_s0 + $0x30] sm:$0xff]  ;;  %v402_v12 = vld [vmem:[%s8078_s3 + $0x120] sm:$0xff] }
  0x1f   :  { %4910 = vmatpush3.bf16.msra.mxu1 %v4907_v7  ;;  %v55_v7 = vld [vmem:[%s8077_s0 + $0x28] sm:$0xff]  ;;  %v405_v13 = vld [vmem:[%s8078_s3 + $0x138] sm:$0xff]  ;;  %v412_v15 = vld [vmem:[%s8078_s3 + $0x170] sm:$0xff] }
  0x20   :  { %4912 = vmatprep.subr.bf16.mxu1 %v4911_v16  ;;  %v409_v14 = vld [vmem:[%s8078_s3 + $0x158] sm:$0xff]  ;;  %v392_v17 = vld [vmem:[%s8078_s3 + $0xd0] sm:$0xff]  ;;  %v395_v18 = vld [vmem:[%s8078_s3 + $0xe8] sm:$0xff]  ;;  %v6612_v21 = vpack.c.bf16 %v405_v13, %v402_v12  ;;  %v6735_v13 = vsub.s32 0, %v6712_v47 }
  0x21   :  { %4886 = vmatpush1.bf16.msra.mxu0 %v4885_v10  ;;  %v6585_v10 = vpack.c.bf16 %v406_v1, %v403_v0  ;;  %v57_v22 = vld [vmem:[%s8077_s0 + $0x38] sm:$0xff]  ;;  %v6618_v23 = vpack.c.bf16 %v412_v15, %v409_v14  ;;  %v408_v24 = vld [vmem:[%s8078_s3 + $0x150] sm:$0xff]  ;;  %v398_v31 = vld [vmem:[%s8078_s3 + $0x100] sm:$0xff]  ;;  %v6738_v14 = vsub.s32 1, %v6712_v47  ;;  %v8094_v47 = vmov 0.0  }
  0x22   :  { %4920 = vmatprep.subr.bf16.mxu0 %v6404_v11  ;;  %v401_v32 = vld [vmem:[%s8078_s3 + $0x118] sm:$0xff]  ;;  %v404_v36 = vld [vmem:[%s8078_s3 + $0x130] sm:$0xff]  ;;  %v410_v41 = vld [vmem:[%s8078_s3 + $0x160] sm:$0xff] }
  0x23   :  { %4914 = vmatpush3.bf16.msra.mxu1 %v4911_v16  ;;  %v6600_v16 = vpack.c.bf16 %v389_v6, %v386_v5  ;;  %v6646_v34 = vpack.c.bf16 %v401_v32, %v398_v31  ;;  %v413_v42 = vld [vmem:[%s8078_s3 + $0x178] sm:$0xff] }
  0x24   :  { %188 = vmatmul.mubr.f32.vlgmr.msra.gmra.mrb[0].mxu0 %v6329_v37  ;;  %4916 = vmatprep.subr.bf16.mxu1 %v4915_v25  ;;  %v766_v37 = vsel %vm765_vm1, 1, %v6168_v4  ;;  %v6674_v43 = vpack.c.bf16 %v413_v42, %v410_v41  ;;  %v6751_v42 = vld [vmem:[%s8081_s5] ss:$0 sm:$0xff] }
  0x25   :  { %4922 = vmatpush1.bf16.msra.mxu0 %v6424_v19  ;;  %193 = vmatprep.mubr.f32.mxu0 %v8092_v3 }
  0x26   :  { %4924 = vmatprep.subr.bf16.mxu0 %v6427_v20  ;;  %768 = vperm.xlu0 %6003, %v766_v37   ;;  %v407_v37 = vld [vmem:[%s8078_s3 + $0x148] sm:$0xff] }
  0x27   :  { %4918 = vmatpush3.bf16.msra.mxu1 %v4915_v25  ;;  %v411_v25 = vld [vmem:[%s8078_s3 + $0x168] sm:$0xff] }
  0x28   :  { %194 = vmatmul.mubr.f32.gmra.mrb[2].mxu0 %v51_v27  ;;  %4951 = vmatprep.subr.bf16.mxu1 %v6169_v45  ;;  %v6642_v33 = vpack.c.bf16 %v411_v25, %v408_v24 }
  0x29   :  { %4926 = vmatpush1.bf16.msra.mxu0 %v6453_v28  ;;  %199 = vmatprep.mubr.f32.mxu0 %v8092_v3 }
  0x2a   :  { %4928 = vmatprep.subr.bf16.mxu0 %v6458_v30  ;;  %4205 = vmatmul.mubr.f32.vlgmr.msra.gmra.mrb[0].mxu1 %v51_v27  ;;  %v6627_v27 = vpack.c.bf16 %v395_v18, %v392_v17 }
  0x2b   :  { %4953 = vmatpush3.bf16.msra.mxu1 %v6502_v46  ;;  %4207 = vmatprep.mubr.f32.mxu1 %v52_v38 }
  0x2c   :  { %200 = vmatmul.mubr.f32.gmra.mrb[4].mxu0 %v52_v38  ;;  %4954 = vmatprep.subr.bf16.mxu1 %v6169_v45  ;;  %v6660_v38 = vpack.c.bf16 %v407_v37, %v404_v36 }
  0x2d   :  { %4930 = vmatpush1.bf16.msra.mxu0 %v6484_v39  ;;  %205 = vmatprep.mubr.f32.mxu0 %v8092_v3 }
  0x2e   :  { %4932 = vmatprep.subr.bf16.mxu0 %v6487_v40  ;;  %4208 = vmatmul.mubr.f32.gmra.mrb[2].mxu1 %v53_v49 }
  0x2f   :  { %4956 = vmatpush3.bf16.msra.mxu1 %v6533_v56  ;;  %4210 = vmatprep.mubr.f32.mxu1 %v54_v59 }
  0x30   :  { %206 = vmatmul.mubr.f32.gmra.mrb[6].mxu0 %v53_v49  ;;  %4957 = vmatprep.subr.bf16.mxu1 %v6169_v45  ;;  %v106_v49 = vld [vmem:[%s8080_s4] sm:$0x7] }
  0x31   :  { %4934 = vmatpush1.bf16.msra.mxu0 %v6515_v50  ;;  %211 = vmatprep.mubr.f32.mxu0 %v8092_v3  ;;  %v119_v52 = vrot.slane %v106_v49, %v118_v48  ;;  %v6741_v15 = vrot.slane %v106_v49, %v6735_v13  ;;  %v6744_v18 = vrot.slane %v106_v49, %v6738_v14 }
  0x32   :  { %4936 = vmatprep.subr.bf16.mxu0 %v6518_v51  ;;  %4211 = vmatmul.mubr.f32.gmra.mrb[4].mxu1 %v55_v7 }
  0x33   :  { %4959 = vmatpush3.bf16.msra.mxu1 %v6565_v2  ;;  %4213 = vmatprep.mubr.f32.mxu1 %v56_v9 }
  0x34   :  { %212 = vmatmul.mubr.f32.gmra.mrb[8].mxu0 %v54_v59  ;;  %4960 = vmatprep.subr.bf16.mxu1 %v6169_v45 }
  0x35   :  { %4938 = vmatpush1.bf16.msra.mxu0 %v6547_v60  ;;  %217 = vmatprep.mubr.f32.mxu0 %v8092_v3 }
  0x36   :  { %4940 = vmatprep.subr.bf16.mxu0 %v6550_v61  ;;  %4214 = vmatmul.mubr.f32.gmra.mrb[6].mxu1 %v57_v22 }
  0x37   :  { %4962 = vmatpush3.bf16.msra.mxu1 %v6600_v16  ;;  %4248 = vmatprep.mubr.msk.f32.mxu1 %vm6170_vm3, %v8092_v3 }
  0x38   :  { %218 = vmatmul.mubr.f32.gmra.mrb[10].mxu0 %v55_v7  ;;  %4963 = vmatprep.subr.bf16.mxu1 %v6169_v45 }
  0x39   :  { %4942 = vmatpush1.bf16.msra.mxu0 %v6579_v8  ;;  %223 = vmatprep.mubr.f32.mxu0 %v8092_v3 }
  0x3a   :  { %4944 = vmatprep.subr.bf16.mxu0 %v6585_v10  ;;  %1299 = vperm.xlu0 %6003, %v1297_v29  }
  0x3b   :  { %4965 = vmatpush3.bf16.msra.mxu1 %v6627_v27 }
  0x3c   :  { %224 = vmatmul.mubr.f32.gmra.mrb[12].mxu0 %v56_v9  ;;  %4966 = vmatprep.subr.bf16.mxu1 %v6169_v45 }
  0x3d   :  { %4946 = vmatpush1.bf16.msra.mxu0 %v6612_v21  ;;  %229 = vmatprep.mubr.f32.mxu0 %v8092_v3 }
  0x3e   :  { %4948 = vmatprep.subr.bf16.mxu0 %v6618_v23  ;;  %1653 = vperm.xlu0 %6003, %v1651_v35  }
  0x3f   :  { %4968 = vmatpush3.bf16.msra.mxu1 %v6646_v34 }
  0x40   :  { %230 = vmatmul.mubr.f32.gmra.mrb[14].mxu0 %v57_v22  ;;  %4969 = vmatprep.subr.bf16.mxu1 %v6169_v45 }
  0x41   :  { %4950 = vmatpush1.bf16.msra.mxu0 %v6642_v33  ;;  %483 = vmatprep.mubr.f32.mxu0 %v8092_v3 }
  0x42   :  { %4976 = vmatprep.subr.bf16.mxu0 %v6404_v11 }
  0x43   :  { %4971 = vmatpush3.bf16.msra.mxu1 %v6660_v38 }
  0x44   :  { %484 = vmatmul.mubr.f32.vlgmr.msra.gmra.mrb[0].mxu0 %v8092_v3  ;;  %4972 = vmatprep.subr.bf16.mxu1 %v6169_v45 }
  0x45   :  { %4978 = vmatpush1.bf16.msra.mxu0 %v6424_v19  ;;  %666 = vmatprep.mubr.f32.mxu0 %v8092_v3 }
  0x46   :  { %4980 = vmatprep.subr.bf16.mxu0 %v6427_v20 }
  0x47   :  { %4974 = vmatpush3.bf16.msra.mxu1 %v6674_v43 }
  0x48   :  { %5007 = vmatprep.subr.bf16.mxu1 %v6169_v45 }
  0x49   :  { %4982 = vmatpush1.bf16.msra.mxu0 %v6453_v28 }
  0x4a   :  { %4984 = vmatprep.subr.bf16.mxu0 %v6458_v30  ;;  %4249 = vmatmul.mubr.f32.vlgmr.msra.gmra.mrb[8].mxu1 %v8092_v3 }
  0x4b   :  { %5009 = vmatpush3.bf16.msra.mxu1 %v6502_v46  ;;  %4283 = vmatprep.mubr.msk.f32.mxu1 %vm6170_vm3, %v8092_v3 }
  0x4c   :  { %5010 = vmatprep.subr.bf16.mxu1 %v6169_v45 }
  0x4d   :  { %4986 = vmatpush1.bf16.msra.mxu0 %v6484_v39 }
  0x4e   :  { %4988 = vmatprep.subr.bf16.mxu0 %v6487_v40 }
  0x4f   :  { %5012 = vmatpush3.bf16.msra.mxu1 %v6533_v56 }
  0x50   :  { %5013 = vmatprep.subr.bf16.mxu1 %v6169_v45 }
  0x51   :  { %4990 = vmatpush1.bf16.msra.mxu0 %v6515_v50 }
  0x52   :  { %4992 = vmatprep.subr.bf16.mxu0 %v6518_v51 }
  0x53   :  { %5015 = vmatpush3.bf16.msra.mxu1 %v6565_v2 }
  0x54   :  { %5016 = vmatprep.subr.bf16.mxu1 %v6169_v45 }
  0x55   :  { %4994 = vmatpush1.bf16.msra.mxu0 %v6547_v60 }
  0x56   :  { %4996 = vmatprep.subr.bf16.mxu0 %v6550_v61 }
  0x57   :  { %5018 = vmatpush3.bf16.msra.mxu1 %v6600_v16 }
  0x58   :  { %5019 = vmatprep.subr.bf16.mxu1 %v6169_v45 }
  0x59   :  { %4998 = vmatpush1.bf16.msra.mxu0 %v6579_v8 }
  0x5a   :  { %5000 = vmatprep.subr.bf16.mxu0 %v6585_v10 }
  0x5b   :  { %5021 = vmatpush3.bf16.msra.mxu1 %v6627_v27 }
  0x5c   :  { %5022 = vmatprep.subr.bf16.mxu1 %v6169_v45 }
  0x5d   :  { %5002 = vmatpush1.bf16.msra.mxu0 %v6612_v21 }
  0x5e   :  { %5004 = vmatprep.subr.bf16.mxu0 %v6618_v23 }
  0x5f   :  { %5024 = vmatpush3.bf16.msra.mxu1 %v6646_v34 }
  0x60   :  { %5025 = vmatprep.subr.bf16.mxu1 %v6169_v45 }
  0x61   :  { %5006 = vmatpush1.bf16.msra.mxu0 %v6642_v33 }
  0x62   :  { %5032 = vmatprep.subr.bf16.mxu0 %v6404_v11 }
  0x63   :  { %5027 = vmatpush3.bf16.msra.mxu1 %v6660_v38 }
  0x64   :  { %5028 = vmatprep.subr.bf16.mxu1 %v6169_v45 }
  0x67   :  { %5030 = vmatpush3.bf16.msra.mxu1 %v6674_v43 }
  0x68   :  { %5063 = vmatprep.subr.bf16.mxu1 %v6169_v45 }
  0xfd   :  { %v4206_v53 = vpop.f32.mrb[0].mxu1 }
  0xfe   :  { %v6720_v54 = vadd.f32 %v4206_v53, %v119_v52  ;;  %v302_v55 = vpop.f32.mrb[1].mxu1 }
 0x101   :  { %v4209_v57 = vpop.f32.mrb[2].mxu1 }
 0x102   :  { %v6722_v58 = vadd.f32 %v4209_v57, %v119_v52  ;;  %v312_v59 = vpop.f32.mrb[3].mxu1  ;;  %v303_v57 = vadd.f32 %v302_v55, %v119_v52  ;;  %v1120_v55 = vsel %vm1119_vm7, 1, %v6168_v4 }
 0x103   :  { %v6724_v62 = vadd.f32 %v312_v59, %v119_v52 }
 0x105   :  { %v4212_v63 = vpop.f32.mrb[4].mxu1 }
 0x106   :  { %v6726_v0 = vadd.f32 %v4212_v63, %v119_v52  ;;  %v322_v1 = vpop.f32.mrb[5].mxu1 }
 0x107   :  { %v6728_v5 = vadd.f32 %v322_v1, %v119_v52 }
 0x109   :  { %v4215_v6 = vpop.f32.mrb[6].mxu1 }
 0x10a   :  { %v6730_v7 = vadd.f32 %v4215_v6, %v119_v52  ;;  %v332_v9 = vpop.f32.mrb[7].mxu1 }
 0x10b   :  { %v6732_v12 = vadd.f32 %v332_v9, %v119_v52  ;;  %v943_v52 = vsel %vm942_vm6, 1, %v6168_v4 }
 0x10c   :  { %945 = vperm.xlu1 %6004, %v943_v52  }
 0x110   :  { %1122 = vperm.xlu1 %6004, %v1120_v55  }
 0x117   :  { %v485_v17 = vpop.f32.mrb[0].mxu0 }
 0x118   :  { %v5935_v22 = vadd.f32 %v485_v17, %v6741_v15  ;;  %v487_v24 = vpop.f32.mrb[1].mxu0  ;;  %v6754_v17 = vpop.permute.xlu0 %591 }
 0x119   :  { %v5936_v29 = vadd.f32 %v487_v24, %v6744_v18  ;;  %vm593_vm5 = vcmp.eq.s32.totalorder %v6754_v17, 1 }
 0x11a   :  { %v3780_v25 = vmul.f32 -1.442695, %v5935_v22 }
 0x11b   :  { %v3781_v31 = vmul.f32 -1.442695, %v5936_v29  ;;  %v1474_v29 = vsel %vm1473_vm8, 1, %v6168_v4 }
 0x11c   :  { %6005 = vpow2.f32 %v3780_v25  ;;  %1476 = vperm.xlu1 %6004, %v1474_v29  }
 0x11d   :  { %v556_v32 = vpop.f32.mrb[8].mxu1  ;;  %6007 = vpow2.f32 %v3781_v31  ;;  %v1828_v31 = vsel %vm1827_vm9, 1, %v6168_v4 }
 0x11e   :  { %v4250_v35 = vpop.f32.mrb[9].mxu1  ;;  %v580_v49 = vadd.f32 %v6751_v42, %v556_v32 }
 0x120   :  { %1830 = vperm.xlu1 %6004, %v1828_v31  }
 0x126   :  { %v6006_v36 = vpop.eup %6005 }
 0x127   :  { %v564_v37 = vadd.f32 1.0, %v6006_v36  ;;  %v6008_v41 = vpop.eup %6007 }
 0x128   :  { %v571_v44 = vadd.f32 1.0, %v6008_v41 }
 0x129   :  { %6009 = vrcp.f32 %v564_v37 }
 0x12a   :  { %6011 = vrcp.f32 %v571_v44 }
 0x133   :  { %v6010_v53 = vpop.eup %6009 }
 0x134   :  { %v581_v59 = vmul.f32 %v6010_v53, %v580_v49  ;;  %v6012_v1 = vpop.eup %6011 }
 0x135   :  { %v584_v6 = vsub.f32 1.0, %v6012_v1  ;;  %v586_v24 = vmul.f32 0.0, %v6012_v1 }
 0x136   :  { %v582_v63 = vadd.f32 %v581_v59, %v303_v57 }
 0x138   :  { %6013 = vtanh.f32 %v582_v63 }
 0x142   :  { %v6014_v9 = vpop.eup %6013 }
 0x143   :  { %v585_v22 = vmul.f32 %v6014_v9, %v584_v6 }
 0x145   :  { %v6757_v25 = vadd.f32 %v586_v24, %v585_v22 }
 0x147   :  { %3815 = vmatmul.mubr.msk.f32.vlgmr.msra.gmra.mrb[2].mxu0 %vm593_vm5, %v6757_v25  ;;  %4284 = vmatmul.mubr.msk.f32.vlgmr.msra.gmra.mrb[10].mxu1 %vm593_vm5, %v6757_v25  ;;  %v594_v55 = vsel %vm593_vm5, %v6757_v25, 0.0 }
 0x148   :  { %5034 = vmatpush1.bf16.msra.mxu0 %v6424_v19  ;;  %5065 = vmatpush3.bf16.msra.mxu1 %v6502_v46 }
 0x149   :  { %5036 = vmatprep.subr.bf16.mxu0 %v6427_v20  ;;  %5066 = vmatprep.subr.bf16.mxu1 %v6169_v45 }
 0x14a   :  { %843 = vmatprep.mubr.f32.mxu0 %v8092_v3  ;;  %4318 = vmatprep.mubr.msk.f32.mxu1 %vm6170_vm3, %v8092_v3 }
 0x14c   :  { %5038 = vmatpush1.bf16.msra.mxu0 %v6453_v28  ;;  %5068 = vmatpush3.bf16.msra.mxu1 %v6533_v56 }
 0x14d   :  { %5040 = vmatprep.subr.bf16.mxu0 %v6458_v30  ;;  %5069 = vmatprep.subr.bf16.mxu1 %v6169_v45 }
 0x150   :  { %5042 = vmatpush1.bf16.msra.mxu0 %v6484_v39  ;;  %5071 = vmatpush3.bf16.msra.mxu1 %v6565_v2 }
 0x151   :  { %5044 = vmatprep.subr.bf16.mxu0 %v6487_v40  ;;  %5072 = vmatprep.subr.bf16.mxu1 %v6169_v45 }
 0x154   :  { %5046 = vmatpush1.bf16.msra.mxu0 %v6515_v50  ;;  %5074 = vmatpush3.bf16.msra.mxu1 %v6600_v16 }
 0x155   :  { %5048 = vmatprep.subr.bf16.mxu0 %v6518_v51  ;;  %5075 = vmatprep.subr.bf16.mxu1 %v6169_v45 }
 0x158   :  { %5050 = vmatpush1.bf16.msra.mxu0 %v6547_v60  ;;  %5077 = vmatpush3.bf16.msra.mxu1 %v6627_v27 }
 0x159   :  { %5052 = vmatprep.subr.bf16.mxu0 %v6550_v61  ;;  %5078 = vmatprep.subr.bf16.mxu1 %v6169_v45 }
 0x15c   :  { %5054 = vmatpush1.bf16.msra.mxu0 %v6579_v8  ;;  %5080 = vmatpush3.bf16.msra.mxu1 %v6646_v34 }
 0x15d   :  { %5056 = vmatprep.subr.bf16.mxu0 %v6585_v10  ;;  %5081 = vmatprep.subr.bf16.mxu1 %v6169_v45 }
 0x160   :  { %5058 = vmatpush1.bf16.msra.mxu0 %v6612_v21  ;;  %5083 = vmatpush3.bf16.msra.mxu1 %v6660_v38 }
 0x161   :  { %5060 = vmatprep.subr.bf16.mxu0 %v6618_v23  ;;  %5084 = vmatprep.subr.bf16.mxu1 %v6169_v45 }
 0x164   :  { %5062 = vmatpush1.bf16.msra.mxu0 %v6642_v33  ;;  %5086 = vmatpush3.bf16.msra.mxu1 %v6674_v43 }
 0x165   :  { %5088 = vmatprep.subr.bf16.mxu0 %v6404_v11  ;;  %5119 = vmatprep.subr.bf16.mxu1 %v6169_v45 }
 0x21a   :  { %v668_v32 = vpop.f32.mrb[2].mxu0  ;;  %v739_v35 = vpop.f32.mrb[10].mxu1 }
 0x21b   :  { %v5937_v36 = vadd.f32 %v668_v32, %v6741_v15  ;;  %v670_v37 = vpop.f32.mrb[3].mxu0  ;;  %v4285_v41 = vpop.f32.mrb[11].mxu1  ;;  %v757_v4 = vadd.f32 %v6751_v42, %v739_v35 }
 0x21c   :  { %v5938_v49 = vadd.f32 %v670_v37, %v6744_v18  ;;  %v6815_v32 = vpop.permute.xlu0 %768 }
 0x21d   :  { %v3783_v44 = vmul.f32 -1.442695, %v5937_v36  ;;  %vm770_vm10 = vcmp.eq.s32.totalorder %v6815_v32, 1 }
 0x21e   :  { %v3784_v53 = vmul.f32 -1.442695, %v5938_v49 }
 0x21f   :  { %6015 = vpow2.f32 %v3783_v44 }
 0x220   :  { %6017 = vpow2.f32 %v3784_v53 }
 0x229   :  { %v6016_v57 = vpop.eup %6015 }
 0x22a   :  { %v747_v59 = vadd.f32 1.0, %v6016_v57  ;;  %v6018_v26 = vpop.eup %6017 }
 0x22b   :  { %v754_v63 = vadd.f32 1.0, %v6018_v26 }
 0x22c   :  { %6019 = vrcp.f32 %v747_v59 }
 0x22d   :  { %6021 = vrcp.f32 %v754_v63 }
 0x236   :  { %v6020_v1 = vpop.eup %6019 }
 0x237   :  { %v758_v6 = vmul.f32 %v6020_v1, %v757_v4  ;;  %v6022_v22 = vpop.eup %6021 }
 0x238   :  { %v761_v24 = vsub.f32 1.0, %v6022_v22  ;;  %v763_v31 = vmul.f32 %v6022_v22, %v594_v55 }
 0x239   :  { %v759_v9 = vadd.f32 %v758_v6, %v6720_v54 }
 0x23b   :  { %6023 = vtanh.f32 %v759_v9 }
 0x245   :  { %v6024_v52 = vpop.eup %6023 }
 0x246   :  { %v762_v29 = vmul.f32 %v6024_v52, %v761_v24 }
 0x248   :  { %v6817_v36 = vadd.f32 %v763_v31, %v762_v29  ;;  %v6866_v31 = vpop.permute.xlu1 %945 }
 0x249   :  { %vm947_vm11 = vcmp.eq.s32.totalorder %v6866_v31, 1 }
 0x24a   :  { %v6823_v54 = vsel %vm770_vm10, %v6817_v36, %v594_v55 }
 0x24b   :  { %844 = vmatmul.mubr.f32.vlgmr.msra.gmra.mrb[4].mxu0 %v6823_v54  ;;  %4319 = vmatmul.mubr.f32.vlgmr.msra.gmra.mrb[12].mxu1 %v6823_v54 }
 0x24c   :  { %5090 = vmatpush1.bf16.msra.mxu0 %v6424_v19  ;;  %5121 = vmatpush3.bf16.msra.mxu1 %v6502_v46 }
 0x24d   :  { %5092 = vmatprep.subr.bf16.mxu0 %v6427_v20  ;;  %5122 = vmatprep.subr.bf16.mxu1 %v6169_v45 }
 0x24e   :  { %1020 = vmatprep.mubr.f32.mxu0 %v8092_v3  ;;  %4353 = vmatprep.mubr.msk.f32.mxu1 %vm6170_vm3, %v8092_v3 }
 0x250   :  { %5094 = vmatpush1.bf16.msra.mxu0 %v6453_v28  ;;  %5124 = vmatpush3.bf16.msra.mxu1 %v6533_v56 }
 0x251   :  { %5096 = vmatprep.subr.bf16.mxu0 %v6458_v30  ;;  %5125 = vmatprep.subr.bf16.mxu1 %v6169_v45 }
 0x254   :  { %5098 = vmatpush1.bf16.msra.mxu0 %v6484_v39  ;;  %5127 = vmatpush3.bf16.msra.mxu1 %v6565_v2 }
 0x255   :  { %5100 = vmatprep.subr.bf16.mxu0 %v6487_v40  ;;  %5128 = vmatprep.subr.bf16.mxu1 %v6169_v45 }
 0x258   :  { %5102 = vmatpush1.bf16.msra.mxu0 %v6515_v50  ;;  %5130 = vmatpush3.bf16.msra.mxu1 %v6600_v16 }
 0x259   :  { %5104 = vmatprep.subr.bf16.mxu0 %v6518_v51  ;;  %5131 = vmatprep.subr.bf16.mxu1 %v6169_v45 }
 0x25c   :  { %5106 = vmatpush1.bf16.msra.mxu0 %v6547_v60  ;;  %5133 = vmatpush3.bf16.msra.mxu1 %v6627_v27 }
 0x25d   :  { %5108 = vmatprep.subr.bf16.mxu0 %v6550_v61  ;;  %5134 = vmatprep.subr.bf16.mxu1 %v6169_v45 }
 0x260   :  { %5110 = vmatpush1.bf16.msra.mxu0 %v6579_v8  ;;  %5136 = vmatpush3.bf16.msra.mxu1 %v6646_v34 }
 0x261   :  { %5112 = vmatprep.subr.bf16.mxu0 %v6585_v10  ;;  %5137 = vmatprep.subr.bf16.mxu1 %v6169_v45 }
 0x264   :  { %5114 = vmatpush1.bf16.msra.mxu0 %v6612_v21  ;;  %5139 = vmatpush3.bf16.msra.mxu1 %v6660_v38 }
 0x265   :  { %5116 = vmatprep.subr.bf16.mxu0 %v6618_v23  ;;  %5140 = vmatprep.subr.bf16.mxu1 %v6169_v45 }
 0x268   :  { %5118 = vmatpush1.bf16.msra.mxu0 %v6642_v33  ;;  %5142 = vmatpush3.bf16.msra.mxu1 %v6674_v43 }
 0x269   :  { %5144 = vmatprep.subr.bf16.mxu0 %v6404_v11  ;;  %5175 = vmatprep.subr.bf16.mxu1 %v6169_v45 }
 0x31e   :  { %v845_v35 = vpop.f32.mrb[4].mxu0  ;;  %v916_v37 = vpop.f32.mrb[12].mxu1 }
 0x31f   :  { %v5939_v41 = vadd.f32 %v845_v35, %v6741_v15  ;;  %v847_v44 = vpop.f32.mrb[5].mxu0  ;;  %v4320_v49 = vpop.f32.mrb[13].mxu1  ;;  %v934_v6 = vadd.f32 %v6751_v42, %v916_v37 }
 0x320   :  { %v5940_v57 = vadd.f32 %v847_v44, %v6744_v18 }
 0x321   :  { %v3785_v53 = vmul.f32 -1.442695, %v5939_v41 }
 0x322   :  { %v3786_v59 = vmul.f32 -1.442695, %v5940_v57 }
 0x323   :  { %6025 = vpow2.f32 %v3785_v53 }
 0x324   :  { %6027 = vpow2.f32 %v3786_v59 }
 0x32d   :  { %v6026_v26 = vpop.eup %6025 }
 0x32e   :  { %v924_v63 = vadd.f32 1.0, %v6026_v26  ;;  %v6028_v4 = vpop.eup %6027 }
 0x32f   :  { %v931_v1 = vadd.f32 1.0, %v6028_v4 }
 0x330   :  { %6029 = vrcp.f32 %v924_v63 }
 0x331   :  { %6031 = vrcp.f32 %v931_v1 }
 0x33a   :  { %v6030_v9 = vpop.eup %6029 }
 0x33b   :  { %v935_v22 = vmul.f32 %v6030_v9, %v934_v6  ;;  %v6032_v52 = vpop.eup %6031 }
 0x33c   :  { %v938_v55 = vsub.f32 1.0, %v6032_v52  ;;  %v940_v41 = vmul.f32 %v6032_v52, %v6823_v54 }
 0x33d   :  { %v936_v24 = vadd.f32 %v935_v22, %v6724_v62 }
 0x33f   :  { %6033 = vtanh.f32 %v936_v24 }
 0x349   :  { %v6034_v29 = vpop.eup %6033 }
 0x34a   :  { %v939_v35 = vmul.f32 %v6034_v29, %v938_v55 }
 0x34c   :  { %v6870_v44 = vadd.f32 %v940_v41, %v939_v35 }
 0x34e   :  { %v6876_v37 = vsel %vm947_vm11, %v6870_v44, %v6823_v54 }
 0x34f   :  { %1021 = vmatmul.mubr.f32.vlgmr.msra.gmra.mrb[6].mxu0 %v6876_v37  ;;  %4354 = vmatmul.mubr.f32.vlgmr.msra.gmra.mrb[14].mxu1 %v6876_v37 }
 0x350   :  { %5146 = vmatpush1.bf16.msra.mxu0 %v6424_v19  ;;  %5177 = vmatpush3.bf16.msra.mxu1 %v6502_v46 }
 0x351   :  { %5148 = vmatprep.subr.bf16.mxu0 %v6427_v20  ;;  %5178 = vmatprep.subr.bf16.mxu1 %v6169_v45 }
 0x352   :  { %1197 = vmatprep.mubr.f32.mxu0 %v8092_v3  ;;  %4388 = vmatprep.mubr.msk.f32.mxu1 %vm6170_vm3, %v8092_v3 }
 0x354   :  { %5150 = vmatpush1.bf16.msra.mxu0 %v6453_v28  ;;  %5180 = vmatpush3.bf16.msra.mxu1 %v6533_v56 }
 0x355   :  { %5152 = vmatprep.subr.bf16.mxu0 %v6458_v30  ;;  %5181 = vmatprep.subr.bf16.mxu1 %v6169_v45 }
 0x358   :  { %5154 = vmatpush1.bf16.msra.mxu0 %v6484_v39  ;;  %5183 = vmatpush3.bf16.msra.mxu1 %v6565_v2 }
 0x359   :  { %5156 = vmatprep.subr.bf16.mxu0 %v6487_v40  ;;  %5184 = vmatprep.subr.bf16.mxu1 %v6169_v45 }
 0x35c   :  { %5158 = vmatpush1.bf16.msra.mxu0 %v6515_v50  ;;  %5186 = vmatpush3.bf16.msra.mxu1 %v6600_v16 }
 0x35d   :  { %5160 = vmatprep.subr.bf16.mxu0 %v6518_v51  ;;  %5187 = vmatprep.subr.bf16.mxu1 %v6169_v45 }
 0x360   :  { %5162 = vmatpush1.bf16.msra.mxu0 %v6547_v60  ;;  %5189 = vmatpush3.bf16.msra.mxu1 %v6627_v27 }
 0x361   :  { %5164 = vmatprep.subr.bf16.mxu0 %v6550_v61  ;;  %5190 = vmatprep.subr.bf16.mxu1 %v6169_v45 }
 0x364   :  { %5166 = vmatpush1.bf16.msra.mxu0 %v6579_v8  ;;  %5192 = vmatpush3.bf16.msra.mxu1 %v6646_v34 }
 0x365   :  { %5168 = vmatprep.subr.bf16.mxu0 %v6585_v10  ;;  %5193 = vmatprep.subr.bf16.mxu1 %v6169_v45 }
 0x368   :  { %5170 = vmatpush1.bf16.msra.mxu0 %v6612_v21  ;;  %5195 = vmatpush3.bf16.msra.mxu1 %v6660_v38 }
 0x369   :  { %5172 = vmatprep.subr.bf16.mxu0 %v6618_v23  ;;  %5196 = vmatprep.subr.bf16.mxu1 %v6169_v45 }
 0x36c   :  { %5174 = vmatpush1.bf16.msra.mxu0 %v6642_v33  ;;  %5198 = vmatpush3.bf16.msra.mxu1 %v6674_v43 }
 0x36d   :  { %5200 = vmatprep.subr.bf16.mxu0 %v6404_v11  ;;  %5231 = vmatprep.subr.bf16.mxu1 %v6169_v45 }
 0x422   :  { %v1022_v62 = vpop.f32.mrb[6].mxu0  ;;  %v1093_v54 = vpop.f32.mrb[14].mxu1 }
 0x423   :  { %v5941_v49 = vadd.f32 %v1022_v62, %v6741_v15  ;;  %v1024_v53 = vpop.f32.mrb[7].mxu0  ;;  %v4355_v57 = vpop.f32.mrb[15].mxu1  ;;  %v1111_v22 = vadd.f32 %v6751_v42, %v1093_v54 }
 0x424   :  { %v5942_v26 = vadd.f32 %v1024_v53, %v6744_v18  ;;  %v6920_v53 = vpop.permute.xlu1 %1122 }
 0x425   :  { %v3787_v59 = vmul.f32 -1.442695, %v5941_v49  ;;  %vm1124_vm12 = vcmp.eq.s32.totalorder %v6920_v53, 1 }
 0x426   :  { %v3788_v63 = vmul.f32 -1.442695, %v5942_v26 }
 0x427   :  { %6035 = vpow2.f32 %v3787_v59 }
 0x428   :  { %6037 = vpow2.f32 %v3788_v63 }
 0x431   :  { %v6036_v4 = vpop.eup %6035 }
 0x432   :  { %v1101_v1 = vadd.f32 1.0, %v6036_v4  ;;  %v6038_v6 = vpop.eup %6037 }
 0x433   :  { %v1108_v9 = vadd.f32 1.0, %v6038_v6 }
 0x434   :  { %6039 = vrcp.f32 %v1101_v1 }
 0x435   :  { %6041 = vrcp.f32 %v1108_v9 }
 0x43e   :  { %v6040_v24 = vpop.eup %6039 }
 0x43f   :  { %v1112_v52 = vmul.f32 %v6040_v24, %v1111_v22  ;;  %v6042_v29 = vpop.eup %6041 }
 0x440   :  { %v1115_v35 = vsub.f32 1.0, %v6042_v29  ;;  %v1117_v49 = vmul.f32 %v6042_v29, %v6876_v37 }
 0x441   :  { %v1113_v55 = vadd.f32 %v1112_v52, %v6722_v58 }
 0x443   :  { %6043 = vtanh.f32 %v1113_v55 }
 0x44d   :  { %v6044_v41 = vpop.eup %6043 }
 0x44e   :  { %v1116_v62 = vmul.f32 %v6044_v41, %v1115_v35 }
 0x450   :  { %v6922_v57 = vadd.f32 %v1117_v49, %v1116_v62 }
 0x452   :  { %v6929_v54 = vsel %vm1124_vm12, %v6922_v57, %v6876_v37 }
 0x453   :  { %1198 = vmatmul.mubr.f32.vlgmr.msra.gmra.mrb[8].mxu0 %v6929_v54  ;;  %4389 = vmatmul.mubr.f32.vlgmr.msra.gmra.mrb[16].mxu1 %v6929_v54 }
 0x454   :  { %5202 = vmatpush1.bf16.msra.mxu0 %v6424_v19  ;;  %5233 = vmatpush3.bf16.msra.mxu1 %v6502_v46 }
 0x455   :  { %5204 = vmatprep.subr.bf16.mxu0 %v6427_v20  ;;  %5234 = vmatprep.subr.bf16.mxu1 %v6169_v45 }
 0x456   :  { %1374 = vmatprep.mubr.f32.mxu0 %v8092_v3  ;;  %4423 = vmatprep.mubr.msk.f32.mxu1 %vm6170_vm3, %v8092_v3 }
 0x458   :  { %5206 = vmatpush1.bf16.msra.mxu0 %v6453_v28  ;;  %5236 = vmatpush3.bf16.msra.mxu1 %v6533_v56 }
 0x459   :  { %5208 = vmatprep.subr.bf16.mxu0 %v6458_v30  ;;  %5237 = vmatprep.subr.bf16.mxu1 %v6169_v45 }
 0x45c   :  { %5210 = vmatpush1.bf16.msra.mxu0 %v6484_v39  ;;  %5239 = vmatpush3.bf16.msra.mxu1 %v6565_v2 }
 0x45d   :  { %5212 = vmatprep.subr.bf16.mxu0 %v6487_v40  ;;  %5240 = vmatprep.subr.bf16.mxu1 %v6169_v45 }
 0x460   :  { %5214 = vmatpush1.bf16.msra.mxu0 %v6515_v50  ;;  %5242 = vmatpush3.bf16.msra.mxu1 %v6600_v16 }
 0x461   :  { %5216 = vmatprep.subr.bf16.mxu0 %v6518_v51  ;;  %5243 = vmatprep.subr.bf16.mxu1 %v6169_v45 }
 0x464   :  { %5218 = vmatpush1.bf16.msra.mxu0 %v6547_v60  ;;  %5245 = vmatpush3.bf16.msra.mxu1 %v6627_v27 }
 0x465   :  { %5220 = vmatprep.subr.bf16.mxu0 %v6550_v61  ;;  %5246 = vmatprep.subr.bf16.mxu1 %v6169_v45 }
 0x468   :  { %5222 = vmatpush1.bf16.msra.mxu0 %v6579_v8  ;;  %5248 = vmatpush3.bf16.msra.mxu1 %v6646_v34 }
 0x469   :  { %5224 = vmatprep.subr.bf16.mxu0 %v6585_v10  ;;  %5249 = vmatprep.subr.bf16.mxu1 %v6169_v45 }
 0x46c   :  { %5226 = vmatpush1.bf16.msra.mxu0 %v6612_v21  ;;  %5251 = vmatpush3.bf16.msra.mxu1 %v6660_v38 }
 0x46d   :  { %5228 = vmatprep.subr.bf16.mxu0 %v6618_v23  ;;  %5252 = vmatprep.subr.bf16.mxu1 %v6169_v45 }
 0x470   :  { %5230 = vmatpush1.bf16.msra.mxu0 %v6642_v33  ;;  %5254 = vmatpush3.bf16.msra.mxu1 %v6674_v43 }
 0x471   :  { %5256 = vmatprep.subr.bf16.mxu0 %v6404_v11  ;;  %5287 = vmatprep.subr.bf16.mxu1 %v6169_v45 }
 0x526   :  { %v1199_v58 = vpop.f32.mrb[8].mxu0  ;;  %v1270_v37 = vpop.f32.mrb[16].mxu1 }
 0x527   :  { %v5943_v59 = vadd.f32 %v1199_v58, %v6741_v15  ;;  %v1201_v26 = vpop.f32.mrb[9].mxu0  ;;  %v4390_v63 = vpop.f32.mrb[17].mxu1  ;;  %v1288_v55 = vadd.f32 %v6751_v42, %v1270_v37 }
 0x528   :  { %v5944_v1 = vadd.f32 %v1201_v26, %v6744_v18  ;;  %v6973_v63 = vpop.permute.xlu0 %1299 }
 0x529   :  { %v3789_v4 = vmul.f32 -1.442695, %v5943_v59  ;;  %vm1301_vm13 = vcmp.eq.s32.totalorder %v6973_v63, 1 }
 0x52a   :  { %v3790_v6 = vmul.f32 -1.442695, %v5944_v1 }
 0x52b   :  { %6045 = vpow2.f32 %v3789_v4 }
 0x52c   :  { %6047 = vpow2.f32 %v3790_v6 }
 0x535   :  { %v6046_v9 = vpop.eup %6045 }
 0x536   :  { %v1278_v22 = vadd.f32 1.0, %v6046_v9  ;;  %v6048_v24 = vpop.eup %6047 }
 0x537   :  { %v1285_v52 = vadd.f32 1.0, %v6048_v24 }
 0x538   :  { %6049 = vrcp.f32 %v1278_v22 }
 0x539   :  { %6051 = vrcp.f32 %v1285_v52 }
 0x542   :  { %v6050_v29 = vpop.eup %6049 }
 0x543   :  { %v1289_v35 = vmul.f32 %v6050_v29, %v1288_v55  ;;  %v6052_v62 = vpop.eup %6051 }
 0x544   :  { %v1292_v49 = vsub.f32 1.0, %v6052_v62  ;;  %v1294_v26 = vmul.f32 %v6052_v62, %v6929_v54 }
 0x545   :  { %v1290_v41 = vadd.f32 %v1289_v35, %v6728_v5 }
 0x547   :  { %6053 = vtanh.f32 %v1290_v41 }
 0x551   :  { %v6054_v58 = vpop.eup %6053 }
 0x552   :  { %v1293_v59 = vmul.f32 %v6054_v58, %v1292_v49 }
 0x554   :  { %v6975_v4 = vadd.f32 %v1294_v26, %v1293_v59 }
 0x556   :  { %v6982_v37 = vsel %vm1301_vm13, %v6975_v4, %v6929_v54 }
 0x557   :  { %1375 = vmatmul.mubr.f32.vlgmr.msra.gmra.mrb[10].mxu0 %v6982_v37  ;;  %4424 = vmatmul.mubr.f32.vlgmr.msra.gmra.mrb[18].mxu1 %v6982_v37 }
 0x558   :  { %5258 = vmatpush1.bf16.msra.mxu0 %v6424_v19  ;;  %5289 = vmatpush3.bf16.msra.mxu1 %v6502_v46 }
 0x559   :  { %5260 = vmatprep.subr.bf16.mxu0 %v6427_v20  ;;  %5290 = vmatprep.subr.bf16.mxu1 %v6169_v45 }
 0x55a   :  { %1551 = vmatprep.mubr.f32.mxu0 %v8092_v3  ;;  %4458 = vmatprep.mubr.msk.f32.mxu1 %vm6170_vm3, %v8092_v3 }
 0x55c   :  { %5262 = vmatpush1.bf16.msra.mxu0 %v6453_v28  ;;  %5292 = vmatpush3.bf16.msra.mxu1 %v6533_v56 }
 0x55d   :  { %5264 = vmatprep.subr.bf16.mxu0 %v6458_v30  ;;  %5293 = vmatprep.subr.bf16.mxu1 %v6169_v45 }
 0x560   :  { %5266 = vmatpush1.bf16.msra.mxu0 %v6484_v39  ;;  %5295 = vmatpush3.bf16.msra.mxu1 %v6565_v2 }
 0x561   :  { %5268 = vmatprep.subr.bf16.mxu0 %v6487_v40  ;;  %5296 = vmatprep.subr.bf16.mxu1 %v6169_v45 }
 0x564   :  { %5270 = vmatpush1.bf16.msra.mxu0 %v6515_v50  ;;  %5298 = vmatpush3.bf16.msra.mxu1 %v6600_v16 }
 0x565   :  { %5272 = vmatprep.subr.bf16.mxu0 %v6518_v51  ;;  %5299 = vmatprep.subr.bf16.mxu1 %v6169_v45 }
 0x568   :  { %5274 = vmatpush1.bf16.msra.mxu0 %v6547_v60  ;;  %5301 = vmatpush3.bf16.msra.mxu1 %v6627_v27 }
 0x569   :  { %5276 = vmatprep.subr.bf16.mxu0 %v6550_v61  ;;  %5302 = vmatprep.subr.bf16.mxu1 %v6169_v45 }
 0x56c   :  { %5278 = vmatpush1.bf16.msra.mxu0 %v6579_v8  ;;  %5304 = vmatpush3.bf16.msra.mxu1 %v6646_v34 }
 0x56d   :  { %5280 = vmatprep.subr.bf16.mxu0 %v6585_v10  ;;  %5305 = vmatprep.subr.bf16.mxu1 %v6169_v45 }
 0x570   :  { %5282 = vmatpush1.bf16.msra.mxu0 %v6612_v21  ;;  %5307 = vmatpush3.bf16.msra.mxu1 %v6660_v38 }
 0x571   :  { %5284 = vmatprep.subr.bf16.mxu0 %v6618_v23  ;;  %5308 = vmatprep.subr.bf16.mxu1 %v6169_v45 }
 0x574   :  { %5286 = vmatpush1.bf16.msra.mxu0 %v6642_v33  ;;  %5310 = vmatpush3.bf16.msra.mxu1 %v6674_v43 }
 0x575   :  { %5312 = vmatprep.subr.bf16.mxu0 %v6404_v11  ;;  %5343 = vmatprep.subr.bf16.mxu1 %v6169_v45 }
 0x62a   :  { %v1376_v5 = vpop.f32.mrb[10].mxu0  ;;  %v1447_v54 = vpop.f32.mrb[18].mxu1 }
 0x62b   :  { %v5945_v1 = vadd.f32 %v1376_v5, %v6741_v15  ;;  %v1378_v6 = vpop.f32.mrb[11].mxu0  ;;  %v4425_v9 = vpop.f32.mrb[19].mxu1  ;;  %v1465_v11 = vadd.f32 %v6751_v42, %v1447_v54 }
 0x62c   :  { %v5946_v24 = vadd.f32 %v1378_v6, %v6744_v18  ;;  %v7026_v9 = vpop.permute.xlu1 %1476 }
 0x62d   :  { %v3791_v22 = vmul.f32 -1.442695, %v5945_v1  ;;  %vm1478_vm14 = vcmp.eq.s32.totalorder %v7026_v9, 1 }
 0x62e   :  { %v3792_v52 = vmul.f32 -1.442695, %v5946_v24  ;;  %v1845_v24 = vld [vmem:[%s8082_s6] sm:$0xff] }
 0x62f   :  { %6055 = vpow2.f32 %v3791_v22 }
 0x630   :  { %6057 = vpow2.f32 %v3792_v52  ;;  %v1848_v52 = vld [vmem:[%s8082_s6 + $0x18] sm:$0xff] }
 0x639   :  { %v6056_v55 = vpop.eup %6055 }
 0x63a   :  { %v1455_v29 = vadd.f32 1.0, %v6056_v55  ;;  %v6058_v35 = vpop.eup %6057  ;;  %v7094_v55 = vpop.permute.xlu0 %1653 }
 0x63b   :  { %v1462_v41 = vadd.f32 1.0, %v6058_v35  ;;  %v1855_v35 = vld [vmem:[%s8082_s6 + $0x50] sm:$0xff]  ;;  %vm1655_vm15 = vcmp.eq.s32.totalorder %v7094_v55, 1 }
 0x63c   :  { %6059 = vrcp.f32 %v1455_v29 }
 0x63d   :  { %6061 = vrcp.f32 %v1462_v41  ;;  %v1853_v41 = vld [vmem:[%s8082_s6 + $0x40] sm:$0xff] }
 0x646   :  { %v6060_v62 = vpop.eup %6059 }
 0x647   :  { %v1466_v49 = vmul.f32 %v6060_v62, %v1465_v11  ;;  %v6062_v59 = vpop.eup %6061  ;;  %v1856_v11 = vld [vmem:[%s8082_s6 + $0x58] sm:$0xff] }
 0x648   :  { %v1469_v26 = vsub.f32 1.0, %v6062_v59  ;;  %v1471_v6 = vmul.f32 %v6062_v59, %v6982_v37  ;;  %v1851_v59 = vld [vmem:[%s8082_s6 + $0x30] sm:$0xff] }
 0x649   :  { %v1467_v58 = vadd.f32 %v1466_v49, %v6726_v0  ;;  %v5369_v49 = vpack.c.bf16 %v1848_v52, %v1845_v24  ;;  %v1876_v24 = vld [vmem:[%s8082_s6 + $0xf8] sm:$0xff]  ;;  %v1879_v52 = vld [vmem:[%s8082_s6 + $0x110] sm:$0xff] }
 0x64b   :  { %6063 = vtanh.f32 %v1467_v58 }
 0x655   :  { %v6064_v5 = vpop.eup %6063 }
 0x656   :  { %v1470_v1 = vmul.f32 %v6064_v5, %v1469_v26  ;;  %v1854_v26 = vld [vmem:[%s8082_s6 + $0x48] sm:$0xff] }
 0x657   :  { %v1858_v5 = vld [vmem:[%s8082_s6 + $0x68] sm:$0xff] }
 0x658   :  { %v7028_v22 = vadd.f32 %v1471_v6, %v1470_v1  ;;  %v5403_v6 = vpack.c.bf16 %v1856_v11, %v1853_v41  ;;  %v1875_v11 = vld [vmem:[%s8082_s6 + $0xf0] sm:$0xff] }
 0x65a   :  { %v7035_v54 = vsel %vm1478_vm14, %v7028_v22, %v6982_v37 }
 0x65b   :  { %1552 = vmatmul.mubr.f32.vlgmr.msra.gmra.mrb[12].mxu0 %v7035_v54  ;;  %4459 = vmatmul.mubr.f32.vlgmr.msra.gmra.mrb[20].mxu1 %v7035_v54 }
 0x65c   :  { %5314 = vmatpush1.bf16.msra.mxu0 %v6424_v19  ;;  %5345 = vmatpush3.bf16.msra.mxu1 %v6502_v46  ;;  %v1846_v19 = vld [vmem:[%s8082_s6 + $0x8] sm:$0xff] }
 0x65d   :  { %5316 = vmatprep.subr.bf16.mxu0 %v6427_v20  ;;  %5346 = vmatprep.subr.bf16.mxu1 %v6169_v45  ;;  %v1849_v20 = vld [vmem:[%s8082_s6 + $0x20] sm:$0xff] }
 0x65e   :  { %1728 = vmatprep.mubr.f32.mxu0 %v8092_v3  ;;  %4493 = vmatprep.mubr.msk.f32.mxu1 %vm6170_vm3, %v8092_v3 }
 0x660   :  { %5318 = vmatpush1.bf16.msra.mxu0 %v6453_v28  ;;  %5348 = vmatpush3.bf16.msra.mxu1 %v6533_v56  ;;  %v1847_v28 = vld [vmem:[%s8082_s6 + $0x10] sm:$0xff] }
 0x661   :  { %5320 = vmatprep.subr.bf16.mxu0 %v6458_v30  ;;  %5349 = vmatprep.subr.bf16.mxu1 %v6169_v45  ;;  %v5367_v30 = vpack.c.bf16 %v1849_v20, %v1846_v19  ;;  %v1861_v19 = vld [vmem:[%s8082_s6 + $0x80] sm:$0xff]  ;;  %v1859_v20 = vld [vmem:[%s8082_s6 + $0x70] sm:$0xff] }
 0x664   :  { %5322 = vmatpush1.bf16.msra.mxu0 %v6484_v39  ;;  %5351 = vmatpush3.bf16.msra.mxu1 %v6565_v2  ;;  %v1850_v39 = vld [vmem:[%s8082_s6 + $0x28] sm:$0xff] }
 0x665   :  { %5324 = vmatprep.subr.bf16.mxu0 %v6487_v40  ;;  %5352 = vmatprep.subr.bf16.mxu1 %v6169_v45  ;;  %v5399_v40 = vpack.c.bf16 %v1850_v39, %v1847_v28  ;;  %v1862_v28 = vld [vmem:[%s8082_s6 + $0x88] sm:$0xff] }
 0x666   :  { %v5407_v39 = vpack.c.bf16 %v1862_v28, %v1859_v20  ;;  %v1881_v28 = vld [vmem:[%s8082_s6 + $0x120] sm:$0xff] }
 0x668   :  { %5326 = vmatpush1.bf16.msra.mxu0 %v6515_v50  ;;  %5354 = vmatpush3.bf16.msra.mxu1 %v6600_v16 }
 0x669   :  { %5328 = vmatprep.subr.bf16.mxu0 %v6518_v51  ;;  %5355 = vmatprep.subr.bf16.mxu1 %v6169_v45 }
 0x66c   :  { %5330 = vmatpush1.bf16.msra.mxu0 %v6547_v60  ;;  %5357 = vmatpush3.bf16.msra.mxu1 %v6627_v27 }
 0x66d   :  { %5332 = vmatprep.subr.bf16.mxu0 %v6550_v61  ;;  %5358 = vmatprep.subr.bf16.mxu1 %v6169_v45 }
 0x670   :  { %5334 = vmatpush1.bf16.msra.mxu0 %v6579_v8  ;;  %5360 = vmatpush3.bf16.msra.mxu1 %v6646_v34 }
 0x671   :  { %5336 = vmatprep.subr.bf16.mxu0 %v6585_v10  ;;  %5361 = vmatprep.subr.bf16.mxu1 %v6169_v45 }
 0x674   :  { %5338 = vmatpush1.bf16.msra.mxu0 %v6612_v21  ;;  %5363 = vmatpush3.bf16.msra.mxu1 %v6660_v38 }
 0x675   :  { %5340 = vmatprep.subr.bf16.mxu0 %v6618_v23  ;;  %5364 = vmatprep.subr.bf16.mxu1 %v6169_v45 }
 0x678   :  { %5342 = vmatpush1.bf16.msra.mxu0 %v6642_v33  ;;  %5366 = vmatpush3.bf16.msra.mxu1 %v6674_v43 }
 0x679   :  { %5368 = vmatprep.subr.bf16.mxu0 %v5367_v30  ;;  %5400 = vmatprep.subr.bf16.mxu1 %v5399_v40  ;;  %v5375_v30 = vpack.c.bf16 %v1861_v19, %v1858_v5  ;;  %v1886_v5 = vld [vmem:[%s8082_s6 + $0x148] sm:$0xff] }
 0x72e   :  { %v1553_v46 = vpop.f32.mrb[12].mxu0  ;;  %v1624_v50 = vpop.f32.mrb[20].mxu1 }
 0x72f   :  { %v5947_v51 = vadd.f32 %v1553_v46, %v6741_v15  ;;  %v1555_v56 = vpop.f32.mrb[13].mxu0  ;;  %v4460_v60 = vpop.f32.mrb[21].mxu1  ;;  %v1642_v27 = vadd.f32 %v6751_v42, %v1624_v50  ;;  %v1857_v46 = vld [vmem:[%s8082_s6 + $0x60] sm:$0xff]  ;;  %v1860_v50 = vld [vmem:[%s8082_s6 + $0x78] sm:$0xff] }
 0x730   :  { %v5948_v2 = vadd.f32 %v1555_v56, %v6744_v18  ;;  %v1865_v56 = vld [vmem:[%s8082_s6 + $0xa0] sm:$0xff]  ;;  %v1868_v60 = vld [vmem:[%s8082_s6 + $0xb8] sm:$0xff] }
 0x731   :  { %v3793_v61 = vmul.f32 -1.442695, %v5947_v51  ;;  %v1867_v51 = vld [vmem:[%s8082_s6 + $0xb0] sm:$0xff] }
 0x732   :  { %v3794_v8 = vmul.f32 -1.442695, %v5948_v2 }
 0x733   :  { %6065 = vpow2.f32 %v3793_v61  ;;  %v5377_v61 = vpack.c.bf16 %v1860_v50, %v1857_v46  ;;  %v1889_v46 = vld [vmem:[%s8082_s6 + $0x160] sm:$0xff]  ;;  %v1892_v50 = vld [vmem:[%s8082_s6 + $0x178] sm:$0xff] }
 0x734   :  { %6067 = vpow2.f32 %v3794_v8  ;;  %v5411_v8 = vpack.c.bf16 %v1868_v60, %v1865_v56  ;;  %v5427_v56 = vpack.c.bf16 %v1892_v50, %v1889_v46  ;;  %v1887_v60 = vld [vmem:[%s8082_s6 + $0x150] sm:$0xff]  ;;  %v2192_v50 = vld [vmem:[%s8083_s7 + $0x138] sm:$0xff] }
 0x73d   :  { %v6066_v10 = vpop.eup %6065 }
 0x73e   :  { %v1632_v16 = vadd.f32 1.0, %v6066_v10  ;;  %v6068_v21 = vpop.eup %6067  ;;  %v1863_v10 = vld [vmem:[%s8082_s6 + $0x90] sm:$0xff] }
 0x73f   :  { %v1639_v23 = vadd.f32 1.0, %v6068_v21  ;;  %v1870_v21 = vld [vmem:[%s8082_s6 + $0xc8] sm:$0xff] }
 0x740   :  { %6069 = vrcp.f32 %v1632_v16  ;;  %v1866_v16 = vld [vmem:[%s8082_s6 + $0xa8] sm:$0xff] }
 0x741   :  { %6071 = vrcp.f32 %v1639_v23  ;;  %v1873_v23 = vld [vmem:[%s8082_s6 + $0xe0] sm:$0xff] }
 0x74a   :  { %v6070_v33 = vpop.eup %6069 }
 0x74b   :  { %v1643_v34 = vmul.f32 %v6070_v33, %v1642_v27  ;;  %v6072_v43 = vpop.eup %6071  ;;  %v1871_v27 = vld [vmem:[%s8082_s6 + $0xd0] sm:$0xff]  ;;  %v1874_v33 = vld [vmem:[%s8082_s6 + $0xe8] sm:$0xff] }
 0x74c   :  { %v1646_v0 = vsub.f32 1.0, %v6072_v43  ;;  %v1648_v29 = vmul.f32 %v6072_v43, %v7035_v54  ;;  %v5415_v43 = vpack.c.bf16 %v1874_v33, %v1871_v27  ;;  %v2166_v27 = vld [vmem:[%s8083_s7 + $0x68] sm:$0xff]  ;;  %v2169_v33 = vld [vmem:[%s8083_s7 + $0x80] sm:$0xff] }
 0x74d   :  { %v1644_v38 = vadd.f32 %v1643_v34, %v6732_v12  ;;  %v1852_v12 = vld [vmem:[%s8082_s6 + $0x38] sm:$0xff]  ;;  %v5381_v34 = vpack.c.bf16 %v1866_v16, %v1863_v10  ;;  %v2159_v16 = vld [vmem:[%s8083_s7 + $0x30] sm:$0xff] }
 0x74e   :  { %v5371_v58 = vpack.c.bf16 %v1855_v35, %v1852_v12  ;;  %v5387_v35 = vpack.c.bf16 %v1879_v52, %v1876_v24  ;;  %v2175_v24 = vld [vmem:[%s8083_s7 + $0xb0] sm:$0xff] }
 0x74f   :  { %6073 = vtanh.f32 %v1644_v38  ;;  %v5383_v38 = vpack.c.bf16 %v1873_v23, %v1870_v21  ;;  %v2162_v21 = vld [vmem:[%s8083_s7 + $0x48] sm:$0xff] }
 0x750   :  { %v7317_v23 = vpack.c.bf16 %v2162_v21, %v2159_v16  ;;  %v2167_v21 = vld [vmem:[%s8083_s7 + $0x70] sm:$0xff] }
 0x759   :  { %v6074_v37 = vpop.eup %6073 }
 0x75a   :  { %v1647_v42 = vmul.f32 %v6074_v37, %v1646_v0  ;;  %v1869_v0 = vld [vmem:[%s8082_s6 + $0xc0] sm:$0xff]  ;;  %v1872_v37 = vld [vmem:[%s8082_s6 + $0xd8] sm:$0xff] }
 0x75b   :  { %v5385_v12 = vpack.c.bf16 %v1872_v37, %v1869_v0  ;;  %v2172_v37 = vld [vmem:[%s8083_s7 + $0x98] sm:$0xff] }
 0x75c   :  { %v7109_v62 = vadd.f32 %v1648_v29, %v1647_v42  ;;  %v1877_v42 = vld [vmem:[%s8082_s6 + $0x100] sm:$0xff]  ;;  %v1880_v29 = vld [vmem:[%s8082_s6 + $0x118] sm:$0xff]  ;;  %v7345_v52 = vpack.c.bf16 %v2175_v24, %v2172_v37  ;;  %v2179_v24 = vld [vmem:[%s8083_s7 + $0xd0] sm:$0xff] }
 0x75d   :  { %v5419_v41 = vpack.c.bf16 %v1880_v29, %v1877_v42  ;;  %v2171_v42 = vld [vmem:[%s8083_s7 + $0x90] sm:$0xff]  ;;  %v2174_v29 = vld [vmem:[%s8083_s7 + $0xa8] sm:$0xff] }
 0x75e   :  { %v7125_v1 = vsel %vm1655_vm15, %v7109_v62, %v7035_v54  ;;  %v5373_v54 = vpack.c.bf16 %v1854_v26, %v1851_v59  ;;  %v1885_v59 = vld [vmem:[%s8082_s6 + $0x140] sm:$0xff]  ;;  %v1883_v26 = vld [vmem:[%s8082_s6 + $0x130] sm:$0xff] }
 0x75f   :  { %1729 = vmatmul.mubr.f32.vlgmr.msra.gmra.mrb[14].mxu0 %v7125_v1  ;;  %4494 = vmatmul.mubr.f32.vlgmr.msra.gmra.mrb[22].mxu1 %v7125_v1  ;;  %v5423_v20 = vpack.c.bf16 %v1886_v5, %v1883_v26  ;;  %v2184_v26 = vld [vmem:[%s8083_s7 + $0xf8] sm:$0xff]  ;;  %v2187_v5 = vld [vmem:[%s8083_s7 + $0x110] sm:$0xff] }
 0x760   :  { %5370 = vmatpush1.bf16.msra.mxu0 %v5369_v49  ;;  %5402 = vmatpush3.bf16.msra.mxu1 %v5399_v40  ;;  %v1864_v40 = vld [vmem:[%s8082_s6 + $0x98] sm:$0xff]  ;;  %v1878_v49 = vld [vmem:[%s8082_s6 + $0x108] sm:$0xff] }
 0x761   :  { %4528 = vmatprep.mubr.msk.f32.mxu1 %vm593_vm5, %v6757_v25  ;;  %5372 = vmatprep.subr.bf16.mxu0 %v5371_v58  ;;  %v5379_v2 = vpack.c.bf16 %v1867_v51, %v1864_v40  ;;  %v1882_v58 = vld [vmem:[%s8082_s6 + $0x128] sm:$0xff] }
 0x762   :  { %5404 = vmatprep.subr.bf16.mxu1 %v5403_v6  ;;  %1974 = vmatprep.mubr.f32.mxu0 %v8092_v3  ;;  %v5391_v19 = vpack.c.bf16 %v1885_v59, %v1882_v58  ;;  %v2180_v58 = vld [vmem:[%s8083_s7 + $0xd8] sm:$0xff] }
 0x764   :  { %5374 = vmatpush1.bf16.msra.mxu0 %v5373_v54  ;;  %5406 = vmatpush3.bf16.msra.mxu1 %v5403_v6  ;;  %v5389_v6 = vpack.c.bf16 %v1878_v49, %v1875_v11  ;;  %v1884_v54 = vld [vmem:[%s8082_s6 + $0x138] sm:$0xff]  ;;  %v2177_v49 = vld [vmem:[%s8083_s7 + $0xc0] sm:$0xff] }
 0x765   :  { %5376 = vmatprep.subr.bf16.mxu0 %v5375_v30  ;;  %5408 = vmatprep.subr.bf16.mxu1 %v5407_v39  ;;  %v1888_v30 = vld [vmem:[%s8082_s6 + $0x158] sm:$0xff]  ;;  %v5393_v40 = vpack.c.bf16 %v1884_v54, %v1881_v28  ;;  %v7371_v59 = vpack.c.bf16 %v2180_v58, %v2177_v49  ;;  %v2190_v54 = vld [vmem:[%s8083_s7 + $0x128] sm:$0xff]  ;;  %v2191_v58 = vld [vmem:[%s8083_s7 + $0x130] sm:$0xff] }
 0x768   :  { %5378 = vmatpush1.bf16.msra.mxu0 %v5377_v61  ;;  %5410 = vmatpush3.bf16.msra.mxu1 %v5407_v39  ;;  %v1891_v39 = vld [vmem:[%s8082_s6 + $0x170] sm:$0xff]  ;;  %v1890_v61 = vld [vmem:[%s8082_s6 + $0x168] sm:$0xff] }
 0x769   :  { %5380 = vmatprep.subr.bf16.mxu0 %v5379_v2  ;;  %5412 = vmatprep.subr.bf16.mxu1 %v5411_v8  ;;  %v5395_v51 = vpack.c.bf16 %v1891_v39, %v1888_v30  ;;  %v5397_v2 = vpack.c.bf16 %v1890_v61, %v1887_v60  ;;  %v2193_v30 = vld [vmem:[%s8083_s7 + $0x140] sm:$0xff]  ;;  %v2196_v61 = vld [vmem:[%s8083_s7 + $0x158] sm:$0xff] }
 0x76a   :  { %v2189_v39 = vld [vmem:[%s8083_s7 + $0x120] sm:$0xff]  ;;  %v7402_v46 = vpack.c.bf16 %v2193_v30, %v2190_v54 }
 0x76c   :  { %5382 = vmatpush1.bf16.msra.mxu0 %v5381_v34  ;;  %5414 = vmatpush3.bf16.msra.mxu1 %v5411_v8  ;;  %v2163_v8 = vld [vmem:[%s8083_s7 + $0x50] sm:$0xff]  ;;  %v7327_v34 = vpack.c.bf16 %v2169_v33, %v2166_v27  ;;  %v2170_v27 = vld [vmem:[%s8083_s7 + $0x88] sm:$0xff]  ;;  %v2173_v33 = vld [vmem:[%s8083_s7 + $0xa0] sm:$0xff] }
 0x76d   :  { %5384 = vmatprep.subr.bf16.mxu0 %v5383_v38  ;;  %5416 = vmatprep.subr.bf16.mxu1 %v5415_v43  ;;  %v2165_v38 = vld [vmem:[%s8083_s7 + $0x60] sm:$0xff] }
 0x770   :  { %5386 = vmatpush1.bf16.msra.mxu0 %v5385_v12  ;;  %5418 = vmatpush3.bf16.msra.mxu1 %v5415_v43  ;;  %v2168_v43 = vld [vmem:[%s8083_s7 + $0x78] sm:$0xff]  ;;  %v7353_v12 = vpack.c.bf16 %v2174_v29, %v2171_v42  ;;  %v2182_v42 = vld [vmem:[%s8083_s7 + $0xe8] sm:$0xff] }
 0x771   :  { %5388 = vmatprep.subr.bf16.mxu0 %v5387_v35  ;;  %5420 = vmatprep.subr.bf16.mxu1 %v5419_v41  ;;  %v7335_v0 = vpack.c.bf16 %v2168_v43, %v2165_v38  ;;  %v2178_v35 = vld [vmem:[%s8083_s7 + $0xc8] sm:$0xff]  ;;  %v7459_v38 = vpack.c.bf16 %v2170_v27, %v2167_v21  ;;  %v2176_v43 = vld [vmem:[%s8083_s7 + $0xb8] sm:$0xff]  ;;  %v7475_v29 = vpack.c.bf16 %v2182_v42, %v2179_v24  ;;  %v6165_v27 = vld [vmem:[%s8081_s5] ss:$0 sm:$0xff] }
 0x772   :  { %v7465_v37 = vpack.c.bf16 %v2176_v43, %v2173_v33 }
 0x774   :  { %5390 = vmatpush1.bf16.msra.mxu0 %v5389_v6  ;;  %5422 = vmatpush3.bf16.msra.mxu1 %v5419_v41  ;;  %v2181_v41 = vld [vmem:[%s8083_s7 + $0xe0] sm:$0xff]  ;;  %v7381_v6 = vpack.c.bf16 %v2187_v5, %v2184_v26  ;;  %v2194_v26 = vld [vmem:[%s8083_s7 + $0x148] sm:$0xff] }
 0x775   :  { %5392 = vmatprep.subr.bf16.mxu0 %v5391_v19  ;;  %5424 = vmatprep.subr.bf16.mxu1 %v5423_v20  ;;  %v7363_v11 = vpack.c.bf16 %v2181_v41, %v2178_v35  ;;  %v2183_v19 = vld [vmem:[%s8083_s7 + $0xf0] sm:$0xff]  ;;  %v2185_v35 = vld [vmem:[%s8083_s7 + $0x100] sm:$0xff]  ;;  %v2188_v41 = vld [vmem:[%s8083_s7 + $0x118] sm:$0xff]  ;;  %v7495_v5 = vpack.c.bf16 %v2194_v26, %v2191_v58 }
 0x776   :  { %v7485_v49 = vpack.c.bf16 %v2188_v41, %v2185_v35 }
 0x778   :  { %5394 = vmatpush1.bf16.msra.mxu0 %v5393_v40  ;;  %5426 = vmatpush3.bf16.msra.mxu1 %v5423_v20  ;;  %v2186_v20 = vld [vmem:[%s8083_s7 + $0x108] sm:$0xff]  ;;  %v2155_v40 = vld [vmem:[%s8083_s7 + $0x10] sm:$0xff] }
 0x779   :  { %5396 = vmatprep.subr.bf16.mxu0 %v5395_v51  ;;  %5428 = vmatprep.subr.bf16.mxu1 %v5427_v56  ;;  %v7389_v28 = vpack.c.bf16 %v2186_v20, %v2183_v19  ;;  %v2158_v51 = vld [vmem:[%s8083_s7 + $0x28] sm:$0xff]  ;;  %v2197_v19 = vld [vmem:[%s8083_s7 + $0x160] sm:$0xff]  ;;  %v2200_v20 = vld [vmem:[%s8083_s7 + $0x178] sm:$0xff] }
 0x77a   :  { %v7415_v60 = vpack.c.bf16 %v2158_v51, %v2155_v40  ;;  %v7505_v54 = vpack.c.bf16 %v2200_v20, %v2197_v19 }
 0x77c   :  { %5398 = vmatpush1.bf16.msra.mxu0 %v5397_v2  ;;  %5430 = vmatpush3.bf16.msra.mxu1 %v5427_v56  ;;  %v7413_v56 = vpack.c.bf16 %v2192_v50, %v2189_v39  ;;  %v2199_v2 = vld [vmem:[%s8083_s7 + $0x170] sm:$0xff] }
 0x77d   :  { %5463 = vmatprep.subr.bf16.mxu1 %v6169_v45 }
 0x77f   :  { %3817 = vmatmul.mubr.msk.f32.vlgmr.msra.gmra.mrb[16].mxu0 %vm593_vm5, %v6757_v25  ;;  %4529 = vmatmul.mubr.msk.f32.vlgmr.msra.gmra.mrb[24].mxu1 %vm770_vm10, %v6817_v36  ;;  %v2154_v25 = vld [vmem:[%s8083_s7 + $0x8] sm:$0xff] }
 0x780   :  { %4531 = vmatprep.mubr.msk.f32.mxu1 %vm947_vm11, %v6870_v44  ;;  %1980 = vmatprep.mubr.f32.mxu0 %v8092_v3 }
 0x781   :  { %5465 = vmatpush3.bf16.msra.mxu1 %v7415_v60 }
 0x782   :  { %5466 = vmatprep.subr.bf16.mxu1 %v6169_v45 }
 0x783   :  { %3818 = vmatmul.mubr.msk.f32.gmra.mrb[18].mxu0 %vm770_vm10, %v6817_v36  ;;  %4532 = vmatmul.mubr.msk.f32.gmra.mrb[26].mxu1 %vm1124_vm12, %v6922_v57  ;;  %v2157_v36 = vld [vmem:[%s8083_s7 + $0x20] sm:$0xff] }
 0x784   :  { %4534 = vmatprep.mubr.msk.f32.mxu1 %vm1301_vm13, %v6975_v4  ;;  %1986 = vmatprep.mubr.f32.mxu0 %v8092_v3 }
 0x787   :  { %3819 = vmatmul.mubr.msk.f32.gmra.mrb[20].mxu0 %vm947_vm11, %v6870_v44  ;;  %4535 = vmatmul.mubr.msk.f32.gmra.mrb[28].mxu1 %vm1478_vm14, %v7028_v22  ;;  %v7291_v44 = vpack.c.bf16 %v2157_v36, %v2154_v25  ;;  %v7426_v25 = vpack.c.bf16 %v2199_v2, %v2196_v61  ;;  %v2195_v36 = vld [vmem:[%s8083_s7 + $0x150] sm:$0xff] }
 0x788   :  { %4537 = vmatprep.mubr.msk.f32.mxu1 %vm1655_vm15, %v7109_v62  ;;  %1992 = vmatprep.mubr.f32.mxu0 %v8092_v3 }
 0x789   :  { %5432 = vmatprep.subr.bf16.mxu0 %v7291_v44 }
 0x78b   :  { %3820 = vmatmul.mubr.msk.f32.gmra.mrb[22].mxu0 %vm1124_vm12, %v6922_v57  ;;  %v2153_v57 = vld [vmem:[%s8083_s7] sm:$0xff] }
 0x78c   :  { %1998 = vmatprep.mubr.f32.mxu0 %v8092_v3 }
 0x78f   :  { %3821 = vmatmul.mubr.msk.f32.gmra.mrb[24].mxu0 %vm1301_vm13, %v6975_v4  ;;  %v2156_v4 = vld [vmem:[%s8083_s7 + $0x18] sm:$0xff] }
 0x790   :  { %2004 = vmatprep.mubr.f32.mxu0 %v8092_v3 }
 0x793   :  { %3822 = vmatmul.mubr.msk.f32.gmra.mrb[26].mxu0 %vm1478_vm14, %v7028_v22  ;;  %v7299_v22 = vpack.c.bf16 %v2156_v4, %v2153_v57  ;;  %v2198_v57 = vld [vmem:[%s8083_s7 + $0x168] sm:$0xff] }
 0x794   :  { %2010 = vmatprep.mubr.f32.mxu0 %v8092_v3  ;;  %v7435_v4 = vpack.c.bf16 %v2198_v57, %v2195_v36 }
 0x795   :  { %5434 = vmatpush1.bf16.msra.mxu0 %v7299_v22 }
 0x797   :  { %3823 = vmatmul.mubr.msk.f32.gmra.mrb[28].mxu0 %vm1655_vm15, %v7109_v62  ;;  %v2160_v62 = vld [vmem:[%s8083_s7 + $0x38] sm:$0xff] }
 0x798   :  { %2016 = vmatprep.mubr.f32.mxu0 %v8092_v3  ;;  %v7309_v10 = vpack.c.bf16 %v2163_v8, %v2160_v62  ;;  %v2161_v62 = vld [vmem:[%s8083_s7 + $0x40] sm:$0xff]  ;;  %v2164_v8 = vld [vmem:[%s8083_s7 + $0x58] sm:$0xff] }
 0x799   :  { %v7444_v16 = vpack.c.bf16 %v2164_v8, %v2161_v62 }
 0x79a   :  { %5436 = vmatprep.subr.bf16.mxu0 %v7309_v10 }
 0x79b   :  { %5438 = vmatpush1.bf16.msra.mxu0 %v7317_v23  ;;  %5468 = vmatpush3.bf16.msra.mxu1 %v7444_v16 }
 0x79c   :  { %5440 = vmatprep.subr.bf16.mxu0 %v7327_v34  ;;  %5469 = vmatprep.subr.bf16.mxu1 %v6169_v45 }
 0x79f   :  { %5442 = vmatpush1.bf16.msra.mxu0 %v7335_v0  ;;  %5471 = vmatpush3.bf16.msra.mxu1 %v7459_v38 }
 0x7a0   :  { %5444 = vmatprep.subr.bf16.mxu0 %v7345_v52  ;;  %5472 = vmatprep.subr.bf16.mxu1 %v6169_v45 }
 0x7a3   :  { %5446 = vmatpush1.bf16.msra.mxu0 %v7353_v12  ;;  %5474 = vmatpush3.bf16.msra.mxu1 %v7465_v37 }
 0x7a4   :  { %5448 = vmatprep.subr.bf16.mxu0 %v7363_v11  ;;  %5475 = vmatprep.subr.bf16.mxu1 %v6169_v45 }
 0x7a7   :  { %5450 = vmatpush1.bf16.msra.mxu0 %v7371_v59  ;;  %5477 = vmatpush3.bf16.msra.mxu1 %v7475_v29 }
 0x7a8   :  { %5452 = vmatprep.subr.bf16.mxu0 %v7381_v6  ;;  %5478 = vmatprep.subr.bf16.mxu1 %v6169_v45 }
 0x7ab   :  { %5454 = vmatpush1.bf16.msra.mxu0 %v7389_v28  ;;  %5480 = vmatpush3.bf16.msra.mxu1 %v7485_v49 }
 0x7ac   :  { %5456 = vmatprep.subr.bf16.mxu0 %v7402_v46  ;;  %5481 = vmatprep.subr.bf16.mxu1 %v6169_v45 }
 0x7af   :  { %5458 = vmatpush1.bf16.msra.mxu0 %v7413_v56  ;;  %5483 = vmatpush3.bf16.msra.mxu1 %v7495_v5 }
 0x7b0   :  { %5460 = vmatprep.subr.bf16.mxu0 %v7426_v25  ;;  %5484 = vmatprep.subr.bf16.mxu1 %v6169_v45 }
 0x7b3   :  { %5462 = vmatpush1.bf16.msra.mxu0 %v7435_v4  ;;  %5486 = vmatpush3.bf16.msra.mxu1 %v7505_v54 }
 0x7b4   :  { %5488 = vmatprep.subr.bf16.mxu0 %v7291_v44  ;;  %5519 = vmatprep.subr.bf16.mxu1 %v6169_v45 }
 0x832   :  { %v1730_v30 = vpop.f32.mrb[14].mxu0  ;;  %v1801_v39 = vpop.f32.mrb[22].mxu1 }
 0x833   :  { %v5949_v50 = vadd.f32 %v1730_v30, %v6741_v15  ;;  %v1732_v40 = vpop.f32.mrb[15].mxu0  ;;  %v4495_v51 = vpop.f32.mrb[23].mxu1  ;;  %v1819_v33 = vadd.f32 %v6165_v27, %v1801_v39 }
 0x834   :  { %v5950_v2 = vadd.f32 %v1732_v40, %v6744_v18  ;;  %v7528_v39 = vpop.permute.xlu1 %1830 }
 0x835   :  { %v3795_v61 = vmul.f32 -1.442695, %v5949_v50  ;;  %vm1832_vm0 = vcmp.eq.s32.totalorder %v7528_v39, 1 }
 0x836   :  { %v3796_v36 = vmul.f32 -1.442695, %v5950_v2 }
 0x837   :  { %6075 = vpow2.f32 %v3795_v61 }
 0x838   :  { %6077 = vpow2.f32 %v3796_v36 }
 0x841   :  { %v6076_v57 = vpop.eup %6075 }
 0x842   :  { %v1809_v62 = vadd.f32 1.0, %v6076_v57  ;;  %v6078_v8 = vpop.eup %6077 }
 0x843   :  { %v1816_v21 = vadd.f32 1.0, %v6078_v8 }
 0x844   :  { %6079 = vrcp.f32 %v1809_v62 }
 0x845   :  { %6081 = vrcp.f32 %v1816_v21 }
 0x84e   :  { %v6080_v43 = vpop.eup %6079 }
 0x84f   :  { %v1820_v15 = vmul.f32 %v6080_v43, %v1819_v33  ;;  %v6082_v58 = vpop.eup %6081 }
 0x850   :  { %v1823_v20 = vsub.f32 1.0, %v6082_v58 }
 0x851   :  { %v1821_v24 = vadd.f32 %v1820_v15, %v6730_v7  ;;  %v1825_v7 = vmul.f32 %v6082_v58, %v7125_v1  ;;  %v1893_v1 = vld [vmem:[%s8084_s8] sm:$0x7] }
 0x852   :  { %v7516_v42 = vpop.f32.mrb[24].mxu1  ;;  %v7584_v2 = vrot.slane %v1893_v1, %v6735_v13  ;;  %v7587_v57 = vrot.slane %v1893_v1, %v6738_v14 }
 0x853   :  { %6083 = vtanh.f32 %v1821_v24  ;;  %v7518_v18 = vpop.f32.mrb[25].mxu1 }
 0x856   :  { %v7520_v35 = vpop.f32.mrb[26].mxu1 }
 0x857   :  { %v7522_v41 = vpop.f32.mrb[27].mxu1 }
 0x85a   :  { %v7524_v26 = vpop.f32.mrb[28].mxu1 }
 0x85b   :  { %v7526_v19 = vpop.f32.mrb[29].mxu1 }
 0x85d   :  { %v6084_v30 = vpop.eup %6083 }
 0x85e   :  { %v1824_v50 = vmul.f32 %v6084_v30, %v1823_v20  ;;  %v7594_v30 = vld [vmem:[%s8085_s9] ss:$0 sm:$0xff] }
 0x860   :  { %v1826_v40 = vadd.f32 %v1825_v7, %v1824_v50  ;;  %v7598_v50 = vrot.slane %v1893_v1, %v118_v48 }
 0x862   :  { %3824 = vmatmul.mubr.msk.f32.gmra.mrb[30].mxu0 %vm1832_vm0, %v1826_v40  ;;  %4538 = vmatmul.mubr.msk.f32.gmra.mrb[30].mxu1 %vm1832_vm0, %v1826_v40 }
 0x863   :  { %2270 = vmatprep.mubr.f32.mxu0 %v8092_v3  ;;  %4572 = vmatprep.mubr.msk.f32.mxu1 %vm6170_vm3, %v8092_v3 }
 0x866   :  { %2271 = vmatmul.mubr.f32.vlgmr.msra.gmra.mrb[16].mxu0 %v8092_v3  ;;  %4573 = vmatmul.mubr.f32.vlgmr.msra.gmra.mrb[32].mxu1 %v8092_v3 }
 0x867   :  { %5490 = vmatpush1.bf16.msra.mxu0 %v7299_v22  ;;  %5521 = vmatpush3.bf16.msra.mxu1 %v7415_v60 }
 0x868   :  { %5492 = vmatprep.subr.bf16.mxu0 %v7309_v10  ;;  %5522 = vmatprep.subr.bf16.mxu1 %v6169_v45 }
 0x869   :  { %2445 = vmatprep.mubr.f32.mxu0 %v8092_v3  ;;  %4607 = vmatprep.mubr.msk.f32.mxu1 %vm6170_vm3, %v8092_v3 }
 0x86b   :  { %5494 = vmatpush1.bf16.msra.mxu0 %v7317_v23  ;;  %5524 = vmatpush3.bf16.msra.mxu1 %v7444_v16 }
 0x86c   :  { %5496 = vmatprep.subr.bf16.mxu0 %v7327_v34  ;;  %5525 = vmatprep.subr.bf16.mxu1 %v6169_v45 }
 0x86f   :  { %5498 = vmatpush1.bf16.msra.mxu0 %v7335_v0  ;;  %5527 = vmatpush3.bf16.msra.mxu1 %v7459_v38 }
 0x870   :  { %5500 = vmatprep.subr.bf16.mxu0 %v7345_v52  ;;  %5528 = vmatprep.subr.bf16.mxu1 %v6169_v45 }
 0x873   :  { %5502 = vmatpush1.bf16.msra.mxu0 %v7353_v12  ;;  %5530 = vmatpush3.bf16.msra.mxu1 %v7465_v37 }
 0x874   :  { %5504 = vmatprep.subr.bf16.mxu0 %v7363_v11  ;;  %5531 = vmatprep.subr.bf16.mxu1 %v6169_v45 }
 0x877   :  { %5506 = vmatpush1.bf16.msra.mxu0 %v7371_v59  ;;  %5533 = vmatpush3.bf16.msra.mxu1 %v7475_v29 }
 0x878   :  { %5508 = vmatprep.subr.bf16.mxu0 %v7381_v6  ;;  %5534 = vmatprep.subr.bf16.mxu1 %v6169_v45 }
 0x87b   :  { %5510 = vmatpush1.bf16.msra.mxu0 %v7389_v28  ;;  %5536 = vmatpush3.bf16.msra.mxu1 %v7485_v49 }
 0x87c   :  { %5512 = vmatprep.subr.bf16.mxu0 %v7402_v46  ;;  %5537 = vmatprep.subr.bf16.mxu1 %v6169_v45 }
 0x87f   :  { %5514 = vmatpush1.bf16.msra.mxu0 %v7413_v56  ;;  %5539 = vmatpush3.bf16.msra.mxu1 %v7495_v5 }
 0x880   :  { %5516 = vmatprep.subr.bf16.mxu0 %v7426_v25  ;;  %5540 = vmatprep.subr.bf16.mxu1 %v6169_v45 }
 0x883   :  { %5518 = vmatpush1.bf16.msra.mxu0 %v7435_v4  ;;  %5542 = vmatpush3.bf16.msra.mxu1 %v7505_v54 }
 0x884   :  { %5544 = vmatprep.subr.bf16.mxu0 %v7291_v44  ;;  %5575 = vmatprep.subr.bf16.mxu1 %v6169_v45 }
 0x935   :  { %v7579_v51 = vpop.f32.mrb[30].mxu1 }
 0x936   :  { %v7581_v61 = vpop.f32.mrb[31].mxu1 }
 0x939   :  { %v2272_v36 = vpop.f32.mrb[16].mxu0  ;;  %v2343_v62 = vpop.f32.mrb[32].mxu1 }
 0x93a   :  { %v5951_v8 = vadd.f32 %v2272_v36, %v7584_v2  ;;  %v2274_v21 = vpop.f32.mrb[17].mxu0  ;;  %v4574_v27 = vpop.f32.mrb[33].mxu1  ;;  %v2367_v40 = vadd.f32 %v7594_v30, %v2343_v62 }
 0x93b   :  { %v5952_v43 = vadd.f32 %v2274_v21, %v7587_v57 }
 0x93c   :  { %v3797_v33 = vmul.f32 -1.442695, %v5951_v8  ;;  %v2090_v8 = vadd.f32 %v7518_v18, %v7598_v50 }
 0x93d   :  { %v3798_v15 = vmul.f32 -1.442695, %v5952_v43 }
 0x93e   :  { %6085 = vpow2.f32 %v3797_v33 }
 0x93f   :  { %6087 = vpow2.f32 %v3798_v15 }
 0x948   :  { %v6086_v24 = vpop.eup %6085 }
 0x949   :  { %v2351_v58 = vadd.f32 1.0, %v6086_v24  ;;  %v6088_v20 = vpop.eup %6087 }
 0x94a   :  { %v2358_v7 = vadd.f32 1.0, %v6088_v20 }
 0x94b   :  { %6089 = vrcp.f32 %v2351_v58 }
 0x94c   :  { %6091 = vrcp.f32 %v2358_v7 }
 0x955   :  { %v6090_v36 = vpop.eup %6089 }
 0x956   :  { %v2368_v21 = vmul.f32 %v6090_v36, %v2367_v40  ;;  %v6092_v33 = vpop.eup %6091 }
 0x957   :  { %v2371_v43 = vsub.f32 1.0, %v6092_v33  ;;  %v2373_v58 = vmul.f32 0.0, %v6092_v33 }
 0x958   :  { %v2369_v27 = vadd.f32 %v2368_v21, %v2090_v8 }
 0x95a   :  { %6093 = vtanh.f32 %v2369_v27 }
 0x964   :  { %v6094_v15 = vpop.eup %6093 }
 0x965   :  { %v2372_v24 = vmul.f32 %v6094_v15, %v2371_v43 }
 0x967   :  { %v2374_v3 = vadd.f32 %v2373_v58, %v2372_v24  ;;  %v2095_v58 = vadd.f32 %v7516_v42, %v7598_v50 }
 0x969   :  { %3833 = vmatmul.mubr.msk.f32.vlgmr.msra.gmra.mrb[18].mxu0 %vm593_vm5, %v2374_v3  ;;  %4608 = vmatmul.mubr.msk.f32.vlgmr.msra.gmra.mrb[34].mxu1 %vm593_vm5, %v2374_v3 }
 0x96a   :  { %5546 = vmatpush1.bf16.msra.mxu0 %v7299_v22  ;;  %5577 = vmatpush3.bf16.msra.mxu1 %v7415_v60 }
 0x96b   :  { %5548 = vmatprep.subr.bf16.mxu0 %v7309_v10  ;;  %5578 = vmatprep.subr.bf16.mxu1 %v6169_v45 }
 0x96c   :  { %2614 = vmatprep.mubr.f32.mxu0 %v8094_v47  ;;  %4642 = vmatprep.mubr.msk.f32.mxu1 %vm6170_vm3, %v8094_v47 }
 0x96e   :  { %5550 = vmatpush1.bf16.msra.mxu0 %v7317_v23  ;;  %5580 = vmatpush3.bf16.msra.mxu1 %v7444_v16 }
 0x96f   :  { %5552 = vmatprep.subr.bf16.mxu0 %v7327_v34  ;;  %5581 = vmatprep.subr.bf16.mxu1 %v6169_v45 }
 0x972   :  { %5554 = vmatpush1.bf16.msra.mxu0 %v7335_v0  ;;  %5583 = vmatpush3.bf16.msra.mxu1 %v7459_v38 }
 0x973   :  { %5556 = vmatprep.subr.bf16.mxu0 %v7345_v52  ;;  %5584 = vmatprep.subr.bf16.mxu1 %v6169_v45 }
 0x976   :  { %5558 = vmatpush1.bf16.msra.mxu0 %v7353_v12  ;;  %5586 = vmatpush3.bf16.msra.mxu1 %v7465_v37 }
 0x977   :  { %5560 = vmatprep.subr.bf16.mxu0 %v7363_v11  ;;  %5587 = vmatprep.subr.bf16.mxu1 %v6169_v45 }
 0x97a   :  { %5562 = vmatpush1.bf16.msra.mxu0 %v7371_v59  ;;  %5589 = vmatpush3.bf16.msra.mxu1 %v7475_v29 }
 0x97b   :  { %5564 = vmatprep.subr.bf16.mxu0 %v7381_v6  ;;  %5590 = vmatprep.subr.bf16.mxu1 %v6169_v45 }
 0x97e   :  { %5566 = vmatpush1.bf16.msra.mxu0 %v7389_v28  ;;  %5592 = vmatpush3.bf16.msra.mxu1 %v7485_v49 }
 0x97f   :  { %5568 = vmatprep.subr.bf16.mxu0 %v7402_v46  ;;  %5593 = vmatprep.subr.bf16.mxu1 %v6169_v45 }
 0x982   :  { %5570 = vmatpush1.bf16.msra.mxu0 %v7413_v56  ;;  %5595 = vmatpush3.bf16.msra.mxu1 %v7495_v5 }
 0x983   :  { %5572 = vmatprep.subr.bf16.mxu0 %v7426_v25  ;;  %5596 = vmatprep.subr.bf16.mxu1 %v6169_v45 }
 0x986   :  { %5574 = vmatpush1.bf16.msra.mxu0 %v7435_v4  ;;  %5598 = vmatpush3.bf16.msra.mxu1 %v7505_v54 }
 0x987   :  { %5600 = vmatprep.subr.bf16.mxu0 %v7291_v44  ;;  %5631 = vmatprep.subr.bf16.mxu1 %v6169_v45 }
 0xa3c   :  { %v2447_v48 = vpop.f32.mrb[18].mxu0  ;;  %v2518_v18 = vpop.f32.mrb[34].mxu1 }
 0xa3d   :  { %v5953_v1 = vadd.f32 %v2447_v48, %v7584_v2  ;;  %v2449_v62 = vpop.f32.mrb[19].mxu0  ;;  %v4609_v20 = vpop.f32.mrb[35].mxu1  ;;  %v2536_v43 = vadd.f32 %v7594_v30, %v2518_v18 }
 0xa3e   :  { %v5954_v7 = vadd.f32 %v2449_v62, %v7587_v57 }
 0xa3f   :  { %v3800_v40 = vmul.f32 -1.442695, %v5953_v1  ;;  %v2375_v1 = vsel %vm593_vm5, %v2374_v3, 0.0 }
 0xa40   :  { %v3801_v36 = vmul.f32 -1.442695, %v5954_v7 }
 0xa41   :  { %6095 = vpow2.f32 %v3800_v40 }
 0xa42   :  { %6097 = vpow2.f32 %v3801_v36 }
 0xa4b   :  { %v6096_v8 = vpop.eup %6095 }
 0xa4c   :  { %v6098_v21 = vpop.eup %6097  ;;  %v2526_v27 = vadd.f32 1.0, %v6096_v8 }
 0xa4d   :  { %v2533_v33 = vadd.f32 1.0, %v6098_v21 }
 0xa4e   :  { %6099 = vrcp.f32 %v2526_v27 }
 0xa4f   :  { %6101 = vrcp.f32 %v2533_v33 }
 0xa58   :  { %v6100_v15 = vpop.eup %6099 }
 0xa59   :  { %v6102_v24 = vpop.eup %6101  ;;  %v2537_v48 = vmul.f32 %v6100_v15, %v2536_v43 }
 0xa5a   :  { %v2542_v62 = vmul.f32 %v6102_v24, %v2375_v1  ;;  %v2540_v7 = vsub.f32 1.0, %v6102_v24 }
 0xa5b   :  { %v2538_v20 = vadd.f32 %v2537_v48, %v2095_v58 }
 0xa5d   :  { %6103 = vtanh.f32 %v2538_v20  ;;  %v2100_v20 = vadd.f32 %v7522_v41, %v7598_v50 }
 0xa67   :  { %v6104_v40 = vpop.eup %6103 }
 0xa68   :  { %v2541_v36 = vmul.f32 %v6104_v40, %v2540_v7 }
 0xa6a   :  { %v2543_v8 = vadd.f32 %v2542_v62, %v2541_v36 }
 0xa6c   :  { %v7651_v21 = vsel %vm770_vm10, %v2543_v8, %v2375_v1 }
 0xa6d   :  { %2615 = vmatmul.mubr.f32.vlgmr.msra.gmra.mrb[20].mxu0 %v7651_v21  ;;  %4643 = vmatmul.mubr.f32.vlgmr.msra.gmra.mrb[36].mxu1 %v7651_v21 }
 0xa6e   :  { %5602 = vmatpush1.bf16.msra.mxu0 %v7299_v22  ;;  %5633 = vmatpush3.bf16.msra.mxu1 %v7415_v60 }
 0xa6f   :  { %5604 = vmatprep.subr.bf16.mxu0 %v7309_v10  ;;  %5634 = vmatprep.subr.bf16.mxu1 %v6169_v45 }
 0xa70   :  { %2783 = vmatprep.mubr.f32.mxu0 %v8094_v47  ;;  %4677 = vmatprep.mubr.msk.f32.mxu1 %vm6170_vm3, %v8094_v47 }
 0xa72   :  { %5606 = vmatpush1.bf16.msra.mxu0 %v7317_v23  ;;  %5636 = vmatpush3.bf16.msra.mxu1 %v7444_v16 }
 0xa73   :  { %5608 = vmatprep.subr.bf16.mxu0 %v7327_v34  ;;  %5637 = vmatprep.subr.bf16.mxu1 %v6169_v45 }
 0xa76   :  { %5610 = vmatpush1.bf16.msra.mxu0 %v7335_v0  ;;  %5639 = vmatpush3.bf16.msra.mxu1 %v7459_v38 }
 0xa77   :  { %5612 = vmatprep.subr.bf16.mxu0 %v7345_v52  ;;  %5640 = vmatprep.subr.bf16.mxu1 %v6169_v45 }
 0xa7a   :  { %5614 = vmatpush1.bf16.msra.mxu0 %v7353_v12  ;;  %5642 = vmatpush3.bf16.msra.mxu1 %v7465_v37 }
 0xa7b   :  { %5616 = vmatprep.subr.bf16.mxu0 %v7363_v11  ;;  %5643 = vmatprep.subr.bf16.mxu1 %v6169_v45 }
 0xa7e   :  { %5618 = vmatpush1.bf16.msra.mxu0 %v7371_v59  ;;  %5645 = vmatpush3.bf16.msra.mxu1 %v7475_v29 }
 0xa7f   :  { %5620 = vmatprep.subr.bf16.mxu0 %v7381_v6  ;;  %5646 = vmatprep.subr.bf16.mxu1 %v6169_v45 }
 0xa82   :  { %5622 = vmatpush1.bf16.msra.mxu0 %v7389_v28  ;;  %5648 = vmatpush3.bf16.msra.mxu1 %v7485_v49 }
 0xa83   :  { %5624 = vmatprep.subr.bf16.mxu0 %v7402_v46  ;;  %5649 = vmatprep.subr.bf16.mxu1 %v6169_v45 }
 0xa86   :  { %5626 = vmatpush1.bf16.msra.mxu0 %v7413_v56  ;;  %5651 = vmatpush3.bf16.msra.mxu1 %v7495_v5 }
 0xa87   :  { %5628 = vmatprep.subr.bf16.mxu0 %v7426_v25  ;;  %5652 = vmatprep.subr.bf16.mxu1 %v6169_v45 }
 0xa8a   :  { %5630 = vmatpush1.bf16.msra.mxu0 %v7435_v4  ;;  %5654 = vmatpush3.bf16.msra.mxu1 %v7505_v54 }
 0xa8b   :  { %5656 = vmatprep.subr.bf16.mxu0 %v7291_v44  ;;  %5687 = vmatprep.subr.bf16.mxu1 %v6169_v45 }
 0xb40   :  { %v2616_v3 = vpop.f32.mrb[20].mxu0  ;;  %v2687_v17 = vpop.f32.mrb[36].mxu1 }
 0xb41   :  { %v5955_v32 = vadd.f32 %v2616_v3, %v7584_v2  ;;  %v2618_v42 = vpop.f32.mrb[21].mxu0  ;;  %v4644_v18 = vpop.f32.mrb[37].mxu1  ;;  %v2705_v1 = vadd.f32 %v7594_v30, %v2687_v17 }
 0xb42   :  { %v5956_v33 = vadd.f32 %v2618_v42, %v7587_v57 }
 0xb43   :  { %v3802_v27 = vmul.f32 -1.442695, %v5955_v32 }
 0xb44   :  { %v3803_v43 = vmul.f32 -1.442695, %v5956_v33 }
 0xb45   :  { %6105 = vpow2.f32 %v3802_v27 }
 0xb46   :  { %6107 = vpow2.f32 %v3803_v43 }
 0xb4f   :  { %v6106_v15 = vpop.eup %6105 }
 0xb50   :  { %v2695_v24 = vadd.f32 1.0, %v6106_v15  ;;  %v6108_v58 = vpop.eup %6107 }
 0xb51   :  { %v2702_v48 = vadd.f32 1.0, %v6108_v58 }
 0xb52   :  { %6109 = vrcp.f32 %v2695_v24 }
 0xb53   :  { %6111 = vrcp.f32 %v2702_v48 }
 0xb5c   :  { %v6110_v62 = vpop.eup %6109 }
 0xb5d   :  { %v2706_v7 = vmul.f32 %v6110_v62, %v2705_v1  ;;  %v6112_v36 = vpop.eup %6111 }
 0xb5e   :  { %v2709_v8 = vsub.f32 1.0, %v6112_v36  ;;  %v2711_v42 = vmul.f32 %v6112_v36, %v7651_v21 }
 0xb5f   :  { %v2707_v40 = vadd.f32 %v2706_v7, %v2100_v20 }
 0xb61   :  { %6113 = vtanh.f32 %v2707_v40  ;;  %v2105_v40 = vadd.f32 %v7520_v35, %v7598_v50 }
 0xb6b   :  { %v6114_v3 = vpop.eup %6113 }
 0xb6c   :  { %v2710_v32 = vmul.f32 %v6114_v3, %v2709_v8 }
 0xb6e   :  { %v2712_v18 = vadd.f32 %v2711_v42, %v2710_v32 }
 0xb70   :  { %v7699_v27 = vsel %vm947_vm11, %v2712_v18, %v7651_v21 }
 0xb71   :  { %2784 = vmatmul.mubr.f32.vlgmr.msra.gmra.mrb[22].mxu0 %v7699_v27  ;;  %4678 = vmatmul.mubr.f32.vlgmr.msra.gmra.mrb[38].mxu1 %v7699_v27 }
 0xb72   :  { %5658 = vmatpush1.bf16.msra.mxu0 %v7299_v22  ;;  %5689 = vmatpush3.bf16.msra.mxu1 %v7415_v60 }
 0xb73   :  { %5660 = vmatprep.subr.bf16.mxu0 %v7309_v10  ;;  %5690 = vmatprep.subr.bf16.mxu1 %v6169_v45 }
 0xb74   :  { %2952 = vmatprep.mubr.f32.mxu0 %v8094_v47  ;;  %4712 = vmatprep.mubr.msk.f32.mxu1 %vm6170_vm3, %v8094_v47 }
 0xb76   :  { %5662 = vmatpush1.bf16.msra.mxu0 %v7317_v23  ;;  %5692 = vmatpush3.bf16.msra.mxu1 %v7444_v16 }
 0xb77   :  { %5664 = vmatprep.subr.bf16.mxu0 %v7327_v34  ;;  %5693 = vmatprep.subr.bf16.mxu1 %v6169_v45 }
 0xb7a   :  { %5666 = vmatpush1.bf16.msra.mxu0 %v7335_v0  ;;  %5695 = vmatpush3.bf16.msra.mxu1 %v7459_v38 }
 0xb7b   :  { %5668 = vmatprep.subr.bf16.mxu0 %v7345_v52  ;;  %5696 = vmatprep.subr.bf16.mxu1 %v6169_v45 }
 0xb7e   :  { %5670 = vmatpush1.bf16.msra.mxu0 %v7353_v12  ;;  %5698 = vmatpush3.bf16.msra.mxu1 %v7465_v37 }
 0xb7f   :  { %5672 = vmatprep.subr.bf16.mxu0 %v7363_v11  ;;  %5699 = vmatprep.subr.bf16.mxu1 %v6169_v45 }
 0xb82   :  { %5674 = vmatpush1.bf16.msra.mxu0 %v7371_v59  ;;  %5701 = vmatpush3.bf16.msra.mxu1 %v7475_v29 }
 0xb83   :  { %5676 = vmatprep.subr.bf16.mxu0 %v7381_v6  ;;  %5702 = vmatprep.subr.bf16.mxu1 %v6169_v45 }
 0xb86   :  { %5678 = vmatpush1.bf16.msra.mxu0 %v7389_v28  ;;  %5704 = vmatpush3.bf16.msra.mxu1 %v7485_v49 }
 0xb87   :  { %5680 = vmatprep.subr.bf16.mxu0 %v7402_v46  ;;  %5705 = vmatprep.subr.bf16.mxu1 %v6169_v45 }
 0xb8a   :  { %5682 = vmatpush1.bf16.msra.mxu0 %v7413_v56  ;;  %5707 = vmatpush3.bf16.msra.mxu1 %v7495_v5 }
 0xb8b   :  { %5684 = vmatprep.subr.bf16.mxu0 %v7426_v25  ;;  %5708 = vmatprep.subr.bf16.mxu1 %v6169_v45 }
 0xb8e   :  { %5686 = vmatpush1.bf16.msra.mxu0 %v7435_v4  ;;  %5710 = vmatpush3.bf16.msra.mxu1 %v7505_v54 }
 0xb8f   :  { %5712 = vmatprep.subr.bf16.mxu0 %v7291_v44  ;;  %5743 = vmatprep.subr.bf16.mxu1 %v6169_v45 }
 0xc44   :  { %v2785_v31 = vpop.f32.mrb[22].mxu0  ;;  %v2856_v41 = vpop.f32.mrb[38].mxu1 }
 0xc45   :  { %v5957_v21 = vadd.f32 %v2785_v31, %v7584_v2  ;;  %v2787_v17 = vpop.f32.mrb[23].mxu0  ;;  %v4679_v33 = vpop.f32.mrb[39].mxu1  ;;  %v2874_v20 = vadd.f32 %v7594_v30, %v2856_v41 }
 0xc46   :  { %v5958_v15 = vadd.f32 %v2787_v17, %v7587_v57 }
 0xc47   :  { %v3804_v43 = vmul.f32 -1.442695, %v5957_v21 }
 0xc48   :  { %v3805_v24 = vmul.f32 -1.442695, %v5958_v15 }
 0xc49   :  { %6115 = vpow2.f32 %v3804_v43 }
 0xc4a   :  { %6117 = vpow2.f32 %v3805_v24 }
 0xc53   :  { %v6116_v58 = vpop.eup %6115 }
 0xc54   :  { %v2864_v48 = vadd.f32 1.0, %v6116_v58  ;;  %v6118_v1 = vpop.eup %6117 }
 0xc55   :  { %v2871_v62 = vadd.f32 1.0, %v6118_v1 }
 0xc56   :  { %6119 = vrcp.f32 %v2864_v48 }
 0xc57   :  { %6121 = vrcp.f32 %v2871_v62 }
 0xc60   :  { %v6120_v7 = vpop.eup %6119 }
 0xc61   :  { %v2875_v36 = vmul.f32 %v6120_v7, %v2874_v20  ;;  %v6122_v3 = vpop.eup %6121 }
 0xc62   :  { %v2878_v32 = vsub.f32 1.0, %v6122_v3  ;;  %v2880_v31 = vmul.f32 %v6122_v3, %v7699_v27 }
 0xc63   :  { %v2876_v8 = vadd.f32 %v2875_v36, %v2105_v40  ;;  %v2110_v40 = vadd.f32 %v7526_v19, %v7598_v50 }
 0xc65   :  { %6123 = vtanh.f32 %v2876_v8 }
 0xc6f   :  { %v6124_v42 = vpop.eup %6123 }
 0xc70   :  { %v2879_v18 = vmul.f32 %v6124_v42, %v2878_v32 }
 0xc72   :  { %v2881_v21 = vadd.f32 %v2880_v31, %v2879_v18 }
 0xc74   :  { %v7747_v17 = vsel %vm1124_vm12, %v2881_v21, %v7699_v27 }
 0xc75   :  { %2953 = vmatmul.mubr.f32.vlgmr.msra.gmra.mrb[24].mxu0 %v7747_v17  ;;  %4713 = vmatmul.mubr.f32.vlgmr.msra.gmra.mrb[40].mxu1 %v7747_v17 }
 0xc76   :  { %5714 = vmatpush1.bf16.msra.mxu0 %v7299_v22  ;;  %5745 = vmatpush3.bf16.msra.mxu1 %v7415_v60 }
 0xc77   :  { %5716 = vmatprep.subr.bf16.mxu0 %v7309_v10  ;;  %5746 = vmatprep.subr.bf16.mxu1 %v6169_v45 }
 0xc78   :  { %3121 = vmatprep.mubr.f32.mxu0 %v8094_v47  ;;  %4747 = vmatprep.mubr.msk.f32.mxu1 %vm6170_vm3, %v8094_v47 }
 0xc7a   :  { %5718 = vmatpush1.bf16.msra.mxu0 %v7317_v23  ;;  %5748 = vmatpush3.bf16.msra.mxu1 %v7444_v16 }
 0xc7b   :  { %5720 = vmatprep.subr.bf16.mxu0 %v7327_v34  ;;  %5749 = vmatprep.subr.bf16.mxu1 %v6169_v45 }
 0xc7e   :  { %5722 = vmatpush1.bf16.msra.mxu0 %v7335_v0  ;;  %5751 = vmatpush3.bf16.msra.mxu1 %v7459_v38 }
 0xc7f   :  { %5724 = vmatprep.subr.bf16.mxu0 %v7345_v52  ;;  %5752 = vmatprep.subr.bf16.mxu1 %v6169_v45 }
 0xc82   :  { %5726 = vmatpush1.bf16.msra.mxu0 %v7353_v12  ;;  %5754 = vmatpush3.bf16.msra.mxu1 %v7465_v37 }
 0xc83   :  { %5728 = vmatprep.subr.bf16.mxu0 %v7363_v11  ;;  %5755 = vmatprep.subr.bf16.mxu1 %v6169_v45 }
 0xc86   :  { %5730 = vmatpush1.bf16.msra.mxu0 %v7371_v59  ;;  %5757 = vmatpush3.bf16.msra.mxu1 %v7475_v29 }
 0xc87   :  { %5732 = vmatprep.subr.bf16.mxu0 %v7381_v6  ;;  %5758 = vmatprep.subr.bf16.mxu1 %v6169_v45 }
 0xc8a   :  { %5734 = vmatpush1.bf16.msra.mxu0 %v7389_v28  ;;  %5760 = vmatpush3.bf16.msra.mxu1 %v7485_v49 }
 0xc8b   :  { %5736 = vmatprep.subr.bf16.mxu0 %v7402_v46  ;;  %5761 = vmatprep.subr.bf16.mxu1 %v6169_v45 }
 0xc8e   :  { %5738 = vmatpush1.bf16.msra.mxu0 %v7413_v56  ;;  %5763 = vmatpush3.bf16.msra.mxu1 %v7495_v5 }
 0xc8f   :  { %5740 = vmatprep.subr.bf16.mxu0 %v7426_v25  ;;  %5764 = vmatprep.subr.bf16.mxu1 %v6169_v45 }
 0xc92   :  { %5742 = vmatpush1.bf16.msra.mxu0 %v7435_v4  ;;  %5766 = vmatpush3.bf16.msra.mxu1 %v7505_v54 }
 0xc93   :  { %5768 = vmatprep.subr.bf16.mxu0 %v7291_v44  ;;  %5799 = vmatprep.subr.bf16.mxu1 %v6169_v45 }
 0xd48   :  { %v2954_v53 = vpop.f32.mrb[24].mxu0  ;;  %v3025_v35 = vpop.f32.mrb[40].mxu1 }
 0xd49   :  { %v5959_v27 = vadd.f32 %v2954_v53, %v7584_v2  ;;  %v2956_v41 = vpop.f32.mrb[25].mxu0  ;;  %v4714_v33 = vpop.f32.mrb[41].mxu1  ;;  %v3043_v20 = vadd.f32 %v7594_v30, %v3025_v35 }
 0xd4a   :  { %v5960_v15 = vadd.f32 %v2956_v41, %v7587_v57 }
 0xd4b   :  { %v3806_v43 = vmul.f32 -1.442695, %v5959_v27 }
 0xd4c   :  { %v3807_v24 = vmul.f32 -1.442695, %v5960_v15 }
 0xd4d   :  { %6125 = vpow2.f32 %v3806_v43 }
 0xd4e   :  { %6127 = vpow2.f32 %v3807_v24 }
 0xd57   :  { %v6126_v58 = vpop.eup %6125 }
 0xd58   :  { %v3033_v48 = vadd.f32 1.0, %v6126_v58  ;;  %v6128_v1 = vpop.eup %6127 }
 0xd59   :  { %v3040_v62 = vadd.f32 1.0, %v6128_v1 }
 0xd5a   :  { %6129 = vrcp.f32 %v3033_v48 }
 0xd5b   :  { %6131 = vrcp.f32 %v3040_v62  ;;  %v2115_v62 = vadd.f32 %v7524_v26, %v7598_v50  ;;  %v3562_v26 = vld [vmem:[%s8086_s10 + $0x8] sm:$0xff] }
 0xd64   :  { %v6130_v7 = vpop.eup %6129 }
 0xd65   :  { %v3044_v36 = vmul.f32 %v6130_v7, %v3043_v20  ;;  %v6132_v3 = vpop.eup %6131 }
 0xd66   :  { %v3047_v32 = vsub.f32 1.0, %v6132_v3  ;;  %v3049_v31 = vmul.f32 %v6132_v3, %v7747_v17 }
 0xd67   :  { %v3045_v8 = vadd.f32 %v3044_v36, %v2110_v40 }
 0xd69   :  { %6133 = vtanh.f32 %v3045_v8 }
 0xd73   :  { %v6134_v42 = vpop.eup %6133 }
 0xd74   :  { %v3048_v18 = vmul.f32 %v6134_v42, %v3047_v32 }
 0xd76   :  { %v3050_v21 = vadd.f32 %v3049_v31, %v3048_v18  ;;  %v3563_v31 = vld [vmem:[%s8086_s10 + $0x10] sm:$0xff] }
 0xd78   :  { %v7795_v53 = vsel %vm1301_vm13, %v3050_v21, %v7747_v17 }
 0xd79   :  { %3122 = vmatmul.mubr.f32.vlgmr.msra.gmra.mrb[26].mxu0 %v7795_v53  ;;  %4748 = vmatmul.mubr.f32.vlgmr.msra.gmra.mrb[42].mxu1 %v7795_v53 }
 0xd7a   :  { %5770 = vmatpush1.bf16.msra.mxu0 %v7299_v22  ;;  %5801 = vmatpush3.bf16.msra.mxu1 %v7415_v60 }
 0xd7b   :  { %5772 = vmatprep.subr.bf16.mxu0 %v7309_v10  ;;  %5802 = vmatprep.subr.bf16.mxu1 %v6169_v45 }
 0xd7c   :  { %3290 = vmatprep.mubr.f32.mxu0 %v8094_v47  ;;  %4782 = vmatprep.mubr.msk.f32.mxu1 %vm6170_vm3, %v8094_v47 }
 0xd7e   :  { %5774 = vmatpush1.bf16.msra.mxu0 %v7317_v23  ;;  %5804 = vmatpush3.bf16.msra.mxu1 %v7444_v16 }
 0xd7f   :  { %5776 = vmatprep.subr.bf16.mxu0 %v7327_v34  ;;  %5805 = vmatprep.subr.bf16.mxu1 %v6169_v45 }
 0xd82   :  { %5778 = vmatpush1.bf16.msra.mxu0 %v7335_v0  ;;  %5807 = vmatpush3.bf16.msra.mxu1 %v7459_v38 }
 0xd83   :  { %5780 = vmatprep.subr.bf16.mxu0 %v7345_v52  ;;  %5808 = vmatprep.subr.bf16.mxu1 %v6169_v45 }
 0xd86   :  { %5782 = vmatpush1.bf16.msra.mxu0 %v7353_v12  ;;  %5810 = vmatpush3.bf16.msra.mxu1 %v7465_v37 }
 0xd87   :  { %5784 = vmatprep.subr.bf16.mxu0 %v7363_v11  ;;  %5811 = vmatprep.subr.bf16.mxu1 %v6169_v45 }
 0xd8a   :  { %5786 = vmatpush1.bf16.msra.mxu0 %v7371_v59  ;;  %5813 = vmatpush3.bf16.msra.mxu1 %v7475_v29 }
 0xd8b   :  { %5788 = vmatprep.subr.bf16.mxu0 %v7381_v6  ;;  %5814 = vmatprep.subr.bf16.mxu1 %v6169_v45 }
 0xd8e   :  { %5790 = vmatpush1.bf16.msra.mxu0 %v7389_v28  ;;  %5816 = vmatpush3.bf16.msra.mxu1 %v7485_v49 }
 0xd8f   :  { %5792 = vmatprep.subr.bf16.mxu0 %v7402_v46  ;;  %5817 = vmatprep.subr.bf16.mxu1 %v6169_v45 }
 0xd92   :  { %5794 = vmatpush1.bf16.msra.mxu0 %v7413_v56  ;;  %5819 = vmatpush3.bf16.msra.mxu1 %v7495_v5 }
 0xd93   :  { %5796 = vmatprep.subr.bf16.mxu0 %v7426_v25  ;;  %5820 = vmatprep.subr.bf16.mxu1 %v6169_v45 }
 0xd96   :  { %5798 = vmatpush1.bf16.msra.mxu0 %v7435_v4  ;;  %5822 = vmatpush3.bf16.msra.mxu1 %v7505_v54 }
 0xd97   :  { %5824 = vmatprep.subr.bf16.mxu0 %v7291_v44  ;;  %5855 = vmatprep.subr.bf16.mxu1 %v6169_v45 }
 0xe4c   :  { %v3123_v63 = vpop.f32.mrb[26].mxu0  ;;  %v3194_v19 = vpop.f32.mrb[42].mxu1 }
 0xe4d   :  { %v5961_v17 = vadd.f32 %v3123_v63, %v7584_v2  ;;  %v3125_v35 = vpop.f32.mrb[27].mxu0  ;;  %v4749_v27 = vpop.f32.mrb[43].mxu1  ;;  %v3212_v44 = vadd.f32 %v7594_v30, %v3194_v19  ;;  %v3565_v19 = vld [vmem:[%s8086_s10 + $0x20] sm:$0xff] }
 0xe4e   :  { %v5962_v33 = vadd.f32 %v3125_v35, %v7587_v57  ;;  %v3570_v27 = vld [vmem:[%s8086_s10 + $0x48] sm:$0xff] }
 0xe4f   :  { %v3808_v41 = vmul.f32 -1.442695, %v5961_v17  ;;  %v3567_v17 = vld [vmem:[%s8086_s10 + $0x30] sm:$0xff] }
 0xe50   :  { %v3809_v43 = vmul.f32 -1.442695, %v5962_v33  ;;  %v5885_v35 = vpack.c.bf16 %v3567_v17, %v3565_v19  ;;  %v3689_v19 = vld [vmem:[%s8087_s12 + $0x58] sm:$0xff] }
 0xe51   :  { %6135 = vpow2.f32 %v3808_v41  ;;  %v3572_v41 = vld [vmem:[%s8086_s10 + $0x58] sm:$0xff] }
 0xe52   :  { %6137 = vpow2.f32 %v3809_v43  ;;  %v5887_v33 = vpack.c.bf16 %v3572_v41, %v3570_v27  ;;  %v3569_v43 = vld [vmem:[%s8086_s10 + $0x40] sm:$0xff]  ;;  %v3691_v27 = vld [vmem:[%s8087_s12 + $0x68] sm:$0xff] }
 0xe5b   :  { %v6136_v15 = vpop.eup %6135 }
 0xe5c   :  { %v3202_v24 = vadd.f32 1.0, %v6136_v15  ;;  %v6138_v58 = vpop.eup %6137  ;;  %v3571_v15 = vld [vmem:[%s8086_s10 + $0x50] sm:$0xff] }
 0xe5d   :  { %v3209_v48 = vadd.f32 1.0, %v6138_v58  ;;  %v3574_v58 = vld [vmem:[%s8086_s10 + $0x68] sm:$0xff] }
 0xe5e   :  { %6139 = vrcp.f32 %v3202_v24  ;;  %v5889_v24 = vpack.c.bf16 %v3571_v15, %v3569_v43 }
 0xe5f   :  { %6141 = vrcp.f32 %v3209_v48  ;;  %v3576_v48 = vld [vmem:[%s8086_s10 + $0x78] sm:$0xff] }
 0xe68   :  { %v6140_v1 = vpop.eup %6139 }
 0xe69   :  { %v3213_v20 = vmul.f32 %v6140_v1, %v3212_v44  ;;  %v6142_v40 = vpop.eup %6141  ;;  %v5891_v44 = vpack.c.bf16 %v3576_v48, %v3574_v58  ;;  %v3573_v1 = vld [vmem:[%s8086_s10 + $0x60] sm:$0xff] }
 0xe6a   :  { %v3216_v36 = vsub.f32 1.0, %v6142_v40  ;;  %v3218_v32 = vmul.f32 %v6142_v40, %v7795_v53  ;;  %v3580_v40 = vld [vmem:[%s8086_s10 + $0x98] sm:$0xff] }
 0xe6b   :  { %v3214_v7 = vadd.f32 %v3213_v20, %v2115_v62  ;;  %v3575_v62 = vld [vmem:[%s8086_s10 + $0x70] sm:$0xff] }
 0xe6c   :  { %v5893_v20 = vpack.c.bf16 %v3575_v62, %v3573_v1 }
 0xe6d   :  { %6143 = vtanh.f32 %v3214_v7  ;;  %v3578_v7 = vld [vmem:[%s8086_s10 + $0x88] sm:$0xff] }
 0xe77   :  { %v6144_v8 = vpop.eup %6143 }
 0xe78   :  { %v3217_v3 = vmul.f32 %v6144_v8, %v3216_v36  ;;  %v5895_v36 = vpack.c.bf16 %v3580_v40, %v3578_v7  ;;  %v3577_v8 = vld [vmem:[%s8086_s10 + $0x80] sm:$0xff] }
 0xe7a   :  { %v3219_v42 = vadd.f32 %v3218_v32, %v3217_v3  ;;  %v3579_v3 = vld [vmem:[%s8086_s10 + $0x90] sm:$0xff] }
 0xe7b   :  { %v5897_v32 = vpack.c.bf16 %v3579_v3, %v3577_v8 }
 0xe7c   :  { %v7843_v18 = vsel %vm1478_vm14, %v3219_v42, %v7795_v53  ;;  %v3568_v53 = vld [vmem:[%s8086_s10 + $0x38] sm:$0xff]  ;;  %v3582_v42 = vld [vmem:[%s8086_s10 + $0xa8] sm:$0xff] }
 0xe7d   :  { %3291 = vmatmul.mubr.f32.vlgmr.msra.gmra.mrb[28].mxu0 %v7843_v18  ;;  %4783 = vmatmul.mubr.f32.vlgmr.msra.gmra.mrb[44].mxu1 %v7843_v18 }
 0xe7e   :  { %5826 = vmatpush1.bf16.msra.mxu0 %v7299_v22  ;;  %5857 = vmatpush3.bf16.msra.mxu1 %v7415_v60  ;;  %v2120_v60 = vadd.f32 %v7581_v61, %v7598_v50  ;;  %v3564_v61 = vld [vmem:[%s8086_s10 + $0x18] sm:$0xff] }
 0xe7f   :  { %5828 = vmatprep.subr.bf16.mxu0 %v7309_v10  ;;  %5858 = vmatprep.subr.bf16.mxu1 %v6169_v45  ;;  %v5879_v55 = vpack.c.bf16 %v3564_v61, %v3562_v26  ;;  %v3683_v26 = vld [vmem:[%s8087_s12 + $0x28] sm:$0xff] }
 0xe80   :  { %3459 = vmatprep.mubr.f32.mxu0 %v8094_v47  ;;  %4817 = vmatprep.mubr.msk.f32.mxu1 %vm6170_vm3, %v8094_v47 }
 0xe82   :  { %5830 = vmatpush1.bf16.msra.mxu0 %v7317_v23  ;;  %5860 = vmatpush3.bf16.msra.mxu1 %v7444_v16 }
 0xe83   :  { %5832 = vmatprep.subr.bf16.mxu0 %v7327_v34  ;;  %5861 = vmatprep.subr.bf16.mxu1 %v6169_v45 }
 0xe86   :  { %5834 = vmatpush1.bf16.msra.mxu0 %v7335_v0  ;;  %5863 = vmatpush3.bf16.msra.mxu1 %v7459_v38 }
 0xe87   :  { %5836 = vmatprep.subr.bf16.mxu0 %v7345_v52  ;;  %5864 = vmatprep.subr.bf16.mxu1 %v6169_v45 }
 0xe8a   :  { %5838 = vmatpush1.bf16.msra.mxu0 %v7353_v12  ;;  %5866 = vmatpush3.bf16.msra.mxu1 %v7465_v37 }
 0xe8b   :  { %5840 = vmatprep.subr.bf16.mxu0 %v7363_v11  ;;  %5867 = vmatprep.subr.bf16.mxu1 %v6169_v45 }
 0xe8e   :  { %5842 = vmatpush1.bf16.msra.mxu0 %v7371_v59  ;;  %5869 = vmatpush3.bf16.msra.mxu1 %v7475_v29 }
 0xe8f   :  { %5844 = vmatprep.subr.bf16.mxu0 %v7381_v6  ;;  %5870 = vmatprep.subr.bf16.mxu1 %v6169_v45 }
 0xe92   :  { %5846 = vmatpush1.bf16.msra.mxu0 %v7389_v28  ;;  %5872 = vmatpush3.bf16.msra.mxu1 %v7485_v49 }
 0xe93   :  { %5848 = vmatprep.subr.bf16.mxu0 %v7402_v46  ;;  %5873 = vmatprep.subr.bf16.mxu1 %v6169_v45 }
 0xe96   :  { %5850 = vmatpush1.bf16.msra.mxu0 %v7413_v56  ;;  %5875 = vmatpush3.bf16.msra.mxu1 %v7495_v5 }
 0xe97   :  { %5852 = vmatprep.subr.bf16.mxu0 %v7426_v25  ;;  %5876 = vmatprep.subr.bf16.mxu1 %v6169_v45 }
 0xe9a   :  { %5854 = vmatpush1.bf16.msra.mxu0 %v7435_v4  ;;  %5878 = vmatpush3.bf16.msra.mxu1 %v7505_v54 }
 0xe9b   :  { %5911 = vmatprep.subr.bf16.mxu1 %v6169_v45  ;;  %5880 = vmatprep.subr.bf16.mxu0 %v5879_v55  ;;  %v3684_v55 = vld [vmem:[%s8087_s12 + $0x30] sm:$0xff] }
 0xf50   :  { %v3292_v9 = vpop.f32.mrb[28].mxu0  ;;  %v3363_v22 = vpop.f32.mrb[44].mxu1 }
 0xf51   :  { %v5963_v10 = vadd.f32 %v3292_v9, %v7584_v2  ;;  %v3294_v23 = vpop.f32.mrb[29].mxu0  ;;  %v4784_v34 = vpop.f32.mrb[45].mxu1  ;;  %v3381_v46 = vadd.f32 %v7594_v30, %v3363_v22  ;;  %v3561_v30 = vld [vmem:[%s8086_s10] sm:$0xff] }
 0xf52   :  { %v5964_v52 = vadd.f32 %v3294_v23, %v7587_v57  ;;  %v5881_v21 = vpack.c.bf16 %v3563_v31, %v3561_v30  ;;  %v3581_v9 = vld [vmem:[%s8086_s10 + $0xa0] sm:$0xff]  ;;  %v3586_v23 = vld [vmem:[%s8086_s10 + $0xc8] sm:$0xff]  ;;  %v3588_v34 = vld [vmem:[%s8086_s10 + $0xd8] sm:$0xff] }
 0xf53   :  { %v3810_v0 = vmul.f32 -1.442695, %v5963_v10  ;;  %v3583_v10 = vld [vmem:[%s8086_s10 + $0xb0] sm:$0xff]  ;;  %v3685_v30 = vld [vmem:[%s8087_s12 + $0x38] sm:$0xff] }
 0xf54   :  { %v3811_v12 = vmul.f32 -1.442695, %v5964_v52  ;;  %v5903_v52 = vpack.c.bf16 %v3588_v34, %v3586_v23  ;;  %v5921_v31 = vpack.c.bf16 %v3685_v30, %v3684_v55 }
 0xf55   :  { %6145 = vpow2.f32 %v3810_v0  ;;  %v5901_v0 = vpack.c.bf16 %v3583_v10, %v3581_v9 }
 0xf56   :  { %6147 = vpow2.f32 %v3811_v12  ;;  %v3585_v12 = vld [vmem:[%s8086_s10 + $0xc0] sm:$0xff] }
 0xf5f   :  { %v6146_v11 = vpop.eup %6145 }
 0xf60   :  { %v3371_v59 = vadd.f32 1.0, %v6146_v11  ;;  %v6148_v6 = vpop.eup %6147  ;;  %v3587_v11 = vld [vmem:[%s8086_s10 + $0xd0] sm:$0xff] }
 0xf61   :  { %v3378_v28 = vadd.f32 1.0, %v6148_v6  ;;  %v3592_v6 = vld [vmem:[%s8086_s10 + $0xf8] sm:$0xff] }
 0xf62   :  { %6149 = vrcp.f32 %v3371_v59  ;;  %v3590_v59 = vld [vmem:[%s8086_s10 + $0xe8] sm:$0xff] }
 0xf63   :  { %6151 = vrcp.f32 %v3378_v28  ;;  %v5905_v28 = vpack.c.bf16 %v3587_v11, %v3585_v12 }
 0xf6c   :  { %v6150_v56 = vpop.eup %6149 }
 0xf6d   :  { %v3382_v25 = vmul.f32 %v6150_v56, %v3381_v46  ;;  %v6152_v16 = vpop.eup %6151  ;;  %v5907_v46 = vpack.c.bf16 %v3592_v6, %v3590_v59  ;;  %v3589_v56 = vld [vmem:[%s8086_s10 + $0xe0] sm:$0xff] }
 0xf6e   :  { %v3385_v38 = vsub.f32 1.0, %v6152_v16  ;;  %v3387_v49 = vmul.f32 %v6152_v16, %v7843_v18  ;;  %v3679_v16 = vld [vmem:[%s8087_s12 + $0x8] sm:$0xff]  ;;  %v3814_v6 = vld [vmem:[%s8090_s13] ss:$0 sm:$0xff] }
 0xf6f   :  { %v3383_v4 = vadd.f32 %v3382_v25, %v2120_v60  ;;  %v3591_v60 = vld [vmem:[%s8086_s10 + $0xf0] sm:$0xff] }
 0xf70   :  { %v5909_v25 = vpack.c.bf16 %v3591_v60, %v3589_v56 }
 0xf71   :  { %6153 = vtanh.f32 %v3383_v4  ;;  %v3678_v4 = vld [vmem:[%s8087_s12] sm:$0xff] }
 0xf7b   :  { %v6154_v37 = vpop.eup %6153 }
 0xf7c   :  { %v3386_v29 = vmul.f32 %v6154_v37, %v3385_v38  ;;  %v3680_v38 = vld [vmem:[%s8087_s12 + $0x10] sm:$0xff]  ;;  %v5912_v37 = vpack.c.bf16 %v3679_v16, %v3678_v4 }
 0xf7e   :  { %v3388_v5 = vadd.f32 %v3387_v49, %v3386_v29  ;;  %v3681_v29 = vld [vmem:[%s8087_s12 + $0x18] sm:$0xff] }
 0xf7f   :  { %v5915_v49 = vpack.c.bf16 %v3681_v29, %v3680_v38 }
 0xf80   :  { %v7890_v54 = vsel %vm1655_vm15, %v3388_v5, %v7843_v18  ;;  %v3584_v18 = vld [vmem:[%s8086_s10 + $0xb8] sm:$0xff]  ;;  %v3682_v5 = vld [vmem:[%s8087_s12 + $0x20] sm:$0xff] }
 0xf81   :  { %3460 = vmatmul.mubr.f32.vlgmr.msra.gmra.mrb[30].mxu0 %v7890_v54  ;;  %4818 = vmatmul.mubr.f32.vlgmr.msra.gmra.mrb[46].mxu1 %v7890_v54  ;;  %v5899_v22 = vpack.c.bf16 %v3584_v18, %v3582_v42  ;;  %v5918_v61 = vpack.c.bf16 %v3683_v26, %v3682_v5 }
 0xf82   :  { %3669 = vmatprep.mubr.f32.mxu0 %v8094_v47  ;;  %4852 = vmatprep.mubr.msk.f32.mxu1 %vm6170_vm3, %v8094_v47  ;;  %v3566_v47 = vld [vmem:[%s8086_s10 + $0x28] sm:$0xff] }
 0xf83   :  { %5882 = vmatpush1.bf16.msra.mxu0 %v5881_v21  ;;  %v5883_v63 = vpack.c.bf16 %v3568_v53, %v3566_v47  ;;  %5913 = vmatpush3.bf16.msra.mxu1 %v5912_v37  ;;  %v3686_v21 = vld [vmem:[%s8087_s12 + $0x40] sm:$0xff]  ;;  %v3687_v47 = vld [vmem:[%s8087_s12 + $0x48] sm:$0xff] }
 0xf84   :  { %5914 = vmatprep.subr.bf16.mxu1 %v6169_v45  ;;  %v5924_v53 = vpack.c.bf16 %v3687_v47, %v3686_v21 }
 0xf85   :  { %5884 = vmatprep.subr.bf16.mxu0 %v5883_v63  ;;  %v3688_v63 = vld [vmem:[%s8087_s12 + $0x50] sm:$0xff] }
 0xf86   :  { %v5927_v17 = vpack.c.bf16 %v3689_v19, %v3688_v63 }
 0xf87   :  { %5886 = vmatpush1.bf16.msra.mxu0 %v5885_v35  ;;  %5916 = vmatpush3.bf16.msra.mxu1 %v5915_v49  ;;  %v3690_v35 = vld [vmem:[%s8087_s12 + $0x60] sm:$0xff] }
 0xf88   :  { %5888 = vmatprep.subr.bf16.mxu0 %v5887_v33  ;;  %5917 = vmatprep.subr.bf16.mxu1 %v6169_v45  ;;  %v5930_v41 = vpack.c.bf16 %v3691_v27, %v3690_v35 }
 0xf8b   :  { %5890 = vmatpush1.bf16.msra.mxu0 %v5889_v24  ;;  %5919 = vmatpush3.bf16.msra.mxu1 %v5918_v61 }
 0xf8c   :  { %5892 = vmatprep.subr.bf16.mxu0 %v5891_v44  ;;  %5920 = vmatprep.subr.bf16.mxu1 %v6169_v45 }
 0xf8f   :  { %5894 = vmatpush1.bf16.msra.mxu0 %v5893_v20  ;;  %5922 = vmatpush3.bf16.msra.mxu1 %v5921_v31 }
 0xf90   :  { %5896 = vmatprep.subr.bf16.mxu0 %v5895_v36  ;;  %5923 = vmatprep.subr.bf16.mxu1 %v6169_v45 }
 0xf93   :  { %5898 = vmatpush1.bf16.msra.mxu0 %v5897_v32  ;;  %5925 = vmatpush3.bf16.msra.mxu1 %v5924_v53 }
 0xf94   :  { %5900 = vmatprep.subr.bf16.mxu0 %v5899_v22  ;;  %5926 = vmatprep.subr.bf16.mxu1 %v6169_v45 }
 0xf97   :  { %5902 = vmatpush1.bf16.msra.mxu0 %v5901_v0  ;;  %5928 = vmatpush3.bf16.msra.mxu1 %v5927_v17  ;;  %v3593_v0 = vld [vmem:[%s8088_s11] sm:$0x3] }
 0xf98   :  { %5904 = vmatprep.subr.bf16.mxu0 %v5903_v52  ;;  %5929 = vmatprep.subr.bf16.mxu1 %v6169_v45  ;;  %v3598_v52 = vrot.slane %v3593_v0, %v6735_v13  ;;  %v3602_v39 = vrot.slane %v3593_v0, %v6738_v14 }
 0xf9b   :  { %5906 = vmatpush1.bf16.msra.mxu0 %v5905_v28  ;;  %5931 = vmatpush3.bf16.msra.mxu1 %v5930_v41 }
 0xf9c   :  { %5908 = vmatprep.subr.bf16.mxu0 %v5907_v46  ;;  %5932 = vmatprep.subr.bf16.mxu1 %v6169_v45  ;;  %v6166_v45 = vld [vmem:[%s8085_s9] ss:$0 sm:$0xff] }
 0xf9f   :  { %5910 = vmatpush1.bf16.msra.mxu0 %v5909_v25 }
0x1054   :  { %v3461_v33 = vpop.f32.mrb[30].mxu0  ;;  %v3532_v43 = vpop.f32.mrb[46].mxu1 }
0x1055   :  { %v5965_v15 = vadd.f32 %v3461_v33, %v7584_v2  ;;  %v3463_v24 = vpop.f32.mrb[31].mxu0  ;;  %v4819_v58 = vpop.f32.mrb[47].mxu1  ;;  %v3550_v36 = vadd.f32 %v6166_v45, %v3532_v43  ;;  %v2125_v2 = vadd.f32 %v7579_v51, %v7598_v50  ;;  %v3692_v51 = vld [vmem:[%s8087_s12 + $0x70] sm:$0xff]  ;;  %v3693_v50 = vld [vmem:[%s8087_s12 + $0x78] sm:$0xff] }
0x1056   :  { %v5966_v44 = vadd.f32 %v3463_v24, %v7587_v57  ;;  %v5933_v34 = vpack.c.bf16 %v3693_v50, %v3692_v51 }
0x1057   :  { %v3812_v48 = vmul.f32 -1.442695, %v5965_v15 }
0x1058   :  { %v3813_v1 = vmul.f32 -1.442695, %v5966_v44  ;;  %5934 = vmatpush3.bf16.msra.mxu1 %v5933_v34 }
0x1059   :  { %6155 = vpow2.f32 %v3812_v48 }
0x105a   :  { %6157 = vpow2.f32 %v3813_v1 }
0x1063   :  { %v6156_v62 = vpop.eup %6155 }
0x1064   :  { %v3540_v20 = vadd.f32 1.0, %v6156_v62  ;;  %v6158_v7 = vpop.eup %6157 }
0x1065   :  { %v3547_v40 = vadd.f32 1.0, %v6158_v7 }
0x1066   :  { %6159 = vrcp.f32 %v3540_v20 }
0x1067   :  { %6161 = vrcp.f32 %v3547_v40 }
0x1070   :  { %v6160_v8 = vpop.eup %6159 }
0x1071   :  { %v3551_v3 = vmul.f32 %v6160_v8, %v3550_v36  ;;  %v6162_v32 = vpop.eup %6161 }
0x1072   :  { %v3554_v42 = vsub.f32 1.0, %v6162_v32  ;;  %v3556_v22 = vmul.f32 %v6162_v32, %v7890_v54 }
0x1073   :  { %v3552_v57 = vadd.f32 %v3551_v3, %v2125_v2 }
0x1075   :  { %6163 = vtanh.f32 %v3552_v57 }
0x107f   :  { %v6164_v18 = vpop.eup %6163 }
0x1080   :  { %v3555_v9 = vmul.f32 %v6164_v18, %v3554_v42 }
0x1082   :  { %v3557_v10 = vadd.f32 %v3556_v22, %v3555_v9 }
0x1084   :  { %v3558_v23 = vsel %vm1832_vm0, %v3557_v10, %v7890_v54 }
0x1085   :  { %3670 = vmatmul.mubr.f32.vlgmr.msra.gmra.mrb[32].mxu0 %v3558_v23 }
0x1158   :  { %v3671_v54 = vpop.f32.mrb[32].mxu0 }
0x1159   :  { %v3672_v12 = vadd.f32 %v3671_v54, %v3598_v52  ;;  %v3673_v11 = vpop.f32.mrb[33].mxu0 }
0x115a   :  { %v3674_v59 = vadd.f32 %v3673_v11, %v3602_v39 }
0x115b   :  { %3676 = vst [vmem:[%s8089_s14] sm:$0xff] %v3672_v12  ;;  %4853 = vmatmul.mubr.f32.vlgmr.msra.gmra.mrb[48].mxu1 %v3672_v12 }
0x115c   :  { %3677 = vst [vmem:[%s8089_s14 + $0x8] sm:$0xff] %v3674_v59 }
0x122e   :  { %v3767_v13 = vpop.f32.mrb[48].mxu1 }
0x122f   :  { %v3768_v28 = vadd.f32 %v3814_v6, %v3767_v13  ;;  %v4854_v14 = vpop.f32.mrb[49].mxu1 }
0x1231   :  { %3771 = vst [vmem:[%s8091_s15] sm:$0xff] %v3768_v28 }

</bundles_post_ra>
